<compile_context>
chip_gen: v7x
topology: tpu7x:2x2x1
jax: 0.10.0
libtpu: 0.0.40
codegen_flags: <defaults>
</compile_context>

<pallas_src>
import numpy as np

import jax
import jax.numpy as jnp
from jax.experimental import pallas as pl
from jax.experimental.pallas import tpu as pltpu


def _round_up(x, m):
    return (x + m - 1) // m * m


# ----------------------------- Pallas kernel ------------------------------- #

def _make_conv_kernel(*, stride, Ho, Wo, Wq, epilogue, use_bias):
    """One image's conv (+bias / +InstanceNorm / +LeakyReLU) in one grid step.

    The input ref holds the reflect-padded, space-to-depth'd, flattened image
    x[p, q, m, c] = xpad[s*(m//Wq)+p, s*(m%Wq)+q, c].  For tap (ki, kj) the
    contribution to accumulator row m' = oh*Wq + ow is the contiguous slab
    x[ki%s, kj%s, m'+shift, :] with shift = (ki//s)*Wq + kj//s, so the whole
    conv is 16 shifted (R, Cin) @ (Cin, Cout) MXU matmuls.  Rows with
    ow >= Wo of the R = Ho*Wq accumulator are garbage: they are discarded by
    the wrapper and masked out of the InstanceNorm statistics.
    """
    s = stride
    R = Ho * Wq
    taps = []
    for ki in range(4):
        for kj in range(4):
            taps.append((ki % s, kj % s, (ki // s) * Wq + (kj // s)))
    use_mask = epilogue == "in_lrelu"

    def kernel(*refs):
        it = iter(refs)
        x_ref = next(it)                                   # (1, s, s, L, Cin)
        w_ref = next(it)                                   # (16, Cin, Coutp)
        b_ref = next(it) if use_bias else None             # (1, Coutp) f32
        m_ref = next(it) if use_mask else None             # (R, 1) f32
        o_ref = next(it)                                   # (1, R, Coutp)

        coutp = w_ref.shape[2]
        acc = jnp.zeros((R, coutp), jnp.float32)
        for t, (p, q, shift) in enumerate(taps):
            win = x_ref[0, p, q, shift:shift + R, :]       # (R, Cin) f32
            acc = acc + jnp.dot(win.astype(jnp.bfloat16), w_ref[t],
                                preferred_element_type=jnp.float32)

        y = acc
        if use_bias:
            y = y + b_ref[...]
        if epilogue == "in_lrelu":
            # InstanceNorm2d (affine=False, biased var, eps=1e-5) over the
            # Ho*Wo valid rows of this image; mean-first centered variance.
            mask = m_ref[...]                              # (R, 1) f32
            inv_n = 1.0 / float(Ho * Wo)
            mean = jnp.sum(y * mask, axis=0, keepdims=True) * inv_n
            yc = y - mean
            var = jnp.sum((yc * yc) * mask, axis=0, keepdims=True) * inv_n
            y = yc * jax.lax.rsqrt(var + 1e-5)
        if epilogue in ("lrelu", "in_lrelu"):
            y = jnp.where(y > 0, y, 0.2 * y)
        o_ref[0] = y.astype(o_ref.dtype)

    return kernel


def fused_conv_layer(x, w, b, *, stride, epilogue):
    """4x4 conv, reflect pad 1, stride s, fused bias/IN/LeakyReLU epilogue.

    x: (N, H, W, Cinp) f32 NHWC; w: (16, Cinp, Coutp) bf16; b: (1, Coutp) f32.
    Returns (N, Ho, Wo, Coutp) f32.
    """
    N, H, W, C = x.shape
    s = stride
    assert (H + 2) % s == 0 and (W + 2) % s == 0, (H, W, s)
    Hp, Wp = H + 2, W + 2
    Hq, Wq = Hp // s, Wp // s
    Ho = (Hp - 4) // s + 1
    Wo = (Wp - 4) // s + 1
    R = Ho * Wq
    coutp = w.shape[2]
    use_bias = epilogue != "in_lrelu"        # IN cancels a per-channel bias
    use_mask = epilogue == "in_lrelu"

    # Reflect pad + space-to-depth + flatten (a few cheap XLA ops; the 16x
    # im2col patch matrix is never materialized in HBM).
    xp = jnp.pad(x, ((0, 0), (1, 1), (1, 1), (0, 0)), mode="reflect")
    xs = xp.reshape(N, Hq, s, Wq, s, C).transpose(0, 2, 4, 1, 3, 5)
    xs = xs.reshape(N, s, s, Hq * Wq, C)
    shift_max = ((4 - 1) // s) * Wq + ((4 - 1) // s)
    L = max(Hq * Wq, shift_max + R)
    if L > Hq * Wq:                          # zero tail: every slab in-bounds
        xs = jnp.pad(xs, ((0, 0), (0, 0), (0, 0), (0, L - Hq * Wq), (0, 0)))

    inputs = [xs, w]
    in_specs = [
        pl.BlockSpec((1, s, s, L, C), lambda n: (n, 0, 0, 0, 0)),
        pl.BlockSpec((16, C, coutp), lambda n: (0, 0, 0)),   # fetched once
    ]
    if use_bias:
        inputs.append(b)
        in_specs.append(pl.BlockSpec((1, coutp), lambda n: (0, 0)))
    if use_mask:
        mask = (np.arange(R) % Wq < Wo).astype(np.float32).reshape(R, 1)
        inputs.append(jnp.asarray(mask))
        in_specs.append(pl.BlockSpec((R, 1), lambda n: (0, 0)))

    out = pl.pallas_call(
        _make_conv_kernel(stride=s, Ho=Ho, Wo=Wo, Wq=Wq,
                          epilogue=epilogue, use_bias=use_bias),
        out_shape=jax.ShapeDtypeStruct((N, R, coutp), jnp.float32),
        grid_spec=pltpu.PrefetchScalarGridSpec(
            num_scalar_prefetch=0,
            grid=(N,),                                    # one image per step
            in_specs=in_specs,
            out_specs=pl.BlockSpec((1, R, coutp), lambda n: (n, 0, 0)),
        ),
        compiler_params=pltpu.CompilerParams(
            dimension_semantics=("parallel",),   # v7x: shard images over 2 TCs
        ),
    )(*inputs)

    # Drop the (Wq - Wo) garbage columns of the "wide" accumulator rows.
    return out.reshape(N, Ho, Wq, coutp)[:, :, :Wo, :]


# ------------------------- Config / params / glue -------------------------- #

def layer_cfg(in_channels=3, num_filters=64, num_layers=3):
    cfg = [dict(cin=in_channels, cout=num_filters, stride=2, epilogue="lrelu")]
    nf = num_filters
    for _ in range(num_layers - 1):
        cfg.append(dict(cin=nf, cout=2 * nf, stride=2, epilogue="in_lrelu"))
        nf *= 2
    cfg.append(dict(cin=nf, cout=1, stride=1, epilogue="none"))
    return cfg


def init_params(key, cfg):
    """Deterministic, PyTorch-style uniform(+/- 1/sqrt(fan_in)) init."""
    params = {}
    keys = jax.random.split(key, 2 * len(cfg))
    for i, c in enumerate(cfg):
        bound = 1.0 / float(np.sqrt(c["cin"] * 16.0))
        params[f"w{i}"] = jax.random.uniform(
            keys[2 * i], (c["cout"], c["cin"], 4, 4), jnp.float32, -bound, bound)
        params[f"b{i}"] = jax.random.uniform(
            keys[2 * i + 1], (c["cout"],), jnp.float32, -bound, bound)
    return params


def prepare_params(params, cfg):
    """Tap-major (16, Cin_pad, Cout_pad) bf16 weights + (1, Cout_pad) f32 bias.

    Done once outside the jitted forward.  Channel padding is carried layer to
    layer (zero input channels x zero weights == exact).
    """
    ws, bs = [], []
    prev_coutp = _round_up(cfg[0]["cin"], 8)
    for i, c in enumerate(cfg):
        w, b = params[f"w{i}"], params[f"b{i}"]            # (Cout, Cin, 4, 4)
        cin, cout = c["cin"], c["cout"]
        cinp, coutp = prev_coutp, _round_up(cout, 128)
        wm = jnp.transpose(w, (2, 3, 1, 0)).reshape(16, cin, cout)
        wm = jnp.pad(wm, ((0, 0), (0, cinp - cin), (0, coutp - cout)))
        ws.append(wm.astype(jnp.bfloat16))
        bs.append(jnp.pad(b, (0, coutp - cout)).reshape(1, coutp)
                  .astype(jnp.float32))
        prev_coutp = coutp
    return tuple(ws), tuple(bs)


def make_forward(cfg):
    def forward(x_nchw, ws, bs):
        x = x_nchw.transpose(0, 2, 3, 1)                   # NCHW -> NHWC, once
        cin0p = ws[0].shape[1]
        x = jnp.pad(x, ((0, 0), (0, 0), (0, 0), (0, cin0p - x.shape[-1])))
        for i, c in enumerate(cfg):
            x = fused_conv_layer(x, ws[i], bs[i],
                                 stride=c["stride"], epilogue=c["epilogue"])
        x = x[..., :cfg[-1]["cout"]]                       # drop lane padding
        return x.transpose(0, 3, 1, 2)                     # NHWC -> NCHW
    return forward


def reference_forward(x, params, cfg):
    """Pure-JAX f32 reference matching the PyTorch module."""
    for i, c in enumerate(cfg):
        w, b = params[f"w{i}"], params[f"b{i}"]
        xp = jnp.pad(x, ((0, 0), (0, 0), (1, 1), (1, 1)), mode="reflect")
        x = jax.lax.conv_general_dilated(
            xp, w, window_strides=(c["stride"],) * 2, padding="VALID",
            dimension_numbers=("NCHW", "OIHW", "NCHW"))
        x = x + b.reshape(1, -1, 1, 1)
        if c["epilogue"] == "in_lrelu":
            mean = jnp.mean(x, axis=(2, 3), keepdims=True)
            var = jnp.mean((x - mean) ** 2, axis=(2, 3), keepdims=True)
            x = (x - mean) * jax.lax.rsqrt(var + 1e-5)
        if c["epilogue"] in ("lrelu", "in_lrelu"):
            x = jnp.where(x > 0, x, 0.2 * x)
    return x


if __name__ == "__main__":
    key = jax.random.PRNGKey(0)
    pkey, xkey = jax.random.split(key)

    cfg = layer_cfg(in_channels=3, num_filters=64, num_layers=3)
    params = init_params(pkey, cfg)
    ws, bs = prepare_params(params, cfg)                   # once, outside jit

    # Small NCHW input: 32 -> 16 -> 8 -> 4 -> (final stride-1 conv) 3x3 map.
    x = jax.random.normal(xkey, (2, 3, 32, 32), dtype=jnp.float32)

    fwd = jax.jit(make_forward(cfg))
    out = fwd(x, ws, bs)
    jax.block_until_ready(out)

    assert out.shape == (2, 1, 3, 3), out.shape
    assert bool(jnp.all(jnp.isfinite(out)))

    # Loose check vs. f32 reference (kernel matmuls run in bf16 on the MXU).
    ref = reference_forward(x, params, cfg)
    rel = float(jnp.linalg.norm(out - ref) / (jnp.linalg.norm(ref) + 1e-12))
    assert rel < 0.1, f"relative L2 error vs reference too large: {rel}"

    print("KERNEL_OK")
</pallas_src>

<mosaic_0001>
module attributes {stable_mosaic.version = 11 : i64} {
  func.func @kernel(%arg0: i32, %arg1: memref<1x2x2x290x8xf32, #tpu.memory_space<vmem>>, %arg2: memref<16x8x128xbf16, #tpu.memory_space<vmem>>, %arg3: memref<1x128xf32, #tpu.memory_space<vmem>>, %arg4: memref<1x272x128xf32, #tpu.memory_space<vmem>>) attributes {dimension_semantics = [#tpu.dimension_semantics<parallel>], iteration_bounds = array<i64: 2>, scalar_prefetch = 0 : i64, scratch_operands = 0 : i64, tpu.core_type = #tpu.core_type<tc>, window_params = [{transform_indices = @transform_0, window_bounds = array<i64: 1, 2, 2, 290, 8>}, {pipeline_mode = #tpu.pipeline_mode<synchronous>, transform_indices = @transform_1, window_bounds = array<i64: 16, 8, 128>}, {pipeline_mode = #tpu.pipeline_mode<synchronous>, transform_indices = @transform_2, window_bounds = array<i64: 1, 128>}, {transform_indices = @transform_3, window_bounds = array<i64: 1, 272, 128>}]} {
    %cst = arith.constant 0.000000e+00 : f32
    %0 = vector.broadcast %cst : f32 to vector<272x128xf32>
    %c0 = arith.constant 0 : index
    %c0_0 = arith.constant 0 : index
    %c0_1 = arith.constant 0 : index
    %c0_2 = arith.constant 0 : index
    %c0_3 = arith.constant 0 : index
    %1 = vector.load %arg1[%c0, %c0_0, %c0_1, %c0_2, %c0_3] : memref<1x2x2x290x8xf32, #tpu.memory_space<vmem>>, vector<1x1x1x272x8xf32>
    %2 = vector.shape_cast %1 : vector<1x1x1x272x8xf32> to vector<272x8xf32>
    %3 = arith.truncf %2 : vector<272x8xf32> to vector<272x8xbf16>
    %c0_4 = arith.constant 0 : index
    %c0_5 = arith.constant 0 : index
    %c0_6 = arith.constant 0 : index
    %4 = vector.load %arg2[%c0_4, %c0_5, %c0_6] : memref<16x8x128xbf16, #tpu.memory_space<vmem>>, vector<1x8x128xbf16>
    %5 = vector.shape_cast %4 : vector<1x8x128xbf16> to vector<8x128xbf16>
    %cst_7 = arith.constant dense<0.000000e+00> : vector<272x128xf32>
    %6 = tpu.matmul %3, %5, %cst_7 {dimension_numbers = #tpu.dot_dimension_numbers<[1], [0], [0], [1], [0, 0, 1, 1], [], []>} : vector<272x8xbf16>, vector<8x128xbf16>, vector<272x128xf32> -> vector<272x128xf32>
    %7 = arith.addf %0, %6 : vector<272x128xf32>
    %c0_8 = arith.constant 0 : index
    %c0_9 = arith.constant 0 : index
    %c1 = arith.constant 1 : index
    %c0_10 = arith.constant 0 : index
    %c0_11 = arith.constant 0 : index
    %8 = vector.load %arg1[%c0_8, %c0_9, %c1, %c0_10, %c0_11] : memref<1x2x2x290x8xf32, #tpu.memory_space<vmem>>, vector<1x1x1x272x8xf32>
    %9 = vector.shape_cast %8 : vector<1x1x1x272x8xf32> to vector<272x8xf32>
    %10 = arith.truncf %9 : vector<272x8xf32> to vector<272x8xbf16>
    %c1_12 = arith.constant 1 : index
    %c0_13 = arith.constant 0 : index
    %c0_14 = arith.constant 0 : index
    %11 = vector.load %arg2[%c1_12, %c0_13, %c0_14] : memref<16x8x128xbf16, #tpu.memory_space<vmem>>, vector<1x8x128xbf16>
    %12 = vector.shape_cast %11 : vector<1x8x128xbf16> to vector<8x128xbf16>
    %cst_15 = arith.constant dense<0.000000e+00> : vector<272x128xf32>
    %13 = tpu.matmul %10, %12, %cst_15 {dimension_numbers = #tpu.dot_dimension_numbers<[1], [0], [0], [1], [0, 0, 1, 1], [], []>} : vector<272x8xbf16>, vector<8x128xbf16>, vector<272x128xf32> -> vector<272x128xf32>
    %14 = arith.addf %7, %13 : vector<272x128xf32>
    %c0_16 = arith.constant 0 : index
    %c0_17 = arith.constant 0 : index
    %c0_18 = arith.constant 0 : index
    %c1_19 = arith.constant 1 : index
    %c0_20 = arith.constant 0 : index
    %15 = vector.load %arg1[%c0_16, %c0_17, %c0_18, %c1_19, %c0_20] : memref<1x2x2x290x8xf32, #tpu.memory_space<vmem>>, vector<1x1x1x272x8xf32>
    %16 = vector.shape_cast %15 : vector<1x1x1x272x8xf32> to vector<272x8xf32>
    %17 = arith.truncf %16 : vector<272x8xf32> to vector<272x8xbf16>
    %c2 = arith.constant 2 : index
    %c0_21 = arith.constant 0 : index
    %c0_22 = arith.constant 0 : index
    %18 = vector.load %arg2[%c2, %c0_21, %c0_22] : memref<16x8x128xbf16, #tpu.memory_space<vmem>>, vector<1x8x128xbf16>
    %19 = vector.shape_cast %18 : vector<1x8x128xbf16> to vector<8x128xbf16>
    %cst_23 = arith.constant dense<0.000000e+00> : vector<272x128xf32>
    %20 = tpu.matmul %17, %19, %cst_23 {dimension_numbers = #tpu.dot_dimension_numbers<[1], [0], [0], [1], [0, 0, 1, 1], [], []>} : vector<272x8xbf16>, vector<8x128xbf16>, vector<272x128xf32> -> vector<272x128xf32>
    %21 = arith.addf %14, %20 : vector<272x128xf32>
    %c0_24 = arith.constant 0 : index
    %c0_25 = arith.constant 0 : index
    %c1_26 = arith.constant 1 : index
    %c1_27 = arith.constant 1 : index
    %c0_28 = arith.constant 0 : index
    %22 = vector.load %arg1[%c0_24, %c0_25, %c1_26, %c1_27, %c0_28] : memref<1x2x2x290x8xf32, #tpu.memory_space<vmem>>, vector<1x1x1x272x8xf32>
    %23 = vector.shape_cast %22 : vector<1x1x1x272x8xf32> to vector<272x8xf32>
    %24 = arith.truncf %23 : vector<272x8xf32> to vector<272x8xbf16>
    %c3 = arith.constant 3 : index
    %c0_29 = arith.constant 0 : index
    %c0_30 = arith.constant 0 : index
    %25 = vector.load %arg2[%c3, %c0_29, %c0_30] : memref<16x8x128xbf16, #tpu.memory_space<vmem>>, vector<1x8x128xbf16>
    %26 = vector.shape_cast %25 : vector<1x8x128xbf16> to vector<8x128xbf16>
    %cst_31 = arith.constant dense<0.000000e+00> : vector<272x128xf32>
    %27 = tpu.matmul %24, %26, %cst_31 {dimension_numbers = #tpu.dot_dimension_numbers<[1], [0], [0], [1], [0, 0, 1, 1], [], []>} : vector<272x8xbf16>, vector<8x128xbf16>, vector<272x128xf32> -> vector<272x128xf32>
    %28 = arith.addf %21, %27 : vector<272x128xf32>
    %c0_32 = arith.constant 0 : index
    %c1_33 = arith.constant 1 : index
    %c0_34 = arith.constant 0 : index
    %c0_35 = arith.constant 0 : index
    %c0_36 = arith.constant 0 : index
    %29 = vector.load %arg1[%c0_32, %c1_33, %c0_34, %c0_35, %c0_36] : memref<1x2x2x290x8xf32, #tpu.memory_space<vmem>>, vector<1x1x1x272x8xf32>
    %30 = vector.shape_cast %29 : vector<1x1x1x272x8xf32> to vector<272x8xf32>
    %31 = arith.truncf %30 : vector<272x8xf32> to vector<272x8xbf16>
    %c4 = arith.constant 4 : index
    %c0_37 = arith.constant 0 : index
    %c0_38 = arith.constant 0 : index
    %32 = vector.load %arg2[%c4, %c0_37, %c0_38] : memref<16x8x128xbf16, #tpu.memory_space<vmem>>, vector<1x8x128xbf16>
    %33 = vector.shape_cast %32 : vector<1x8x128xbf16> to vector<8x128xbf16>
    %cst_39 = arith.constant dense<0.000000e+00> : vector<272x128xf32>
    %34 = tpu.matmul %31, %33, %cst_39 {dimension_numbers = #tpu.dot_dimension_numbers<[1], [0], [0], [1], [0, 0, 1, 1], [], []>} : vector<272x8xbf16>, vector<8x128xbf16>, vector<272x128xf32> -> vector<272x128xf32>
    %35 = arith.addf %28, %34 : vector<272x128xf32>
    %c0_40 = arith.constant 0 : index
    %c1_41 = arith.constant 1 : index
    %c1_42 = arith.constant 1 : index
    %c0_43 = arith.constant 0 : index
    %c0_44 = arith.constant 0 : index
    %36 = vector.load %arg1[%c0_40, %c1_41, %c1_42, %c0_43, %c0_44] : memref<1x2x2x290x8xf32, #tpu.memory_space<vmem>>, vector<1x1x1x272x8xf32>
    %37 = vector.shape_cast %36 : vector<1x1x1x272x8xf32> to vector<272x8xf32>
    %38 = arith.truncf %37 : vector<272x8xf32> to vector<272x8xbf16>
    %c5 = arith.constant 5 : index
    %c0_45 = arith.constant 0 : index
    %c0_46 = arith.constant 0 : index
    %39 = vector.load %arg2[%c5, %c0_45, %c0_46] : memref<16x8x128xbf16, #tpu.memory_space<vmem>>, vector<1x8x128xbf16>
    %40 = vector.shape_cast %39 : vector<1x8x128xbf16> to vector<8x128xbf16>
    %cst_47 = arith.constant dense<0.000000e+00> : vector<272x128xf32>
    %41 = tpu.matmul %38, %40, %cst_47 {dimension_numbers = #tpu.dot_dimension_numbers<[1], [0], [0], [1], [0, 0, 1, 1], [], []>} : vector<272x8xbf16>, vector<8x128xbf16>, vector<272x128xf32> -> vector<272x128xf32>
    %42 = arith.addf %35, %41 : vector<272x128xf32>
    %c0_48 = arith.constant 0 : index
    %c1_49 = arith.constant 1 : index
    %c0_50 = arith.constant 0 : index
    %c1_51 = arith.constant 1 : index
    %c0_52 = arith.constant 0 : index
    %43 = vector.load %arg1[%c0_48, %c1_49, %c0_50, %c1_51, %c0_52] : memref<1x2x2x290x8xf32, #tpu.memory_space<vmem>>, vector<1x1x1x272x8xf32>
    %44 = vector.shape_cast %43 : vector<1x1x1x272x8xf32> to vector<272x8xf32>
    %45 = arith.truncf %44 : vector<272x8xf32> to vector<272x8xbf16>
    %c6 = arith.constant 6 : index
    %c0_53 = arith.constant 0 : index
    %c0_54 = arith.constant 0 : index
    %46 = vector.load %arg2[%c6, %c0_53, %c0_54] : memref<16x8x128xbf16, #tpu.memory_space<vmem>>, vector<1x8x128xbf16>
    %47 = vector.shape_cast %46 : vector<1x8x128xbf16> to vector<8x128xbf16>
    %cst_55 = arith.constant dense<0.000000e+00> : vector<272x128xf32>
    %48 = tpu.matmul %45, %47, %cst_55 {dimension_numbers = #tpu.dot_dimension_numbers<[1], [0], [0], [1], [0, 0, 1, 1], [], []>} : vector<272x8xbf16>, vector<8x128xbf16>, vector<272x128xf32> -> vector<272x128xf32>
    %49 = arith.addf %42, %48 : vector<272x128xf32>
    %c0_56 = arith.constant 0 : index
    %c1_57 = arith.constant 1 : index
    %c1_58 = arith.constant 1 : index
    %c1_59 = arith.constant 1 : index
    %c0_60 = arith.constant 0 : index
    %50 = vector.load %arg1[%c0_56, %c1_57, %c1_58, %c1_59, %c0_60] : memref<1x2x2x290x8xf32, #tpu.memory_space<vmem>>, vector<1x1x1x272x8xf32>
    %51 = vector.shape_cast %50 : vector<1x1x1x272x8xf32> to vector<272x8xf32>
    %52 = arith.truncf %51 : vector<272x8xf32> to vector<272x8xbf16>
    %c7 = arith.constant 7 : index
    %c0_61 = arith.constant 0 : index
    %c0_62 = arith.constant 0 : index
    %53 = vector.load %arg2[%c7, %c0_61, %c0_62] : memref<16x8x128xbf16, #tpu.memory_space<vmem>>, vector<1x8x128xbf16>
    %54 = vector.shape_cast %53 : vector<1x8x128xbf16> to vector<8x128xbf16>
    %cst_63 = arith.constant dense<0.000000e+00> : vector<272x128xf32>
    %55 = tpu.matmul %52, %54, %cst_63 {dimension_numbers = #tpu.dot_dimension_numbers<[1], [0], [0], [1], [0, 0, 1, 1], [], []>} : vector<272x8xbf16>, vector<8x128xbf16>, vector<272x128xf32> -> vector<272x128xf32>
    %56 = arith.addf %49, %55 : vector<272x128xf32>
    %c0_64 = arith.constant 0 : index
    %c0_65 = arith.constant 0 : index
    %c0_66 = arith.constant 0 : index
    %c17 = arith.constant 17 : index
    %c0_67 = arith.constant 0 : index
    %57 = vector.load %arg1[%c0_64, %c0_65, %c0_66, %c17, %c0_67] : memref<1x2x2x290x8xf32, #tpu.memory_space<vmem>>, vector<1x1x1x272x8xf32>
    %58 = vector.shape_cast %57 : vector<1x1x1x272x8xf32> to vector<272x8xf32>
    %59 = arith.truncf %58 : vector<272x8xf32> to vector<272x8xbf16>
    %c8 = arith.constant 8 : index
    %c0_68 = arith.constant 0 : index
    %c0_69 = arith.constant 0 : index
    %60 = vector.load %arg2[%c8, %c0_68, %c0_69] : memref<16x8x128xbf16, #tpu.memory_space<vmem>>, vector<1x8x128xbf16>
    %61 = vector.shape_cast %60 : vector<1x8x128xbf16> to vector<8x128xbf16>
    %cst_70 = arith.constant dense<0.000000e+00> : vector<272x128xf32>
    %62 = tpu.matmul %59, %61, %cst_70 {dimension_numbers = #tpu.dot_dimension_numbers<[1], [0], [0], [1], [0, 0, 1, 1], [], []>} : vector<272x8xbf16>, vector<8x128xbf16>, vector<272x128xf32> -> vector<272x128xf32>
    %63 = arith.addf %56, %62 : vector<272x128xf32>
    %c0_71 = arith.constant 0 : index
    %c0_72 = arith.constant 0 : index
    %c1_73 = arith.constant 1 : index
    %c17_74 = arith.constant 17 : index
    %c0_75 = arith.constant 0 : index
    %64 = vector.load %arg1[%c0_71, %c0_72, %c1_73, %c17_74, %c0_75] : memref<1x2x2x290x8xf32, #tpu.memory_space<vmem>>, vector<1x1x1x272x8xf32>
    %65 = vector.shape_cast %64 : vector<1x1x1x272x8xf32> to vector<272x8xf32>
    %66 = arith.truncf %65 : vector<272x8xf32> to vector<272x8xbf16>
    %c9 = arith.constant 9 : index
    %c0_76 = arith.constant 0 : index
    %c0_77 = arith.constant 0 : index
    %67 = vector.load %arg2[%c9, %c0_76, %c0_77] : memref<16x8x128xbf16, #tpu.memory_space<vmem>>, vector<1x8x128xbf16>
    %68 = vector.shape_cast %67 : vector<1x8x128xbf16> to vector<8x128xbf16>
    %cst_78 = arith.constant dense<0.000000e+00> : vector<272x128xf32>
    %69 = tpu.matmul %66, %68, %cst_78 {dimension_numbers = #tpu.dot_dimension_numbers<[1], [0], [0], [1], [0, 0, 1, 1], [], []>} : vector<272x8xbf16>, vector<8x128xbf16>, vector<272x128xf32> -> vector<272x128xf32>
    %70 = arith.addf %63, %69 : vector<272x128xf32>
    %c0_79 = arith.constant 0 : index
    %c0_80 = arith.constant 0 : index
    %c0_81 = arith.constant 0 : index
    %c18 = arith.constant 18 : index
    %c0_82 = arith.constant 0 : index
    %71 = vector.load %arg1[%c0_79, %c0_80, %c0_81, %c18, %c0_82] : memref<1x2x2x290x8xf32, #tpu.memory_space<vmem>>, vector<1x1x1x272x8xf32>
    %72 = vector.shape_cast %71 : vector<1x1x1x272x8xf32> to vector<272x8xf32>
    %73 = arith.truncf %72 : vector<272x8xf32> to vector<272x8xbf16>
    %c10 = arith.constant 10 : index
    %c0_83 = arith.constant 0 : index
    %c0_84 = arith.constant 0 : index
    %74 = vector.load %arg2[%c10, %c0_83, %c0_84] : memref<16x8x128xbf16, #tpu.memory_space<vmem>>, vector<1x8x128xbf16>
    %75 = vector.shape_cast %74 : vector<1x8x128xbf16> to vector<8x128xbf16>
    %cst_85 = arith.constant dense<0.000000e+00> : vector<272x128xf32>
    %76 = tpu.matmul %73, %75, %cst_85 {dimension_numbers = #tpu.dot_dimension_numbers<[1], [0], [0], [1], [0, 0, 1, 1], [], []>} : vector<272x8xbf16>, vector<8x128xbf16>, vector<272x128xf32> -> vector<272x128xf32>
    %77 = arith.addf %70, %76 : vector<272x128xf32>
    %c0_86 = arith.constant 0 : index
    %c0_87 = arith.constant 0 : index
    %c1_88 = arith.constant 1 : index
    %c18_89 = arith.constant 18 : index
    %c0_90 = arith.constant 0 : index
    %78 = vector.load %arg1[%c0_86, %c0_87, %c1_88, %c18_89, %c0_90] : memref<1x2x2x290x8xf32, #tpu.memory_space<vmem>>, vector<1x1x1x272x8xf32>
    %79 = vector.shape_cast %78 : vector<1x1x1x272x8xf32> to vector<272x8xf32>
    %80 = arith.truncf %79 : vector<272x8xf32> to vector<272x8xbf16>
    %c11 = arith.constant 11 : index
    %c0_91 = arith.constant 0 : index
    %c0_92 = arith.constant 0 : index
    %81 = vector.load %arg2[%c11, %c0_91, %c0_92] : memref<16x8x128xbf16, #tpu.memory_space<vmem>>, vector<1x8x128xbf16>
    %82 = vector.shape_cast %81 : vector<1x8x128xbf16> to vector<8x128xbf16>
    %cst_93 = arith.constant dense<0.000000e+00> : vector<272x128xf32>
    %83 = tpu.matmul %80, %82, %cst_93 {dimension_numbers = #tpu.dot_dimension_numbers<[1], [0], [0], [1], [0, 0, 1, 1], [], []>} : vector<272x8xbf16>, vector<8x128xbf16>, vector<272x128xf32> -> vector<272x128xf32>
    %84 = arith.addf %77, %83 : vector<272x128xf32>
    %c0_94 = arith.constant 0 : index
    %c1_95 = arith.constant 1 : index
    %c0_96 = arith.constant 0 : index
    %c17_97 = arith.constant 17 : index
    %c0_98 = arith.constant 0 : index
    %85 = vector.load %arg1[%c0_94, %c1_95, %c0_96, %c17_97, %c0_98] : memref<1x2x2x290x8xf32, #tpu.memory_space<vmem>>, vector<1x1x1x272x8xf32>
    %86 = vector.shape_cast %85 : vector<1x1x1x272x8xf32> to vector<272x8xf32>
    %87 = arith.truncf %86 : vector<272x8xf32> to vector<272x8xbf16>
    %c12 = arith.constant 12 : index
    %c0_99 = arith.constant 0 : index
    %c0_100 = arith.constant 0 : index
    %88 = vector.load %arg2[%c12, %c0_99, %c0_100] : memref<16x8x128xbf16, #tpu.memory_space<vmem>>, vector<1x8x128xbf16>
    %89 = vector.shape_cast %88 : vector<1x8x128xbf16> to vector<8x128xbf16>
    %cst_101 = arith.constant dense<0.000000e+00> : vector<272x128xf32>
    %90 = tpu.matmul %87, %89, %cst_101 {dimension_numbers = #tpu.dot_dimension_numbers<[1], [0], [0], [1], [0, 0, 1, 1], [], []>} : vector<272x8xbf16>, vector<8x128xbf16>, vector<272x128xf32> -> vector<272x128xf32>
    %91 = arith.addf %84, %90 : vector<272x128xf32>
    %c0_102 = arith.constant 0 : index
    %c1_103 = arith.constant 1 : index
    %c1_104 = arith.constant 1 : index
    %c17_105 = arith.constant 17 : index
    %c0_106 = arith.constant 0 : index
    %92 = vector.load %arg1[%c0_102, %c1_103, %c1_104, %c17_105, %c0_106] : memref<1x2x2x290x8xf32, #tpu.memory_space<vmem>>, vector<1x1x1x272x8xf32>
    %93 = vector.shape_cast %92 : vector<1x1x1x272x8xf32> to vector<272x8xf32>
    %94 = arith.truncf %93 : vector<272x8xf32> to vector<272x8xbf16>
    %c13 = arith.constant 13 : index
    %c0_107 = arith.constant 0 : index
    %c0_108 = arith.constant 0 : index
    %95 = vector.load %arg2[%c13, %c0_107, %c0_108] : memref<16x8x128xbf16, #tpu.memory_space<vmem>>, vector<1x8x128xbf16>
    %96 = vector.shape_cast %95 : vector<1x8x128xbf16> to vector<8x128xbf16>
    %cst_109 = arith.constant dense<0.000000e+00> : vector<272x128xf32>
    %97 = tpu.matmul %94, %96, %cst_109 {dimension_numbers = #tpu.dot_dimension_numbers<[1], [0], [0], [1], [0, 0, 1, 1], [], []>} : vector<272x8xbf16>, vector<8x128xbf16>, vector<272x128xf32> -> vector<272x128xf32>
    %98 = arith.addf %91, %97 : vector<272x128xf32>
    %c0_110 = arith.constant 0 : index
    %c1_111 = arith.constant 1 : index
    %c0_112 = arith.constant 0 : index
    %c18_113 = arith.constant 18 : index
    %c0_114 = arith.constant 0 : index
    %99 = vector.load %arg1[%c0_110, %c1_111, %c0_112, %c18_113, %c0_114] : memref<1x2x2x290x8xf32, #tpu.memory_space<vmem>>, vector<1x1x1x272x8xf32>
    %100 = vector.shape_cast %99 : vector<1x1x1x272x8xf32> to vector<272x8xf32>
    %101 = arith.truncf %100 : vector<272x8xf32> to vector<272x8xbf16>
    %c14 = arith.constant 14 : index
    %c0_115 = arith.constant 0 : index
    %c0_116 = arith.constant 0 : index
    %102 = vector.load %arg2[%c14, %c0_115, %c0_116] : memref<16x8x128xbf16, #tpu.memory_space<vmem>>, vector<1x8x128xbf16>
    %103 = vector.shape_cast %102 : vector<1x8x128xbf16> to vector<8x128xbf16>
    %cst_117 = arith.constant dense<0.000000e+00> : vector<272x128xf32>
    %104 = tpu.matmul %101, %103, %cst_117 {dimension_numbers = #tpu.dot_dimension_numbers<[1], [0], [0], [1], [0, 0, 1, 1], [], []>} : vector<272x8xbf16>, vector<8x128xbf16>, vector<272x128xf32> -> vector<272x128xf32>
    %105 = arith.addf %98, %104 : vector<272x128xf32>
    %c0_118 = arith.constant 0 : index
    %c1_119 = arith.constant 1 : index
    %c1_120 = arith.constant 1 : index
    %c18_121 = arith.constant 18 : index
    %c0_122 = arith.constant 0 : index
    %106 = vector.load %arg1[%c0_118, %c1_119, %c1_120, %c18_121, %c0_122] : memref<1x2x2x290x8xf32, #tpu.memory_space<vmem>>, vector<1x1x1x272x8xf32>
    %107 = vector.shape_cast %106 : vector<1x1x1x272x8xf32> to vector<272x8xf32>
    %108 = arith.truncf %107 : vector<272x8xf32> to vector<272x8xbf16>
    %c15 = arith.constant 15 : index
    %c0_123 = arith.constant 0 : index
    %c0_124 = arith.constant 0 : index
    %109 = vector.load %arg2[%c15, %c0_123, %c0_124] : memref<16x8x128xbf16, #tpu.memory_space<vmem>>, vector<1x8x128xbf16>
    %110 = vector.shape_cast %109 : vector<1x8x128xbf16> to vector<8x128xbf16>
    %cst_125 = arith.constant dense<0.000000e+00> : vector<272x128xf32>
    %111 = tpu.matmul %108, %110, %cst_125 {dimension_numbers = #tpu.dot_dimension_numbers<[1], [0], [0], [1], [0, 0, 1, 1], [], []>} : vector<272x8xbf16>, vector<8x128xbf16>, vector<272x128xf32> -> vector<272x128xf32>
    %112 = arith.addf %105, %111 : vector<272x128xf32>
    %c0_126 = arith.constant 0 : index
    %c0_127 = arith.constant 0 : index
    %113 = vector.load %arg3[%c0_126, %c0_127] : memref<1x128xf32, #tpu.memory_space<vmem>>, vector<1x128xf32>
    %114 = vector.broadcast %113 : vector<1x128xf32> to vector<272x128xf32>
    %115 = arith.addf %112, %114 : vector<272x128xf32>
    %cst_128 = arith.constant 0.000000e+00 : f32
    %116 = vector.broadcast %cst_128 : f32 to vector<272x128xf32>
    %117 = arith.cmpf ogt, %115, %116 : vector<272x128xf32>
    %cst_129 = arith.constant 2.000000e-01 : f32
    %118 = vector.broadcast %cst_129 : f32 to vector<272x128xf32>
    %119 = arith.mulf %118, %115 : vector<272x128xf32>
    %120 = arith.select %117, %115, %119 : vector<272x128xi1>, vector<272x128xf32>
    %c0_130 = arith.constant 0 : index
    %c0_131 = arith.constant 0 : index
    %c0_132 = arith.constant 0 : index
    %121 = vector.load %arg4[%c0_130, %c0_131, %c0_132] : memref<1x272x128xf32, #tpu.memory_space<vmem>>, vector<1x272x128xf32>
    %122 = vector.shape_cast %121 : vector<1x272x128xf32> to vector<272x128xf32>
    %123 = vector.shape_cast %120 : vector<272x128xf32> to vector<1x272x128xf32>
    tpu.vector_store %arg4[%c0_130, %c0_131, %c0_132], %123 {strides = array<i32>} : memref<1x272x128xf32, #tpu.memory_space<vmem>>, vector<1x272x128xf32>,
    return
  }
  func.func @transform_0(%arg0: i32) -> (i32, i32, i32, i32, i32) {
    %c0_i32 = arith.constant 0 : i32
    %c0_i32_0 = arith.constant 0 : i32
    %c0_i32_1 = arith.constant 0 : i32
    %c0_i32_2 = arith.constant 0 : i32
    %c0_i32_3 = arith.constant 0 : i32
    return %arg0, %c0_i32, %c0_i32_0, %c0_i32_1, %c0_i32_2 : i32, i32, i32, i32, i32
  }
  func.func @transform_1(%arg0: i32) -> (i32, i32, i32) {
    %c0_i32 = arith.constant 0 : i32
    %c0_i32_0 = arith.constant 0 : i32
    %c0_i32_1 = arith.constant 0 : i32
    %c0_i32_2 = arith.constant 0 : i32
    return %c0_i32, %c0_i32_0, %c0_i32_1 : i32, i32, i32
  }
  func.func @transform_2(%arg0: i32) -> (i32, i32) {
    %c0_i32 = arith.constant 0 : i32
    %c0_i32_0 = arith.constant 0 : i32
    %c0_i32_1 = arith.constant 0 : i32
    return %c0_i32, %c0_i32_0 : i32, i32
  }
  func.func @transform_3(%arg0: i32) -> (i32, i32, i32) {
    %c0_i32 = arith.constant 0 : i32
    %c0_i32_0 = arith.constant 0 : i32
    %c0_i32_1 = arith.constant 0 : i32
    return %arg0, %c0_i32, %c0_i32_0 : i32, i32, i32
  }
}

module attributes {stable_mosaic.version = 11 : i64} {
  func.func @kernel(%arg0: i32, %arg1: memref<1x2x2x82x128xf32, #tpu.memory_space<vmem>>, %arg2: memref<16x128x128xbf16, #tpu.memory_space<vmem>>, %arg3: memref<72x1xf32, #tpu.memory_space<vmem>>, %arg4: memref<1x72x128xf32, #tpu.memory_space<vmem>>) attributes {dimension_semantics = [#tpu.dimension_semantics<parallel>], iteration_bounds = array<i64: 2>, scalar_prefetch = 0 : i64, scratch_operands = 0 : i64, tpu.core_type = #tpu.core_type<tc>, window_params = [{transform_indices = @transform_0, window_bounds = array<i64: 1, 2, 2, 82, 128>}, {pipeline_mode = #tpu.pipeline_mode<synchronous>, transform_indices = @transform_1, window_bounds = array<i64: 16, 128, 128>}, {pipeline_mode = #tpu.pipeline_mode<synchronous>, transform_indices = @transform_2, window_bounds = array<i64: 72, 1>}, {transform_indices = @transform_3, window_bounds = array<i64: 1, 72, 128>}]} {
    %cst = arith.constant 0.000000e+00 : f32
    %0 = vector.broadcast %cst : f32 to vector<72x128xf32>
    %c0 = arith.constant 0 : index
    %c0_0 = arith.constant 0 : index
    %c0_1 = arith.constant 0 : index
    %c0_2 = arith.constant 0 : index
    %c0_3 = arith.constant 0 : index
    %1 = vector.load %arg1[%c0, %c0_0, %c0_1, %c0_2, %c0_3] : memref<1x2x2x82x128xf32, #tpu.memory_space<vmem>>, vector<1x1x1x72x128xf32>
    %2 = vector.shape_cast %1 : vector<1x1x1x72x128xf32> to vector<72x128xf32>
    %3 = arith.truncf %2 : vector<72x128xf32> to vector<72x128xbf16>
    %c0_4 = arith.constant 0 : index
    %c0_5 = arith.constant 0 : index
    %c0_6 = arith.constant 0 : index
    %4 = vector.load %arg2[%c0_4, %c0_5, %c0_6] : memref<16x128x128xbf16, #tpu.memory_space<vmem>>, vector<1x128x128xbf16>
    %5 = vector.shape_cast %4 : vector<1x128x128xbf16> to vector<128x128xbf16>
    %cst_7 = arith.constant dense<0.000000e+00> : vector<72x128xf32>
    %6 = tpu.matmul %3, %5, %cst_7 {dimension_numbers = #tpu.dot_dimension_numbers<[1], [0], [0], [1], [0, 0, 1, 1], [], []>} : vector<72x128xbf16>, vector<128x128xbf16>, vector<72x128xf32> -> vector<72x128xf32>
    %7 = arith.addf %0, %6 : vector<72x128xf32>
    %c0_8 = arith.constant 0 : index
    %c0_9 = arith.constant 0 : index
    %c1 = arith.constant 1 : index
    %c0_10 = arith.constant 0 : index
    %c0_11 = arith.constant 0 : index
    %8 = vector.load %arg1[%c0_8, %c0_9, %c1, %c0_10, %c0_11] : memref<1x2x2x82x128xf32, #tpu.memory_space<vmem>>, vector<1x1x1x72x128xf32>
    %9 = vector.shape_cast %8 : vector<1x1x1x72x128xf32> to vector<72x128xf32>
    %10 = arith.truncf %9 : vector<72x128xf32> to vector<72x128xbf16>
    %c1_12 = arith.constant 1 : index
    %c0_13 = arith.constant 0 : index
    %c0_14 = arith.constant 0 : index
    %11 = vector.load %arg2[%c1_12, %c0_13, %c0_14] : memref<16x128x128xbf16, #tpu.memory_space<vmem>>, vector<1x128x128xbf16>
    %12 = vector.shape_cast %11 : vector<1x128x128xbf16> to vector<128x128xbf16>
    %cst_15 = arith.constant dense<0.000000e+00> : vector<72x128xf32>
    %13 = tpu.matmul %10, %12, %cst_15 {dimension_numbers = #tpu.dot_dimension_numbers<[1], [0], [0], [1], [0, 0, 1, 1], [], []>} : vector<72x128xbf16>, vector<128x128xbf16>, vector<72x128xf32> -> vector<72x128xf32>
    %14 = arith.addf %7, %13 : vector<72x128xf32>
    %c0_16 = arith.constant 0 : index
    %c0_17 = arith.constant 0 : index
    %c0_18 = arith.constant 0 : index
    %c1_19 = arith.constant 1 : index
    %c0_20 = arith.constant 0 : index
    %15 = vector.load %arg1[%c0_16, %c0_17, %c0_18, %c1_19, %c0_20] : memref<1x2x2x82x128xf32, #tpu.memory_space<vmem>>, vector<1x1x1x72x128xf32>
    %16 = vector.shape_cast %15 : vector<1x1x1x72x128xf32> to vector<72x128xf32>
    %17 = arith.truncf %16 : vector<72x128xf32> to vector<72x128xbf16>
    %c2 = arith.constant 2 : index
    %c0_21 = arith.constant 0 : index
    %c0_22 = arith.constant 0 : index
    %18 = vector.load %arg2[%c2, %c0_21, %c0_22] : memref<16x128x128xbf16, #tpu.memory_space<vmem>>, vector<1x128x128xbf16>
    %19 = vector.shape_cast %18 : vector<1x128x128xbf16> to vector<128x128xbf16>
    %cst_23 = arith.constant dense<0.000000e+00> : vector<72x128xf32>
    %20 = tpu.matmul %17, %19, %cst_23 {dimension_numbers = #tpu.dot_dimension_numbers<[1], [0], [0], [1], [0, 0, 1, 1], [], []>} : vector<72x128xbf16>, vector<128x128xbf16>, vector<72x128xf32> -> vector<72x128xf32>
    %21 = arith.addf %14, %20 : vector<72x128xf32>
    %c0_24 = arith.constant 0 : index
    %c0_25 = arith.constant 0 : index
    %c1_26 = arith.constant 1 : index
    %c1_27 = arith.constant 1 : index
    %c0_28 = arith.constant 0 : index
    %22 = vector.load %arg1[%c0_24, %c0_25, %c1_26, %c1_27, %c0_28] : memref<1x2x2x82x128xf32, #tpu.memory_space<vmem>>, vector<1x1x1x72x128xf32>
    %23 = vector.shape_cast %22 : vector<1x1x1x72x128xf32> to vector<72x128xf32>
    %24 = arith.truncf %23 : vector<72x128xf32> to vector<72x128xbf16>
    %c3 = arith.constant 3 : index
    %c0_29 = arith.constant 0 : index
    %c0_30 = arith.constant 0 : index
    %25 = vector.load %arg2[%c3, %c0_29, %c0_30] : memref<16x128x128xbf16, #tpu.memory_space<vmem>>, vector<1x128x128xbf16>
    %26 = vector.shape_cast %25 : vector<1x128x128xbf16> to vector<128x128xbf16>
    %cst_31 = arith.constant dense<0.000000e+00> : vector<72x128xf32>
    %27 = tpu.matmul %24, %26, %cst_31 {dimension_numbers = #tpu.dot_dimension_numbers<[1], [0], [0], [1], [0, 0, 1, 1], [], []>} : vector<72x128xbf16>, vector<128x128xbf16>, vector<72x128xf32> -> vector<72x128xf32>
    %28 = arith.addf %21, %27 : vector<72x128xf32>
    %c0_32 = arith.constant 0 : index
    %c1_33 = arith.constant 1 : index
    %c0_34 = arith.constant 0 : index
    %c0_35 = arith.constant 0 : index
    %c0_36 = arith.constant 0 : index
    %29 = vector.load %arg1[%c0_32, %c1_33, %c0_34, %c0_35, %c0_36] : memref<1x2x2x82x128xf32, #tpu.memory_space<vmem>>, vector<1x1x1x72x128xf32>
    %30 = vector.shape_cast %29 : vector<1x1x1x72x128xf32> to vector<72x128xf32>
    %31 = arith.truncf %30 : vector<72x128xf32> to vector<72x128xbf16>
    %c4 = arith.constant 4 : index
    %c0_37 = arith.constant 0 : index
    %c0_38 = arith.constant 0 : index
    %32 = vector.load %arg2[%c4, %c0_37, %c0_38] : memref<16x128x128xbf16, #tpu.memory_space<vmem>>, vector<1x128x128xbf16>
    %33 = vector.shape_cast %32 : vector<1x128x128xbf16> to vector<128x128xbf16>
    %cst_39 = arith.constant dense<0.000000e+00> : vector<72x128xf32>
    %34 = tpu.matmul %31, %33, %cst_39 {dimension_numbers = #tpu.dot_dimension_numbers<[1], [0], [0], [1], [0, 0, 1, 1], [], []>} : vector<72x128xbf16>, vector<128x128xbf16>, vector<72x128xf32> -> vector<72x128xf32>
    %35 = arith.addf %28, %34 : vector<72x128xf32>
    %c0_40 = arith.constant 0 : index
    %c1_41 = arith.constant 1 : index
    %c1_42 = arith.constant 1 : index
    %c0_43 = arith.constant 0 : index
    %c0_44 = arith.constant 0 : index
    %36 = vector.load %arg1[%c0_40, %c1_41, %c1_42, %c0_43, %c0_44] : memref<1x2x2x82x128xf32, #tpu.memory_space<vmem>>, vector<1x1x1x72x128xf32>
    %37 = vector.shape_cast %36 : vector<1x1x1x72x128xf32> to vector<72x128xf32>
    %38 = arith.truncf %37 : vector<72x128xf32> to vector<72x128xbf16>
    %c5 = arith.constant 5 : index
    %c0_45 = arith.constant 0 : index
    %c0_46 = arith.constant 0 : index
    %39 = vector.load %arg2[%c5, %c0_45, %c0_46] : memref<16x128x128xbf16, #tpu.memory_space<vmem>>, vector<1x128x128xbf16>
    %40 = vector.shape_cast %39 : vector<1x128x128xbf16> to vector<128x128xbf16>
    %cst_47 = arith.constant dense<0.000000e+00> : vector<72x128xf32>
    %41 = tpu.matmul %38, %40, %cst_47 {dimension_numbers = #tpu.dot_dimension_numbers<[1], [0], [0], [1], [0, 0, 1, 1], [], []>} : vector<72x128xbf16>, vector<128x128xbf16>, vector<72x128xf32> -> vector<72x128xf32>
    %42 = arith.addf %35, %41 : vector<72x128xf32>
    %c0_48 = arith.constant 0 : index
    %c1_49 = arith.constant 1 : index
    %c0_50 = arith.constant 0 : index
    %c1_51 = arith.constant 1 : index
    %c0_52 = arith.constant 0 : index
    %43 = vector.load %arg1[%c0_48, %c1_49, %c0_50, %c1_51, %c0_52] : memref<1x2x2x82x128xf32, #tpu.memory_space<vmem>>, vector<1x1x1x72x128xf32>
    %44 = vector.shape_cast %43 : vector<1x1x1x72x128xf32> to vector<72x128xf32>
    %45 = arith.truncf %44 : vector<72x128xf32> to vector<72x128xbf16>
    %c6 = arith.constant 6 : index
    %c0_53 = arith.constant 0 : index
    %c0_54 = arith.constant 0 : index
    %46 = vector.load %arg2[%c6, %c0_53, %c0_54] : memref<16x128x128xbf16, #tpu.memory_space<vmem>>, vector<1x128x128xbf16>
    %47 = vector.shape_cast %46 : vector<1x128x128xbf16> to vector<128x128xbf16>
    %cst_55 = arith.constant dense<0.000000e+00> : vector<72x128xf32>
    %48 = tpu.matmul %45, %47, %cst_55 {dimension_numbers = #tpu.dot_dimension_numbers<[1], [0], [0], [1], [0, 0, 1, 1], [], []>} : vector<72x128xbf16>, vector<128x128xbf16>, vector<72x128xf32> -> vector<72x128xf32>
    %49 = arith.addf %42, %48 : vector<72x128xf32>
    %c0_56 = arith.constant 0 : index
    %c1_57 = arith.constant 1 : index
    %c1_58 = arith.constant 1 : index
    %c1_59 = arith.constant 1 : index
    %c0_60 = arith.constant 0 : index
    %50 = vector.load %arg1[%c0_56, %c1_57, %c1_58, %c1_59, %c0_60] : memref<1x2x2x82x128xf32, #tpu.memory_space<vmem>>, vector<1x1x1x72x128xf32>
    %51 = vector.shape_cast %50 : vector<1x1x1x72x128xf32> to vector<72x128xf32>
    %52 = arith.truncf %51 : vector<72x128xf32> to vector<72x128xbf16>
    %c7 = arith.constant 7 : index
    %c0_61 = arith.constant 0 : index
    %c0_62 = arith.constant 0 : index
    %53 = vector.load %arg2[%c7, %c0_61, %c0_62] : memref<16x128x128xbf16, #tpu.memory_space<vmem>>, vector<1x128x128xbf16>
    %54 = vector.shape_cast %53 : vector<1x128x128xbf16> to vector<128x128xbf16>
    %cst_63 = arith.constant dense<0.000000e+00> : vector<72x128xf32>
    %55 = tpu.matmul %52, %54, %cst_63 {dimension_numbers = #tpu.dot_dimension_numbers<[1], [0], [0], [1], [0, 0, 1, 1], [], []>} : vector<72x128xbf16>, vector<128x128xbf16>, vector<72x128xf32> -> vector<72x128xf32>
    %56 = arith.addf %49, %55 : vector<72x128xf32>
    %c0_64 = arith.constant 0 : index
    %c0_65 = arith.constant 0 : index
    %c0_66 = arith.constant 0 : index
    %c9 = arith.constant 9 : index
    %c0_67 = arith.constant 0 : index
    %57 = vector.load %arg1[%c0_64, %c0_65, %c0_66, %c9, %c0_67] : memref<1x2x2x82x128xf32, #tpu.memory_space<vmem>>, vector<1x1x1x72x128xf32>
    %58 = vector.shape_cast %57 : vector<1x1x1x72x128xf32> to vector<72x128xf32>
    %59 = arith.truncf %58 : vector<72x128xf32> to vector<72x128xbf16>
    %c8 = arith.constant 8 : index
    %c0_68 = arith.constant 0 : index
    %c0_69 = arith.constant 0 : index
    %60 = vector.load %arg2[%c8, %c0_68, %c0_69] : memref<16x128x128xbf16, #tpu.memory_space<vmem>>, vector<1x128x128xbf16>
    %61 = vector.shape_cast %60 : vector<1x128x128xbf16> to vector<128x128xbf16>
    %cst_70 = arith.constant dense<0.000000e+00> : vector<72x128xf32>
    %62 = tpu.matmul %59, %61, %cst_70 {dimension_numbers = #tpu.dot_dimension_numbers<[1], [0], [0], [1], [0, 0, 1, 1], [], []>} : vector<72x128xbf16>, vector<128x128xbf16>, vector<72x128xf32> -> vector<72x128xf32>
    %63 = arith.addf %56, %62 : vector<72x128xf32>
    %c0_71 = arith.constant 0 : index
    %c0_72 = arith.constant 0 : index
    %c1_73 = arith.constant 1 : index
    %c9_74 = arith.constant 9 : index
    %c0_75 = arith.constant 0 : index
    %64 = vector.load %arg1[%c0_71, %c0_72, %c1_73, %c9_74, %c0_75] : memref<1x2x2x82x128xf32, #tpu.memory_space<vmem>>, vector<1x1x1x72x128xf32>
    %65 = vector.shape_cast %64 : vector<1x1x1x72x128xf32> to vector<72x128xf32>
    %66 = arith.truncf %65 : vector<72x128xf32> to vector<72x128xbf16>
    %c9_76 = arith.constant 9 : index
    %c0_77 = arith.constant 0 : index
    %c0_78 = arith.constant 0 : index
    %67 = vector.load %arg2[%c9_76, %c0_77, %c0_78] : memref<16x128x128xbf16, #tpu.memory_space<vmem>>, vector<1x128x128xbf16>
    %68 = vector.shape_cast %67 : vector<1x128x128xbf16> to vector<128x128xbf16>
    %cst_79 = arith.constant dense<0.000000e+00> : vector<72x128xf32>
    %69 = tpu.matmul %66, %68, %cst_79 {dimension_numbers = #tpu.dot_dimension_numbers<[1], [0], [0], [1], [0, 0, 1, 1], [], []>} : vector<72x128xbf16>, vector<128x128xbf16>, vector<72x128xf32> -> vector<72x128xf32>
    %70 = arith.addf %63, %69 : vector<72x128xf32>
    %c0_80 = arith.constant 0 : index
    %c0_81 = arith.constant 0 : index
    %c0_82 = arith.constant 0 : index
    %c10 = arith.constant 10 : index
    %c0_83 = arith.constant 0 : index
    %71 = vector.load %arg1[%c0_80, %c0_81, %c0_82, %c10, %c0_83] : memref<1x2x2x82x128xf32, #tpu.memory_space<vmem>>, vector<1x1x1x72x128xf32>
    %72 = vector.shape_cast %71 : vector<1x1x1x72x128xf32> to vector<72x128xf32>
    %73 = arith.truncf %72 : vector<72x128xf32> to vector<72x128xbf16>
    %c10_84 = arith.constant 10 : index
    %c0_85 = arith.constant 0 : index
    %c0_86 = arith.constant 0 : index
    %74 = vector.load %arg2[%c10_84, %c0_85, %c0_86] : memref<16x128x128xbf16, #tpu.memory_space<vmem>>, vector<1x128x128xbf16>
    %75 = vector.shape_cast %74 : vector<1x128x128xbf16> to vector<128x128xbf16>
    %cst_87 = arith.constant dense<0.000000e+00> : vector<72x128xf32>
    %76 = tpu.matmul %73, %75, %cst_87 {dimension_numbers = #tpu.dot_dimension_numbers<[1], [0], [0], [1], [0, 0, 1, 1], [], []>} : vector<72x128xbf16>, vector<128x128xbf16>, vector<72x128xf32> -> vector<72x128xf32>
    %77 = arith.addf %70, %76 : vector<72x128xf32>
    %c0_88 = arith.constant 0 : index
    %c0_89 = arith.constant 0 : index
    %c1_90 = arith.constant 1 : index
    %c10_91 = arith.constant 10 : index
    %c0_92 = arith.constant 0 : index
    %78 = vector.load %arg1[%c0_88, %c0_89, %c1_90, %c10_91, %c0_92] : memref<1x2x2x82x128xf32, #tpu.memory_space<vmem>>, vector<1x1x1x72x128xf32>
    %79 = vector.shape_cast %78 : vector<1x1x1x72x128xf32> to vector<72x128xf32>
    %80 = arith.truncf %79 : vector<72x128xf32> to vector<72x128xbf16>
    %c11 = arith.constant 11 : index
    %c0_93 = arith.constant 0 : index
    %c0_94 = arith.constant 0 : index
    %81 = vector.load %arg2[%c11, %c0_93, %c0_94] : memref<16x128x128xbf16, #tpu.memory_space<vmem>>, vector<1x128x128xbf16>
    %82 = vector.shape_cast %81 : vector<1x128x128xbf16> to vector<128x128xbf16>
    %cst_95 = arith.constant dense<0.000000e+00> : vector<72x128xf32>
    %83 = tpu.matmul %80, %82, %cst_95 {dimension_numbers = #tpu.dot_dimension_numbers<[1], [0], [0], [1], [0, 0, 1, 1], [], []>} : vector<72x128xbf16>, vector<128x128xbf16>, vector<72x128xf32> -> vector<72x128xf32>
    %84 = arith.addf %77, %83 : vector<72x128xf32>
    %c0_96 = arith.constant 0 : index
    %c1_97 = arith.constant 1 : index
    %c0_98 = arith.constant 0 : index
    %c9_99 = arith.constant 9 : index
    %c0_100 = arith.constant 0 : index
    %85 = vector.load %arg1[%c0_96, %c1_97, %c0_98, %c9_99, %c0_100] : memref<1x2x2x82x128xf32, #tpu.memory_space<vmem>>, vector<1x1x1x72x128xf32>
    %86 = vector.shape_cast %85 : vector<1x1x1x72x128xf32> to vector<72x128xf32>
    %87 = arith.truncf %86 : vector<72x128xf32> to vector<72x128xbf16>
    %c12 = arith.constant 12 : index
    %c0_101 = arith.constant 0 : index
    %c0_102 = arith.constant 0 : index
    %88 = vector.load %arg2[%c12, %c0_101, %c0_102] : memref<16x128x128xbf16, #tpu.memory_space<vmem>>, vector<1x128x128xbf16>
    %89 = vector.shape_cast %88 : vector<1x128x128xbf16> to vector<128x128xbf16>
    %cst_103 = arith.constant dense<0.000000e+00> : vector<72x128xf32>
    %90 = tpu.matmul %87, %89, %cst_103 {dimension_numbers = #tpu.dot_dimension_numbers<[1], [0], [0], [1], [0, 0, 1, 1], [], []>} : vector<72x128xbf16>, vector<128x128xbf16>, vector<72x128xf32> -> vector<72x128xf32>
    %91 = arith.addf %84, %90 : vector<72x128xf32>
    %c0_104 = arith.constant 0 : index
    %c1_105 = arith.constant 1 : index
    %c1_106 = arith.constant 1 : index
    %c9_107 = arith.constant 9 : index
    %c0_108 = arith.constant 0 : index
    %92 = vector.load %arg1[%c0_104, %c1_105, %c1_106, %c9_107, %c0_108] : memref<1x2x2x82x128xf32, #tpu.memory_space<vmem>>, vector<1x1x1x72x128xf32>
    %93 = vector.shape_cast %92 : vector<1x1x1x72x128xf32> to vector<72x128xf32>
    %94 = arith.truncf %93 : vector<72x128xf32> to vector<72x128xbf16>
    %c13 = arith.constant 13 : index
    %c0_109 = arith.constant 0 : index
    %c0_110 = arith.constant 0 : index
    %95 = vector.load %arg2[%c13, %c0_109, %c0_110] : memref<16x128x128xbf16, #tpu.memory_space<vmem>>, vector<1x128x128xbf16>
    %96 = vector.shape_cast %95 : vector<1x128x128xbf16> to vector<128x128xbf16>
    %cst_111 = arith.constant dense<0.000000e+00> : vector<72x128xf32>
    %97 = tpu.matmul %94, %96, %cst_111 {dimension_numbers = #tpu.dot_dimension_numbers<[1], [0], [0], [1], [0, 0, 1, 1], [], []>} : vector<72x128xbf16>, vector<128x128xbf16>, vector<72x128xf32> -> vector<72x128xf32>
    %98 = arith.addf %91, %97 : vector<72x128xf32>
    %c0_112 = arith.constant 0 : index
    %c1_113 = arith.constant 1 : index
    %c0_114 = arith.constant 0 : index
    %c10_115 = arith.constant 10 : index
    %c0_116 = arith.constant 0 : index
    %99 = vector.load %arg1[%c0_112, %c1_113, %c0_114, %c10_115, %c0_116] : memref<1x2x2x82x128xf32, #tpu.memory_space<vmem>>, vector<1x1x1x72x128xf32>
    %100 = vector.shape_cast %99 : vector<1x1x1x72x128xf32> to vector<72x128xf32>
    %101 = arith.truncf %100 : vector<72x128xf32> to vector<72x128xbf16>
    %c14 = arith.constant 14 : index
    %c0_117 = arith.constant 0 : index
    %c0_118 = arith.constant 0 : index
    %102 = vector.load %arg2[%c14, %c0_117, %c0_118] : memref<16x128x128xbf16, #tpu.memory_space<vmem>>, vector<1x128x128xbf16>
    %103 = vector.shape_cast %102 : vector<1x128x128xbf16> to vector<128x128xbf16>
    %cst_119 = arith.constant dense<0.000000e+00> : vector<72x128xf32>
    %104 = tpu.matmul %101, %103, %cst_119 {dimension_numbers = #tpu.dot_dimension_numbers<[1], [0], [0], [1], [0, 0, 1, 1], [], []>} : vector<72x128xbf16>, vector<128x128xbf16>, vector<72x128xf32> -> vector<72x128xf32>
    %105 = arith.addf %98, %104 : vector<72x128xf32>
    %c0_120 = arith.constant 0 : index
    %c1_121 = arith.constant 1 : index
    %c1_122 = arith.constant 1 : index
    %c10_123 = arith.constant 10 : index
    %c0_124 = arith.constant 0 : index
    %106 = vector.load %arg1[%c0_120, %c1_121, %c1_122, %c10_123, %c0_124] : memref<1x2x2x82x128xf32, #tpu.memory_space<vmem>>, vector<1x1x1x72x128xf32>
    %107 = vector.shape_cast %106 : vector<1x1x1x72x128xf32> to vector<72x128xf32>
    %108 = arith.truncf %107 : vector<72x128xf32> to vector<72x128xbf16>
    %c15 = arith.constant 15 : index
    %c0_125 = arith.constant 0 : index
    %c0_126 = arith.constant 0 : index
    %109 = vector.load %arg2[%c15, %c0_125, %c0_126] : memref<16x128x128xbf16, #tpu.memory_space<vmem>>, vector<1x128x128xbf16>
    %110 = vector.shape_cast %109 : vector<1x128x128xbf16> to vector<128x128xbf16>
    %cst_127 = arith.constant dense<0.000000e+00> : vector<72x128xf32>
    %111 = tpu.matmul %108, %110, %cst_127 {dimension_numbers = #tpu.dot_dimension_numbers<[1], [0], [0], [1], [0, 0, 1, 1], [], []>} : vector<72x128xbf16>, vector<128x128xbf16>, vector<72x128xf32> -> vector<72x128xf32>
    %112 = arith.addf %105, %111 : vector<72x128xf32>
    %c0_128 = arith.constant 0 : index
    %c0_129 = arith.constant 0 : index
    %113 = vector.load %arg3[%c0_128, %c0_129] : memref<72x1xf32, #tpu.memory_space<vmem>>, vector<72x1xf32>
    %114 = vector.broadcast %113 : vector<72x1xf32> to vector<72x128xf32>
    %115 = arith.mulf %112, %114 : vector<72x128xf32>
    %cst_130 = arith.constant dense<0.000000e+00> : vector<128xf32>
    %116 = vector.multi_reduction <add>, %115, %cst_130 [0] : vector<72x128xf32> to vector<128xf32>
    %117 = vector.shape_cast %116 : vector<128xf32> to vector<1x128xf32>
    %cst_131 = arith.constant 1.562500e-02 : f32
    %118 = vector.broadcast %cst_131 : f32 to vector<1x128xf32>
    %119 = arith.mulf %117, %118 : vector<1x128xf32>
    %120 = vector.broadcast %119 : vector<1x128xf32> to vector<72x128xf32>
    %121 = arith.subf %112, %120 : vector<72x128xf32>
    %122 = arith.mulf %121, %121 : vector<72x128xf32>
    %123 = vector.broadcast %113 : vector<72x1xf32> to vector<72x128xf32>
    %124 = arith.mulf %122, %123 : vector<72x128xf32>
    %cst_132 = arith.constant dense<0.000000e+00> : vector<128xf32>
    %125 = vector.multi_reduction <add>, %124, %cst_132 [0] : vector<72x128xf32> to vector<128xf32>
    %126 = vector.shape_cast %125 : vector<128xf32> to vector<1x128xf32>
    %cst_133 = arith.constant 1.562500e-02 : f32
    %127 = vector.broadcast %cst_133 : f32 to vector<1x128xf32>
    %128 = arith.mulf %126, %127 : vector<1x128xf32>
    %cst_134 = arith.constant 9.99999974E-6 : f32
    %129 = vector.broadcast %cst_134 : f32 to vector<1x128xf32>
    %130 = arith.addf %128, %129 : vector<1x128xf32>
    %131 = math.rsqrt %130 : vector<1x128xf32>
    %132 = vector.broadcast %131 : vector<1x128xf32> to vector<72x128xf32>
    %133 = arith.mulf %121, %132 : vector<72x128xf32>
    %cst_135 = arith.constant 0.000000e+00 : f32
    %134 = vector.broadcast %cst_135 : f32 to vector<72x128xf32>
    %135 = arith.cmpf ogt, %133, %134 : vector<72x128xf32>
    %cst_136 = arith.constant 2.000000e-01 : f32
    %136 = vector.broadcast %cst_136 : f32 to vector<72x128xf32>
    %137 = arith.mulf %136, %133 : vector<72x128xf32>
    %138 = arith.select %135, %133, %137 : vector<72x128xi1>, vector<72x128xf32>
    %c0_137 = arith.constant 0 : index
    %c0_138 = arith.constant 0 : index
    %c0_139 = arith.constant 0 : index
    %139 = vector.load %arg4[%c0_137, %c0_138, %c0_139] : memref<1x72x128xf32, #tpu.memory_space<vmem>>, vector<1x72x128xf32>
    %140 = vector.shape_cast %139 : vector<1x72x128xf32> to vector<72x128xf32>
    %141 = vector.shape_cast %138 : vector<72x128xf32> to vector<1x72x128xf32>
    tpu.vector_store %arg4[%c0_137, %c0_138, %c0_139], %141 {strides = array<i32>} : memref<1x72x128xf32, #tpu.memory_space<vmem>>, vector<1x72x128xf32>,
    return
  }
  func.func @transform_0(%arg0: i32) -> (i32, i32, i32, i32, i32) {
    %c0_i32 = arith.constant 0 : i32
    %c0_i32_0 = arith.constant 0 : i32
    %c0_i32_1 = arith.constant 0 : i32
    %c0_i32_2 = arith.constant 0 : i32
    %c0_i32_3 = arith.constant 0 : i32
    return %arg0, %c0_i32, %c0_i32_0, %c0_i32_1, %c0_i32_2 : i32, i32, i32, i32, i32
  }
  func.func @transform_1(%arg0: i32) -> (i32, i32, i32) {
    %c0_i32 = arith.constant 0 : i32
    %c0_i32_0 = arith.constant 0 : i32
    %c0_i32_1 = arith.constant 0 : i32
    %c0_i32_2 = arith.constant 0 : i32
    return %c0_i32, %c0_i32_0, %c0_i32_1 : i32, i32, i32
  }
  func.func @transform_2(%arg0: i32) -> (i32, i32) {
    %c0_i32 = arith.constant 0 : i32
    %c0_i32_0 = arith.constant 0 : i32
    %c0_i32_1 = arith.constant 0 : i32
    return %c0_i32, %c0_i32_0 : i32, i32
  }
  func.func @transform_3(%arg0: i32) -> (i32, i32, i32) {
    %c0_i32 = arith.constant 0 : i32
    %c0_i32_0 = arith.constant 0 : i32
    %c0_i32_1 = arith.constant 0 : i32
    return %arg0, %c0_i32, %c0_i32_0 : i32, i32, i32
  }
}

module attributes {stable_mosaic.version = 11 : i64} {
  func.func @kernel(%arg0: i32, %arg1: memref<1x2x2x26x128xf32, #tpu.memory_space<vmem>>, %arg2: memref<16x128x256xbf16, #tpu.memory_space<vmem>>, %arg3: memref<20x1xf32, #tpu.memory_space<vmem>>, %arg4: memref<1x20x256xf32, #tpu.memory_space<vmem>>) attributes {dimension_semantics = [#tpu.dimension_semantics<parallel>], iteration_bounds = array<i64: 2>, scalar_prefetch = 0 : i64, scratch_operands = 0 : i64, tpu.core_type = #tpu.core_type<tc>, window_params = [{transform_indices = @transform_0, window_bounds = array<i64: 1, 2, 2, 26, 128>}, {pipeline_mode = #tpu.pipeline_mode<synchronous>, transform_indices = @transform_1, window_bounds = array<i64: 16, 128, 256>}, {pipeline_mode = #tpu.pipeline_mode<synchronous>, transform_indices = @transform_2, window_bounds = array<i64: 20, 1>}, {transform_indices = @transform_3, window_bounds = array<i64: 1, 20, 256>}]} {
    %cst = arith.constant 0.000000e+00 : f32
    %0 = vector.broadcast %cst : f32 to vector<20x256xf32>
    %c0 = arith.constant 0 : index
    %c0_0 = arith.constant 0 : index
    %c0_1 = arith.constant 0 : index
    %c0_2 = arith.constant 0 : index
    %c0_3 = arith.constant 0 : index
    %1 = vector.load %arg1[%c0, %c0_0, %c0_1, %c0_2, %c0_3] : memref<1x2x2x26x128xf32, #tpu.memory_space<vmem>>, vector<1x1x1x20x128xf32>
    %2 = vector.shape_cast %1 : vector<1x1x1x20x128xf32> to vector<20x128xf32>
    %3 = arith.truncf %2 : vector<20x128xf32> to vector<20x128xbf16>
    %c0_4 = arith.constant 0 : index
    %c0_5 = arith.constant 0 : index
    %c0_6 = arith.constant 0 : index
    %4 = vector.load %arg2[%c0_4, %c0_5, %c0_6] : memref<16x128x256xbf16, #tpu.memory_space<vmem>>, vector<1x128x256xbf16>
    %5 = vector.shape_cast %4 : vector<1x128x256xbf16> to vector<128x256xbf16>
    %cst_7 = arith.constant dense<0.000000e+00> : vector<20x256xf32>
    %6 = tpu.matmul %3, %5, %cst_7 {dimension_numbers = #tpu.dot_dimension_numbers<[1], [0], [0], [1], [0, 0, 1, 1], [], []>} : vector<20x128xbf16>, vector<128x256xbf16>, vector<20x256xf32> -> vector<20x256xf32>
    %7 = arith.addf %0, %6 : vector<20x256xf32>
    %c0_8 = arith.constant 0 : index
    %c0_9 = arith.constant 0 : index
    %c1 = arith.constant 1 : index
    %c0_10 = arith.constant 0 : index
    %c0_11 = arith.constant 0 : index
    %8 = vector.load %arg1[%c0_8, %c0_9, %c1, %c0_10, %c0_11] : memref<1x2x2x26x128xf32, #tpu.memory_space<vmem>>, vector<1x1x1x20x128xf32>
    %9 = vector.shape_cast %8 : vector<1x1x1x20x128xf32> to vector<20x128xf32>
    %10 = arith.truncf %9 : vector<20x128xf32> to vector<20x128xbf16>
    %c1_12 = arith.constant 1 : index
    %c0_13 = arith.constant 0 : index
    %c0_14 = arith.constant 0 : index
    %11 = vector.load %arg2[%c1_12, %c0_13, %c0_14] : memref<16x128x256xbf16, #tpu.memory_space<vmem>>, vector<1x128x256xbf16>
    %12 = vector.shape_cast %11 : vector<1x128x256xbf16> to vector<128x256xbf16>
    %cst_15 = arith.constant dense<0.000000e+00> : vector<20x256xf32>
    %13 = tpu.matmul %10, %12, %cst_15 {dimension_numbers = #tpu.dot_dimension_numbers<[1], [0], [0], [1], [0, 0, 1, 1], [], []>} : vector<20x128xbf16>, vector<128x256xbf16>, vector<20x256xf32> -> vector<20x256xf32>
    %14 = arith.addf %7, %13 : vector<20x256xf32>
    %c0_16 = arith.constant 0 : index
    %c0_17 = arith.constant 0 : index
    %c0_18 = arith.constant 0 : index
    %c1_19 = arith.constant 1 : index
    %c0_20 = arith.constant 0 : index
    %15 = vector.load %arg1[%c0_16, %c0_17, %c0_18, %c1_19, %c0_20] : memref<1x2x2x26x128xf32, #tpu.memory_space<vmem>>, vector<1x1x1x20x128xf32>
    %16 = vector.shape_cast %15 : vector<1x1x1x20x128xf32> to vector<20x128xf32>
    %17 = arith.truncf %16 : vector<20x128xf32> to vector<20x128xbf16>
    %c2 = arith.constant 2 : index
    %c0_21 = arith.constant 0 : index
    %c0_22 = arith.constant 0 : index
    %18 = vector.load %arg2[%c2, %c0_21, %c0_22] : memref<16x128x256xbf16, #tpu.memory_space<vmem>>, vector<1x128x256xbf16>
    %19 = vector.shape_cast %18 : vector<1x128x256xbf16> to vector<128x256xbf16>
    %cst_23 = arith.constant dense<0.000000e+00> : vector<20x256xf32>
    %20 = tpu.matmul %17, %19, %cst_23 {dimension_numbers = #tpu.dot_dimension_numbers<[1], [0], [0], [1], [0, 0, 1, 1], [], []>} : vector<20x128xbf16>, vector<128x256xbf16>, vector<20x256xf32> -> vector<20x256xf32>
    %21 = arith.addf %14, %20 : vector<20x256xf32>
    %c0_24 = arith.constant 0 : index
    %c0_25 = arith.constant 0 : index
    %c1_26 = arith.constant 1 : index
    %c1_27 = arith.constant 1 : index
    %c0_28 = arith.constant 0 : index
    %22 = vector.load %arg1[%c0_24, %c0_25, %c1_26, %c1_27, %c0_28] : memref<1x2x2x26x128xf32, #tpu.memory_space<vmem>>, vector<1x1x1x20x128xf32>
    %23 = vector.shape_cast %22 : vector<1x1x1x20x128xf32> to vector<20x128xf32>
    %24 = arith.truncf %23 : vector<20x128xf32> to vector<20x128xbf16>
    %c3 = arith.constant 3 : index
    %c0_29 = arith.constant 0 : index
    %c0_30 = arith.constant 0 : index
    %25 = vector.load %arg2[%c3, %c0_29, %c0_30] : memref<16x128x256xbf16, #tpu.memory_space<vmem>>, vector<1x128x256xbf16>
    %26 = vector.shape_cast %25 : vector<1x128x256xbf16> to vector<128x256xbf16>
    %cst_31 = arith.constant dense<0.000000e+00> : vector<20x256xf32>
    %27 = tpu.matmul %24, %26, %cst_31 {dimension_numbers = #tpu.dot_dimension_numbers<[1], [0], [0], [1], [0, 0, 1, 1], [], []>} : vector<20x128xbf16>, vector<128x256xbf16>, vector<20x256xf32> -> vector<20x256xf32>
    %28 = arith.addf %21, %27 : vector<20x256xf32>
    %c0_32 = arith.constant 0 : index
    %c1_33 = arith.constant 1 : index
    %c0_34 = arith.constant 0 : index
    %c0_35 = arith.constant 0 : index
    %c0_36 = arith.constant 0 : index
    %29 = vector.load %arg1[%c0_32, %c1_33, %c0_34, %c0_35, %c0_36] : memref<1x2x2x26x128xf32, #tpu.memory_space<vmem>>, vector<1x1x1x20x128xf32>
    %30 = vector.shape_cast %29 : vector<1x1x1x20x128xf32> to vector<20x128xf32>
    %31 = arith.truncf %30 : vector<20x128xf32> to vector<20x128xbf16>
    %c4 = arith.constant 4 : index
    %c0_37 = arith.constant 0 : index
    %c0_38 = arith.constant 0 : index
    %32 = vector.load %arg2[%c4, %c0_37, %c0_38] : memref<16x128x256xbf16, #tpu.memory_space<vmem>>, vector<1x128x256xbf16>
    %33 = vector.shape_cast %32 : vector<1x128x256xbf16> to vector<128x256xbf16>
    %cst_39 = arith.constant dense<0.000000e+00> : vector<20x256xf32>
    %34 = tpu.matmul %31, %33, %cst_39 {dimension_numbers = #tpu.dot_dimension_numbers<[1], [0], [0], [1], [0, 0, 1, 1], [], []>} : vector<20x128xbf16>, vector<128x256xbf16>, vector<20x256xf32> -> vector<20x256xf32>
    %35 = arith.addf %28, %34 : vector<20x256xf32>
    %c0_40 = arith.constant 0 : index
    %c1_41 = arith.constant 1 : index
    %c1_42 = arith.constant 1 : index
    %c0_43 = arith.constant 0 : index
    %c0_44 = arith.constant 0 : index
    %36 = vector.load %arg1[%c0_40, %c1_41, %c1_42, %c0_43, %c0_44] : memref<1x2x2x26x128xf32, #tpu.memory_space<vmem>>, vector<1x1x1x20x128xf32>
    %37 = vector.shape_cast %36 : vector<1x1x1x20x128xf32> to vector<20x128xf32>
    %38 = arith.truncf %37 : vector<20x128xf32> to vector<20x128xbf16>
    %c5 = arith.constant 5 : index
    %c0_45 = arith.constant 0 : index
    %c0_46 = arith.constant 0 : index
    %39 = vector.load %arg2[%c5, %c0_45, %c0_46] : memref<16x128x256xbf16, #tpu.memory_space<vmem>>, vector<1x128x256xbf16>
    %40 = vector.shape_cast %39 : vector<1x128x256xbf16> to vector<128x256xbf16>
    %cst_47 = arith.constant dense<0.000000e+00> : vector<20x256xf32>
    %41 = tpu.matmul %38, %40, %cst_47 {dimension_numbers = #tpu.dot_dimension_numbers<[1], [0], [0], [1], [0, 0, 1, 1], [], []>} : vector<20x128xbf16>, vector<128x256xbf16>, vector<20x256xf32> -> vector<20x256xf32>
    %42 = arith.addf %35, %41 : vector<20x256xf32>
    %c0_48 = arith.constant 0 : index
    %c1_49 = arith.constant 1 : index
    %c0_50 = arith.constant 0 : index
    %c1_51 = arith.constant 1 : index
    %c0_52 = arith.constant 0 : index
    %43 = vector.load %arg1[%c0_48, %c1_49, %c0_50, %c1_51, %c0_52] : memref<1x2x2x26x128xf32, #tpu.memory_space<vmem>>, vector<1x1x1x20x128xf32>
    %44 = vector.shape_cast %43 : vector<1x1x1x20x128xf32> to vector<20x128xf32>
    %45 = arith.truncf %44 : vector<20x128xf32> to vector<20x128xbf16>
    %c6 = arith.constant 6 : index
    %c0_53 = arith.constant 0 : index
    %c0_54 = arith.constant 0 : index
    %46 = vector.load %arg2[%c6, %c0_53, %c0_54] : memref<16x128x256xbf16, #tpu.memory_space<vmem>>, vector<1x128x256xbf16>
    %47 = vector.shape_cast %46 : vector<1x128x256xbf16> to vector<128x256xbf16>
    %cst_55 = arith.constant dense<0.000000e+00> : vector<20x256xf32>
    %48 = tpu.matmul %45, %47, %cst_55 {dimension_numbers = #tpu.dot_dimension_numbers<[1], [0], [0], [1], [0, 0, 1, 1], [], []>} : vector<20x128xbf16>, vector<128x256xbf16>, vector<20x256xf32> -> vector<20x256xf32>
    %49 = arith.addf %42, %48 : vector<20x256xf32>
    %c0_56 = arith.constant 0 : index
    %c1_57 = arith.constant 1 : index
    %c1_58 = arith.constant 1 : index
    %c1_59 = arith.constant 1 : index
    %c0_60 = arith.constant 0 : index
    %50 = vector.load %arg1[%c0_56, %c1_57, %c1_58, %c1_59, %c0_60] : memref<1x2x2x26x128xf32, #tpu.memory_space<vmem>>, vector<1x1x1x20x128xf32>
    %51 = vector.shape_cast %50 : vector<1x1x1x20x128xf32> to vector<20x128xf32>
    %52 = arith.truncf %51 : vector<20x128xf32> to vector<20x128xbf16>
    %c7 = arith.constant 7 : index
    %c0_61 = arith.constant 0 : index
    %c0_62 = arith.constant 0 : index
    %53 = vector.load %arg2[%c7, %c0_61, %c0_62] : memref<16x128x256xbf16, #tpu.memory_space<vmem>>, vector<1x128x256xbf16>
    %54 = vector.shape_cast %53 : vector<1x128x256xbf16> to vector<128x256xbf16>
    %cst_63 = arith.constant dense<0.000000e+00> : vector<20x256xf32>
    %55 = tpu.matmul %52, %54, %cst_63 {dimension_numbers = #tpu.dot_dimension_numbers<[1], [0], [0], [1], [0, 0, 1, 1], [], []>} : vector<20x128xbf16>, vector<128x256xbf16>, vector<20x256xf32> -> vector<20x256xf32>
    %56 = arith.addf %49, %55 : vector<20x256xf32>
    %c0_64 = arith.constant 0 : index
    %c0_65 = arith.constant 0 : index
    %c0_66 = arith.constant 0 : index
    %c5_67 = arith.constant 5 : index
    %c0_68 = arith.constant 0 : index
    %57 = vector.load %arg1[%c0_64, %c0_65, %c0_66, %c5_67, %c0_68] : memref<1x2x2x26x128xf32, #tpu.memory_space<vmem>>, vector<1x1x1x20x128xf32>
    %58 = vector.shape_cast %57 : vector<1x1x1x20x128xf32> to vector<20x128xf32>
    %59 = arith.truncf %58 : vector<20x128xf32> to vector<20x128xbf16>
    %c8 = arith.constant 8 : index
    %c0_69 = arith.constant 0 : index
    %c0_70 = arith.constant 0 : index
    %60 = vector.load %arg2[%c8, %c0_69, %c0_70] : memref<16x128x256xbf16, #tpu.memory_space<vmem>>, vector<1x128x256xbf16>
    %61 = vector.shape_cast %60 : vector<1x128x256xbf16> to vector<128x256xbf16>
    %cst_71 = arith.constant dense<0.000000e+00> : vector<20x256xf32>
    %62 = tpu.matmul %59, %61, %cst_71 {dimension_numbers = #tpu.dot_dimension_numbers<[1], [0], [0], [1], [0, 0, 1, 1], [], []>} : vector<20x128xbf16>, vector<128x256xbf16>, vector<20x256xf32> -> vector<20x256xf32>
    %63 = arith.addf %56, %62 : vector<20x256xf32>
    %c0_72 = arith.constant 0 : index
    %c0_73 = arith.constant 0 : index
    %c1_74 = arith.constant 1 : index
    %c5_75 = arith.constant 5 : index
    %c0_76 = arith.constant 0 : index
    %64 = vector.load %arg1[%c0_72, %c0_73, %c1_74, %c5_75, %c0_76] : memref<1x2x2x26x128xf32, #tpu.memory_space<vmem>>, vector<1x1x1x20x128xf32>
    %65 = vector.shape_cast %64 : vector<1x1x1x20x128xf32> to vector<20x128xf32>
    %66 = arith.truncf %65 : vector<20x128xf32> to vector<20x128xbf16>
    %c9 = arith.constant 9 : index
    %c0_77 = arith.constant 0 : index
    %c0_78 = arith.constant 0 : index
    %67 = vector.load %arg2[%c9, %c0_77, %c0_78] : memref<16x128x256xbf16, #tpu.memory_space<vmem>>, vector<1x128x256xbf16>
    %68 = vector.shape_cast %67 : vector<1x128x256xbf16> to vector<128x256xbf16>
    %cst_79 = arith.constant dense<0.000000e+00> : vector<20x256xf32>
    %69 = tpu.matmul %66, %68, %cst_79 {dimension_numbers = #tpu.dot_dimension_numbers<[1], [0], [0], [1], [0, 0, 1, 1], [], []>} : vector<20x128xbf16>, vector<128x256xbf16>, vector<20x256xf32> -> vector<20x256xf32>
    %70 = arith.addf %63, %69 : vector<20x256xf32>
    %c0_80 = arith.constant 0 : index
    %c0_81 = arith.constant 0 : index
    %c0_82 = arith.constant 0 : index
    %c6_83 = arith.constant 6 : index
    %c0_84 = arith.constant 0 : index
    %71 = vector.load %arg1[%c0_80, %c0_81, %c0_82, %c6_83, %c0_84] : memref<1x2x2x26x128xf32, #tpu.memory_space<vmem>>, vector<1x1x1x20x128xf32>
    %72 = vector.shape_cast %71 : vector<1x1x1x20x128xf32> to vector<20x128xf32>
    %73 = arith.truncf %72 : vector<20x128xf32> to vector<20x128xbf16>
    %c10 = arith.constant 10 : index
    %c0_85 = arith.constant 0 : index
    %c0_86 = arith.constant 0 : index
    %74 = vector.load %arg2[%c10, %c0_85, %c0_86] : memref<16x128x256xbf16, #tpu.memory_space<vmem>>, vector<1x128x256xbf16>
    %75 = vector.shape_cast %74 : vector<1x128x256xbf16> to vector<128x256xbf16>
    %cst_87 = arith.constant dense<0.000000e+00> : vector<20x256xf32>
    %76 = tpu.matmul %73, %75, %cst_87 {dimension_numbers = #tpu.dot_dimension_numbers<[1], [0], [0], [1], [0, 0, 1, 1], [], []>} : vector<20x128xbf16>, vector<128x256xbf16>, vector<20x256xf32> -> vector<20x256xf32>
    %77 = arith.addf %70, %76 : vector<20x256xf32>
    %c0_88 = arith.constant 0 : index
    %c0_89 = arith.constant 0 : index
    %c1_90 = arith.constant 1 : index
    %c6_91 = arith.constant 6 : index
    %c0_92 = arith.constant 0 : index
    %78 = vector.load %arg1[%c0_88, %c0_89, %c1_90, %c6_91, %c0_92] : memref<1x2x2x26x128xf32, #tpu.memory_space<vmem>>, vector<1x1x1x20x128xf32>
    %79 = vector.shape_cast %78 : vector<1x1x1x20x128xf32> to vector<20x128xf32>
    %80 = arith.truncf %79 : vector<20x128xf32> to vector<20x128xbf16>
    %c11 = arith.constant 11 : index
    %c0_93 = arith.constant 0 : index
    %c0_94 = arith.constant 0 : index
    %81 = vector.load %arg2[%c11, %c0_93, %c0_94] : memref<16x128x256xbf16, #tpu.memory_space<vmem>>, vector<1x128x256xbf16>
    %82 = vector.shape_cast %81 : vector<1x128x256xbf16> to vector<128x256xbf16>
    %cst_95 = arith.constant dense<0.000000e+00> : vector<20x256xf32>
    %83 = tpu.matmul %80, %82, %cst_95 {dimension_numbers = #tpu.dot_dimension_numbers<[1], [0], [0], [1], [0, 0, 1, 1], [], []>} : vector<20x128xbf16>, vector<128x256xbf16>, vector<20x256xf32> -> vector<20x256xf32>
    %84 = arith.addf %77, %83 : vector<20x256xf32>
    %c0_96 = arith.constant 0 : index
    %c1_97 = arith.constant 1 : index
    %c0_98 = arith.constant 0 : index
    %c5_99 = arith.constant 5 : index
    %c0_100 = arith.constant 0 : index
    %85 = vector.load %arg1[%c0_96, %c1_97, %c0_98, %c5_99, %c0_100] : memref<1x2x2x26x128xf32, #tpu.memory_space<vmem>>, vector<1x1x1x20x128xf32>
    %86 = vector.shape_cast %85 : vector<1x1x1x20x128xf32> to vector<20x128xf32>
    %87 = arith.truncf %86 : vector<20x128xf32> to vector<20x128xbf16>
    %c12 = arith.constant 12 : index
    %c0_101 = arith.constant 0 : index
    %c0_102 = arith.constant 0 : index
    %88 = vector.load %arg2[%c12, %c0_101, %c0_102] : memref<16x128x256xbf16, #tpu.memory_space<vmem>>, vector<1x128x256xbf16>
    %89 = vector.shape_cast %88 : vector<1x128x256xbf16> to vector<128x256xbf16>
    %cst_103 = arith.constant dense<0.000000e+00> : vector<20x256xf32>
    %90 = tpu.matmul %87, %89, %cst_103 {dimension_numbers = #tpu.dot_dimension_numbers<[1], [0], [0], [1], [0, 0, 1, 1], [], []>} : vector<20x128xbf16>, vector<128x256xbf16>, vector<20x256xf32> -> vector<20x256xf32>
    %91 = arith.addf %84, %90 : vector<20x256xf32>
    %c0_104 = arith.constant 0 : index
    %c1_105 = arith.constant 1 : index
    %c1_106 = arith.constant 1 : index
    %c5_107 = arith.constant 5 : index
    %c0_108 = arith.constant 0 : index
    %92 = vector.load %arg1[%c0_104, %c1_105, %c1_106, %c5_107, %c0_108] : memref<1x2x2x26x128xf32, #tpu.memory_space<vmem>>, vector<1x1x1x20x128xf32>
    %93 = vector.shape_cast %92 : vector<1x1x1x20x128xf32> to vector<20x128xf32>
    %94 = arith.truncf %93 : vector<20x128xf32> to vector<20x128xbf16>
    %c13 = arith.constant 13 : index
    %c0_109 = arith.constant 0 : index
    %c0_110 = arith.constant 0 : index
    %95 = vector.load %arg2[%c13, %c0_109, %c0_110] : memref<16x128x256xbf16, #tpu.memory_space<vmem>>, vector<1x128x256xbf16>
    %96 = vector.shape_cast %95 : vector<1x128x256xbf16> to vector<128x256xbf16>
    %cst_111 = arith.constant dense<0.000000e+00> : vector<20x256xf32>
    %97 = tpu.matmul %94, %96, %cst_111 {dimension_numbers = #tpu.dot_dimension_numbers<[1], [0], [0], [1], [0, 0, 1, 1], [], []>} : vector<20x128xbf16>, vector<128x256xbf16>, vector<20x256xf32> -> vector<20x256xf32>
    %98 = arith.addf %91, %97 : vector<20x256xf32>
    %c0_112 = arith.constant 0 : index
    %c1_113 = arith.constant 1 : index
    %c0_114 = arith.constant 0 : index
    %c6_115 = arith.constant 6 : index
    %c0_116 = arith.constant 0 : index
    %99 = vector.load %arg1[%c0_112, %c1_113, %c0_114, %c6_115, %c0_116] : memref<1x2x2x26x128xf32, #tpu.memory_space<vmem>>, vector<1x1x1x20x128xf32>
    %100 = vector.shape_cast %99 : vector<1x1x1x20x128xf32> to vector<20x128xf32>
    %101 = arith.truncf %100 : vector<20x128xf32> to vector<20x128xbf16>
    %c14 = arith.constant 14 : index
    %c0_117 = arith.constant 0 : index
    %c0_118 = arith.constant 0 : index
    %102 = vector.load %arg2[%c14, %c0_117, %c0_118] : memref<16x128x256xbf16, #tpu.memory_space<vmem>>, vector<1x128x256xbf16>
    %103 = vector.shape_cast %102 : vector<1x128x256xbf16> to vector<128x256xbf16>
    %cst_119 = arith.constant dense<0.000000e+00> : vector<20x256xf32>
    %104 = tpu.matmul %101, %103, %cst_119 {dimension_numbers = #tpu.dot_dimension_numbers<[1], [0], [0], [1], [0, 0, 1, 1], [], []>} : vector<20x128xbf16>, vector<128x256xbf16>, vector<20x256xf32> -> vector<20x256xf32>
    %105 = arith.addf %98, %104 : vector<20x256xf32>
    %c0_120 = arith.constant 0 : index
    %c1_121 = arith.constant 1 : index
    %c1_122 = arith.constant 1 : index
    %c6_123 = arith.constant 6 : index
    %c0_124 = arith.constant 0 : index
    %106 = vector.load %arg1[%c0_120, %c1_121, %c1_122, %c6_123, %c0_124] : memref<1x2x2x26x128xf32, #tpu.memory_space<vmem>>, vector<1x1x1x20x128xf32>
    %107 = vector.shape_cast %106 : vector<1x1x1x20x128xf32> to vector<20x128xf32>
    %108 = arith.truncf %107 : vector<20x128xf32> to vector<20x128xbf16>
    %c15 = arith.constant 15 : index
    %c0_125 = arith.constant 0 : index
    %c0_126 = arith.constant 0 : index
    %109 = vector.load %arg2[%c15, %c0_125, %c0_126] : memref<16x128x256xbf16, #tpu.memory_space<vmem>>, vector<1x128x256xbf16>
    %110 = vector.shape_cast %109 : vector<1x128x256xbf16> to vector<128x256xbf16>
    %cst_127 = arith.constant dense<0.000000e+00> : vector<20x256xf32>
    %111 = tpu.matmul %108, %110, %cst_127 {dimension_numbers = #tpu.dot_dimension_numbers<[1], [0], [0], [1], [0, 0, 1, 1], [], []>} : vector<20x128xbf16>, vector<128x256xbf16>, vector<20x256xf32> -> vector<20x256xf32>
    %112 = arith.addf %105, %111 : vector<20x256xf32>
    %c0_128 = arith.constant 0 : index
    %c0_129 = arith.constant 0 : index
    %113 = vector.load %arg3[%c0_128, %c0_129] : memref<20x1xf32, #tpu.memory_space<vmem>>, vector<20x1xf32>
    %114 = vector.broadcast %113 : vector<20x1xf32> to vector<20x256xf32>
    %115 = arith.mulf %112, %114 : vector<20x256xf32>
    %cst_130 = arith.constant dense<0.000000e+00> : vector<256xf32>
    %116 = vector.multi_reduction <add>, %115, %cst_130 [0] : vector<20x256xf32> to vector<256xf32>
    %117 = vector.shape_cast %116 : vector<256xf32> to vector<1x256xf32>
    %cst_131 = arith.constant 6.250000e-02 : f32
    %118 = vector.broadcast %cst_131 : f32 to vector<1x256xf32>
    %119 = arith.mulf %117, %118 : vector<1x256xf32>
    %120 = vector.broadcast %119 : vector<1x256xf32> to vector<20x256xf32>
    %121 = arith.subf %112, %120 : vector<20x256xf32>
    %122 = arith.mulf %121, %121 : vector<20x256xf32>
    %123 = vector.broadcast %113 : vector<20x1xf32> to vector<20x256xf32>
    %124 = arith.mulf %122, %123 : vector<20x256xf32>
    %cst_132 = arith.constant dense<0.000000e+00> : vector<256xf32>
    %125 = vector.multi_reduction <add>, %124, %cst_132 [0] : vector<20x256xf32> to vector<256xf32>
    %126 = vector.shape_cast %125 : vector<256xf32> to vector<1x256xf32>
    %cst_133 = arith.constant 6.250000e-02 : f32
    %127 = vector.broadcast %cst_133 : f32 to vector<1x256xf32>
    %128 = arith.mulf %126, %127 : vector<1x256xf32>
    %cst_134 = arith.constant 9.99999974E-6 : f32
    %129 = vector.broadcast %cst_134 : f32 to vector<1x256xf32>
    %130 = arith.addf %128, %129 : vector<1x256xf32>
    %131 = math.rsqrt %130 : vector<1x256xf32>
    %132 = vector.broadcast %131 : vector<1x256xf32> to vector<20x256xf32>
    %133 = arith.mulf %121, %132 : vector<20x256xf32>
    %cst_135 = arith.constant 0.000000e+00 : f32
    %134 = vector.broadcast %cst_135 : f32 to vector<20x256xf32>
    %135 = arith.cmpf ogt, %133, %134 : vector<20x256xf32>
    %cst_136 = arith.constant 2.000000e-01 : f32
    %136 = vector.broadcast %cst_136 : f32 to vector<20x256xf32>
    %137 = arith.mulf %136, %133 : vector<20x256xf32>
    %138 = arith.select %135, %133, %137 : vector<20x256xi1>, vector<20x256xf32>
    %c0_137 = arith.constant 0 : index
    %c0_138 = arith.constant 0 : index
    %c0_139 = arith.constant 0 : index
    %139 = vector.load %arg4[%c0_137, %c0_138, %c0_139] : memref<1x20x256xf32, #tpu.memory_space<vmem>>, vector<1x20x256xf32>
    %140 = vector.shape_cast %139 : vector<1x20x256xf32> to vector<20x256xf32>
    %141 = vector.shape_cast %138 : vector<20x256xf32> to vector<1x20x256xf32>
    tpu.vector_store %arg4[%c0_137, %c0_138, %c0_139], %141 {strides = array<i32>} : memref<1x20x256xf32, #tpu.memory_space<vmem>>, vector<1x20x256xf32>,
    return
  }
  func.func @transform_0(%arg0: i32) -> (i32, i32, i32, i32, i32) {
    %c0_i32 = arith.constant 0 : i32
    %c0_i32_0 = arith.constant 0 : i32
    %c0_i32_1 = arith.constant 0 : i32
    %c0_i32_2 = arith.constant 0 : i32
    %c0_i32_3 = arith.constant 0 : i32
    return %arg0, %c0_i32, %c0_i32_0, %c0_i32_1, %c0_i32_2 : i32, i32, i32, i32, i32
  }
  func.func @transform_1(%arg0: i32) -> (i32, i32, i32) {
    %c0_i32 = arith.constant 0 : i32
    %c0_i32_0 = arith.constant 0 : i32
    %c0_i32_1 = arith.constant 0 : i32
    %c0_i32_2 = arith.constant 0 : i32
    return %c0_i32, %c0_i32_0, %c0_i32_1 : i32, i32, i32
  }
  func.func @transform_2(%arg0: i32) -> (i32, i32) {
    %c0_i32 = arith.constant 0 : i32
    %c0_i32_0 = arith.constant 0 : i32
    %c0_i32_1 = arith.constant 0 : i32
    return %c0_i32, %c0_i32_0 : i32, i32
  }
  func.func @transform_3(%arg0: i32) -> (i32, i32, i32) {
    %c0_i32 = arith.constant 0 : i32
    %c0_i32_0 = arith.constant 0 : i32
    %c0_i32_1 = arith.constant 0 : i32
    return %arg0, %c0_i32, %c0_i32_0 : i32, i32, i32
  }
}

module attributes {stable_mosaic.version = 11 : i64} {
  func.func @kernel(%arg0: i32, %arg1: memref<1x1x1x39x256xf32, #tpu.memory_space<vmem>>, %arg2: memref<16x256x128xbf16, #tpu.memory_space<vmem>>, %arg3: memref<1x128xf32, #tpu.memory_space<vmem>>, %arg4: memref<1x18x128xf32, #tpu.memory_space<vmem>>) attributes {dimension_semantics = [#tpu.dimension_semantics<parallel>], iteration_bounds = array<i64: 2>, scalar_prefetch = 0 : i64, scratch_operands = 0 : i64, tpu.core_type = #tpu.core_type<tc>, window_params = [{transform_indices = @transform_0, window_bounds = array<i64: 1, 1, 1, 39, 256>}, {pipeline_mode = #tpu.pipeline_mode<synchronous>, transform_indices = @transform_1, window_bounds = array<i64: 16, 256, 128>}, {pipeline_mode = #tpu.pipeline_mode<synchronous>, transform_indices = @transform_2, window_bounds = array<i64: 1, 128>}, {transform_indices = @transform_3, window_bounds = array<i64: 1, 18, 128>}]} {
    %cst = arith.constant 0.000000e+00 : f32
    %0 = vector.broadcast %cst : f32 to vector<18x128xf32>
    %c0 = arith.constant 0 : index
    %c0_0 = arith.constant 0 : index
    %c0_1 = arith.constant 0 : index
    %c0_2 = arith.constant 0 : index
    %c0_3 = arith.constant 0 : index
    %1 = vector.load %arg1[%c0, %c0_0, %c0_1, %c0_2, %c0_3] : memref<1x1x1x39x256xf32, #tpu.memory_space<vmem>>, vector<1x1x1x18x256xf32>
    %2 = vector.shape_cast %1 : vector<1x1x1x18x256xf32> to vector<18x256xf32>
    %3 = arith.truncf %2 : vector<18x256xf32> to vector<18x256xbf16>
    %c0_4 = arith.constant 0 : index
    %c0_5 = arith.constant 0 : index
    %c0_6 = arith.constant 0 : index
    %4 = vector.load %arg2[%c0_4, %c0_5, %c0_6] : memref<16x256x128xbf16, #tpu.memory_space<vmem>>, vector<1x256x128xbf16>
    %5 = vector.shape_cast %4 : vector<1x256x128xbf16> to vector<256x128xbf16>
    %cst_7 = arith.constant dense<0.000000e+00> : vector<18x128xf32>
    %6 = tpu.matmul %3, %5, %cst_7 {dimension_numbers = #tpu.dot_dimension_numbers<[1], [0], [0], [1], [0, 0, 1, 1], [], []>} : vector<18x256xbf16>, vector<256x128xbf16>, vector<18x128xf32> -> vector<18x128xf32>
    %7 = arith.addf %0, %6 : vector<18x128xf32>
    %c0_8 = arith.constant 0 : index
    %c0_9 = arith.constant 0 : index
    %c0_10 = arith.constant 0 : index
    %c1 = arith.constant 1 : index
    %c0_11 = arith.constant 0 : index
    %8 = vector.load %arg1[%c0_8, %c0_9, %c0_10, %c1, %c0_11] : memref<1x1x1x39x256xf32, #tpu.memory_space<vmem>>, vector<1x1x1x18x256xf32>
    %9 = vector.shape_cast %8 : vector<1x1x1x18x256xf32> to vector<18x256xf32>
    %10 = arith.truncf %9 : vector<18x256xf32> to vector<18x256xbf16>
    %c1_12 = arith.constant 1 : index
    %c0_13 = arith.constant 0 : index
    %c0_14 = arith.constant 0 : index
    %11 = vector.load %arg2[%c1_12, %c0_13, %c0_14] : memref<16x256x128xbf16, #tpu.memory_space<vmem>>, vector<1x256x128xbf16>
    %12 = vector.shape_cast %11 : vector<1x256x128xbf16> to vector<256x128xbf16>
    %cst_15 = arith.constant dense<0.000000e+00> : vector<18x128xf32>
    %13 = tpu.matmul %10, %12, %cst_15 {dimension_numbers = #tpu.dot_dimension_numbers<[1], [0], [0], [1], [0, 0, 1, 1], [], []>} : vector<18x256xbf16>, vector<256x128xbf16>, vector<18x128xf32> -> vector<18x128xf32>
    %14 = arith.addf %7, %13 : vector<18x128xf32>
    %c0_16 = arith.constant 0 : index
    %c0_17 = arith.constant 0 : index
    %c0_18 = arith.constant 0 : index
    %c2 = arith.constant 2 : index
    %c0_19 = arith.constant 0 : index
    %15 = vector.load %arg1[%c0_16, %c0_17, %c0_18, %c2, %c0_19] : memref<1x1x1x39x256xf32, #tpu.memory_space<vmem>>, vector<1x1x1x18x256xf32>
    %16 = vector.shape_cast %15 : vector<1x1x1x18x256xf32> to vector<18x256xf32>
    %17 = arith.truncf %16 : vector<18x256xf32> to vector<18x256xbf16>
    %c2_20 = arith.constant 2 : index
    %c0_21 = arith.constant 0 : index
    %c0_22 = arith.constant 0 : index
    %18 = vector.load %arg2[%c2_20, %c0_21, %c0_22] : memref<16x256x128xbf16, #tpu.memory_space<vmem>>, vector<1x256x128xbf16>
    %19 = vector.shape_cast %18 : vector<1x256x128xbf16> to vector<256x128xbf16>
    %cst_23 = arith.constant dense<0.000000e+00> : vector<18x128xf32>
    %20 = tpu.matmul %17, %19, %cst_23 {dimension_numbers = #tpu.dot_dimension_numbers<[1], [0], [0], [1], [0, 0, 1, 1], [], []>} : vector<18x256xbf16>, vector<256x128xbf16>, vector<18x128xf32> -> vector<18x128xf32>
    %21 = arith.addf %14, %20 : vector<18x128xf32>
    %c0_24 = arith.constant 0 : index
    %c0_25 = arith.constant 0 : index
    %c0_26 = arith.constant 0 : index
    %c3 = arith.constant 3 : index
    %c0_27 = arith.constant 0 : index
    %22 = vector.load %arg1[%c0_24, %c0_25, %c0_26, %c3, %c0_27] : memref<1x1x1x39x256xf32, #tpu.memory_space<vmem>>, vector<1x1x1x18x256xf32>
    %23 = vector.shape_cast %22 : vector<1x1x1x18x256xf32> to vector<18x256xf32>
    %24 = arith.truncf %23 : vector<18x256xf32> to vector<18x256xbf16>
    %c3_28 = arith.constant 3 : index
    %c0_29 = arith.constant 0 : index
    %c0_30 = arith.constant 0 : index
    %25 = vector.load %arg2[%c3_28, %c0_29, %c0_30] : memref<16x256x128xbf16, #tpu.memory_space<vmem>>, vector<1x256x128xbf16>
    %26 = vector.shape_cast %25 : vector<1x256x128xbf16> to vector<256x128xbf16>
    %cst_31 = arith.constant dense<0.000000e+00> : vector<18x128xf32>
    %27 = tpu.matmul %24, %26, %cst_31 {dimension_numbers = #tpu.dot_dimension_numbers<[1], [0], [0], [1], [0, 0, 1, 1], [], []>} : vector<18x256xbf16>, vector<256x128xbf16>, vector<18x128xf32> -> vector<18x128xf32>
    %28 = arith.addf %21, %27 : vector<18x128xf32>
    %c0_32 = arith.constant 0 : index
    %c0_33 = arith.constant 0 : index
    %c0_34 = arith.constant 0 : index
    %c6 = arith.constant 6 : index
    %c0_35 = arith.constant 0 : index
    %29 = vector.load %arg1[%c0_32, %c0_33, %c0_34, %c6, %c0_35] : memref<1x1x1x39x256xf32, #tpu.memory_space<vmem>>, vector<1x1x1x18x256xf32>
    %30 = vector.shape_cast %29 : vector<1x1x1x18x256xf32> to vector<18x256xf32>
    %31 = arith.truncf %30 : vector<18x256xf32> to vector<18x256xbf16>
    %c4 = arith.constant 4 : index
    %c0_36 = arith.constant 0 : index
    %c0_37 = arith.constant 0 : index
    %32 = vector.load %arg2[%c4, %c0_36, %c0_37] : memref<16x256x128xbf16, #tpu.memory_space<vmem>>, vector<1x256x128xbf16>
    %33 = vector.shape_cast %32 : vector<1x256x128xbf16> to vector<256x128xbf16>
    %cst_38 = arith.constant dense<0.000000e+00> : vector<18x128xf32>
    %34 = tpu.matmul %31, %33, %cst_38 {dimension_numbers = #tpu.dot_dimension_numbers<[1], [0], [0], [1], [0, 0, 1, 1], [], []>} : vector<18x256xbf16>, vector<256x128xbf16>, vector<18x128xf32> -> vector<18x128xf32>
    %35 = arith.addf %28, %34 : vector<18x128xf32>
    %c0_39 = arith.constant 0 : index
    %c0_40 = arith.constant 0 : index
    %c0_41 = arith.constant 0 : index
    %c7 = arith.constant 7 : index
    %c0_42 = arith.constant 0 : index
    %36 = vector.load %arg1[%c0_39, %c0_40, %c0_41, %c7, %c0_42] : memref<1x1x1x39x256xf32, #tpu.memory_space<vmem>>, vector<1x1x1x18x256xf32>
    %37 = vector.shape_cast %36 : vector<1x1x1x18x256xf32> to vector<18x256xf32>
    %38 = arith.truncf %37 : vector<18x256xf32> to vector<18x256xbf16>
    %c5 = arith.constant 5 : index
    %c0_43 = arith.constant 0 : index
    %c0_44 = arith.constant 0 : index
    %39 = vector.load %arg2[%c5, %c0_43, %c0_44] : memref<16x256x128xbf16, #tpu.memory_space<vmem>>, vector<1x256x128xbf16>
    %40 = vector.shape_cast %39 : vector<1x256x128xbf16> to vector<256x128xbf16>
    %cst_45 = arith.constant dense<0.000000e+00> : vector<18x128xf32>
    %41 = tpu.matmul %38, %40, %cst_45 {dimension_numbers = #tpu.dot_dimension_numbers<[1], [0], [0], [1], [0, 0, 1, 1], [], []>} : vector<18x256xbf16>, vector<256x128xbf16>, vector<18x128xf32> -> vector<18x128xf32>
    %42 = arith.addf %35, %41 : vector<18x128xf32>
    %c0_46 = arith.constant 0 : index
    %c0_47 = arith.constant 0 : index
    %c0_48 = arith.constant 0 : index
    %c8 = arith.constant 8 : index
    %c0_49 = arith.constant 0 : index
    %43 = vector.load %arg1[%c0_46, %c0_47, %c0_48, %c8, %c0_49] : memref<1x1x1x39x256xf32, #tpu.memory_space<vmem>>, vector<1x1x1x18x256xf32>
    %44 = vector.shape_cast %43 : vector<1x1x1x18x256xf32> to vector<18x256xf32>
    %45 = arith.truncf %44 : vector<18x256xf32> to vector<18x256xbf16>
    %c6_50 = arith.constant 6 : index
    %c0_51 = arith.constant 0 : index
    %c0_52 = arith.constant 0 : index
    %46 = vector.load %arg2[%c6_50, %c0_51, %c0_52] : memref<16x256x128xbf16, #tpu.memory_space<vmem>>, vector<1x256x128xbf16>
    %47 = vector.shape_cast %46 : vector<1x256x128xbf16> to vector<256x128xbf16>
    %cst_53 = arith.constant dense<0.000000e+00> : vector<18x128xf32>
    %48 = tpu.matmul %45, %47, %cst_53 {dimension_numbers = #tpu.dot_dimension_numbers<[1], [0], [0], [1], [0, 0, 1, 1], [], []>} : vector<18x256xbf16>, vector<256x128xbf16>, vector<18x128xf32> -> vector<18x128xf32>
    %49 = arith.addf %42, %48 : vector<18x128xf32>
    %c0_54 = arith.constant 0 : index
    %c0_55 = arith.constant 0 : index
    %c0_56 = arith.constant 0 : index
    %c9 = arith.constant 9 : index
    %c0_57 = arith.constant 0 : index
    %50 = vector.load %arg1[%c0_54, %c0_55, %c0_56, %c9, %c0_57] : memref<1x1x1x39x256xf32, #tpu.memory_space<vmem>>, vector<1x1x1x18x256xf32>
    %51 = vector.shape_cast %50 : vector<1x1x1x18x256xf32> to vector<18x256xf32>
    %52 = arith.truncf %51 : vector<18x256xf32> to vector<18x256xbf16>
    %c7_58 = arith.constant 7 : index
    %c0_59 = arith.constant 0 : index
    %c0_60 = arith.constant 0 : index
    %53 = vector.load %arg2[%c7_58, %c0_59, %c0_60] : memref<16x256x128xbf16, #tpu.memory_space<vmem>>, vector<1x256x128xbf16>
    %54 = vector.shape_cast %53 : vector<1x256x128xbf16> to vector<256x128xbf16>
    %cst_61 = arith.constant dense<0.000000e+00> : vector<18x128xf32>
    %55 = tpu.matmul %52, %54, %cst_61 {dimension_numbers = #tpu.dot_dimension_numbers<[1], [0], [0], [1], [0, 0, 1, 1], [], []>} : vector<18x256xbf16>, vector<256x128xbf16>, vector<18x128xf32> -> vector<18x128xf32>
    %56 = arith.addf %49, %55 : vector<18x128xf32>
    %c0_62 = arith.constant 0 : index
    %c0_63 = arith.constant 0 : index
    %c0_64 = arith.constant 0 : index
    %c12 = arith.constant 12 : index
    %c0_65 = arith.constant 0 : index
    %57 = vector.load %arg1[%c0_62, %c0_63, %c0_64, %c12, %c0_65] : memref<1x1x1x39x256xf32, #tpu.memory_space<vmem>>, vector<1x1x1x18x256xf32>
    %58 = vector.shape_cast %57 : vector<1x1x1x18x256xf32> to vector<18x256xf32>
    %59 = arith.truncf %58 : vector<18x256xf32> to vector<18x256xbf16>
    %c8_66 = arith.constant 8 : index
    %c0_67 = arith.constant 0 : index
    %c0_68 = arith.constant 0 : index
    %60 = vector.load %arg2[%c8_66, %c0_67, %c0_68] : memref<16x256x128xbf16, #tpu.memory_space<vmem>>, vector<1x256x128xbf16>
    %61 = vector.shape_cast %60 : vector<1x256x128xbf16> to vector<256x128xbf16>
    %cst_69 = arith.constant dense<0.000000e+00> : vector<18x128xf32>
    %62 = tpu.matmul %59, %61, %cst_69 {dimension_numbers = #tpu.dot_dimension_numbers<[1], [0], [0], [1], [0, 0, 1, 1], [], []>} : vector<18x256xbf16>, vector<256x128xbf16>, vector<18x128xf32> -> vector<18x128xf32>
    %63 = arith.addf %56, %62 : vector<18x128xf32>
    %c0_70 = arith.constant 0 : index
    %c0_71 = arith.constant 0 : index
    %c0_72 = arith.constant 0 : index
    %c13 = arith.constant 13 : index
    %c0_73 = arith.constant 0 : index
    %64 = vector.load %arg1[%c0_70, %c0_71, %c0_72, %c13, %c0_73] : memref<1x1x1x39x256xf32, #tpu.memory_space<vmem>>, vector<1x1x1x18x256xf32>
    %65 = vector.shape_cast %64 : vector<1x1x1x18x256xf32> to vector<18x256xf32>
    %66 = arith.truncf %65 : vector<18x256xf32> to vector<18x256xbf16>
    %c9_74 = arith.constant 9 : index
    %c0_75 = arith.constant 0 : index
    %c0_76 = arith.constant 0 : index
    %67 = vector.load %arg2[%c9_74, %c0_75, %c0_76] : memref<16x256x128xbf16, #tpu.memory_space<vmem>>, vector<1x256x128xbf16>
    %68 = vector.shape_cast %67 : vector<1x256x128xbf16> to vector<256x128xbf16>
    %cst_77 = arith.constant dense<0.000000e+00> : vector<18x128xf32>
    %69 = tpu.matmul %66, %68, %cst_77 {dimension_numbers = #tpu.dot_dimension_numbers<[1], [0], [0], [1], [0, 0, 1, 1], [], []>} : vector<18x256xbf16>, vector<256x128xbf16>, vector<18x128xf32> -> vector<18x128xf32>
    %70 = arith.addf %63, %69 : vector<18x128xf32>
    %c0_78 = arith.constant 0 : index
    %c0_79 = arith.constant 0 : index
    %c0_80 = arith.constant 0 : index
    %c14 = arith.constant 14 : index
    %c0_81 = arith.constant 0 : index
    %71 = vector.load %arg1[%c0_78, %c0_79, %c0_80, %c14, %c0_81] : memref<1x1x1x39x256xf32, #tpu.memory_space<vmem>>, vector<1x1x1x18x256xf32>
    %72 = vector.shape_cast %71 : vector<1x1x1x18x256xf32> to vector<18x256xf32>
    %73 = arith.truncf %72 : vector<18x256xf32> to vector<18x256xbf16>
    %c10 = arith.constant 10 : index
    %c0_82 = arith.constant 0 : index
    %c0_83 = arith.constant 0 : index
    %74 = vector.load %arg2[%c10, %c0_82, %c0_83] : memref<16x256x128xbf16, #tpu.memory_space<vmem>>, vector<1x256x128xbf16>
    %75 = vector.shape_cast %74 : vector<1x256x128xbf16> to vector<256x128xbf16>
    %cst_84 = arith.constant dense<0.000000e+00> : vector<18x128xf32>
    %76 = tpu.matmul %73, %75, %cst_84 {dimension_numbers = #tpu.dot_dimension_numbers<[1], [0], [0], [1], [0, 0, 1, 1], [], []>} : vector<18x256xbf16>, vector<256x128xbf16>, vector<18x128xf32> -> vector<18x128xf32>
    %77 = arith.addf %70, %76 : vector<18x128xf32>
    %c0_85 = arith.constant 0 : index
    %c0_86 = arith.constant 0 : index
    %c0_87 = arith.constant 0 : index
    %c15 = arith.constant 15 : index
    %c0_88 = arith.constant 0 : index
    %78 = vector.load %arg1[%c0_85, %c0_86, %c0_87, %c15, %c0_88] : memref<1x1x1x39x256xf32, #tpu.memory_space<vmem>>, vector<1x1x1x18x256xf32>
    %79 = vector.shape_cast %78 : vector<1x1x1x18x256xf32> to vector<18x256xf32>
    %80 = arith.truncf %79 : vector<18x256xf32> to vector<18x256xbf16>
    %c11 = arith.constant 11 : index
    %c0_89 = arith.constant 0 : index
    %c0_90 = arith.constant 0 : index
    %81 = vector.load %arg2[%c11, %c0_89, %c0_90] : memref<16x256x128xbf16, #tpu.memory_space<vmem>>, vector<1x256x128xbf16>
    %82 = vector.shape_cast %81 : vector<1x256x128xbf16> to vector<256x128xbf16>
    %cst_91 = arith.constant dense<0.000000e+00> : vector<18x128xf32>
    %83 = tpu.matmul %80, %82, %cst_91 {dimension_numbers = #tpu.dot_dimension_numbers<[1], [0], [0], [1], [0, 0, 1, 1], [], []>} : vector<18x256xbf16>, vector<256x128xbf16>, vector<18x128xf32> -> vector<18x128xf32>
    %84 = arith.addf %77, %83 : vector<18x128xf32>
    %c0_92 = arith.constant 0 : index
    %c0_93 = arith.constant 0 : index
    %c0_94 = arith.constant 0 : index
    %c18 = arith.constant 18 : index
    %c0_95 = arith.constant 0 : index
    %85 = vector.load %arg1[%c0_92, %c0_93, %c0_94, %c18, %c0_95] : memref<1x1x1x39x256xf32, #tpu.memory_space<vmem>>, vector<1x1x1x18x256xf32>
    %86 = vector.shape_cast %85 : vector<1x1x1x18x256xf32> to vector<18x256xf32>
    %87 = arith.truncf %86 : vector<18x256xf32> to vector<18x256xbf16>
    %c12_96 = arith.constant 12 : index
    %c0_97 = arith.constant 0 : index
    %c0_98 = arith.constant 0 : index
    %88 = vector.load %arg2[%c12_96, %c0_97, %c0_98] : memref<16x256x128xbf16, #tpu.memory_space<vmem>>, vector<1x256x128xbf16>
    %89 = vector.shape_cast %88 : vector<1x256x128xbf16> to vector<256x128xbf16>
    %cst_99 = arith.constant dense<0.000000e+00> : vector<18x128xf32>
    %90 = tpu.matmul %87, %89, %cst_99 {dimension_numbers = #tpu.dot_dimension_numbers<[1], [0], [0], [1], [0, 0, 1, 1], [], []>} : vector<18x256xbf16>, vector<256x128xbf16>, vector<18x128xf32> -> vector<18x128xf32>
    %91 = arith.addf %84, %90 : vector<18x128xf32>
    %c0_100 = arith.constant 0 : index
    %c0_101 = arith.constant 0 : index
    %c0_102 = arith.constant 0 : index
    %c19 = arith.constant 19 : index
    %c0_103 = arith.constant 0 : index
    %92 = vector.load %arg1[%c0_100, %c0_101, %c0_102, %c19, %c0_103] : memref<1x1x1x39x256xf32, #tpu.memory_space<vmem>>, vector<1x1x1x18x256xf32>
    %93 = vector.shape_cast %92 : vector<1x1x1x18x256xf32> to vector<18x256xf32>
    %94 = arith.truncf %93 : vector<18x256xf32> to vector<18x256xbf16>
    %c13_104 = arith.constant 13 : index
    %c0_105 = arith.constant 0 : index
    %c0_106 = arith.constant 0 : index
    %95 = vector.load %arg2[%c13_104, %c0_105, %c0_106] : memref<16x256x128xbf16, #tpu.memory_space<vmem>>, vector<1x256x128xbf16>
    %96 = vector.shape_cast %95 : vector<1x256x128xbf16> to vector<256x128xbf16>
    %cst_107 = arith.constant dense<0.000000e+00> : vector<18x128xf32>
    %97 = tpu.matmul %94, %96, %cst_107 {dimension_numbers = #tpu.dot_dimension_numbers<[1], [0], [0], [1], [0, 0, 1, 1], [], []>} : vector<18x256xbf16>, vector<256x128xbf16>, vector<18x128xf32> -> vector<18x128xf32>
    %98 = arith.addf %91, %97 : vector<18x128xf32>
    %c0_108 = arith.constant 0 : index
    %c0_109 = arith.constant 0 : index
    %c0_110 = arith.constant 0 : index
    %c20 = arith.constant 20 : index
    %c0_111 = arith.constant 0 : index
    %99 = vector.load %arg1[%c0_108, %c0_109, %c0_110, %c20, %c0_111] : memref<1x1x1x39x256xf32, #tpu.memory_space<vmem>>, vector<1x1x1x18x256xf32>
    %100 = vector.shape_cast %99 : vector<1x1x1x18x256xf32> to vector<18x256xf32>
    %101 = arith.truncf %100 : vector<18x256xf32> to vector<18x256xbf16>
    %c14_112 = arith.constant 14 : index
    %c0_113 = arith.constant 0 : index
    %c0_114 = arith.constant 0 : index
    %102 = vector.load %arg2[%c14_112, %c0_113, %c0_114] : memref<16x256x128xbf16, #tpu.memory_space<vmem>>, vector<1x256x128xbf16>
    %103 = vector.shape_cast %102 : vector<1x256x128xbf16> to vector<256x128xbf16>
    %cst_115 = arith.constant dense<0.000000e+00> : vector<18x128xf32>
    %104 = tpu.matmul %101, %103, %cst_115 {dimension_numbers = #tpu.dot_dimension_numbers<[1], [0], [0], [1], [0, 0, 1, 1], [], []>} : vector<18x256xbf16>, vector<256x128xbf16>, vector<18x128xf32> -> vector<18x128xf32>
    %105 = arith.addf %98, %104 : vector<18x128xf32>
    %c0_116 = arith.constant 0 : index
    %c0_117 = arith.constant 0 : index
    %c0_118 = arith.constant 0 : index
    %c21 = arith.constant 21 : index
    %c0_119 = arith.constant 0 : index
    %106 = vector.load %arg1[%c0_116, %c0_117, %c0_118, %c21, %c0_119] : memref<1x1x1x39x256xf32, #tpu.memory_space<vmem>>, vector<1x1x1x18x256xf32>
    %107 = vector.shape_cast %106 : vector<1x1x1x18x256xf32> to vector<18x256xf32>
    %108 = arith.truncf %107 : vector<18x256xf32> to vector<18x256xbf16>
    %c15_120 = arith.constant 15 : index
    %c0_121 = arith.constant 0 : index
    %c0_122 = arith.constant 0 : index
    %109 = vector.load %arg2[%c15_120, %c0_121, %c0_122] : memref<16x256x128xbf16, #tpu.memory_space<vmem>>, vector<1x256x128xbf16>
    %110 = vector.shape_cast %109 : vector<1x256x128xbf16> to vector<256x128xbf16>
    %cst_123 = arith.constant dense<0.000000e+00> : vector<18x128xf32>
    %111 = tpu.matmul %108, %110, %cst_123 {dimension_numbers = #tpu.dot_dimension_numbers<[1], [0], [0], [1], [0, 0, 1, 1], [], []>} : vector<18x256xbf16>, vector<256x128xbf16>, vector<18x128xf32> -> vector<18x128xf32>
    %112 = arith.addf %105, %111 : vector<18x128xf32>
    %c0_124 = arith.constant 0 : index
    %c0_125 = arith.constant 0 : index
    %113 = vector.load %arg3[%c0_124, %c0_125] : memref<1x128xf32, #tpu.memory_space<vmem>>, vector<1x128xf32>
    %114 = vector.broadcast %113 : vector<1x128xf32> to vector<18x128xf32>
    %115 = arith.addf %112, %114 : vector<18x128xf32>
    %c0_126 = arith.constant 0 : index
    %c0_127 = arith.constant 0 : index
    %c0_128 = arith.constant 0 : index
    %116 = vector.load %arg4[%c0_126, %c0_127, %c0_128] : memref<1x18x128xf32, #tpu.memory_space<vmem>>, vector<1x18x128xf32>
    %117 = vector.shape_cast %116 : vector<1x18x128xf32> to vector<18x128xf32>
    %118 = vector.shape_cast %115 : vector<18x128xf32> to vector<1x18x128xf32>
    tpu.vector_store %arg4[%c0_126, %c0_127, %c0_128], %118 {strides = array<i32>} : memref<1x18x128xf32, #tpu.memory_space<vmem>>, vector<1x18x128xf32>,
    return
  }
  func.func @transform_0(%arg0: i32) -> (i32, i32, i32, i32, i32) {
    %c0_i32 = arith.constant 0 : i32
    %c0_i32_0 = arith.constant 0 : i32
    %c0_i32_1 = arith.constant 0 : i32
    %c0_i32_2 = arith.constant 0 : i32
    %c0_i32_3 = arith.constant 0 : i32
    return %arg0, %c0_i32, %c0_i32_0, %c0_i32_1, %c0_i32_2 : i32, i32, i32, i32, i32
  }
  func.func @transform_1(%arg0: i32) -> (i32, i32, i32) {
    %c0_i32 = arith.constant 0 : i32
    %c0_i32_0 = arith.constant 0 : i32
    %c0_i32_1 = arith.constant 0 : i32
    %c0_i32_2 = arith.constant 0 : i32
    return %c0_i32, %c0_i32_0, %c0_i32_1 : i32, i32, i32
  }
  func.func @transform_2(%arg0: i32) -> (i32, i32) {
    %c0_i32 = arith.constant 0 : i32
    %c0_i32_0 = arith.constant 0 : i32
    %c0_i32_1 = arith.constant 0 : i32
    return %c0_i32, %c0_i32_0 : i32, i32
  }
  func.func @transform_3(%arg0: i32) -> (i32, i32, i32) {
    %c0_i32 = arith.constant 0 : i32
    %c0_i32_0 = arith.constant 0 : i32
    %c0_i32_1 = arith.constant 0 : i32
    return %arg0, %c0_i32, %c0_i32_0 : i32, i32, i32
  }
}

</mosaic_0001>

<bundles_post_ra>
// kernel: forward.4
= control target key start
LH: loop header
LB: loop body
LE: loop exit
PB: predicated region body
PF: predicated region fallthrough
CT: control target
= control target key end

     0   :  { %s7455_s12 = smov 0   ;;  %s9707_s0 = inlined_call_operand.vmem [shape: f32[2,2,2,290,8], index: 0, kind: input, shape index: {}]   ;;  %s9708_s1 = inlined_call_operand.vmem [shape: bf16[16,8,128], index: 1, kind: input, shape index: {}]   ;;  %s9709_s2 = inlined_call_operand.vmem [shape: f32[1,128], index: 2, kind: input, shape index: {}]   ;;  %s9710_s3 = inlined_call_operand.vmem [shape: f32[2,272,128], index: 3, kind: output, shape index: {}]  }
   0x1 LB: > { %s5300_s13 = sadd.s32 4294967295, %s7431_s12   ;;  %p5304_p0 = scmp.ge.s32.totalorder %s7431_s12, 1  ;;  %s7431_s12 = sphi %s7455_s12, %s13_s12  }
   0x2   : > { %p137_p1 = scmp.lt.s32.totalorder %s7431_s12, 3 }
   0x4   : > { %p138_p2 = pnand %p5304_p0, %p137_p1 }
   0x5   : > { %v5341_v0 = vld [vmem:[%s9708_s1 + $0x4] sm:$0xf] (!%p138_p2)  ;;  %vm330_vm0 = vcmask (!%p138_p2), 1043456   ;;  %v223_v1 = vld [vmem:[%s9708_s1] sm:$0xf] (!%p138_p2)  ;;  %v7433_v2 = vmov (!%p138_p2), 0.0  }
   0x6   : > { %141 = sbr.rel (%p138_p2) target bundleno = 1324 (0x52c), region = 32  ;;  %6293 = vmatprep.subr.bf16.mxu0 (!%p138_p2), %v7433_v2  ;;  %v332_v3 = vsel (!%p138_p2), %vm330_vm0, %v5341_v0, 0  ;;  %6363 = vmatprep.subr.bf16.mxu1 (!%p138_p2), %v7433_v2  ;;  %v555_v4 = vsel (!%p138_p2), %vm330_vm0, %v223_v1, 0  ;;  %p161_p3 = scmp.lt.s32.totalorder (!%p138_p2), %s5300_s13, 1  ;;  %vm7434_vm1 = vmmov (!%p138_p2), 0   ;;  %vm278_vm2 = vcmask (!%p138_p2), 64512  }
   0x7   : > { %6294 = vmatpush3.bf16.msra.mxu0 (!%p138_p2), %v332_v3  ;;  %6364 = vmatpush3.bf16.msra.mxu1 (!%p138_p2), %v555_v4  ;;  %v5376_v5 = vld [vmem:[%s9708_s1 + $0x8] sm:$0xf] (!%p138_p2)  ;;  %v5428_v6 = vld [vmem:[%s9708_s1 + $0xc] sm:$0xf] (!%p138_p2) }
   0x8   : > { %6295 = vmatprep.mubr.msk.bf16.mxu0 (!%p138_p2), %vm7434_vm1, %v7433_v2  ;;  %6365 = vmatprep.mubr.msk.bf16.mxu1 (!%p138_p2), %vm7434_vm1, %v7433_v2  ;;  %v831_v12 = vsel (!%p138_p2), %vm330_vm0, %v5376_v5, 0  ;;  %v1141_v14 = vsel (!%p138_p2), %vm330_vm0, %v5428_v6, 0 }
   0x9   : > { %6433 = vmatprep.subr.bf16.mxu0 (!%p138_p2), %v7433_v2  ;;  %6503 = vmatprep.subr.bf16.mxu1 (!%p138_p2), %v7433_v2 }
   0xd   : > { %s9712_s13 = smov (!%p161_p3, %s5300_s13), 1 }
   0xe   : > { %s7413_s18 = smul.u32 1184, %s9712_s13 }
   0xf   : > { %s7414_s27 = smul.u32 272, %s9712_s13 }
  0x10   : > { %s7488_s23 = scalar_lea.vmem %s9707_s0, %s7413_s18 }
  0x11   : > { %v5307_v7 = vld [vmem:[%s7488_s23 + $0x128] sm:$0xff]  ;;  %v5308_v8 = vld [vmem:[%s7488_s23 + $0x130] sm:$0xff]  ;;  %v172_v9 = vld [vmem:[%s7488_s23] sm:$0xff]  ;;  %s9603_s30 = scalar_lea.vmem %s9710_s3, %s7414_s27 }
  0x12   : > { %v259_v10 = vpack.c.bf16 %v5308_v8, %v5307_v7  ;;  %v173_v11 = vld [vmem:[%s7488_s23 + $0x8] sm:$0xff]  ;;  %v5309_v15 = vld [vmem:[%s7488_s23 + $0x138] sm:$0xff]  ;;  %v5310_v16 = vld [vmem:[%s7488_s23 + $0x140] sm:$0xff] }
  0x13   : > { %v206_v13 = vpack.c.bf16 %v173_v11, %v172_v9  ;;  %v174_v17 = vld [vmem:[%s7488_s23 + $0x10] sm:$0xff]  ;;  %v175_v18 = vld [vmem:[%s7488_s23 + $0x18] sm:$0xff]  ;;  %v260_v19 = vpack.c.bf16 %v5310_v16, %v5309_v15  ;;  %v5311_v21 = vld [vmem:[%s7488_s23 + $0x148] sm:$0xff] }
  0x14   : > { %6296 = vmatmul.mubr.msk.bf16.vlgmr.msra.gmra.mrb[0].mxu0 %vm278_vm2, %v259_v10  ;;  %v207_v20 = vpack.c.bf16 %v175_v18, %v174_v17  ;;  %v5312_v22 = vld [vmem:[%s7488_s23 + $0x150] sm:$0xff]  ;;  %v176_v23 = vld [vmem:[%s7488_s23 + $0x20] sm:$0xff]  ;;  %v177_v24 = vld [vmem:[%s7488_s23 + $0x28] sm:$0xff] }
  0x15   : > { %6366 = vmatmul.mubr.msk.bf16.vlgmr.msra.gmra.mrb[0].mxu1 %vm278_vm2, %v206_v13  ;;  %6434 = vmatpush3.bf16.msra.mxu0 %v831_v12  ;;  %v261_v25 = vpack.c.bf16 %v5312_v22, %v5311_v21  ;;  %v208_v26 = vpack.c.bf16 %v177_v24, %v176_v23  ;;  %v5313_v27 = vld [vmem:[%s7488_s23 + $0x158] sm:$0xff]  ;;  %v5314_v28 = vld [vmem:[%s7488_s23 + $0x160] sm:$0xff]  ;;  %v178_v29 = vld [vmem:[%s7488_s23 + $0x30] sm:$0xff] }
  0x16   : > { %6504 = vmatpush3.bf16.msra.mxu1 %v1141_v14  ;;  %6299 = vmatprep.mubr.msk.bf16.mxu0 %vm7434_vm1, %v7433_v2  ;;  %v179_v30 = vld [vmem:[%s7488_s23 + $0x38] sm:$0xff]  ;;  %v262_v31 = vpack.c.bf16 %v5314_v28, %v5313_v27  ;;  %v5315_v33 = vld [vmem:[%s7488_s23 + $0x168] sm:$0xff]  ;;  %v5316_v34 = vld [vmem:[%s7488_s23 + $0x170] sm:$0xff] }
  0x17   : > { %6369 = vmatprep.mubr.msk.bf16.mxu1 %vm7434_vm1, %v7433_v2  ;;  %6573 = vmatprep.subr.bf16.mxu0 %v7433_v2  ;;  %v209_v32 = vpack.c.bf16 %v179_v30, %v178_v29  ;;  %v180_v35 = vld [vmem:[%s7488_s23 + $0x40] sm:$0xff]  ;;  %v181_v36 = vld [vmem:[%s7488_s23 + $0x48] sm:$0xff]  ;;  %v263_v37 = vpack.c.bf16 %v5316_v34, %v5315_v33  ;;  %v5317_v39 = vld [vmem:[%s7488_s23 + $0x178] sm:$0xff] }
  0x18   : > { %6643 = vmatprep.subr.bf16.mxu1 %v7433_v2  ;;  %v210_v38 = vpack.c.bf16 %v181_v36, %v180_v35  ;;  %v5318_v40 = vld [vmem:[%s7488_s23 + $0x180] sm:$0xff]  ;;  %v182_v41 = vld [vmem:[%s7488_s23 + $0x50] sm:$0xff]  ;;  %v183_v42 = vld [vmem:[%s7488_s23 + $0x58] sm:$0xff] }
  0x19   : > { %v264_v43 = vpack.c.bf16 %v5318_v40, %v5317_v39  ;;  %v211_v44 = vpack.c.bf16 %v183_v42, %v182_v41  ;;  %v5319_v45 = vld [vmem:[%s7488_s23 + $0x188] sm:$0xff]  ;;  %v5320_v46 = vld [vmem:[%s7488_s23 + $0x190] sm:$0xff]  ;;  %v184_v47 = vld [vmem:[%s7488_s23 + $0x60] sm:$0xff] }
  0x1a   : > { %v185_v48 = vld [vmem:[%s7488_s23 + $0x68] sm:$0xff]  ;;  %v265_v49 = vpack.c.bf16 %v5320_v46, %v5319_v45  ;;  %v5321_v51 = vld [vmem:[%s7488_s23 + $0x198] sm:$0xff]  ;;  %v5322_v52 = vld [vmem:[%s7488_s23 + $0x1a0] sm:$0xff] }
  0x1b   : > { %v212_v50 = vpack.c.bf16 %v185_v48, %v184_v47  ;;  %v186_v53 = vld [vmem:[%s7488_s23 + $0x70] sm:$0xff]  ;;  %v187_v54 = vld [vmem:[%s7488_s23 + $0x78] sm:$0xff]  ;;  %v266_v55 = vpack.c.bf16 %v5322_v52, %v5321_v51  ;;  %v5323_v57 = vld [vmem:[%s7488_s23 + $0x1a8] sm:$0xff] }
  0x1c   : > { %6300 = vmatmul.mubr.msk.bf16.gmra.mrb[4].mxu0 %vm278_vm2, %v260_v19  ;;  %v213_v56 = vpack.c.bf16 %v187_v54, %v186_v53  ;;  %v5324_v58 = vld [vmem:[%s7488_s23 + $0x1b0] sm:$0xff]  ;;  %v188_v59 = vld [vmem:[%s7488_s23 + $0x80] sm:$0xff]  ;;  %v189_v60 = vld [vmem:[%s7488_s23 + $0x88] sm:$0xff] }
  0x1d   : > { %6370 = vmatmul.mubr.msk.bf16.gmra.mrb[4].mxu1 %vm278_vm2, %v207_v20  ;;  %6303 = vmatprep.mubr.msk.bf16.mxu0 %vm7434_vm1, %v7433_v2  ;;  %v267_v61 = vpack.c.bf16 %v5324_v58, %v5323_v57  ;;  %v214_v62 = vpack.c.bf16 %v189_v60, %v188_v59  ;;  %v5325_v63 = vld [vmem:[%s7488_s23 + $0x1b8] sm:$0xff]  ;;  %v5326_v0 = vld [vmem:[%s7488_s23 + $0x1c0] sm:$0xff]  ;;  %v190_v1 = vld [vmem:[%s7488_s23 + $0x90] sm:$0xff] }
  0x1e   : > { %6373 = vmatprep.mubr.msk.bf16.mxu1 %vm7434_vm1, %v7433_v2  ;;  %v191_v3 = vld [vmem:[%s7488_s23 + $0x98] sm:$0xff]  ;;  %v268_v4 = vpack.c.bf16 %v5326_v0, %v5325_v63  ;;  %v5327_v6 = vld [vmem:[%s7488_s23 + $0x1c8] sm:$0xff]  ;;  %v5328_v7 = vld [vmem:[%s7488_s23 + $0x1d0] sm:$0xff] }
  0x1f   : > { %v215_v5 = vpack.c.bf16 %v191_v3, %v190_v1  ;;  %v192_v8 = vld [vmem:[%s7488_s23 + $0xa0] sm:$0xff]  ;;  %v193_v9 = vld [vmem:[%s7488_s23 + $0xa8] sm:$0xff]  ;;  %v269_v10 = vpack.c.bf16 %v5328_v7, %v5327_v6  ;;  %v5329_v12 = vld [vmem:[%s7488_s23 + $0x1d8] sm:$0xff] }
  0x20   : > { %v216_v11 = vpack.c.bf16 %v193_v9, %v192_v8  ;;  %v5330_v13 = vld [vmem:[%s7488_s23 + $0x1e0] sm:$0xff]  ;;  %v194_v14 = vld [vmem:[%s7488_s23 + $0xb0] sm:$0xff]  ;;  %v195_v15 = vld [vmem:[%s7488_s23 + $0xb8] sm:$0xff] }
  0x21   : > { %v270_v16 = vpack.c.bf16 %v5330_v13, %v5329_v12  ;;  %v217_v17 = vpack.c.bf16 %v195_v15, %v194_v14  ;;  %v5331_v18 = vld [vmem:[%s7488_s23 + $0x1e8] sm:$0xff]  ;;  %v5332_v19 = vld [vmem:[%s7488_s23 + $0x1f0] sm:$0xff]  ;;  %v196_v20 = vld [vmem:[%s7488_s23 + $0xc0] sm:$0xff] }
  0x22   : > { %v197_v21 = vld [vmem:[%s7488_s23 + $0xc8] sm:$0xff]  ;;  %v271_v22 = vpack.c.bf16 %v5332_v19, %v5331_v18  ;;  %v5333_v24 = vld [vmem:[%s7488_s23 + $0x1f8] sm:$0xff]  ;;  %v5480_v52 = vld [vmem:[%s9708_s1 + $0x10] sm:$0xf] }
  0x23   : > { %v218_v23 = vpack.c.bf16 %v197_v21, %v196_v20  ;;  %v199_v27 = vld [vmem:[%s7488_s23 + $0xd8] sm:$0xff]  ;;  %v5335_v30 = vld [vmem:[%s7488_s23 + $0x208] sm:$0xff]  ;;  %v5532_v54 = vld [vmem:[%s9708_s1 + $0x14] sm:$0xf] }
  0x24   : > { %6304 = vmatmul.mubr.msk.bf16.gmra.mrb[8].mxu0 %vm278_vm2, %v261_v25  ;;  %v5334_v25 = vld [vmem:[%s7488_s23 + $0x200] sm:$0xff]  ;;  %v201_v33 = vld [vmem:[%s7488_s23 + $0xe8] sm:$0xff]  ;;  %v5337_v36 = vld [vmem:[%s7488_s23 + $0x218] sm:$0xff]  ;;  %v1763_v57 = vsel %vm330_vm0, %v5532_v54, 0 }
  0x25   : > { %6374 = vmatmul.mubr.msk.bf16.gmra.mrb[8].mxu1 %vm278_vm2, %v208_v26  ;;  %6307 = vmatprep.mubr.msk.bf16.mxu0 %vm7434_vm1, %v7433_v2  ;;  %v198_v26 = vld [vmem:[%s7488_s23 + $0xd0] sm:$0xff]  ;;  %v272_v28 = vpack.c.bf16 %v5334_v25, %v5333_v24  ;;  %v203_v39 = vld [vmem:[%s7488_s23 + $0xf8] sm:$0xff]  ;;  %v5339_v42 = vld [vmem:[%s7488_s23 + $0x228] sm:$0xff] }
  0x26   : > { %6377 = vmatprep.mubr.msk.bf16.mxu1 %vm7434_vm1, %v7433_v2  ;;  %v219_v29 = vpack.c.bf16 %v199_v27, %v198_v26  ;;  %v205_v45 = vld [vmem:[%s7488_s23 + $0x108] sm:$0xff]  ;;  %v5395_v51 = vld [vmem:[%s7488_s23 + $0x131] sm:$0xff]  ;;  %v729_v59 = vld [vmem:[%s7488_s23 + $0x19] sm:$0xff] }
  0x27   : > { %v726_v48 = vld [vmem:[%s7488_s23 + $0x1] sm:$0xff]  ;;  %v728_v58 = vld [vmem:[%s7488_s23 + $0x11] sm:$0xff]  ;;  %v5396_v60 = vld [vmem:[%s7488_s23 + $0x139] sm:$0xff] }
  0x28   : > { %v730_v0 = vld [vmem:[%s7488_s23 + $0x21] sm:$0xff]  ;;  %v731_v1 = vld [vmem:[%s7488_s23 + $0x29] sm:$0xff]  ;;  %v732_v7 = vld [vmem:[%s7488_s23 + $0x31] sm:$0xff] }
  0x29   : > { %v5398_v3 = vld [vmem:[%s7488_s23 + $0x149] sm:$0xff]  ;;  %v733_v8 = vld [vmem:[%s7488_s23 + $0x39] sm:$0xff]  ;;  %v734_v13 = vld [vmem:[%s7488_s23 + $0x41] sm:$0xff] }
  0x2a   : > { %v5400_v9 = vld [vmem:[%s7488_s23 + $0x159] sm:$0xff]  ;;  %v735_v14 = vld [vmem:[%s7488_s23 + $0x49] sm:$0xff]  ;;  %v736_v19 = vld [vmem:[%s7488_s23 + $0x51] sm:$0xff] }
  0x2b   : > { %v5402_v15 = vld [vmem:[%s7488_s23 + $0x169] sm:$0xff]  ;;  %v737_v20 = vld [vmem:[%s7488_s23 + $0x59] sm:$0xff]  ;;  %v738_v25 = vld [vmem:[%s7488_s23 + $0x61] sm:$0xff] }
  0x2c   : > { %6308 = vmatmul.mubr.msk.bf16.gmra.mrb[12].mxu0 %vm278_vm2, %v262_v31  ;;  %v5336_v31 = vld [vmem:[%s7488_s23 + $0x210] sm:$0xff]  ;;  %v5404_v21 = vld [vmem:[%s7488_s23 + $0x179] sm:$0xff] }
  0x2d   : > { %6378 = vmatmul.mubr.msk.bf16.gmra.mrb[12].mxu1 %vm278_vm2, %v209_v32  ;;  %6311 = vmatprep.mubr.msk.bf16.mxu0 %vm7434_vm1, %v7433_v2  ;;  %v200_v32 = vld [vmem:[%s7488_s23 + $0xe0] sm:$0xff]  ;;  %v273_v34 = vpack.c.bf16 %v5336_v31, %v5335_v30  ;;  %v739_v26 = vld [vmem:[%s7488_s23 + $0x69] sm:$0xff]  ;;  %v740_v31 = vld [vmem:[%s7488_s23 + $0x71] sm:$0xff] }
  0x2e   : > { %6381 = vmatprep.mubr.msk.bf16.mxu1 %vm7434_vm1, %v7433_v2  ;;  %v220_v35 = vpack.c.bf16 %v201_v33, %v200_v32  ;;  %v5406_v27 = vld [vmem:[%s7488_s23 + $0x189] sm:$0xff]  ;;  %v741_v32 = vld [vmem:[%s7488_s23 + $0x79] sm:$0xff] }
  0x2f   : > { %v5408_v33 = vld [vmem:[%s7488_s23 + $0x199] sm:$0xff] }
  0x34   : > { %6312 = vmatmul.mubr.msk.bf16.gmra.mrb[16].mxu0 %vm278_vm2, %v263_v37  ;;  %v5338_v37 = vld [vmem:[%s7488_s23 + $0x220] sm:$0xff] }
  0x35   : > { %6382 = vmatmul.mubr.msk.bf16.gmra.mrb[16].mxu1 %vm278_vm2, %v210_v38  ;;  %6315 = vmatprep.mubr.msk.bf16.mxu0 %vm7434_vm1, %v7433_v2  ;;  %v202_v38 = vld [vmem:[%s7488_s23 + $0xf0] sm:$0xff]  ;;  %v274_v40 = vpack.c.bf16 %v5338_v37, %v5337_v36  ;;  %v742_v37 = vld [vmem:[%s7488_s23 + $0x81] sm:$0xff] }
  0x36   : > { %6385 = vmatprep.mubr.msk.bf16.mxu1 %vm7434_vm1, %v7433_v2  ;;  %v221_v41 = vpack.c.bf16 %v203_v39, %v202_v38  ;;  %v743_v38 = vld [vmem:[%s7488_s23 + $0x89] sm:$0xff] }
  0x37   : > { %v5410_v39 = vld [vmem:[%s7488_s23 + $0x1a9] sm:$0xff] }
  0x3c   : > { %6316 = vmatmul.mubr.msk.bf16.gmra.mrb[20].mxu0 %vm278_vm2, %v264_v43  ;;  %v5340_v43 = vld [vmem:[%s7488_s23 + $0x230] sm:$0xff] }
  0x3d   : > { %6386 = vmatmul.mubr.msk.bf16.gmra.mrb[20].mxu1 %vm278_vm2, %v211_v44  ;;  %6319 = vmatprep.mubr.msk.bf16.mxu0 %vm7434_vm1, %v7433_v2  ;;  %v204_v44 = vld [vmem:[%s7488_s23 + $0x100] sm:$0xff]  ;;  %v275_v46 = vpack.c.bf16 %v5340_v43, %v5339_v42  ;;  %v744_v43 = vld [vmem:[%s7488_s23 + $0x91] sm:$0xff] }
  0x3e   : > { %6389 = vmatprep.mubr.msk.bf16.mxu1 %vm7434_vm1, %v7433_v2  ;;  %v222_v47 = vpack.c.bf16 %v205_v45, %v204_v44  ;;  %v745_v44 = vld [vmem:[%s7488_s23 + $0x99] sm:$0xff] }
  0x3f   : > { %v5412_v45 = vld [vmem:[%s7488_s23 + $0x1b9] sm:$0xff] }
  0x44   : > { %6320 = vmatmul.mubr.msk.bf16.gmra.mrb[24].mxu0 %vm278_vm2, %v265_v49  ;;  %v727_v49 = vld [vmem:[%s7488_s23 + $0x9] sm:$0xff] }
  0x45   : > { %6390 = vmatmul.mubr.msk.bf16.gmra.mrb[24].mxu1 %vm278_vm2, %v212_v50  ;;  %6323 = vmatprep.mubr.msk.bf16.mxu0 %vm7434_vm1, %v7433_v2  ;;  %v5394_v50 = vld [vmem:[%s7488_s23 + $0x129] sm:$0xff]  ;;  %v760_v53 = vpack.c.bf16 %v727_v49, %v726_v48  ;;  %v746_v49 = vld [vmem:[%s7488_s23 + $0xa1] sm:$0xff] }
  0x46   : > { %6393 = vmatprep.mubr.msk.bf16.mxu1 %vm7434_vm1, %v7433_v2 }
  0x4c   : > { %6324 = vmatmul.mubr.msk.bf16.gmra.mrb[28].mxu0 %vm278_vm2, %v266_v55  ;;  %v1070_v55 = vpack.c.bf16 %v5395_v51, %v5394_v50  ;;  %v747_v50 = vld [vmem:[%s7488_s23 + $0xa9] sm:$0xff] }
  0x4d   : > { %6394 = vmatmul.mubr.msk.bf16.gmra.mrb[28].mxu1 %vm278_vm2, %v213_v56  ;;  %6327 = vmatprep.mubr.msk.bf16.mxu0 %vm7434_vm1, %v7433_v2  ;;  %v1452_v56 = vsel %vm330_vm0, %v5480_v52, 0  ;;  %v5414_v51 = vld [vmem:[%s7488_s23 + $0x1c9] sm:$0xff]  ;;  %v5415_v52 = vld [vmem:[%s7488_s23 + $0x1d1] sm:$0xff] }
  0x4e   : > { %6397 = vmatprep.mubr.msk.bf16.mxu1 %vm7434_vm1, %v7433_v2 }
  0x54   : > { %6328 = vmatmul.mubr.msk.bf16.gmra.mrb[32].mxu0 %vm278_vm2, %v267_v61  ;;  %v5397_v61 = vld [vmem:[%s7488_s23 + $0x141] sm:$0xff] }
  0x55   : > { %6398 = vmatmul.mubr.msk.bf16.gmra.mrb[32].mxu1 %vm278_vm2, %v214_v62  ;;  %6331 = vmatprep.mubr.msk.bf16.mxu0 %vm7434_vm1, %v7433_v2  ;;  %v761_v62 = vpack.c.bf16 %v729_v59, %v728_v58  ;;  %v1071_v63 = vpack.c.bf16 %v5397_v61, %v5396_v60  ;;  %v1080_v60 = vpack.c.bf16 %v5415_v52, %v5414_v51  ;;  %v755_v51 = vld [vmem:[%s7488_s23 + $0xe9] sm:$0xff] }
  0x56   : > { %6401 = vmatprep.mubr.msk.bf16.mxu1 %vm7434_vm1, %v7433_v2  ;;  %v5422_v52 = vld [vmem:[%s7488_s23 + $0x209] sm:$0xff] }
  0x5c   : > { %6332 = vmatmul.mubr.msk.bf16.gmra.mrb[36].mxu0 %vm278_vm2, %v268_v4  ;;  %v5399_v4 = vld [vmem:[%s7488_s23 + $0x151] sm:$0xff] }
  0x5d   : > { %6402 = vmatmul.mubr.msk.bf16.gmra.mrb[36].mxu1 %vm278_vm2, %v215_v5  ;;  %6335 = vmatprep.mubr.msk.bf16.mxu0 %vm7434_vm1, %v7433_v2  ;;  %v762_v5 = vpack.c.bf16 %v731_v1, %v730_v0  ;;  %v1072_v6 = vpack.c.bf16 %v5399_v4, %v5398_v3  ;;  %v748_v1 = vld [vmem:[%s7488_s23 + $0xb1] sm:$0xff]  ;;  %v749_v3 = vld [vmem:[%s7488_s23 + $0xb9] sm:$0xff] }
  0x5e   : > { %6405 = vmatprep.mubr.msk.bf16.mxu1 %vm7434_vm1, %v7433_v2  ;;  %v5416_v4 = vld [vmem:[%s7488_s23 + $0x1d9] sm:$0xff] }
  0x64   : > { %6336 = vmatmul.mubr.msk.bf16.gmra.mrb[40].mxu0 %vm278_vm2, %v269_v10  ;;  %v5401_v10 = vld [vmem:[%s7488_s23 + $0x161] sm:$0xff] }
  0x65   : > { %6406 = vmatmul.mubr.msk.bf16.gmra.mrb[40].mxu1 %vm278_vm2, %v216_v11  ;;  %6339 = vmatprep.mubr.msk.bf16.mxu0 %vm7434_vm1, %v7433_v2  ;;  %v763_v11 = vpack.c.bf16 %v733_v8, %v732_v7  ;;  %v1073_v12 = vpack.c.bf16 %v5401_v10, %v5400_v9  ;;  %v771_v9 = vpack.c.bf16 %v749_v3, %v748_v1 }
  0x66   : > { %6409 = vmatprep.mubr.msk.bf16.mxu1 %vm7434_vm1, %v7433_v2 }
  0x6c   : > { %6340 = vmatmul.mubr.msk.bf16.gmra.mrb[44].mxu0 %vm278_vm2, %v270_v16  ;;  %v5403_v16 = vld [vmem:[%s7488_s23 + $0x171] sm:$0xff] }
  0x6d   : > { %6410 = vmatmul.mubr.msk.bf16.gmra.mrb[44].mxu1 %vm278_vm2, %v217_v17  ;;  %6343 = vmatprep.mubr.msk.bf16.mxu0 %vm7434_vm1, %v7433_v2  ;;  %v764_v17 = vpack.c.bf16 %v735_v14, %v734_v13  ;;  %v1074_v18 = vpack.c.bf16 %v5403_v16, %v5402_v15 }
  0x6e   : > { %6413 = vmatprep.mubr.msk.bf16.mxu1 %vm7434_vm1, %v7433_v2 }
  0x74   : > { %6344 = vmatmul.mubr.msk.bf16.gmra.mrb[48].mxu0 %vm278_vm2, %v271_v22  ;;  %v5405_v22 = vld [vmem:[%s7488_s23 + $0x181] sm:$0xff] }
  0x75   : > { %6414 = vmatmul.mubr.msk.bf16.gmra.mrb[48].mxu1 %vm278_vm2, %v218_v23  ;;  %6347 = vmatprep.mubr.msk.bf16.mxu0 %vm7434_vm1, %v7433_v2  ;;  %v765_v23 = vpack.c.bf16 %v737_v20, %v736_v19  ;;  %v1075_v24 = vpack.c.bf16 %v5405_v22, %v5404_v21  ;;  %v751_v19 = vld [vmem:[%s7488_s23 + $0xc9] sm:$0xff]  ;;  %v5419_v21 = vld [vmem:[%s7488_s23 + $0x1f1] sm:$0xff] }
  0x76   : > { %6417 = vmatprep.mubr.msk.bf16.mxu1 %vm7434_vm1, %v7433_v2  ;;  %v5418_v20 = vld [vmem:[%s7488_s23 + $0x1e9] sm:$0xff] }
  0x7c   : > { %6348 = vmatmul.mubr.msk.bf16.gmra.mrb[52].mxu0 %vm278_vm2, %v272_v28  ;;  %v5407_v28 = vld [vmem:[%s7488_s23 + $0x191] sm:$0xff] }
  0x7d   : > { %6418 = vmatmul.mubr.msk.bf16.gmra.mrb[52].mxu1 %vm278_vm2, %v219_v29  ;;  %6351 = vmatprep.mubr.msk.bf16.mxu0 %vm7434_vm1, %v7433_v2  ;;  %v766_v29 = vpack.c.bf16 %v739_v26, %v738_v25  ;;  %v1076_v30 = vpack.c.bf16 %v5407_v28, %v5406_v27 }
  0x7e   : > { %6421 = vmatprep.mubr.msk.bf16.mxu1 %vm7434_vm1, %v7433_v2 }
  0x84   : > { %6352 = vmatmul.mubr.msk.bf16.gmra.mrb[56].mxu0 %vm278_vm2, %v273_v34  ;;  %v5409_v34 = vld [vmem:[%s7488_s23 + $0x1a1] sm:$0xff] }
  0x85   : > { %6422 = vmatmul.mubr.msk.bf16.gmra.mrb[56].mxu1 %vm278_vm2, %v220_v35  ;;  %6355 = vmatprep.mubr.msk.bf16.mxu0 %vm7434_vm1, %v7433_v2  ;;  %v767_v35 = vpack.c.bf16 %v741_v32, %v740_v31  ;;  %v1077_v36 = vpack.c.bf16 %v5409_v34, %v5408_v33  ;;  %v752_v34 = vld [vmem:[%s7488_s23 + $0xd1] sm:$0xff] }
  0x86   : > { %6425 = vmatprep.mubr.msk.bf16.mxu1 %vm7434_vm1, %v7433_v2 }
  0x8c   : > { %6356 = vmatmul.mubr.msk.bf16.gmra.mrb[60].mxu0 %vm278_vm2, %v274_v40  ;;  %v5411_v40 = vld [vmem:[%s7488_s23 + $0x1b1] sm:$0xff] }
  0x8d   : > { %6426 = vmatmul.mubr.msk.bf16.gmra.mrb[60].mxu1 %vm278_vm2, %v221_v41  ;;  %6359 = vmatprep.mubr.msk.bf16.mxu0 %vm7434_vm1, %v7433_v2  ;;  %v768_v41 = vpack.c.bf16 %v743_v38, %v742_v37  ;;  %v1078_v42 = vpack.c.bf16 %v5411_v40, %v5410_v39  ;;  %v5421_v37 = vld [vmem:[%s7488_s23 + $0x201] sm:$0xff] }
  0x8e   : > { %6429 = vmatprep.mubr.msk.bf16.mxu1 %vm7434_vm1, %v7433_v2 }
  0x94   : > { %6360 = vmatmul.mubr.msk.bf16.gmra.mrb[64].mxu0 %vm278_vm2, %v275_v46  ;;  %v5413_v46 = vld [vmem:[%s7488_s23 + $0x1c1] sm:$0xff] }
  0x95   : > { %6430 = vmatmul.mubr.msk.bf16.gmra.mrb[64].mxu1 %vm278_vm2, %v222_v47  ;;  %6435 = vmatprep.mubr.msk.bf16.mxu0 %vm7434_vm1, %v7433_v2  ;;  %v769_v47 = vpack.c.bf16 %v745_v44, %v744_v43  ;;  %v1079_v48 = vpack.c.bf16 %v5413_v46, %v5412_v45 }
  0x96   : > { %6505 = vmatprep.mubr.msk.bf16.mxu1 %vm7434_vm1, %v7433_v2 }
  0x9c   : > { %6436 = vmatmul.mubr.msk.bf16.vlgmr.msra.gmra.mrb[68].mxu0 %vm278_vm2, %v760_v53 }
  0x9d   : > { %6506 = vmatmul.mubr.msk.bf16.vlgmr.msra.gmra.mrb[68].mxu1 %vm278_vm2, %v1070_v55  ;;  %6574 = vmatpush3.bf16.msra.mxu0 %v1452_v56  ;;  %v770_v56 = vpack.c.bf16 %v747_v50, %v746_v49  ;;  %v754_v50 = vld [vmem:[%s7488_s23 + $0xe1] sm:$0xff] }
  0x9e   : > { %6644 = vmatpush3.bf16.msra.mxu1 %v1763_v57  ;;  %6439 = vmatprep.mubr.msk.bf16.mxu0 %vm7434_vm1, %v7433_v2 }
  0x9f   : > { %6509 = vmatprep.mubr.msk.bf16.mxu1 %vm7434_vm1, %v7433_v2  ;;  %6713 = vmatprep.subr.bf16.mxu0 %v7433_v2 }
  0xa0   : > { %6783 = vmatprep.subr.bf16.mxu1 %v7433_v2 }
  0xa4   : > { %6440 = vmatmul.mubr.msk.bf16.gmra.mrb[72].mxu0 %vm278_vm2, %v761_v62 }
  0xa5   : > { %6510 = vmatmul.mubr.msk.bf16.gmra.mrb[72].mxu1 %vm278_vm2, %v1071_v63  ;;  %6443 = vmatprep.mubr.msk.bf16.mxu0 %vm7434_vm1, %v7433_v2 }
  0xa6   : > { %6513 = vmatprep.mubr.msk.bf16.mxu1 %vm7434_vm1, %v7433_v2 }
  0xac   : > { %6444 = vmatmul.mubr.msk.bf16.gmra.mrb[76].mxu0 %vm278_vm2, %v762_v5  ;;  %v5417_v5 = vld [vmem:[%s7488_s23 + $0x1e1] sm:$0xff] }
  0xad   : > { %6514 = vmatmul.mubr.msk.bf16.gmra.mrb[76].mxu1 %vm278_vm2, %v1072_v6  ;;  %6447 = vmatprep.mubr.msk.bf16.mxu0 %vm7434_vm1, %v7433_v2  ;;  %v1081_v13 = vpack.c.bf16 %v5417_v5, %v5416_v4  ;;  %v756_v5 = vld [vmem:[%s7488_s23 + $0xf1] sm:$0xff] }
  0xae   : > { %6517 = vmatprep.mubr.msk.bf16.mxu1 %vm7434_vm1, %v7433_v2 }
  0xb4   : > { %6448 = vmatmul.mubr.msk.bf16.gmra.mrb[80].mxu0 %vm278_vm2, %v763_v11 }
  0xb5   : > { %6518 = vmatmul.mubr.msk.bf16.gmra.mrb[80].mxu1 %vm278_vm2, %v1073_v12  ;;  %6451 = vmatprep.mubr.msk.bf16.mxu0 %vm7434_vm1, %v7433_v2 }
  0xb6   : > { %6521 = vmatprep.mubr.msk.bf16.mxu1 %vm7434_vm1, %v7433_v2 }
  0xbc   : > { %6452 = vmatmul.mubr.msk.bf16.gmra.mrb[84].mxu0 %vm278_vm2, %v764_v17 }
  0xbd   : > { %6522 = vmatmul.mubr.msk.bf16.gmra.mrb[84].mxu1 %vm278_vm2, %v1074_v18  ;;  %6455 = vmatprep.mubr.msk.bf16.mxu0 %vm7434_vm1, %v7433_v2  ;;  %v750_v18 = vld [vmem:[%s7488_s23 + $0xc1] sm:$0xff] }
  0xbe   : > { %6525 = vmatprep.mubr.msk.bf16.mxu1 %vm7434_vm1, %v7433_v2  ;;  %v772_v25 = vpack.c.bf16 %v751_v19, %v750_v18 }
  0xc4   : > { %6456 = vmatmul.mubr.msk.bf16.gmra.mrb[88].mxu0 %vm278_vm2, %v765_v23 }
  0xc5   : > { %6526 = vmatmul.mubr.msk.bf16.gmra.mrb[88].mxu1 %vm278_vm2, %v1075_v24  ;;  %6459 = vmatprep.mubr.msk.bf16.mxu0 %vm7434_vm1, %v7433_v2 }
  0xc6   : > { %6529 = vmatprep.mubr.msk.bf16.mxu1 %vm7434_vm1, %v7433_v2 }
  0xcc   : > { %6460 = vmatmul.mubr.msk.bf16.gmra.mrb[92].mxu0 %vm278_vm2, %v766_v29  ;;  %v1082_v29 = vpack.c.bf16 %v5419_v21, %v5418_v20 }
  0xcd   : > { %6530 = vmatmul.mubr.msk.bf16.gmra.mrb[92].mxu1 %vm278_vm2, %v1076_v30  ;;  %6463 = vmatprep.mubr.msk.bf16.mxu0 %vm7434_vm1, %v7433_v2 }
  0xce   : > { %6533 = vmatprep.mubr.msk.bf16.mxu1 %vm7434_vm1, %v7433_v2 }
  0xd4   : > { %6464 = vmatmul.mubr.msk.bf16.gmra.mrb[96].mxu0 %vm278_vm2, %v767_v35  ;;  %v753_v35 = vld [vmem:[%s7488_s23 + $0xd9] sm:$0xff] }
  0xd5   : > { %6534 = vmatmul.mubr.msk.bf16.gmra.mrb[96].mxu1 %vm278_vm2, %v1077_v36  ;;  %6467 = vmatprep.mubr.msk.bf16.mxu0 %vm7434_vm1, %v7433_v2  ;;  %v5420_v36 = vld [vmem:[%s7488_s23 + $0x1f9] sm:$0xff] }
  0xd6   : > { %6537 = vmatprep.mubr.msk.bf16.mxu1 %vm7434_vm1, %v7433_v2  ;;  %v1083_v45 = vpack.c.bf16 %v5421_v37, %v5420_v36 }
  0xdc   : > { %6468 = vmatmul.mubr.msk.bf16.gmra.mrb[100].mxu0 %vm278_vm2, %v768_v41  ;;  %v773_v41 = vpack.c.bf16 %v753_v35, %v752_v34 }
  0xdd   : > { %6538 = vmatmul.mubr.msk.bf16.gmra.mrb[100].mxu1 %vm278_vm2, %v1078_v42  ;;  %6471 = vmatprep.mubr.msk.bf16.mxu0 %vm7434_vm1, %v7433_v2 }
  0xde   : > { %6541 = vmatprep.mubr.msk.bf16.mxu1 %vm7434_vm1, %v7433_v2 }
  0xe4   : > { %6472 = vmatmul.mubr.msk.bf16.gmra.mrb[104].mxu0 %vm278_vm2, %v769_v47 }
  0xe5   : > { %6542 = vmatmul.mubr.msk.bf16.gmra.mrb[104].mxu1 %vm278_vm2, %v1079_v48  ;;  %6475 = vmatprep.mubr.msk.bf16.mxu0 %vm7434_vm1, %v7433_v2 }
  0xe6   : > { %6545 = vmatprep.mubr.msk.bf16.mxu1 %vm7434_vm1, %v7433_v2 }
  0xe7   : > { %v368_v53 = vpop.f32.mrb[0].mxu0 }
  0xe8   : > { %v591_v54 = vpop.f32.mrb[0].mxu1  ;;  %v6297_v55 = vpop.f32.mrb[1].mxu0 }
  0xe9   : > { %v7781_v57 = vadd.f32 %v591_v54, %v368_v53  ;;  %v6367_v58 = vpop.f32.mrb[1].mxu1  ;;  %v371_v59 = vpop.f32.mrb[2].mxu0  ;;  %v5423_v53 = vld [vmem:[%s7488_s23 + $0x211] sm:$0xff] }
  0xea   : > { %v594_v61 = vpop.f32.mrb[2].mxu1  ;;  %v6298_v62 = vpop.f32.mrb[3].mxu0  ;;  %v774_v58 = vpack.c.bf16 %v755_v51, %v754_v50 }
  0xeb   : > { %v7783_v63 = vadd.f32 %v594_v61, %v371_v59  ;;  %v6368_v0 = vpop.f32.mrb[3].mxu1  ;;  %v1084_v62 = vpack.c.bf16 %v5423_v53, %v5422_v52  ;;  %v5636_v52 = vld [vmem:[%s9708_s1 + $0x1c] sm:$0xf] }
  0xec   : > { %6476 = vmatmul.mubr.msk.bf16.gmra.mrb[108].mxu0 %vm278_vm2, %v770_v56 }
  0xed   : > { %6546 = vmatmul.mubr.msk.bf16.gmra.mrb[108].mxu1 %vm278_vm2, %v1080_v60  ;;  %6479 = vmatprep.mubr.msk.bf16.mxu0 %vm7434_vm1, %v7433_v2 }
  0xee   : > { %6549 = vmatprep.mubr.msk.bf16.mxu1 %vm7434_vm1, %v7433_v2 }
  0xef   : > { %v376_v6 = vpop.f32.mrb[4].mxu0 }
  0xf0   : > { %v599_v7 = vpop.f32.mrb[4].mxu1  ;;  %v6301_v8 = vpop.f32.mrb[5].mxu0 }
  0xf1   : > { %v7795_v10 = vadd.f32 %v599_v7, %v376_v6  ;;  %v6371_v11 = vpop.f32.mrb[5].mxu1  ;;  %v379_v12 = vpop.f32.mrb[6].mxu0  ;;  %v757_v6 = vld [vmem:[%s7488_s23 + $0xf9] sm:$0xff]  ;;  %v5425_v8 = vld [vmem:[%s7488_s23 + $0x221] sm:$0xff] }
  0xf2   : > { %v602_v14 = vpop.f32.mrb[6].mxu1  ;;  %v6302_v15 = vpop.f32.mrb[7].mxu0  ;;  %v5424_v7 = vld [vmem:[%s7488_s23 + $0x219] sm:$0xff] }
  0xf3   : > { %v7797_v16 = vadd.f32 %v602_v14, %v379_v12  ;;  %v6372_v17 = vpop.f32.mrb[7].mxu1  ;;  %v1085_v18 = vpack.c.bf16 %v5425_v8, %v5424_v7  ;;  %v5501_v7 = vld [vmem:[%s7488_s23 + $0x390] sm:$0xff] }
  0xf4   : > { %6480 = vmatmul.mubr.msk.bf16.gmra.mrb[112].mxu0 %vm278_vm2, %v771_v9 }
  0xf5   : > { %6550 = vmatmul.mubr.msk.bf16.gmra.mrb[112].mxu1 %vm278_vm2, %v1081_v13  ;;  %6483 = vmatprep.mubr.msk.bf16.mxu0 %vm7434_vm1, %v7433_v2  ;;  %v775_v13 = vpack.c.bf16 %v757_v6, %v756_v5  ;;  %v5449_v5 = vld [vmem:[%s7488_s23 + $0x268] sm:$0xff] }
  0xf6   : > { %6553 = vmatprep.mubr.msk.bf16.mxu1 %vm7434_vm1, %v7433_v2  ;;  %v5500_v6 = vld [vmem:[%s7488_s23 + $0x388] sm:$0xff] }
  0xf7   : > { %v384_v22 = vpop.f32.mrb[8].mxu0 }
  0xf8   : > { %v607_v23 = vpop.f32.mrb[8].mxu1  ;;  %v6305_v24 = vpop.f32.mrb[9].mxu0 }
  0xf9   : > { %v7809_v26 = vadd.f32 %v607_v23, %v384_v22  ;;  %v6375_v27 = vpop.f32.mrb[9].mxu1  ;;  %v387_v28 = vpop.f32.mrb[10].mxu0  ;;  %v758_v23 = vld [vmem:[%s7488_s23 + $0x101] sm:$0xff]  ;;  %v759_v24 = vld [vmem:[%s7488_s23 + $0x109] sm:$0xff] }
  0xfa   : > { %v610_v30 = vpop.f32.mrb[10].mxu1  ;;  %v6306_v31 = vpop.f32.mrb[11].mxu0  ;;  %v5427_v27 = vld [vmem:[%s7488_s23 + $0x231] sm:$0xff] }
  0xfb   : > { %v7811_v32 = vadd.f32 %v610_v30, %v387_v28  ;;  %v6376_v33 = vpop.f32.mrb[11].mxu1  ;;  %v776_v31 = vpack.c.bf16 %v759_v24, %v758_v23  ;;  %v5450_v24 = vld [vmem:[%s7488_s23 + $0x270] sm:$0xff] }
  0xfc   : > { %6484 = vmatmul.mubr.msk.bf16.gmra.mrb[116].mxu0 %vm278_vm2, %v772_v25  ;;  %v5426_v25 = vld [vmem:[%s7488_s23 + $0x229] sm:$0xff] }
  0xfd   : > { %6554 = vmatmul.mubr.msk.bf16.gmra.mrb[116].mxu1 %vm278_vm2, %v1082_v29  ;;  %6487 = vmatprep.mubr.msk.bf16.mxu0 %vm7434_vm1, %v7433_v2  ;;  %v1086_v36 = vpack.c.bf16 %v5427_v27, %v5426_v25  ;;  %v5451_v25 = vld [vmem:[%s7488_s23 + $0x278] sm:$0xff] }
  0xfe   : > { %6557 = vmatprep.mubr.msk.bf16.mxu1 %vm7434_vm1, %v7433_v2  ;;  %v5502_v27 = vld [vmem:[%s7488_s23 + $0x398] sm:$0xff] }
  0xff   : > { %v392_v38 = vpop.f32.mrb[12].mxu0 }
 0x100   : > { %v615_v39 = vpop.f32.mrb[12].mxu1  ;;  %v6309_v40 = vpop.f32.mrb[13].mxu0 }
 0x101   : > { %v7823_v42 = vadd.f32 %v615_v39, %v392_v38  ;;  %v6379_v43 = vpop.f32.mrb[13].mxu1  ;;  %v395_v44 = vpop.f32.mrb[14].mxu0 }
 0x102   : > { %v618_v46 = vpop.f32.mrb[14].mxu1  ;;  %v6310_v47 = vpop.f32.mrb[15].mxu0  ;;  %v5447_v43 = vld [vmem:[%s7488_s23 + $0x258] sm:$0xff] }
 0x103   : > { %v7825_v48 = vadd.f32 %v618_v46, %v395_v44  ;;  %v6380_v49 = vpop.f32.mrb[15].mxu1  ;;  %v5498_v44 = vld [vmem:[%s7488_s23 + $0x378] sm:$0xff] }
 0x104   : > { %6488 = vmatmul.mubr.msk.bf16.gmra.mrb[120].mxu0 %vm278_vm2, %v773_v41  ;;  %v5446_v41 = vld [vmem:[%s7488_s23 + $0x250] sm:$0xff]  ;;  %v5584_v47 = vld [vmem:[%s9708_s1 + $0x18] sm:$0xf] }
 0x105   : > { %6558 = vmatmul.mubr.msk.bf16.gmra.mrb[120].mxu1 %vm278_vm2, %v1083_v45  ;;  %6491 = vmatprep.mubr.msk.bf16.mxu0 %vm7434_vm1, %v7433_v2  ;;  %v5499_v45 = vld [vmem:[%s7488_s23 + $0x380] sm:$0xff]  ;;  %v1381_v51 = vpack.c.bf16 %v5447_v43, %v5446_v41 }
 0x106   : > { %6561 = vmatprep.mubr.msk.bf16.mxu1 %vm7434_vm1, %v7433_v2 }
 0x107   : > { %v400_v54 = vpop.f32.mrb[16].mxu0 }
 0x108   : > { %v623_v55 = vpop.f32.mrb[16].mxu1  ;;  %v6313_v56 = vpop.f32.mrb[17].mxu0 }
 0x109   : > { %v7837_v59 = vadd.f32 %v623_v55, %v400_v54  ;;  %v6383_v60 = vpop.f32.mrb[17].mxu1  ;;  %v403_v61 = vpop.f32.mrb[18].mxu0  ;;  %v1692_v56 = vpack.c.bf16 %v5499_v45, %v5498_v44  ;;  %v5452_v45 = vld [vmem:[%s7488_s23 + $0x280] sm:$0xff] }
 0x10a   : > { %v626_v0 = vpop.f32.mrb[18].mxu1  ;;  %v6314_v1 = vpop.f32.mrb[19].mxu0 }
 0x10b   : > { %v7839_v3 = vadd.f32 %v626_v0, %v403_v61  ;;  %v6384_v4 = vpop.f32.mrb[19].mxu1  ;;  %v2073_v61 = vsel %vm330_vm0, %v5584_v47, 0  ;;  %v2383_v1 = vsel %vm330_vm0, %v5636_v52, 0  ;;  %v5504_v47 = vld [vmem:[%s7488_s23 + $0x3a8] sm:$0xff] }
 0x10c   : > { %6492 = vmatmul.mubr.msk.bf16.gmra.mrb[124].mxu0 %vm278_vm2, %v774_v58  ;;  %v5448_v4 = vld [vmem:[%s7488_s23 + $0x260] sm:$0xff] }
 0x10d   : > { %6562 = vmatmul.mubr.msk.bf16.gmra.mrb[124].mxu1 %vm278_vm2, %v1084_v62  ;;  %6495 = vmatprep.mubr.msk.bf16.mxu0 %vm7434_vm1, %v7433_v2 }
 0x10e   : > { %6565 = vmatprep.mubr.msk.bf16.mxu1 %vm7434_vm1, %v7433_v2 }
 0x10f   : > { %v408_v9 = vpop.f32.mrb[20].mxu0 }
 0x110   : > { %v631_v11 = vpop.f32.mrb[20].mxu1  ;;  %v6317_v12 = vpop.f32.mrb[21].mxu0 }
 0x111   : > { %v7851_v14 = vadd.f32 %v631_v11, %v408_v9  ;;  %v6387_v15 = vpop.f32.mrb[21].mxu1  ;;  %v411_v17 = vpop.f32.mrb[22].mxu0  ;;  %v1382_v12 = vpack.c.bf16 %v5449_v5, %v5448_v4  ;;  %v5454_v5 = vld [vmem:[%s7488_s23 + $0x290] sm:$0xff] }
 0x112   : > { %v634_v19 = vpop.f32.mrb[22].mxu1  ;;  %v6318_v20 = vpop.f32.mrb[23].mxu0 }
 0x113   : > { %v7853_v21 = vadd.f32 %v634_v19, %v411_v17  ;;  %v6388_v22 = vpop.f32.mrb[23].mxu1 }
 0x114   : > { %6496 = vmatmul.mubr.msk.bf16.gmra.mrb[128].mxu0 %vm278_vm2, %v775_v13 }
 0x115   : > { %6566 = vmatmul.mubr.msk.bf16.gmra.mrb[128].mxu1 %vm278_vm2, %v1085_v18  ;;  %6499 = vmatprep.mubr.msk.bf16.mxu0 %vm7434_vm1, %v7433_v2  ;;  %v1693_v18 = vpack.c.bf16 %v5501_v7, %v5500_v6  ;;  %v5455_v6 = vld [vmem:[%s7488_s23 + $0x298] sm:$0xff] }
 0x116   : > { %6569 = vmatprep.mubr.msk.bf16.mxu1 %vm7434_vm1, %v7433_v2  ;;  %v5506_v7 = vld [vmem:[%s7488_s23 + $0x3b8] sm:$0xff] }
 0x117   : > { %v416_v28 = vpop.f32.mrb[24].mxu0 }
 0x118   : > { %v639_v29 = vpop.f32.mrb[24].mxu1  ;;  %v6321_v30 = vpop.f32.mrb[25].mxu0 }
 0x119   : > { %v7865_v33 = vadd.f32 %v639_v29, %v416_v28  ;;  %v6391_v34 = vpop.f32.mrb[25].mxu1  ;;  %v419_v35 = vpop.f32.mrb[26].mxu0  ;;  %v5503_v28 = vld [vmem:[%s7488_s23 + $0x3a0] sm:$0xff] }
 0x11a   : > { %v642_v37 = vpop.f32.mrb[26].mxu1  ;;  %v6322_v38 = vpop.f32.mrb[27].mxu0  ;;  %v1383_v34 = vpack.c.bf16 %v5451_v25, %v5450_v24 }
 0x11b   : > { %v7867_v39 = vadd.f32 %v642_v37, %v419_v35  ;;  %v6392_v40 = vpop.f32.mrb[27].mxu1  ;;  %v1694_v38 = vpack.c.bf16 %v5503_v28, %v5502_v27  ;;  %v5456_v28 = vld [vmem:[%s7488_s23 + $0x2a0] sm:$0xff] }
 0x11c   : > { %6500 = vmatmul.mubr.msk.bf16.gmra.mrb[132].mxu0 %vm278_vm2, %v776_v31 }
 0x11d   : > { %6570 = vmatmul.mubr.msk.bf16.gmra.mrb[132].mxu1 %vm278_vm2, %v1086_v36  ;;  %6575 = vmatprep.mubr.msk.bf16.mxu0 %vm7434_vm1, %v7433_v2 }
 0x11e   : > { %6645 = vmatprep.mubr.msk.bf16.mxu1 %vm7434_vm1, %v7433_v2 }
 0x11f   : > { %v424_v46 = vpop.f32.mrb[28].mxu0 }
 0x120   : > { %v647_v49 = vpop.f32.mrb[28].mxu1  ;;  %v6325_v50 = vpop.f32.mrb[29].mxu0 }
 0x121   : > { %v7885_v53 = vadd.f32 %v647_v49, %v424_v46  ;;  %v6395_v54 = vpop.f32.mrb[29].mxu1  ;;  %v427_v55 = vpop.f32.mrb[30].mxu0  ;;  %v5453_v46 = vld [vmem:[%s7488_s23 + $0x288] sm:$0xff]  ;;  %v5505_v49 = vld [vmem:[%s7488_s23 + $0x3b0] sm:$0xff] }
 0x122   : > { %v650_v58 = vpop.f32.mrb[30].mxu1  ;;  %v6326_v60 = vpop.f32.mrb[31].mxu0  ;;  %v1384_v54 = vpack.c.bf16 %v5453_v46, %v5452_v45 }
 0x123   : > { %v7888_v62 = vadd.f32 %v650_v58, %v427_v55  ;;  %v6396_v0 = vpop.f32.mrb[31].mxu1  ;;  %v1695_v60 = vpack.c.bf16 %v5505_v49, %v5504_v47 }
 0x124   : > { %6576 = vmatmul.mubr.msk.bf16.vlgmr.msra.gmra.mrb[136].mxu0 %vm278_vm2, %v1381_v51 }
 0x125   : > { %6646 = vmatmul.mubr.msk.bf16.vlgmr.msra.gmra.mrb[136].mxu1 %vm278_vm2, %v1692_v56  ;;  %6714 = vmatpush3.bf16.msra.mxu0 %v2073_v61 }
 0x126   : > { %6784 = vmatpush3.bf16.msra.mxu1 %v2383_v1  ;;  %6579 = vmatprep.mubr.msk.bf16.mxu0 %vm7434_vm1, %v7433_v2 }
 0x127   : > { %v432_v8 = vpop.f32.mrb[32].mxu0  ;;  %6649 = vmatprep.mubr.msk.bf16.mxu1 %vm7434_vm1, %v7433_v2  ;;  %6853 = vmatprep.subr.bf16.mxu0 %v7433_v2 }
 0x128   : > { %v655_v9 = vpop.f32.mrb[32].mxu1  ;;  %v6329_v11 = vpop.f32.mrb[33].mxu0  ;;  %6923 = vmatprep.subr.bf16.mxu1 %v7433_v2 }
 0x129   : > { %v7903_v13 = vadd.f32 %v655_v9, %v432_v8  ;;  %v6399_v15 = vpop.f32.mrb[33].mxu1  ;;  %v435_v17 = vpop.f32.mrb[34].mxu0  ;;  %v5507_v8 = vld [vmem:[%s7488_s23 + $0x3c0] sm:$0xff] }
 0x12a   : > { %v658_v19 = vpop.f32.mrb[34].mxu1  ;;  %v6330_v20 = vpop.f32.mrb[35].mxu0  ;;  %v1385_v15 = vpack.c.bf16 %v5455_v6, %v5454_v5 }
 0x12b   : > { %v7905_v22 = vadd.f32 %v658_v19, %v435_v17  ;;  %v6400_v23 = vpop.f32.mrb[35].mxu1  ;;  %v1696_v20 = vpack.c.bf16 %v5507_v8, %v5506_v7 }
 0x12c   : > { %6580 = vmatmul.mubr.msk.bf16.gmra.mrb[140].mxu0 %vm278_vm2, %v1382_v12 }
 0x12d   : > { %6650 = vmatmul.mubr.msk.bf16.gmra.mrb[140].mxu1 %vm278_vm2, %v1693_v18  ;;  %6583 = vmatprep.mubr.msk.bf16.mxu0 %vm7434_vm1, %v7433_v2 }
 0x12e   : > { %6653 = vmatprep.mubr.msk.bf16.mxu1 %vm7434_vm1, %v7433_v2 }
 0x12f   : > { %v440_v29 = vpop.f32.mrb[36].mxu0 }
 0x130   : > { %v663_v30 = vpop.f32.mrb[36].mxu1  ;;  %v6333_v31 = vpop.f32.mrb[37].mxu0 }
 0x131   : > { %v7917_v35 = vadd.f32 %v663_v30, %v440_v29  ;;  %v6403_v36 = vpop.f32.mrb[37].mxu1  ;;  %v443_v37 = vpop.f32.mrb[38].mxu0  ;;  %v5457_v29 = vld [vmem:[%s7488_s23 + $0x2a8] sm:$0xff]  ;;  %v5509_v31 = vld [vmem:[%s7488_s23 + $0x3d0] sm:$0xff] }
 0x132   : > { %v666_v40 = vpop.f32.mrb[38].mxu1  ;;  %v6334_v41 = vpop.f32.mrb[39].mxu0  ;;  %v5508_v30 = vld [vmem:[%s7488_s23 + $0x3c8] sm:$0xff] }
 0x133   : > { %v7919_v43 = vadd.f32 %v666_v40, %v443_v37  ;;  %v6404_v44 = vpop.f32.mrb[39].mxu1  ;;  %v1697_v45 = vpack.c.bf16 %v5509_v31, %v5508_v30 }
 0x134   : > { %6584 = vmatmul.mubr.msk.bf16.gmra.mrb[144].mxu0 %vm278_vm2, %v1383_v34 }
 0x135   : > { %6654 = vmatmul.mubr.msk.bf16.gmra.mrb[144].mxu1 %vm278_vm2, %v1694_v38  ;;  %6587 = vmatprep.mubr.msk.bf16.mxu0 %vm7434_vm1, %v7433_v2  ;;  %v1386_v38 = vpack.c.bf16 %v5457_v29, %v5456_v28 }
 0x136   : > { %6657 = vmatprep.mubr.msk.bf16.mxu1 %vm7434_vm1, %v7433_v2 }
 0x137   : > { %v448_v50 = vpop.f32.mrb[40].mxu0 }
 0x138   : > { %v671_v51 = vpop.f32.mrb[40].mxu1  ;;  %v6337_v52 = vpop.f32.mrb[41].mxu0 }
 0x139   : > { %v7931_v55 = vadd.f32 %v671_v51, %v448_v50  ;;  %v6407_v56 = vpop.f32.mrb[41].mxu1  ;;  %v451_v58 = vpop.f32.mrb[42].mxu0  ;;  %v5458_v51 = vld [vmem:[%s7488_s23 + $0x2b0] sm:$0xff]  ;;  %v5459_v52 = vld [vmem:[%s7488_s23 + $0x2b8] sm:$0xff] }
 0x13a   : > { %v674_v61 = vpop.f32.mrb[42].mxu1  ;;  %v6338_v0 = vpop.f32.mrb[43].mxu0  ;;  %v5511_v56 = vld [vmem:[%s7488_s23 + $0x3e0] sm:$0xff] }
 0x13b   : > { %v7933_v1 = vadd.f32 %v674_v61, %v451_v58  ;;  %v6408_v4 = vpop.f32.mrb[43].mxu1  ;;  %v1387_v0 = vpack.c.bf16 %v5459_v52, %v5458_v51 }
 0x13c   : > { %6588 = vmatmul.mubr.msk.bf16.gmra.mrb[148].mxu0 %vm278_vm2, %v1384_v54  ;;  %v5510_v54 = vld [vmem:[%s7488_s23 + $0x3d8] sm:$0xff] }
 0x13d   : > { %6658 = vmatmul.mubr.msk.bf16.gmra.mrb[148].mxu1 %vm278_vm2, %v1695_v60  ;;  %6591 = vmatprep.mubr.msk.bf16.mxu0 %vm7434_vm1, %v7433_v2  ;;  %v1698_v7 = vpack.c.bf16 %v5511_v56, %v5510_v54 }
 0x13e   : > { %6661 = vmatprep.mubr.msk.bf16.mxu1 %vm7434_vm1, %v7433_v2 }
 0x13f   : > { %v456_v9 = vpop.f32.mrb[44].mxu0 }
 0x140   : > { %v679_v11 = vpop.f32.mrb[44].mxu1  ;;  %v6341_v12 = vpop.f32.mrb[45].mxu0 }
 0x141   : > { %v7945_v17 = vadd.f32 %v679_v11, %v456_v9  ;;  %v6411_v18 = vpop.f32.mrb[45].mxu1  ;;  %v459_v19 = vpop.f32.mrb[46].mxu0 }
 0x142   : > { %v682_v23 = vpop.f32.mrb[46].mxu1  ;;  %v6342_v24 = vpop.f32.mrb[47].mxu0  ;;  %v5461_v18 = vld [vmem:[%s7488_s23 + $0x2c8] sm:$0xff] }
 0x143   : > { %v7947_v25 = vadd.f32 %v682_v23, %v459_v19  ;;  %v6412_v27 = vpop.f32.mrb[47].mxu1  ;;  %v5512_v19 = vld [vmem:[%s7488_s23 + $0x3e8] sm:$0xff] }
 0x144   : > { %6592 = vmatmul.mubr.msk.bf16.gmra.mrb[152].mxu0 %vm278_vm2, %v1385_v15  ;;  %v5460_v15 = vld [vmem:[%s7488_s23 + $0x2c0] sm:$0xff] }
 0x145   : > { %6662 = vmatmul.mubr.msk.bf16.gmra.mrb[152].mxu1 %vm278_vm2, %v1696_v20  ;;  %6595 = vmatprep.mubr.msk.bf16.mxu0 %vm7434_vm1, %v7433_v2  ;;  %v5513_v20 = vld [vmem:[%s7488_s23 + $0x3f0] sm:$0xff]  ;;  %v1388_v28 = vpack.c.bf16 %v5461_v18, %v5460_v15 }
 0x146   : > { %6665 = vmatprep.mubr.msk.bf16.mxu1 %vm7434_vm1, %v7433_v2  ;;  %v5517_v15 = vld [vmem:[%s7488_s23 + $0x410] sm:$0xff] }
 0x147   : > { %v464_v34 = vpop.f32.mrb[48].mxu0 }
 0x148   : > { %v687_v36 = vpop.f32.mrb[48].mxu1  ;;  %v6345_v37 = vpop.f32.mrb[49].mxu0 }
 0x149   : > { %v7959_v40 = vadd.f32 %v687_v36, %v464_v34  ;;  %v6415_v41 = vpop.f32.mrb[49].mxu1  ;;  %v467_v44 = vpop.f32.mrb[50].mxu0  ;;  %v1699_v34 = vpack.c.bf16 %v5513_v20, %v5512_v19 }
 0x14a   : > { %v690_v46 = vpop.f32.mrb[50].mxu1  ;;  %v6346_v47 = vpop.f32.mrb[51].mxu0 }
 0x14b   : > { %v7961_v49 = vadd.f32 %v690_v46, %v467_v44  ;;  %v6416_v50 = vpop.f32.mrb[51].mxu1  ;;  %v5462_v44 = vld [vmem:[%s7488_s23 + $0x2d0] sm:$0xff]  ;;  %v5514_v46 = vld [vmem:[%s7488_s23 + $0x3f8] sm:$0xff]  ;;  %v5515_v47 = vld [vmem:[%s7488_s23 + $0x400] sm:$0xff] }
 0x14c   : > { %6596 = vmatmul.mubr.msk.bf16.gmra.mrb[156].mxu0 %vm278_vm2, %v1386_v38 }
 0x14d   : > { %6666 = vmatmul.mubr.msk.bf16.gmra.mrb[156].mxu1 %vm278_vm2, %v1697_v45  ;;  %6599 = vmatprep.mubr.msk.bf16.mxu0 %vm7434_vm1, %v7433_v2  ;;  %v5463_v45 = vld [vmem:[%s7488_s23 + $0x2d8] sm:$0xff] }
 0x14e   : > { %6669 = vmatprep.mubr.msk.bf16.mxu1 %vm7434_vm1, %v7433_v2  ;;  %v1389_v54 = vpack.c.bf16 %v5463_v45, %v5462_v44  ;;  %v5467_v44 = vld [vmem:[%s7488_s23 + $0x2f8] sm:$0xff] }
 0x14f   : > { %v472_v58 = vpop.f32.mrb[52].mxu0  ;;  %v5518_v45 = vld [vmem:[%s7488_s23 + $0x418] sm:$0xff] }
 0x150   : > { %v695_v60 = vpop.f32.mrb[52].mxu1  ;;  %v6349_v61 = vpop.f32.mrb[53].mxu0 }
 0x151   : > { %v7973_v4 = vadd.f32 %v695_v60, %v472_v58  ;;  %v6419_v5 = vpop.f32.mrb[53].mxu1  ;;  %v475_v6 = vpop.f32.mrb[54].mxu0  ;;  %v1700_v61 = vpack.c.bf16 %v5515_v47, %v5514_v46  ;;  %v5519_v46 = vld [vmem:[%s7488_s23 + $0x420] sm:$0xff] }
 0x152   : > { %v698_v8 = vpop.f32.mrb[54].mxu1  ;;  %v6350_v9 = vpop.f32.mrb[55].mxu0 }
 0x153   : > { %v7975_v11 = vadd.f32 %v698_v8, %v475_v6  ;;  %v6420_v12 = vpop.f32.mrb[55].mxu1  ;;  %v5464_v8 = vld [vmem:[%s7488_s23 + $0x2e0] sm:$0xff]  ;;  %v5465_v9 = vld [vmem:[%s7488_s23 + $0x2e8] sm:$0xff] }
 0x154   : > { %6600 = vmatmul.mubr.msk.bf16.gmra.mrb[160].mxu0 %vm278_vm2, %v1387_v0  ;;  %v5516_v12 = vld [vmem:[%s7488_s23 + $0x408] sm:$0xff] }
 0x155   : > { %6670 = vmatmul.mubr.msk.bf16.gmra.mrb[160].mxu1 %vm278_vm2, %v1698_v7  ;;  %6603 = vmatprep.mubr.msk.bf16.mxu0 %vm7434_vm1, %v7433_v2 }
 0x156   : > { %6673 = vmatprep.mubr.msk.bf16.mxu1 %vm7434_vm1, %v7433_v2 }
 0x157   : > { %v480_v23 = vpop.f32.mrb[56].mxu0 }
 0x158   : > { %v703_v24 = vpop.f32.mrb[56].mxu1  ;;  %v6353_v27 = vpop.f32.mrb[57].mxu0 }
 0x159   : > { %v7987_v29 = vadd.f32 %v703_v24, %v480_v23  ;;  %v6423_v30 = vpop.f32.mrb[57].mxu1  ;;  %v483_v31 = vpop.f32.mrb[58].mxu0  ;;  %v1390_v23 = vpack.c.bf16 %v5465_v9, %v5464_v8 }
 0x15a   : > { %v706_v36 = vpop.f32.mrb[58].mxu1  ;;  %v6354_v37 = vpop.f32.mrb[59].mxu0  ;;  %v1701_v30 = vpack.c.bf16 %v5517_v15, %v5516_v12  ;;  %v5469_v15 = vld [vmem:[%s7488_s23 + $0x308] sm:$0xff] }
 0x15b   : > { %v7989_v38 = vadd.f32 %v706_v36, %v483_v31  ;;  %v6424_v41 = vpop.f32.mrb[59].mxu1 }
 0x15c   : > { %6604 = vmatmul.mubr.msk.bf16.gmra.mrb[164].mxu0 %vm278_vm2, %v1388_v28  ;;  %v5466_v41 = vld [vmem:[%s7488_s23 + $0x2f0] sm:$0xff] }
 0x15d   : > { %6674 = vmatmul.mubr.msk.bf16.gmra.mrb[164].mxu1 %vm278_vm2, %v1699_v34  ;;  %6607 = vmatprep.mubr.msk.bf16.mxu0 %vm7434_vm1, %v7433_v2 }
 0x15e   : > { %6677 = vmatprep.mubr.msk.bf16.mxu1 %vm7434_vm1, %v7433_v2 }
 0x15f   : > { %v488_v50 = vpop.f32.mrb[60].mxu0 }
 0x160   : > { %v711_v51 = vpop.f32.mrb[60].mxu1  ;;  %v6357_v52 = vpop.f32.mrb[61].mxu0 }
 0x161   : > { %v8001_v56 = vadd.f32 %v711_v51, %v488_v50  ;;  %v6427_v58 = vpop.f32.mrb[61].mxu1  ;;  %v491_v60 = vpop.f32.mrb[62].mxu0 }
 0x162   : > { %v714_v0 = vpop.f32.mrb[62].mxu1  ;;  %v6358_v5 = vpop.f32.mrb[63].mxu0 }
 0x163   : > { %v8003_v6 = vadd.f32 %v714_v0, %v491_v60  ;;  %v6428_v7 = vpop.f32.mrb[63].mxu1 }
 0x164   : > { %6608 = vmatmul.mubr.msk.bf16.gmra.mrb[168].mxu0 %vm278_vm2, %v1389_v54  ;;  %v1391_v54 = vpack.c.bf16 %v5467_v44, %v5466_v41 }
 0x165   : > { %6678 = vmatmul.mubr.msk.bf16.gmra.mrb[168].mxu1 %vm278_vm2, %v1700_v61  ;;  %6611 = vmatprep.mubr.msk.bf16.mxu0 %vm7434_vm1, %v7433_v2  ;;  %v1702_v61 = vpack.c.bf16 %v5519_v46, %v5518_v45 }
 0x166   : > { %6681 = vmatprep.mubr.msk.bf16.mxu1 %vm7434_vm1, %v7433_v2 }
 0x167   : > { %v496_v18 = vpop.f32.mrb[64].mxu0 }
 0x168   : > { %v719_v19 = vpop.f32.mrb[64].mxu1  ;;  %v6361_v20 = vpop.f32.mrb[65].mxu0 }
 0x169   : > { %v8015_v24 = vadd.f32 %v719_v19, %v496_v18  ;;  %v6431_v27 = vpop.f32.mrb[65].mxu1  ;;  %v499_v28 = vpop.f32.mrb[66].mxu0  ;;  %v5520_v18 = vld [vmem:[%s7488_s23 + $0x428] sm:$0xff]  ;;  %v5521_v19 = vld [vmem:[%s7488_s23 + $0x430] sm:$0xff] }
 0x16a   : > { %v722_v31 = vpop.f32.mrb[66].mxu1  ;;  %v6362_v34 = vpop.f32.mrb[67].mxu0 }
 0x16b   : > { %v8017_v36 = vadd.f32 %v722_v31, %v499_v28  ;;  %v6432_v37 = vpop.f32.mrb[67].mxu1  ;;  %v1703_v34 = vpack.c.bf16 %v5521_v19, %v5520_v18 }
 0x16c   : > { %6612 = vmatmul.mubr.msk.bf16.gmra.mrb[172].mxu0 %vm278_vm2, %v1390_v23 }
 0x16d   : > { %6682 = vmatmul.mubr.msk.bf16.gmra.mrb[172].mxu1 %vm278_vm2, %v1701_v30  ;;  %6615 = vmatprep.mubr.msk.bf16.mxu0 %vm7434_vm1, %v7433_v2 }
 0x16e   : > { %6685 = vmatprep.mubr.msk.bf16.mxu1 %vm7434_vm1, %v7433_v2 }
 0x16f   : > { %v867_v47 = vpop.f32.mrb[68].mxu0 }
 0x170   : > { %v1002_v50 = vadd.f32 %v867_v47, %v7781_v57  ;;  %v1177_v51 = vpop.f32.mrb[68].mxu1  ;;  %v6437_v52 = vpop.f32.mrb[69].mxu0  ;;  %v5468_v57 = vld [vmem:[%s7488_s23 + $0x300] sm:$0xff] }
 0x171   : > { %v6507_v58 = vpop.f32.mrb[69].mxu1  ;;  %v870_v60 = vpop.f32.mrb[70].mxu0  ;;  %v1392_v28 = vpack.c.bf16 %v5469_v15, %v5468_v57  ;;  %v5523_v52 = vld [vmem:[%s7488_s23 + $0x440] sm:$0xff] }
 0x172   : > { %v8030_v0 = vadd.f32 %v1177_v51, %v1002_v50  ;;  %v1003_v5 = vadd.f32 %v870_v60, %v7783_v63  ;;  %v1180_v7 = vpop.f32.mrb[70].mxu1  ;;  %v6438_v8 = vpop.f32.mrb[71].mxu0  ;;  %v5471_v50 = vld [vmem:[%s7488_s23 + $0x318] sm:$0xff] }
 0x173   : > { %v6508_v9 = vpop.f32.mrb[71].mxu1  ;;  %v5522_v51 = vld [vmem:[%s7488_s23 + $0x438] sm:$0xff] }
 0x174   : > { %v8033_v12 = vadd.f32 %v1180_v7, %v1003_v5  ;;  %6616 = vmatmul.mubr.msk.bf16.gmra.mrb[176].mxu0 %vm278_vm2, %v1391_v54  ;;  %v1704_v8 = vpack.c.bf16 %v5523_v52, %v5522_v51 }
 0x175   : > { %6686 = vmatmul.mubr.msk.bf16.gmra.mrb[176].mxu1 %vm278_vm2, %v1702_v61  ;;  %6619 = vmatprep.mubr.msk.bf16.mxu0 %vm7434_vm1, %v7433_v2 }
 0x176   : > { %6689 = vmatprep.mubr.msk.bf16.mxu1 %vm7434_vm1, %v7433_v2 }
 0x177   : > { %v875_v63 = vpop.f32.mrb[72].mxu0 }
 0x178   : > { %v1004_v20 = vadd.f32 %v875_v63, %v7795_v10  ;;  %v1185_v23 = vpop.f32.mrb[72].mxu1  ;;  %v6441_v27 = vpop.f32.mrb[73].mxu0  ;;  %v5470_v10 = vld [vmem:[%s7488_s23 + $0x310] sm:$0xff] }
 0x179   : > { %v6511_v30 = vpop.f32.mrb[73].mxu1  ;;  %v878_v31 = vpop.f32.mrb[74].mxu0  ;;  %v1393_v61 = vpack.c.bf16 %v5471_v50, %v5470_v10  ;;  %v5525_v27 = vld [vmem:[%s7488_s23 + $0x450] sm:$0xff] }
 0x17a   : > { %v8046_v37 = vadd.f32 %v1185_v23, %v1004_v20  ;;  %v1005_v41 = vadd.f32 %v878_v31, %v7797_v16  ;;  %v1188_v44 = vpop.f32.mrb[74].mxu1  ;;  %v6442_v45 = vpop.f32.mrb[75].mxu0  ;;  %v5473_v20 = vld [vmem:[%s7488_s23 + $0x328] sm:$0xff] }
 0x17b   : > { %v6512_v46 = vpop.f32.mrb[75].mxu1  ;;  %v5524_v23 = vld [vmem:[%s7488_s23 + $0x448] sm:$0xff] }
 0x17c   : > { %v8049_v47 = vadd.f32 %v1188_v44, %v1005_v41  ;;  %6620 = vmatmul.mubr.msk.bf16.gmra.mrb[180].mxu0 %vm278_vm2, %v1392_v28  ;;  %v1705_v45 = vpack.c.bf16 %v5525_v27, %v5524_v23 }
 0x17d   : > { %6690 = vmatmul.mubr.msk.bf16.gmra.mrb[180].mxu1 %vm278_vm2, %v1703_v34  ;;  %6623 = vmatprep.mubr.msk.bf16.mxu0 %vm7434_vm1, %v7433_v2 }
 0x17e   : > { %6693 = vmatprep.mubr.msk.bf16.mxu1 %vm7434_vm1, %v7433_v2 }
 0x17f   : > { %v883_v16 = vpop.f32.mrb[76].mxu0 }
 0x180   : > { %v1006_v54 = vadd.f32 %v883_v16, %v7809_v26  ;;  %v1193_v58 = vpop.f32.mrb[76].mxu1  ;;  %v6445_v60 = vpop.f32.mrb[77].mxu0  ;;  %v5472_v26 = vld [vmem:[%s7488_s23 + $0x320] sm:$0xff] }
 0x181   : > { %v6515_v5 = vpop.f32.mrb[77].mxu1  ;;  %v886_v7 = vpop.f32.mrb[78].mxu0  ;;  %v1394_v34 = vpack.c.bf16 %v5473_v20, %v5472_v26  ;;  %v5527_v60 = vld [vmem:[%s7488_s23 + $0x460] sm:$0xff] }
 0x182   : > { %v8062_v9 = vadd.f32 %v1193_v58, %v1006_v54  ;;  %v1007_v57 = vadd.f32 %v886_v7, %v7811_v32  ;;  %v1196_v15 = vpop.f32.mrb[78].mxu1  ;;  %v6446_v18 = vpop.f32.mrb[79].mxu0  ;;  %v5475_v54 = vld [vmem:[%s7488_s23 + $0x338] sm:$0xff] }
 0x183   : > { %v6516_v19 = vpop.f32.mrb[79].mxu1  ;;  %v5526_v58 = vld [vmem:[%s7488_s23 + $0x458] sm:$0xff] }
 0x184   : > { %v8065_v63 = vadd.f32 %v1196_v15, %v1007_v57  ;;  %6624 = vmatmul.mubr.msk.bf16.gmra.mrb[184].mxu0 %vm278_vm2, %v1393_v61  ;;  %v1706_v18 = vpack.c.bf16 %v5527_v60, %v5526_v58 }
 0x185   : > { %6694 = vmatmul.mubr.msk.bf16.gmra.mrb[184].mxu1 %vm278_vm2, %v1704_v8  ;;  %6627 = vmatprep.mubr.msk.bf16.mxu0 %vm7434_vm1, %v7433_v2 }
 0x186   : > { %6697 = vmatprep.mubr.msk.bf16.mxu1 %vm7434_vm1, %v7433_v2 }
 0x187   : > { %v891_v32 = vpop.f32.mrb[80].mxu0 }
 0x188   : > { %v1008_v28 = vadd.f32 %v891_v32, %v7823_v42  ;;  %v1201_v30 = vpop.f32.mrb[80].mxu1  ;;  %v6449_v31 = vpop.f32.mrb[81].mxu0  ;;  %v5474_v42 = vld [vmem:[%s7488_s23 + $0x330] sm:$0xff] }
 0x189   : > { %v6519_v41 = vpop.f32.mrb[81].mxu1  ;;  %v894_v44 = vpop.f32.mrb[82].mxu0  ;;  %v1395_v8 = vpack.c.bf16 %v5475_v54, %v5474_v42  ;;  %v5529_v31 = vld [vmem:[%s7488_s23 + $0x470] sm:$0xff] }
 0x18a   : > { %v8078_v46 = vadd.f32 %v1201_v30, %v1008_v28  ;;  %v1009_v10 = vadd.f32 %v894_v44, %v7825_v48  ;;  %v1204_v50 = vpop.f32.mrb[82].mxu1  ;;  %v6450_v51 = vpop.f32.mrb[83].mxu0  ;;  %v5477_v28 = vld [vmem:[%s7488_s23 + $0x348] sm:$0xff] }
 0x18b   : > { %v6520_v52 = vpop.f32.mrb[83].mxu1  ;;  %v5528_v30 = vld [vmem:[%s7488_s23 + $0x468] sm:$0xff] }
 0x18c   : > { %v8081_v16 = vadd.f32 %v1204_v50, %v1009_v10  ;;  %6628 = vmatmul.mubr.msk.bf16.gmra.mrb[188].mxu0 %vm278_vm2, %v1394_v34  ;;  %v1707_v51 = vpack.c.bf16 %v5529_v31, %v5528_v30 }
 0x18d   : > { %6698 = vmatmul.mubr.msk.bf16.gmra.mrb[188].mxu1 %vm278_vm2, %v1705_v45  ;;  %6631 = vmatprep.mubr.msk.bf16.mxu0 %vm7434_vm1, %v7433_v2 }
 0x18e   : > { %6701 = vmatprep.mubr.msk.bf16.mxu1 %vm7434_vm1, %v7433_v2 }
 0x18f   : > { %v899_v48 = vpop.f32.mrb[84].mxu0 }
 0x190   : > { %v1010_v61 = vadd.f32 %v899_v48, %v7837_v59  ;;  %v1209_v5 = vpop.f32.mrb[84].mxu1  ;;  %v6453_v7 = vpop.f32.mrb[85].mxu0  ;;  %v5476_v59 = vld [vmem:[%s7488_s23 + $0x340] sm:$0xff] }
 0x191   : > { %v6523_v57 = vpop.f32.mrb[85].mxu1  ;;  %v902_v15 = vpop.f32.mrb[86].mxu0  ;;  %v1396_v45 = vpack.c.bf16 %v5477_v28, %v5476_v59  ;;  %v5531_v7 = vld [vmem:[%s7488_s23 + $0x480] sm:$0xff] }
 0x192   : > { %v8094_v19 = vadd.f32 %v1209_v5, %v1010_v61  ;;  %v1011_v26 = vadd.f32 %v902_v15, %v7839_v3  ;;  %v1212_v20 = vpop.f32.mrb[86].mxu1  ;;  %v6454_v23 = vpop.f32.mrb[87].mxu0  ;;  %v5479_v61 = vld [vmem:[%s7488_s23 + $0x358] sm:$0xff] }
 0x193   : > { %v6524_v27 = vpop.f32.mrb[87].mxu1  ;;  %v5530_v5 = vld [vmem:[%s7488_s23 + $0x478] sm:$0xff] }
 0x194   : > { %v8097_v32 = vadd.f32 %v1212_v20, %v1011_v26  ;;  %6632 = vmatmul.mubr.msk.bf16.gmra.mrb[192].mxu0 %vm278_vm2, %v1395_v8  ;;  %v1708_v23 = vpack.c.bf16 %v5531_v7, %v5530_v5 }
 0x195   : > { %6702 = vmatmul.mubr.msk.bf16.gmra.mrb[192].mxu1 %vm278_vm2, %v1706_v18  ;;  %6635 = vmatprep.mubr.msk.bf16.mxu0 %vm7434_vm1, %v7433_v2 }
 0x196   : > { %6705 = vmatprep.mubr.msk.bf16.mxu1 %vm7434_vm1, %v7433_v2 }
 0x197   : > { %v907_v3 = vpop.f32.mrb[88].mxu0 }
 0x198   : > { %v1012_v34 = vadd.f32 %v907_v3, %v7851_v14  ;;  %v1217_v41 = vpop.f32.mrb[88].mxu1  ;;  %v6457_v44 = vpop.f32.mrb[89].mxu0  ;;  %v5478_v14 = vld [vmem:[%s7488_s23 + $0x350] sm:$0xff] }
 0x199   : > { %v6527_v10 = vpop.f32.mrb[89].mxu1  ;;  %v910_v50 = vpop.f32.mrb[90].mxu0  ;;  %v1397_v18 = vpack.c.bf16 %v5479_v61, %v5478_v14  ;;  %v5603_v44 = vld [vmem:[%s7488_s23 + $0x381] sm:$0xff] }
 0x19a   : > { %v8110_v52 = vadd.f32 %v1217_v41, %v1012_v34  ;;  %v1013_v42 = vadd.f32 %v910_v50, %v7853_v21  ;;  %v1220_v54 = vpop.f32.mrb[90].mxu1  ;;  %v6458_v58 = vpop.f32.mrb[91].mxu0  ;;  %v5551_v34 = vld [vmem:[%s7488_s23 + $0x259] sm:$0xff] }
 0x19b   : > { %v6528_v60 = vpop.f32.mrb[91].mxu1  ;;  %v5602_v41 = vld [vmem:[%s7488_s23 + $0x379] sm:$0xff] }
 0x19c   : > { %v8113_v48 = vadd.f32 %v1220_v54, %v1013_v42  ;;  %6636 = vmatmul.mubr.msk.bf16.gmra.mrb[196].mxu0 %vm278_vm2, %v1396_v45  ;;  %v5654_v45 = vld [vmem:[%s9708_s1 + $0x20] sm:$0xf]  ;;  %v5706_v54 = vld [vmem:[%s9708_s1 + $0x24] sm:$0xf]  ;;  %v2312_v14 = vpack.c.bf16 %v5603_v44, %v5602_v41 }
 0x19d   : > { %6706 = vmatmul.mubr.msk.bf16.gmra.mrb[196].mxu1 %vm278_vm2, %v1707_v51  ;;  %6639 = vmatprep.mubr.msk.bf16.mxu0 %vm7434_vm1, %v7433_v2 }
 0x19e   : > { %6709 = vmatprep.mubr.msk.bf16.mxu1 %vm7434_vm1, %v7433_v2 }
 0x19f   : > { %v915_v21 = vpop.f32.mrb[92].mxu0 }
 0x1a0   : > { %v1014_v8 = vadd.f32 %v915_v21, %v7865_v33  ;;  %v1225_v57 = vpop.f32.mrb[92].mxu1  ;;  %v6461_v15 = vpop.f32.mrb[93].mxu0  ;;  %v5550_v33 = vld [vmem:[%s7488_s23 + $0x251] sm:$0xff]  ;;  %v2693_v21 = vsel %vm330_vm0, %v5654_v45, 0 }
 0x1a1   : > { %v6531_v26 = vpop.f32.mrb[93].mxu1  ;;  %v918_v20 = vpop.f32.mrb[94].mxu0  ;;  %v2002_v42 = vpack.c.bf16 %v5551_v34, %v5550_v33 }
 0x1a2   : > { %v8126_v27 = vadd.f32 %v1225_v57, %v1014_v8  ;;  %v1015_v59 = vadd.f32 %v918_v20, %v7867_v39  ;;  %v1228_v28 = vpop.f32.mrb[94].mxu1  ;;  %v6462_v30 = vpop.f32.mrb[95].mxu0  ;;  %v3003_v57 = vsel %vm330_vm0, %v5706_v54, 0  ;;  %v5553_v26 = vld [vmem:[%s7488_s23 + $0x269] sm:$0xff]  ;;  %v5605_v20 = vld [vmem:[%s7488_s23 + $0x391] sm:$0xff]  ;;  %v5606_v54 = vld [vmem:[%s7488_s23 + $0x399] sm:$0xff] }
 0x1a3   : > { %v6532_v31 = vpop.f32.mrb[95].mxu1 }
 0x1a4   : > { %v8129_v3 = vadd.f32 %v1228_v28, %v1015_v59  ;;  %6640 = vmatmul.mubr.msk.bf16.gmra.mrb[200].mxu0 %vm278_vm2, %v1397_v18  ;;  %v5552_v18 = vld [vmem:[%s7488_s23 + $0x261] sm:$0xff] }
 0x1a5   : > { %6710 = vmatmul.mubr.msk.bf16.gmra.mrb[200].mxu1 %vm278_vm2, %v1708_v23  ;;  %6715 = vmatprep.mubr.msk.bf16.mxu0 %vm7434_vm1, %v7433_v2  ;;  %v2003_v31 = vpack.c.bf16 %v5553_v26, %v5552_v18 }
 0x1a6   : > { %6785 = vmatprep.mubr.msk.bf16.mxu1 %vm7434_vm1, %v7433_v2 }
 0x1a7   : > { %v923_v39 = vpop.f32.mrb[96].mxu0 }
 0x1a8   : > { %v1016_v10 = vadd.f32 %v923_v39, %v7885_v53  ;;  %v1233_v50 = vpop.f32.mrb[96].mxu1  ;;  %v6465_v51 = vpop.f32.mrb[97].mxu0 }
 0x1a9   : > { %v6535_v58 = vpop.f32.mrb[97].mxu1  ;;  %v926_v60 = vpop.f32.mrb[98].mxu0  ;;  %v5554_v51 = vld [vmem:[%s7488_s23 + $0x271] sm:$0xff] }
 0x1aa   : > { %v8148_v61 = vadd.f32 %v1233_v50, %v1016_v10  ;;  %v1017_v5 = vadd.f32 %v926_v60, %v7888_v62  ;;  %v1236_v7 = vpop.f32.mrb[98].mxu1  ;;  %v6466_v53 = vpop.f32.mrb[99].mxu0  ;;  %v5604_v62 = vld [vmem:[%s7488_s23 + $0x389] sm:$0xff]  ;;  %v5607_v58 = vld [vmem:[%s7488_s23 + $0x3a1] sm:$0xff] }
 0x1ab   : > { %v6536_v8 = vpop.f32.mrb[99].mxu1  ;;  %v2313_v41 = vpack.c.bf16 %v5605_v20, %v5604_v62 }
 0x1ac   : > { %v8153_v15 = vadd.f32 %v1236_v7, %v1017_v5  ;;  %6716 = vmatmul.mubr.msk.bf16.vlgmr.msra.gmra.mrb[204].mxu0 %vm278_vm2, %v2002_v42  ;;  %v5555_v42 = vld [vmem:[%s7488_s23 + $0x279] sm:$0xff]  ;;  %v2314_v8 = vpack.c.bf16 %v5607_v58, %v5606_v54 }
 0x1ad   : > { %6786 = vmatmul.mubr.msk.bf16.vlgmr.msra.gmra.mrb[204].mxu1 %vm278_vm2, %v2312_v14  ;;  %6854 = vmatpush3.bf16.msra.mxu0 %v2693_v21  ;;  %v2004_v7 = vpack.c.bf16 %v5555_v42, %v5554_v51 }
 0x1ae   : > { %6924 = vmatpush3.bf16.msra.mxu1 %v3003_v57  ;;  %6719 = vmatprep.mubr.msk.bf16.mxu0 %vm7434_vm1, %v7433_v2 }
 0x1af   : > { %v931_v23 = vpop.f32.mrb[100].mxu0  ;;  %6789 = vmatprep.mubr.msk.bf16.mxu1 %vm7434_vm1, %v7433_v2  ;;  %6993 = vmatprep.subr.bf16.mxu0 %v7433_v2 }
 0x1b0   : > { %v1018_v59 = vadd.f32 %v931_v23, %v7903_v13  ;;  %v1241_v28 = vpop.f32.mrb[100].mxu1  ;;  %v6469_v30 = vpop.f32.mrb[101].mxu0  ;;  %7063 = vmatprep.subr.bf16.mxu1 %v7433_v2 }
 0x1b1   : > { %v6539_v33 = vpop.f32.mrb[101].mxu1  ;;  %v934_v34 = vpop.f32.mrb[102].mxu0  ;;  %v5609_v30 = vld [vmem:[%s7488_s23 + $0x3b1] sm:$0xff] }
 0x1b2   : > { %v8168_v44 = vadd.f32 %v1241_v28, %v1018_v59  ;;  %v1019_v39 = vadd.f32 %v934_v34, %v7905_v22  ;;  %v1244_v45 = vpop.f32.mrb[102].mxu1  ;;  %v6470_v10 = vpop.f32.mrb[103].mxu0  ;;  %v5557_v59 = vld [vmem:[%s7488_s23 + $0x289] sm:$0xff] }
 0x1b3   : > { %v6540_v50 = vpop.f32.mrb[103].mxu1  ;;  %v5608_v28 = vld [vmem:[%s7488_s23 + $0x3a9] sm:$0xff] }
 0x1b4   : > { %v8171_v13 = vadd.f32 %v1244_v45, %v1019_v39  ;;  %6720 = vmatmul.mubr.msk.bf16.gmra.mrb[208].mxu0 %vm278_vm2, %v2003_v31  ;;  %v2315_v10 = vpack.c.bf16 %v5609_v30, %v5608_v28 }
 0x1b5   : > { %6790 = vmatmul.mubr.msk.bf16.gmra.mrb[208].mxu1 %vm278_vm2, %v2313_v41  ;;  %6723 = vmatprep.mubr.msk.bf16.mxu0 %vm7434_vm1, %v7433_v2 }
 0x1b6   : > { %6793 = vmatprep.mubr.msk.bf16.mxu1 %vm7434_vm1, %v7433_v2 }
 0x1b7   : > { %v939_v22 = vpop.f32.mrb[104].mxu0 }
 0x1b8   : > { %v1020_v60 = vadd.f32 %v939_v22, %v7917_v35  ;;  %v1249_v14 = vpop.f32.mrb[104].mxu1  ;;  %v6473_v5 = vpop.f32.mrb[105].mxu0  ;;  %v5556_v35 = vld [vmem:[%s7488_s23 + $0x281] sm:$0xff] }
 0x1b9   : > { %v6543_v53 = vpop.f32.mrb[105].mxu1  ;;  %v942_v21 = vpop.f32.mrb[106].mxu0  ;;  %v2005_v41 = vpack.c.bf16 %v5557_v59, %v5556_v35  ;;  %v5611_v5 = vld [vmem:[%s7488_s23 + $0x3c1] sm:$0xff] }
 0x1ba   : > { %v8184_v57 = vadd.f32 %v1249_v14, %v1020_v60  ;;  %v1021_v18 = vadd.f32 %v942_v21, %v7919_v43  ;;  %v1252_v26 = vpop.f32.mrb[106].mxu1  ;;  %v6474_v62 = vpop.f32.mrb[107].mxu0  ;;  %v5559_v60 = vld [vmem:[%s7488_s23 + $0x299] sm:$0xff] }
 0x1bb   : > { %v6544_v20 = vpop.f32.mrb[107].mxu1  ;;  %v5610_v14 = vld [vmem:[%s7488_s23 + $0x3b9] sm:$0xff] }
 0x1bc   : > { %v8187_v23 = vadd.f32 %v1252_v26, %v1021_v18  ;;  %6724 = vmatmul.mubr.msk.bf16.gmra.mrb[212].mxu0 %vm278_vm2, %v2004_v7  ;;  %v2316_v62 = vpack.c.bf16 %v5611_v5, %v5610_v14 }
 0x1bd   : > { %6794 = vmatmul.mubr.msk.bf16.gmra.mrb[212].mxu1 %vm278_vm2, %v2314_v8  ;;  %6727 = vmatprep.mubr.msk.bf16.mxu0 %vm7434_vm1, %v7433_v2 }
 0x1be   : > { %6797 = vmatprep.mubr.msk.bf16.mxu1 %vm7434_vm1, %v7433_v2 }
 0x1bf   : > { %v947_v43 = vpop.f32.mrb[108].mxu0 }
 0x1c0   : > { %v1022_v31 = vadd.f32 %v947_v43, %v7931_v55  ;;  %v1257_v33 = vpop.f32.mrb[108].mxu1  ;;  %v6477_v34 = vpop.f32.mrb[109].mxu0  ;;  %v5558_v55 = vld [vmem:[%s7488_s23 + $0x291] sm:$0xff] }
 0x1c1   : > { %v6547_v39 = vpop.f32.mrb[109].mxu1  ;;  %v950_v45 = vpop.f32.mrb[110].mxu0  ;;  %v2006_v8 = vpack.c.bf16 %v5559_v60, %v5558_v55  ;;  %v5613_v34 = vld [vmem:[%s7488_s23 + $0x3d1] sm:$0xff] }
 0x1c2   : > { %v8200_v50 = vadd.f32 %v1257_v33, %v1022_v31  ;;  %v1023_v51 = vadd.f32 %v950_v45, %v7933_v1  ;;  %v1260_v42 = vpop.f32.mrb[110].mxu1  ;;  %v6478_v54 = vpop.f32.mrb[111].mxu0  ;;  %v5561_v31 = vld [vmem:[%s7488_s23 + $0x2a9] sm:$0xff] }
 0x1c3   : > { %v6548_v58 = vpop.f32.mrb[111].mxu1  ;;  %v5612_v33 = vld [vmem:[%s7488_s23 + $0x3c9] sm:$0xff] }
 0x1c4   : > { %v8203_v22 = vadd.f32 %v1260_v42, %v1023_v51  ;;  %6728 = vmatmul.mubr.msk.bf16.gmra.mrb[216].mxu0 %vm278_vm2, %v2005_v41  ;;  %v2317_v54 = vpack.c.bf16 %v5613_v34, %v5612_v33 }
 0x1c5   : > { %6798 = vmatmul.mubr.msk.bf16.gmra.mrb[216].mxu1 %vm278_vm2, %v2315_v10  ;;  %6731 = vmatprep.mubr.msk.bf16.mxu0 %vm7434_vm1, %v7433_v2 }
 0x1c6   : > { %6801 = vmatprep.mubr.msk.bf16.mxu1 %vm7434_vm1, %v7433_v2 }
 0x1c7   : > { %v955_v1 = vpop.f32.mrb[112].mxu0 }
 0x1c8   : > { %v1024_v7 = vadd.f32 %v955_v1, %v7945_v17  ;;  %v1265_v53 = vpop.f32.mrb[112].mxu1  ;;  %v6481_v21 = vpop.f32.mrb[113].mxu0  ;;  %v5560_v17 = vld [vmem:[%s7488_s23 + $0x2a1] sm:$0xff] }
 0x1c9   : > { %v6551_v18 = vpop.f32.mrb[113].mxu1  ;;  %v958_v26 = vpop.f32.mrb[114].mxu0  ;;  %v2007_v10 = vpack.c.bf16 %v5561_v31, %v5560_v17  ;;  %v5615_v21 = vld [vmem:[%s7488_s23 + $0x3e1] sm:$0xff] }
 0x1ca   : > { %v8216_v20 = vadd.f32 %v1265_v53, %v1024_v7  ;;  %v1025_v35 = vadd.f32 %v958_v26, %v7947_v25  ;;  %v1268_v59 = vpop.f32.mrb[114].mxu1  ;;  %v6482_v28 = vpop.f32.mrb[115].mxu0  ;;  %v5563_v7 = vld [vmem:[%s7488_s23 + $0x2b9] sm:$0xff] }
 0x1cb   : > { %v6552_v30 = vpop.f32.mrb[115].mxu1  ;;  %v5614_v53 = vld [vmem:[%s7488_s23 + $0x3d9] sm:$0xff] }
 0x1cc   : > { %v8219_v43 = vadd.f32 %v1268_v59, %v1025_v35  ;;  %6732 = vmatmul.mubr.msk.bf16.gmra.mrb[220].mxu0 %vm278_vm2, %v2006_v8  ;;  %v2318_v28 = vpack.c.bf16 %v5615_v21, %v5614_v53 }
 0x1cd   : > { %6802 = vmatmul.mubr.msk.bf16.gmra.mrb[220].mxu1 %vm278_vm2, %v2316_v62  ;;  %6735 = vmatprep.mubr.msk.bf16.mxu0 %vm7434_vm1, %v7433_v2 }
 0x1ce   : > { %6805 = vmatprep.mubr.msk.bf16.mxu1 %vm7434_vm1, %v7433_v2 }
 0x1cf   : > { %v963_v25 = vpop.f32.mrb[116].mxu0 }
 0x1d0   : > { %v1026_v41 = vadd.f32 %v963_v25, %v7959_v40  ;;  %v1273_v39 = vpop.f32.mrb[116].mxu1  ;;  %v6485_v45 = vpop.f32.mrb[117].mxu0  ;;  %v5562_v40 = vld [vmem:[%s7488_s23 + $0x2b1] sm:$0xff] }
 0x1d1   : > { %v6555_v51 = vpop.f32.mrb[117].mxu1  ;;  %v966_v42 = vpop.f32.mrb[118].mxu0  ;;  %v2008_v62 = vpack.c.bf16 %v5563_v7, %v5562_v40  ;;  %v5617_v45 = vld [vmem:[%s7488_s23 + $0x3f1] sm:$0xff] }
 0x1d2   : > { %v8232_v58 = vadd.f32 %v1273_v39, %v1026_v41  ;;  %v1027_v55 = vadd.f32 %v966_v42, %v7961_v49  ;;  %v1276_v60 = vpop.f32.mrb[118].mxu1  ;;  %v6486_v14 = vpop.f32.mrb[119].mxu0  ;;  %v5565_v41 = vld [vmem:[%s7488_s23 + $0x2c9] sm:$0xff] }
 0x1d3   : > { %v6556_v5 = vpop.f32.mrb[119].mxu1  ;;  %v5616_v39 = vld [vmem:[%s7488_s23 + $0x3e9] sm:$0xff] }
 0x1d4   : > { %v8235_v1 = vadd.f32 %v1276_v60, %v1027_v55  ;;  %6736 = vmatmul.mubr.msk.bf16.gmra.mrb[224].mxu0 %vm278_vm2, %v2007_v10  ;;  %v2319_v14 = vpack.c.bf16 %v5617_v45, %v5616_v39 }
 0x1d5   : > { %6806 = vmatmul.mubr.msk.bf16.gmra.mrb[224].mxu1 %vm278_vm2, %v2317_v54  ;;  %6739 = vmatprep.mubr.msk.bf16.mxu0 %vm7434_vm1, %v7433_v2 }
 0x1d6   : > { %6809 = vmatprep.mubr.msk.bf16.mxu1 %vm7434_vm1, %v7433_v2 }
 0x1d7   : > { %v971_v49 = vpop.f32.mrb[120].mxu0 }
 0x1d8   : > { %v1028_v8 = vadd.f32 %v971_v49, %v7973_v4  ;;  %v1281_v18 = vpop.f32.mrb[120].mxu1  ;;  %v6489_v26 = vpop.f32.mrb[121].mxu0  ;;  %v5564_v4 = vld [vmem:[%s7488_s23 + $0x2c1] sm:$0xff] }
 0x1d9   : > { %v6559_v35 = vpop.f32.mrb[121].mxu1  ;;  %v974_v59 = vpop.f32.mrb[122].mxu0  ;;  %v2009_v54 = vpack.c.bf16 %v5565_v41, %v5564_v4  ;;  %v5619_v26 = vld [vmem:[%s7488_s23 + $0x401] sm:$0xff] }
 0x1da   : > { %v8248_v30 = vadd.f32 %v1281_v18, %v1028_v8  ;;  %v1029_v17 = vadd.f32 %v974_v59, %v7975_v11  ;;  %v1284_v31 = vpop.f32.mrb[122].mxu1  ;;  %v6490_v33 = vpop.f32.mrb[123].mxu0  ;;  %v5567_v8 = vld [vmem:[%s7488_s23 + $0x2d9] sm:$0xff] }
 0x1db   : > { %v6560_v34 = vpop.f32.mrb[123].mxu1  ;;  %v5618_v18 = vld [vmem:[%s7488_s23 + $0x3f9] sm:$0xff] }
 0x1dc   : > { %v8251_v25 = vadd.f32 %v1284_v31, %v1029_v17  ;;  %6740 = vmatmul.mubr.msk.bf16.gmra.mrb[228].mxu0 %vm278_vm2, %v2008_v62  ;;  %v2320_v33 = vpack.c.bf16 %v5619_v26, %v5618_v18 }
 0x1dd   : > { %6810 = vmatmul.mubr.msk.bf16.gmra.mrb[228].mxu1 %vm278_vm2, %v2318_v28  ;;  %6743 = vmatprep.mubr.msk.bf16.mxu0 %vm7434_vm1, %v7433_v2 }
 0x1de   : > { %6813 = vmatprep.mubr.msk.bf16.mxu1 %vm7434_vm1, %v7433_v2 }
 0x1df   : > { %v979_v11 = vpop.f32.mrb[124].mxu0 }
 0x1e0   : > { %v1030_v10 = vadd.f32 %v979_v11, %v7987_v29  ;;  %v1289_v51 = vpop.f32.mrb[124].mxu1  ;;  %v6493_v42 = vpop.f32.mrb[125].mxu0  ;;  %v5566_v29 = vld [vmem:[%s7488_s23 + $0x2d1] sm:$0xff] }
 0x1e1   : > { %v6563_v55 = vpop.f32.mrb[125].mxu1  ;;  %v982_v60 = vpop.f32.mrb[126].mxu0  ;;  %v2010_v28 = vpack.c.bf16 %v5567_v8, %v5566_v29  ;;  %v5621_v42 = vld [vmem:[%s7488_s23 + $0x411] sm:$0xff] }
 0x1e2   : > { %v8264_v5 = vadd.f32 %v1289_v51, %v1030_v10  ;;  %v1031_v40 = vadd.f32 %v982_v60, %v7989_v38  ;;  %v1292_v7 = vpop.f32.mrb[126].mxu1  ;;  %v6494_v53 = vpop.f32.mrb[127].mxu0  ;;  %v5569_v10 = vld [vmem:[%s7488_s23 + $0x2e9] sm:$0xff] }
 0x1e3   : > { %v6564_v21 = vpop.f32.mrb[127].mxu1  ;;  %v5620_v51 = vld [vmem:[%s7488_s23 + $0x409] sm:$0xff] }
 0x1e4   : > { %v8267_v49 = vadd.f32 %v1292_v7, %v1031_v40  ;;  %6744 = vmatmul.mubr.msk.bf16.gmra.mrb[232].mxu0 %vm278_vm2, %v2009_v54  ;;  %v2321_v53 = vpack.c.bf16 %v5621_v42, %v5620_v51 }
 0x1e5   : > { %6814 = vmatmul.mubr.msk.bf16.gmra.mrb[232].mxu1 %vm278_vm2, %v2319_v14  ;;  %6747 = vmatprep.mubr.msk.bf16.mxu0 %vm7434_vm1, %v7433_v2 }
 0x1e6   : > { %6817 = vmatprep.mubr.msk.bf16.mxu1 %vm7434_vm1, %v7433_v2 }
 0x1e7   : > { %v987_v38 = vpop.f32.mrb[128].mxu0 }
 0x1e8   : > { %v1032_v62 = vadd.f32 %v987_v38, %v8001_v56  ;;  %v1297_v35 = vpop.f32.mrb[128].mxu1  ;;  %v6497_v59 = vpop.f32.mrb[129].mxu0  ;;  %v5568_v56 = vld [vmem:[%s7488_s23 + $0x2e1] sm:$0xff] }
 0x1e9   : > { %v6567_v17 = vpop.f32.mrb[129].mxu1  ;;  %v990_v31 = vpop.f32.mrb[130].mxu0  ;;  %v2011_v14 = vpack.c.bf16 %v5569_v10, %v5568_v56  ;;  %v5623_v59 = vld [vmem:[%s7488_s23 + $0x421] sm:$0xff] }
 0x1ea   : > { %v8280_v34 = vadd.f32 %v1297_v35, %v1032_v62  ;;  %v1033_v4 = vadd.f32 %v990_v31, %v8003_v6  ;;  %v1300_v41 = vpop.f32.mrb[130].mxu1  ;;  %v6498_v39 = vpop.f32.mrb[131].mxu0  ;;  %v5571_v62 = vld [vmem:[%s7488_s23 + $0x2f9] sm:$0xff] }
 0x1eb   : > { %v6568_v45 = vpop.f32.mrb[131].mxu1  ;;  %v5622_v35 = vld [vmem:[%s7488_s23 + $0x419] sm:$0xff] }
 0x1ec   : > { %v8283_v11 = vadd.f32 %v1300_v41, %v1033_v4  ;;  %6748 = vmatmul.mubr.msk.bf16.gmra.mrb[236].mxu0 %vm278_vm2, %v2010_v28  ;;  %v2322_v39 = vpack.c.bf16 %v5623_v59, %v5622_v35 }
 0x1ed   : > { %6818 = vmatmul.mubr.msk.bf16.gmra.mrb[236].mxu1 %vm278_vm2, %v2320_v33  ;;  %6751 = vmatprep.mubr.msk.bf16.mxu0 %vm7434_vm1, %v7433_v2 }
 0x1ee   : > { %6821 = vmatprep.mubr.msk.bf16.mxu1 %vm7434_vm1, %v7433_v2 }
 0x1ef   : > { %v995_v6 = vpop.f32.mrb[132].mxu0 }
 0x1f0   : > { %v1034_v54 = vadd.f32 %v995_v6, %v8015_v24  ;;  %v1305_v55 = vpop.f32.mrb[132].mxu1  ;;  %v6501_v60 = vpop.f32.mrb[133].mxu0  ;;  %v5570_v24 = vld [vmem:[%s7488_s23 + $0x2f1] sm:$0xff] }
 0x1f1   : > { %v6571_v40 = vpop.f32.mrb[133].mxu1  ;;  %v998_v7 = vpop.f32.mrb[134].mxu0  ;;  %v2012_v33 = vpack.c.bf16 %v5571_v62, %v5570_v24  ;;  %v5625_v60 = vld [vmem:[%s7488_s23 + $0x431] sm:$0xff] }
 0x1f2   : > { %v8296_v21 = vadd.f32 %v1305_v55, %v1034_v54  ;;  %v1035_v29 = vadd.f32 %v998_v7, %v8017_v36  ;;  %v1308_v8 = vpop.f32.mrb[134].mxu1  ;;  %v6502_v18 = vpop.f32.mrb[135].mxu0  ;;  %v5573_v54 = vld [vmem:[%s7488_s23 + $0x309] sm:$0xff] }
 0x1f3   : > { %v6572_v26 = vpop.f32.mrb[135].mxu1  ;;  %v5624_v55 = vld [vmem:[%s7488_s23 + $0x429] sm:$0xff] }
 0x1f4   : > { %v8299_v38 = vadd.f32 %v1308_v8, %v1035_v29  ;;  %6752 = vmatmul.mubr.msk.bf16.gmra.mrb[240].mxu0 %vm278_vm2, %v2011_v14  ;;  %v2323_v18 = vpack.c.bf16 %v5625_v60, %v5624_v55 }
 0x1f5   : > { %6822 = vmatmul.mubr.msk.bf16.gmra.mrb[240].mxu1 %vm278_vm2, %v2321_v53  ;;  %6755 = vmatprep.mubr.msk.bf16.mxu0 %vm7434_vm1, %v7433_v2 }
 0x1f6   : > { %6825 = vmatprep.mubr.msk.bf16.mxu1 %vm7434_vm1, %v7433_v2 }
 0x1f7   : > { %v1488_v36 = vpop.f32.mrb[136].mxu0 }
 0x1f8   : > { %v1623_v28 = vadd.f32 %v1488_v36, %v8030_v0  ;;  %v1799_v17 = vpop.f32.mrb[136].mxu1  ;;  %v6577_v31 = vpop.f32.mrb[137].mxu0  ;;  %v5572_v0 = vld [vmem:[%s7488_s23 + $0x301] sm:$0xff] }
 0x1f9   : > { %v6647_v4 = vpop.f32.mrb[137].mxu1  ;;  %v1491_v41 = vpop.f32.mrb[138].mxu0  ;;  %v2013_v53 = vpack.c.bf16 %v5573_v54, %v5572_v0  ;;  %v5627_v31 = vld [vmem:[%s7488_s23 + $0x441] sm:$0xff] }
 0x1fa   : > { %v8312_v45 = vadd.f32 %v1799_v17, %v1623_v28  ;;  %v1624_v56 = vadd.f32 %v1491_v41, %v8033_v12  ;;  %v1802_v10 = vpop.f32.mrb[138].mxu1  ;;  %v6578_v51 = vpop.f32.mrb[139].mxu0  ;;  %v5575_v28 = vld [vmem:[%s7488_s23 + $0x319] sm:$0xff] }
 0x1fb   : > { %v6648_v42 = vpop.f32.mrb[139].mxu1  ;;  %v5626_v17 = vld [vmem:[%s7488_s23 + $0x439] sm:$0xff] }
 0x1fc   : > { %v8315_v6 = vadd.f32 %v1802_v10, %v1624_v56  ;;  %6756 = vmatmul.mubr.msk.bf16.gmra.mrb[244].mxu0 %vm278_vm2, %v2012_v33  ;;  %v2324_v51 = vpack.c.bf16 %v5627_v31, %v5626_v17 }
 0x1fd   : > { %6826 = vmatmul.mubr.msk.bf16.gmra.mrb[244].mxu1 %vm278_vm2, %v2322_v39  ;;  %6759 = vmatprep.mubr.msk.bf16.mxu0 %vm7434_vm1, %v7433_v2 }
 0x1fe   : > { %6829 = vmatprep.mubr.msk.bf16.mxu1 %vm7434_vm1, %v7433_v2 }
 0x1ff   : > { %v1496_v12 = vpop.f32.mrb[140].mxu0 }
 0x200   : > { %v1625_v14 = vadd.f32 %v1496_v12, %v8046_v37  ;;  %v1807_v40 = vpop.f32.mrb[140].mxu1  ;;  %v6581_v7 = vpop.f32.mrb[141].mxu0  ;;  %v5574_v37 = vld [vmem:[%s7488_s23 + $0x311] sm:$0xff] }
 0x201   : > { %v6651_v29 = vpop.f32.mrb[141].mxu1  ;;  %v1499_v8 = vpop.f32.mrb[142].mxu0  ;;  %v2014_v39 = vpack.c.bf16 %v5575_v28, %v5574_v37  ;;  %v5629_v7 = vld [vmem:[%s7488_s23 + $0x451] sm:$0xff] }
 0x202   : > { %v8328_v26 = vadd.f32 %v1807_v40, %v1625_v14  ;;  %v1626_v24 = vadd.f32 %v1499_v8, %v8049_v47  ;;  %v1810_v62 = vpop.f32.mrb[142].mxu1  ;;  %v6582_v35 = vpop.f32.mrb[143].mxu0  ;;  %v5577_v14 = vld [vmem:[%s7488_s23 + $0x329] sm:$0xff] }
 0x203   : > { %v6652_v59 = vpop.f32.mrb[143].mxu1  ;;  %v5628_v40 = vld [vmem:[%s7488_s23 + $0x449] sm:$0xff] }
 0x204   : > { %v8331_v36 = vadd.f32 %v1810_v62, %v1626_v24  ;;  %6760 = vmatmul.mubr.msk.bf16.gmra.mrb[248].mxu0 %vm278_vm2, %v2013_v53  ;;  %v2325_v35 = vpack.c.bf16 %v5629_v7, %v5628_v40 }
 0x205   : > { %6830 = vmatmul.mubr.msk.bf16.gmra.mrb[248].mxu1 %vm278_vm2, %v2323_v18  ;;  %6763 = vmatprep.mubr.msk.bf16.mxu0 %vm7434_vm1, %v7433_v2 }
 0x206   : > { %6833 = vmatprep.mubr.msk.bf16.mxu1 %vm7434_vm1, %v7433_v2 }
 0x207   : > { %v1504_v47 = vpop.f32.mrb[144].mxu0 }
 0x208   : > { %v1627_v33 = vadd.f32 %v1504_v47, %v8062_v9  ;;  %v1815_v4 = vpop.f32.mrb[144].mxu1  ;;  %v6585_v41 = vpop.f32.mrb[145].mxu0  ;;  %v5576_v9 = vld [vmem:[%s7488_s23 + $0x321] sm:$0xff] }
 0x209   : > { %v6655_v56 = vpop.f32.mrb[145].mxu1  ;;  %v1507_v10 = vpop.f32.mrb[146].mxu0  ;;  %v2015_v18 = vpack.c.bf16 %v5577_v14, %v5576_v9  ;;  %v5631_v41 = vld [vmem:[%s7488_s23 + $0x461] sm:$0xff] }
 0x20a   : > { %v8344_v42 = vadd.f32 %v1815_v4, %v1627_v33  ;;  %v1628_v0 = vadd.f32 %v1507_v10, %v8065_v63  ;;  %v1818_v54 = vpop.f32.mrb[146].mxu1  ;;  %v6586_v55 = vpop.f32.mrb[147].mxu0  ;;  %v5579_v33 = vld [vmem:[%s7488_s23 + $0x339] sm:$0xff] }
 0x20b   : > { %v6656_v60 = vpop.f32.mrb[147].mxu1  ;;  %v5630_v4 = vld [vmem:[%s7488_s23 + $0x459] sm:$0xff] }
 0x20c   : > { %v8347_v12 = vadd.f32 %v1818_v54, %v1628_v0  ;;  %6764 = vmatmul.mubr.msk.bf16.gmra.mrb[252].mxu0 %vm278_vm2, %v2014_v39  ;;  %v2326_v55 = vpack.c.bf16 %v5631_v41, %v5630_v4 }
 0x20d   : > { %6834 = vmatmul.mubr.msk.bf16.gmra.mrb[252].mxu1 %vm278_vm2, %v2324_v51  ;;  %6767 = vmatprep.mubr.msk.bf16.mxu0 %vm7434_vm1, %v7433_v2 }
 0x20e   : > { %6837 = vmatprep.mubr.msk.bf16.mxu1 %vm7434_vm1, %v7433_v2 }
 0x20f   : > { %v1512_v63 = vpop.f32.mrb[148].mxu0 }
 0x210   : > { %v1629_v53 = vadd.f32 %v1512_v63, %v8078_v46  ;;  %v1823_v29 = vpop.f32.mrb[148].mxu1  ;;  %v6589_v8 = vpop.f32.mrb[149].mxu0  ;;  %v5578_v46 = vld [vmem:[%s7488_s23 + $0x331] sm:$0xff] }
 0x211   : > { %v6659_v24 = vpop.f32.mrb[149].mxu1  ;;  %v1515_v62 = vpop.f32.mrb[150].mxu0  ;;  %v2016_v51 = vpack.c.bf16 %v5579_v33, %v5578_v46  ;;  %v5633_v8 = vld [vmem:[%s7488_s23 + $0x471] sm:$0xff] }
 0x212   : > { %v8360_v59 = vadd.f32 %v1823_v29, %v1629_v53  ;;  %v1630_v37 = vadd.f32 %v1515_v62, %v8081_v16  ;;  %v1826_v28 = vpop.f32.mrb[150].mxu1  ;;  %v6590_v17 = vpop.f32.mrb[151].mxu0  ;;  %v5581_v53 = vld [vmem:[%s7488_s23 + $0x349] sm:$0xff] }
 0x213   : > { %v6660_v31 = vpop.f32.mrb[151].mxu1  ;;  %v5632_v29 = vld [vmem:[%s7488_s23 + $0x469] sm:$0xff] }
 0x214   : > { %v8363_v47 = vadd.f32 %v1826_v28, %v1630_v37  ;;  %6768 = vmatmul.mubr.msk.bf16.gmra.mrb[0].mxu0 %vm278_vm2, %v2015_v18  ;;  %v2327_v17 = vpack.c.bf16 %v5633_v8, %v5632_v29 }
 0x215   : > { %6838 = vmatmul.mubr.msk.bf16.gmra.mrb[0].mxu1 %vm278_vm2, %v2325_v35  ;;  %6771 = vmatprep.mubr.msk.bf16.mxu0 %vm7434_vm1, %v7433_v2 }
 0x216   : > { %6841 = vmatprep.mubr.msk.bf16.mxu1 %vm7434_vm1, %v7433_v2 }
 0x217   : > { %v1520_v16 = vpop.f32.mrb[152].mxu0 }
 0x218   : > { %v1631_v39 = vadd.f32 %v1520_v16, %v8094_v19  ;;  %v1831_v56 = vpop.f32.mrb[152].mxu1  ;;  %v6593_v10 = vpop.f32.mrb[153].mxu0  ;;  %v5580_v19 = vld [vmem:[%s7488_s23 + $0x341] sm:$0xff] }
 0x219   : > { %v6663_v0 = vpop.f32.mrb[153].mxu1  ;;  %v1523_v54 = vpop.f32.mrb[154].mxu0  ;;  %v2017_v35 = vpack.c.bf16 %v5581_v53, %v5580_v19  ;;  %v5635_v10 = vld [vmem:[%s7488_s23 + $0x481] sm:$0xff] }
 0x21a   : > { %v8376_v60 = vadd.f32 %v1831_v56, %v1631_v39  ;;  %v1632_v9 = vadd.f32 %v1523_v54, %v8097_v32  ;;  %v1834_v14 = vpop.f32.mrb[154].mxu1  ;;  %v6594_v40 = vpop.f32.mrb[155].mxu0  ;;  %v5583_v39 = vld [vmem:[%s7488_s23 + $0x359] sm:$0xff] }
 0x21b   : > { %v6664_v7 = vpop.f32.mrb[155].mxu1  ;;  %v5634_v56 = vld [vmem:[%s7488_s23 + $0x479] sm:$0xff] }
 0x21c   : > { %v8379_v63 = vadd.f32 %v1834_v14, %v1632_v9  ;;  %6772 = vmatmul.mubr.msk.bf16.gmra.mrb[4].mxu0 %vm278_vm2, %v2016_v51  ;;  %v2328_v40 = vpack.c.bf16 %v5635_v10, %v5634_v56 }
 0x21d   : > { %6842 = vmatmul.mubr.msk.bf16.gmra.mrb[4].mxu1 %vm278_vm2, %v2326_v55  ;;  %6775 = vmatprep.mubr.msk.bf16.mxu0 %vm7434_vm1, %v7433_v2 }
 0x21e   : > { %6845 = vmatprep.mubr.msk.bf16.mxu1 %vm7434_vm1, %v7433_v2 }
 0x21f   : > { %v1528_v32 = vpop.f32.mrb[156].mxu0 }
 0x220   : > { %v1633_v18 = vadd.f32 %v1528_v32, %v8110_v52  ;;  %v1839_v24 = vpop.f32.mrb[156].mxu1  ;;  %v6597_v62 = vpop.f32.mrb[157].mxu0  ;;  %v5582_v52 = vld [vmem:[%s7488_s23 + $0x351] sm:$0xff] }
 0x221   : > { %v6667_v37 = vpop.f32.mrb[157].mxu1  ;;  %v1531_v28 = vpop.f32.mrb[158].mxu0  ;;  %v2018_v55 = vpack.c.bf16 %v5583_v39, %v5582_v52  ;;  %v5673_v62 = vld [vmem:[%s7488_s23 + $0x141] sm:$0xff] }
 0x222   : > { %v8392_v31 = vadd.f32 %v1839_v24, %v1633_v18  ;;  %v1634_v46 = vadd.f32 %v1531_v28, %v8113_v48  ;;  %v1842_v33 = vpop.f32.mrb[158].mxu1  ;;  %v6598_v4 = vpop.f32.mrb[159].mxu0  ;;  %v2589_v18 = vld [vmem:[%s7488_s23 + $0x19] sm:$0xff] }
 0x223   : > { %v6668_v41 = vpop.f32.mrb[159].mxu1  ;;  %v5672_v24 = vld [vmem:[%s7488_s23 + $0x139] sm:$0xff] }
 0x224   : > { %v8395_v16 = vadd.f32 %v1842_v33, %v1634_v46  ;;  %6776 = vmatmul.mubr.msk.bf16.gmra.mrb[8].mxu0 %vm278_vm2, %v2017_v35  ;;  %v5724_v35 = vld [vmem:[%s9708_s1 + $0x28] sm:$0xf]  ;;  %v5776_v33 = vld [vmem:[%s9708_s1 + $0x2c] sm:$0xf]  ;;  %v2932_v52 = vpack.c.bf16 %v5673_v62, %v5672_v24 }
 0x225   : > { %6846 = vmatmul.mubr.msk.bf16.gmra.mrb[8].mxu1 %vm278_vm2, %v2327_v17  ;;  %6779 = vmatprep.mubr.msk.bf16.mxu0 %vm7434_vm1, %v7433_v2 }
 0x226   : > { %6849 = vmatprep.mubr.msk.bf16.mxu1 %vm7434_vm1, %v7433_v2 }
 0x227   : > { %v1536_v48 = vpop.f32.mrb[160].mxu0 }
 0x228   : > { %v1635_v51 = vadd.f32 %v1536_v48, %v8126_v27  ;;  %v1847_v0 = vpop.f32.mrb[160].mxu1  ;;  %v6601_v54 = vpop.f32.mrb[161].mxu0  ;;  %v2588_v27 = vld [vmem:[%s7488_s23 + $0x11] sm:$0xff]  ;;  %v3313_v48 = vsel %vm330_vm0, %v5724_v35, 0 }
 0x229   : > { %v6671_v9 = vpop.f32.mrb[161].mxu1  ;;  %v1539_v14 = vpop.f32.mrb[162].mxu0  ;;  %v2622_v46 = vpack.c.bf16 %v2589_v18, %v2588_v27 }
 0x22a   : > { %v8408_v7 = vadd.f32 %v1847_v0, %v1635_v51  ;;  %v1636_v19 = vadd.f32 %v1539_v14, %v8129_v3  ;;  %v1850_v53 = vpop.f32.mrb[162].mxu1  ;;  %v6602_v29 = vpop.f32.mrb[163].mxu0  ;;  %v3623_v0 = vsel %vm330_vm0, %v5776_v33, 0  ;;  %v2591_v9 = vld [vmem:[%s7488_s23 + $0x29] sm:$0xff]  ;;  %v5675_v14 = vld [vmem:[%s7488_s23 + $0x151] sm:$0xff]  ;;  %v5676_v33 = vld [vmem:[%s7488_s23 + $0x159] sm:$0xff] }
 0x22b   : > { %v6672_v8 = vpop.f32.mrb[163].mxu1 }
 0x22c   : > { %v8411_v32 = vadd.f32 %v1850_v53, %v1636_v19  ;;  %6780 = vmatmul.mubr.msk.bf16.gmra.mrb[12].mxu0 %vm278_vm2, %v2018_v55  ;;  %v2590_v55 = vld [vmem:[%s7488_s23 + $0x21] sm:$0xff] }
 0x22d   : > { %6850 = vmatmul.mubr.msk.bf16.gmra.mrb[12].mxu1 %vm278_vm2, %v2328_v40  ;;  %6855 = vmatprep.mubr.msk.bf16.mxu0 %vm7434_vm1, %v7433_v2  ;;  %v2623_v8 = vpack.c.bf16 %v2591_v9, %v2590_v55 }
 0x22e   : > { %6925 = vmatprep.mubr.msk.bf16.mxu1 %vm7434_vm1, %v7433_v2 }
 0x22f   : > { %v1544_v3 = vpop.f32.mrb[164].mxu0 }
 0x230   : > { %v1637_v37 = vadd.f32 %v1544_v3, %v8148_v61  ;;  %v1855_v28 = vpop.f32.mrb[164].mxu1  ;;  %v6605_v17 = vpop.f32.mrb[165].mxu0 }
 0x231   : > { %v6675_v4 = vpop.f32.mrb[165].mxu1  ;;  %v1547_v41 = vpop.f32.mrb[166].mxu0  ;;  %v2592_v17 = vld [vmem:[%s7488_s23 + $0x31] sm:$0xff] }
 0x232   : > { %v8430_v39 = vadd.f32 %v1855_v28, %v1637_v37  ;;  %v1638_v56 = vadd.f32 %v1547_v41, %v8153_v15  ;;  %v1858_v10 = vpop.f32.mrb[166].mxu1  ;;  %v6606_v61 = vpop.f32.mrb[167].mxu0  ;;  %v5674_v15 = vld [vmem:[%s7488_s23 + $0x149] sm:$0xff]  ;;  %v5677_v4 = vld [vmem:[%s7488_s23 + $0x161] sm:$0xff] }
 0x233   : > { %v6676_v51 = vpop.f32.mrb[167].mxu1  ;;  %v2933_v24 = vpack.c.bf16 %v5675_v14, %v5674_v15 }
 0x234   : > { %v8435_v54 = vadd.f32 %v1858_v10, %v1638_v56  ;;  %6856 = vmatmul.mubr.msk.bf16.vlgmr.msra.gmra.mrb[16].mxu0 %vm278_vm2, %v2622_v46  ;;  %v2593_v46 = vld [vmem:[%s7488_s23 + $0x39] sm:$0xff]  ;;  %v2934_v51 = vpack.c.bf16 %v5677_v4, %v5676_v33 }
 0x235   : > { %6926 = vmatmul.mubr.msk.bf16.vlgmr.msra.gmra.mrb[16].mxu1 %vm278_vm2, %v2932_v52  ;;  %6994 = vmatpush3.bf16.msra.mxu0 %v3313_v48  ;;  %v2624_v10 = vpack.c.bf16 %v2593_v46, %v2592_v17 }
 0x236   : > { %7064 = vmatpush3.bf16.msra.mxu1 %v3623_v0  ;;  %6859 = vmatprep.mubr.msk.bf16.mxu0 %vm7434_vm1, %v7433_v2 }
 0x237   : > { %v1552_v40 = vpop.f32.mrb[168].mxu0  ;;  %6929 = vmatprep.mubr.msk.bf16.mxu1 %vm7434_vm1, %v7433_v2  ;;  %7133 = vmatprep.subr.bf16.mxu0 %v7433_v2 }
 0x238   : > { %v1639_v19 = vadd.f32 %v1552_v40, %v8168_v44  ;;  %v1863_v53 = vpop.f32.mrb[168].mxu1  ;;  %v6609_v29 = vpop.f32.mrb[169].mxu0  ;;  %7203 = vmatprep.subr.bf16.mxu1 %v7433_v2 }
 0x239   : > { %v6679_v27 = vpop.f32.mrb[169].mxu1  ;;  %v1555_v18 = vpop.f32.mrb[170].mxu0  ;;  %v5679_v29 = vld [vmem:[%s7488_s23 + $0x171] sm:$0xff] }
 0x23a   : > { %v8450_v62 = vadd.f32 %v1863_v53, %v1639_v19  ;;  %v1640_v3 = vadd.f32 %v1555_v18, %v8171_v13  ;;  %v1866_v35 = vpop.f32.mrb[170].mxu1  ;;  %v6610_v37 = vpop.f32.mrb[171].mxu0  ;;  %v2595_v19 = vld [vmem:[%s7488_s23 + $0x49] sm:$0xff] }
 0x23b   : > { %v6680_v28 = vpop.f32.mrb[171].mxu1  ;;  %v5678_v53 = vld [vmem:[%s7488_s23 + $0x169] sm:$0xff] }
 0x23c   : > { %v8453_v44 = vadd.f32 %v1866_v35, %v1640_v3  ;;  %6860 = vmatmul.mubr.msk.bf16.gmra.mrb[20].mxu0 %vm278_vm2, %v2623_v8  ;;  %v2935_v37 = vpack.c.bf16 %v5679_v29, %v5678_v53 }
 0x23d   : > { %6930 = vmatmul.mubr.msk.bf16.gmra.mrb[20].mxu1 %vm278_vm2, %v2933_v24  ;;  %6863 = vmatprep.mubr.msk.bf16.mxu0 %vm7434_vm1, %v7433_v2 }
 0x23e   : > { %6933 = vmatprep.mubr.msk.bf16.mxu1 %vm7434_vm1, %v7433_v2 }
 0x23f   : > { %v1560_v13 = vpop.f32.mrb[172].mxu0 }
 0x240   : > { %v1641_v41 = vadd.f32 %v1560_v13, %v8184_v57  ;;  %v1871_v52 = vpop.f32.mrb[172].mxu1  ;;  %v6613_v56 = vpop.f32.mrb[173].mxu0  ;;  %v2594_v57 = vld [vmem:[%s7488_s23 + $0x41] sm:$0xff] }
 0x241   : > { %v6683_v61 = vpop.f32.mrb[173].mxu1  ;;  %v1563_v48 = vpop.f32.mrb[174].mxu0  ;;  %v2625_v24 = vpack.c.bf16 %v2595_v19, %v2594_v57  ;;  %v5681_v56 = vld [vmem:[%s7488_s23 + $0x181] sm:$0xff] }
 0x242   : > { %v8466_v0 = vadd.f32 %v1871_v52, %v1641_v41  ;;  %v1642_v55 = vadd.f32 %v1563_v48, %v8187_v23  ;;  %v1874_v9 = vpop.f32.mrb[174].mxu1  ;;  %v6614_v15 = vpop.f32.mrb[175].mxu0  ;;  %v2597_v41 = vld [vmem:[%s7488_s23 + $0x59] sm:$0xff] }
 0x243   : > { %v6684_v14 = vpop.f32.mrb[175].mxu1  ;;  %v5680_v52 = vld [vmem:[%s7488_s23 + $0x179] sm:$0xff] }
 0x244   : > { %v8469_v40 = vadd.f32 %v1874_v9, %v1642_v55  ;;  %6864 = vmatmul.mubr.msk.bf16.gmra.mrb[24].mxu0 %vm278_vm2, %v2624_v10  ;;  %v2936_v15 = vpack.c.bf16 %v5681_v56, %v5680_v52 }
 0x245   : > { %6934 = vmatmul.mubr.msk.bf16.gmra.mrb[24].mxu1 %vm278_vm2, %v2934_v51  ;;  %6867 = vmatprep.mubr.msk.bf16.mxu0 %vm7434_vm1, %v7433_v2 }
 0x246   : > { %6937 = vmatprep.mubr.msk.bf16.mxu1 %vm7434_vm1, %v7433_v2 }
 0x247   : > { %v1568_v23 = vpop.f32.mrb[176].mxu0 }
 0x248   : > { %v1643_v8 = vadd.f32 %v1568_v23, %v8200_v50  ;;  %v1879_v27 = vpop.f32.mrb[176].mxu1  ;;  %v6617_v18 = vpop.f32.mrb[177].mxu0  ;;  %v2596_v50 = vld [vmem:[%s7488_s23 + $0x51] sm:$0xff] }
 0x249   : > { %v6687_v3 = vpop.f32.mrb[177].mxu1  ;;  %v1571_v35 = vpop.f32.mrb[178].mxu0  ;;  %v2626_v51 = vpack.c.bf16 %v2597_v41, %v2596_v50  ;;  %v5683_v18 = vld [vmem:[%s7488_s23 + $0x191] sm:$0xff] }
 0x24a   : > { %v8482_v28 = vadd.f32 %v1879_v27, %v1643_v8  ;;  %v1644_v17 = vadd.f32 %v1571_v35, %v8203_v22  ;;  %v1882_v46 = vpop.f32.mrb[178].mxu1  ;;  %v6618_v33 = vpop.f32.mrb[179].mxu0  ;;  %v2599_v8 = vld [vmem:[%s7488_s23 + $0x69] sm:$0xff] }
 0x24b   : > { %v6688_v4 = vpop.f32.mrb[179].mxu1  ;;  %v5682_v27 = vld [vmem:[%s7488_s23 + $0x189] sm:$0xff] }
 0x24c   : > { %v8485_v13 = vadd.f32 %v1882_v46, %v1644_v17  ;;  %6868 = vmatmul.mubr.msk.bf16.gmra.mrb[28].mxu0 %vm278_vm2, %v2625_v24  ;;  %v2937_v33 = vpack.c.bf16 %v5683_v18, %v5682_v27 }
 0x24d   : > { %6938 = vmatmul.mubr.msk.bf16.gmra.mrb[28].mxu1 %vm278_vm2, %v2935_v37  ;;  %6871 = vmatprep.mubr.msk.bf16.mxu0 %vm7434_vm1, %v7433_v2 }
 0x24e   : > { %6941 = vmatprep.mubr.msk.bf16.mxu1 %vm7434_vm1, %v7433_v2 }
 0x24f   : > { %v1576_v22 = vpop.f32.mrb[180].mxu0 }
 0x250   : > { %v1645_v10 = vadd.f32 %v1576_v22, %v8216_v20  ;;  %v1887_v61 = vpop.f32.mrb[180].mxu1  ;;  %v6621_v48 = vpop.f32.mrb[181].mxu0  ;;  %v2598_v20 = vld [vmem:[%s7488_s23 + $0x61] sm:$0xff] }
 0x251   : > { %v6691_v55 = vpop.f32.mrb[181].mxu1  ;;  %v1579_v9 = vpop.f32.mrb[182].mxu0  ;;  %v2627_v37 = vpack.c.bf16 %v2599_v8, %v2598_v20  ;;  %v5685_v48 = vld [vmem:[%s7488_s23 + $0x1a1] sm:$0xff] }
 0x252   : > { %v8498_v14 = vadd.f32 %v1887_v61, %v1645_v10  ;;  %v1646_v57 = vadd.f32 %v1579_v9, %v8219_v43  ;;  %v1890_v19 = vpop.f32.mrb[182].mxu1  ;;  %v6622_v53 = vpop.f32.mrb[183].mxu0  ;;  %v2601_v10 = vld [vmem:[%s7488_s23 + $0x79] sm:$0xff] }
 0x253   : > { %v6692_v29 = vpop.f32.mrb[183].mxu1  ;;  %v5684_v61 = vld [vmem:[%s7488_s23 + $0x199] sm:$0xff] }
 0x254   : > { %v8501_v23 = vadd.f32 %v1890_v19, %v1646_v57  ;;  %6872 = vmatmul.mubr.msk.bf16.gmra.mrb[32].mxu0 %vm278_vm2, %v2626_v51  ;;  %v2938_v53 = vpack.c.bf16 %v5685_v48, %v5684_v61 }
 0x255   : > { %6942 = vmatmul.mubr.msk.bf16.gmra.mrb[32].mxu1 %vm278_vm2, %v2936_v15  ;;  %6875 = vmatprep.mubr.msk.bf16.mxu0 %vm7434_vm1, %v7433_v2 }
 0x256   : > { %6945 = vmatprep.mubr.msk.bf16.mxu1 %vm7434_vm1, %v7433_v2 }
 0x257   : > { %v1584_v43 = vpop.f32.mrb[184].mxu0 }
 0x258   : > { %v1647_v24 = vadd.f32 %v1584_v43, %v8232_v58  ;;  %v1895_v3 = vpop.f32.mrb[184].mxu1  ;;  %v6625_v35 = vpop.f32.mrb[185].mxu0  ;;  %v2600_v58 = vld [vmem:[%s7488_s23 + $0x71] sm:$0xff] }
 0x259   : > { %v6695_v17 = vpop.f32.mrb[185].mxu1  ;;  %v1587_v46 = vpop.f32.mrb[186].mxu0  ;;  %v2628_v15 = vpack.c.bf16 %v2601_v10, %v2600_v58  ;;  %v5687_v35 = vld [vmem:[%s7488_s23 + $0x1b1] sm:$0xff] }
 0x25a   : > { %v8514_v4 = vadd.f32 %v1895_v3, %v1647_v24  ;;  %v1648_v50 = vadd.f32 %v1587_v46, %v8235_v1  ;;  %v1898_v41 = vpop.f32.mrb[186].mxu1  ;;  %v6626_v52 = vpop.f32.mrb[187].mxu0  ;;  %v2603_v24 = vld [vmem:[%s7488_s23 + $0x89] sm:$0xff] }
 0x25b   : > { %v6696_v56 = vpop.f32.mrb[187].mxu1  ;;  %v5686_v3 = vld [vmem:[%s7488_s23 + $0x1a9] sm:$0xff] }
 0x25c   : > { %v8517_v22 = vadd.f32 %v1898_v41, %v1648_v50  ;;  %6876 = vmatmul.mubr.msk.bf16.gmra.mrb[36].mxu0 %vm278_vm2, %v2627_v37  ;;  %v2939_v52 = vpack.c.bf16 %v5687_v35, %v5686_v3 }
 0x25d   : > { %6946 = vmatmul.mubr.msk.bf16.gmra.mrb[36].mxu1 %vm278_vm2, %v2937_v33  ;;  %6879 = vmatprep.mubr.msk.bf16.mxu0 %vm7434_vm1, %v7433_v2 }
 0x25e   : > { %6949 = vmatprep.mubr.msk.bf16.mxu1 %vm7434_vm1, %v7433_v2 }
 0x25f   : > { %v1592_v1 = vpop.f32.mrb[188].mxu0 }
 0x260   : > { %v1649_v51 = vadd.f32 %v1592_v1, %v8248_v30  ;;  %v1903_v55 = vpop.f32.mrb[188].mxu1  ;;  %v6629_v9 = vpop.f32.mrb[189].mxu0  ;;  %v2602_v30 = vld [vmem:[%s7488_s23 + $0x81] sm:$0xff] }
 0x261   : > { %v6699_v57 = vpop.f32.mrb[189].mxu1  ;;  %v1595_v19 = vpop.f32.mrb[190].mxu0  ;;  %v2629_v33 = vpack.c.bf16 %v2603_v24, %v2602_v30  ;;  %v5689_v9 = vld [vmem:[%s7488_s23 + $0x1c1] sm:$0xff] }
 0x262   : > { %v8530_v29 = vadd.f32 %v1903_v55, %v1649_v51  ;;  %v1650_v20 = vadd.f32 %v1595_v19, %v8251_v25  ;;  %v1906_v8 = vpop.f32.mrb[190].mxu1  ;;  %v6630_v27 = vpop.f32.mrb[191].mxu0  ;;  %v2605_v51 = vld [vmem:[%s7488_s23 + $0x99] sm:$0xff] }
 0x263   : > { %v6700_v18 = vpop.f32.mrb[191].mxu1  ;;  %v5688_v55 = vld [vmem:[%s7488_s23 + $0x1b9] sm:$0xff] }
 0x264   : > { %v8533_v43 = vadd.f32 %v1906_v8, %v1650_v20  ;;  %6880 = vmatmul.mubr.msk.bf16.gmra.mrb[40].mxu0 %vm278_vm2, %v2628_v15  ;;  %v2940_v27 = vpack.c.bf16 %v5689_v9, %v5688_v55 }
 0x265   : > { %6950 = vmatmul.mubr.msk.bf16.gmra.mrb[40].mxu1 %vm278_vm2, %v2938_v53  ;;  %6883 = vmatprep.mubr.msk.bf16.mxu0 %vm7434_vm1, %v7433_v2 }
 0x266   : > { %6953 = vmatprep.mubr.msk.bf16.mxu1 %vm7434_vm1, %v7433_v2 }
 0x267   : > { %v1600_v25 = vpop.f32.mrb[192].mxu0 }
 0x268   : > { %v1651_v37 = vadd.f32 %v1600_v25, %v8264_v5  ;;  %v1911_v17 = vpop.f32.mrb[192].mxu1  ;;  %v6633_v46 = vpop.f32.mrb[193].mxu0  ;;  %v2604_v5 = vld [vmem:[%s7488_s23 + $0x91] sm:$0xff] }
 0x269   : > { %v6703_v50 = vpop.f32.mrb[193].mxu1  ;;  %v1603_v41 = vpop.f32.mrb[194].mxu0  ;;  %v2630_v53 = vpack.c.bf16 %v2605_v51, %v2604_v5  ;;  %v5691_v46 = vld [vmem:[%s7488_s23 + $0x1d1] sm:$0xff] }
 0x26a   : > { %v8546_v56 = vadd.f32 %v1911_v17, %v1651_v37  ;;  %v1652_v58 = vadd.f32 %v1603_v41, %v8267_v49  ;;  %v1914_v10 = vpop.f32.mrb[194].mxu1  ;;  %v6634_v61 = vpop.f32.mrb[195].mxu0  ;;  %v2607_v37 = vld [vmem:[%s7488_s23 + $0xa9] sm:$0xff] }
 0x26b   : > { %v6704_v48 = vpop.f32.mrb[195].mxu1  ;;  %v5690_v17 = vld [vmem:[%s7488_s23 + $0x1c9] sm:$0xff] }
 0x26c   : > { %v8549_v1 = vadd.f32 %v1914_v10, %v1652_v58  ;;  %6884 = vmatmul.mubr.msk.bf16.gmra.mrb[44].mxu0 %vm278_vm2, %v2629_v33  ;;  %v2941_v61 = vpack.c.bf16 %v5691_v46, %v5690_v17 }
 0x26d   : > { %6954 = vmatmul.mubr.msk.bf16.gmra.mrb[44].mxu1 %vm278_vm2, %v2939_v52  ;;  %6887 = vmatprep.mubr.msk.bf16.mxu0 %vm7434_vm1, %v7433_v2 }
 0x26e   : > { %6957 = vmatprep.mubr.msk.bf16.mxu1 %vm7434_vm1, %v7433_v2 }
 0x26f   : > { %v1608_v49 = vpop.f32.mrb[196].mxu0 }
 0x270   : > { %v1653_v15 = vadd.f32 %v1608_v49, %v8280_v34  ;;  %v1919_v57 = vpop.f32.mrb[196].mxu1  ;;  %v6637_v19 = vpop.f32.mrb[197].mxu0  ;;  %v2606_v34 = vld [vmem:[%s7488_s23 + $0xa1] sm:$0xff] }
 0x271   : > { %v6707_v20 = vpop.f32.mrb[197].mxu1  ;;  %v1611_v8 = vpop.f32.mrb[198].mxu0  ;;  %v2631_v52 = vpack.c.bf16 %v2607_v37, %v2606_v34  ;;  %v5693_v19 = vld [vmem:[%s7488_s23 + $0x1e1] sm:$0xff] }
 0x272   : > { %v8562_v18 = vadd.f32 %v1919_v57, %v1653_v15  ;;  %v1654_v30 = vadd.f32 %v1611_v8, %v8283_v11  ;;  %v1922_v24 = vpop.f32.mrb[198].mxu1  ;;  %v6638_v3 = vpop.f32.mrb[199].mxu0  ;;  %v2609_v15 = vld [vmem:[%s7488_s23 + $0xb9] sm:$0xff] }
 0x273   : > { %v6708_v35 = vpop.f32.mrb[199].mxu1  ;;  %v5692_v57 = vld [vmem:[%s7488_s23 + $0x1d9] sm:$0xff] }
 0x274   : > { %v8565_v25 = vadd.f32 %v1922_v24, %v1654_v30  ;;  %6888 = vmatmul.mubr.msk.bf16.gmra.mrb[48].mxu0 %vm278_vm2, %v2630_v53  ;;  %v2942_v3 = vpack.c.bf16 %v5693_v19, %v5692_v57 }
 0x275   : > { %6958 = vmatmul.mubr.msk.bf16.gmra.mrb[48].mxu1 %vm278_vm2, %v2940_v27  ;;  %6891 = vmatprep.mubr.msk.bf16.mxu0 %vm7434_vm1, %v7433_v2 }
 0x276   : > { %6961 = vmatprep.mubr.msk.bf16.mxu1 %vm7434_vm1, %v7433_v2 }
 0x277   : > { %v1616_v11 = vpop.f32.mrb[200].mxu0 }
 0x278   : > { %v1655_v33 = vadd.f32 %v1616_v11, %v8296_v21  ;;  %v1927_v50 = vpop.f32.mrb[200].mxu1  ;;  %v6641_v41 = vpop.f32.mrb[201].mxu0  ;;  %v2608_v21 = vld [vmem:[%s7488_s23 + $0xb1] sm:$0xff] }
 0x279   : > { %v6711_v58 = vpop.f32.mrb[201].mxu1  ;;  %v1619_v10 = vpop.f32.mrb[202].mxu0  ;;  %v2632_v27 = vpack.c.bf16 %v2609_v15, %v2608_v21  ;;  %v5695_v41 = vld [vmem:[%s7488_s23 + $0x1f1] sm:$0xff] }
 0x27a   : > { %v8578_v48 = vadd.f32 %v1927_v50, %v1655_v33  ;;  %v1656_v5 = vadd.f32 %v1619_v10, %v8299_v38  ;;  %v1930_v51 = vpop.f32.mrb[202].mxu1  ;;  %v6642_v55 = vpop.f32.mrb[203].mxu0  ;;  %v2611_v33 = vld [vmem:[%s7488_s23 + $0xc9] sm:$0xff] }
 0x27b   : > { %v6712_v9 = vpop.f32.mrb[203].mxu1  ;;  %v5694_v50 = vld [vmem:[%s7488_s23 + $0x1e9] sm:$0xff] }
 0x27c   : > { %v8581_v49 = vadd.f32 %v1930_v51, %v1656_v5  ;;  %6892 = vmatmul.mubr.msk.bf16.gmra.mrb[52].mxu0 %vm278_vm2, %v2631_v52  ;;  %v2943_v55 = vpack.c.bf16 %v5695_v41, %v5694_v50 }
 0x27d   : > { %6962 = vmatmul.mubr.msk.bf16.gmra.mrb[52].mxu1 %vm278_vm2, %v2941_v61  ;;  %6895 = vmatprep.mubr.msk.bf16.mxu0 %vm7434_vm1, %v7433_v2 }
 0x27e   : > { %6965 = vmatprep.mubr.msk.bf16.mxu1 %vm7434_vm1, %v7433_v2 }
 0x27f   : > { %v2109_v38 = vpop.f32.mrb[204].mxu0 }
 0x280   : > { %v2244_v53 = vadd.f32 %v2109_v38, %v8312_v45  ;;  %v2419_v20 = vpop.f32.mrb[204].mxu1  ;;  %v6717_v8 = vpop.f32.mrb[205].mxu0  ;;  %v2610_v45 = vld [vmem:[%s7488_s23 + $0xc1] sm:$0xff] }
 0x281   : > { %v6787_v30 = vpop.f32.mrb[205].mxu1  ;;  %v2112_v24 = vpop.f32.mrb[206].mxu0  ;;  %v2633_v61 = vpack.c.bf16 %v2611_v33, %v2610_v45  ;;  %v5697_v8 = vld [vmem:[%s7488_s23 + $0x201] sm:$0xff] }
 0x282   : > { %v8594_v35 = vadd.f32 %v2419_v20, %v2244_v53  ;;  %v2245_v34 = vadd.f32 %v2112_v24, %v8315_v6  ;;  %v2422_v37 = vpop.f32.mrb[206].mxu1  ;;  %v6718_v17 = vpop.f32.mrb[207].mxu0  ;;  %v2613_v53 = vld [vmem:[%s7488_s23 + $0xd9] sm:$0xff] }
 0x283   : > { %v6788_v46 = vpop.f32.mrb[207].mxu1  ;;  %v5696_v20 = vld [vmem:[%s7488_s23 + $0x1f9] sm:$0xff] }
 0x284   : > { %v8597_v11 = vadd.f32 %v2422_v37, %v2245_v34  ;;  %6896 = vmatmul.mubr.msk.bf16.gmra.mrb[56].mxu0 %vm278_vm2, %v2632_v27  ;;  %v2944_v17 = vpack.c.bf16 %v5697_v8, %v5696_v20 }
 0x285   : > { %6966 = vmatmul.mubr.msk.bf16.gmra.mrb[56].mxu1 %vm278_vm2, %v2942_v3  ;;  %6899 = vmatprep.mubr.msk.bf16.mxu0 %vm7434_vm1, %v7433_v2 }
 0x286   : > { %6969 = vmatprep.mubr.msk.bf16.mxu1 %vm7434_vm1, %v7433_v2 }
 0x287   : > { %v2117_v6 = vpop.f32.mrb[208].mxu0 }
 0x288   : > { %v2246_v52 = vadd.f32 %v2117_v6, %v8328_v26  ;;  %v2427_v58 = vpop.f32.mrb[208].mxu1  ;;  %v6721_v10 = vpop.f32.mrb[209].mxu0  ;;  %v2612_v26 = vld [vmem:[%s7488_s23 + $0xd1] sm:$0xff] }
 0x289   : > { %v6791_v5 = vpop.f32.mrb[209].mxu1  ;;  %v2120_v51 = vpop.f32.mrb[210].mxu0  ;;  %v2634_v3 = vpack.c.bf16 %v2613_v53, %v2612_v26  ;;  %v5699_v10 = vld [vmem:[%s7488_s23 + $0x211] sm:$0xff] }
 0x28a   : > { %v8610_v9 = vadd.f32 %v2427_v58, %v2246_v52  ;;  %v2247_v21 = vadd.f32 %v2120_v51, %v8331_v36  ;;  %v2430_v15 = vpop.f32.mrb[210].mxu1  ;;  %v6722_v57 = vpop.f32.mrb[211].mxu0  ;;  %v2615_v52 = vld [vmem:[%s7488_s23 + $0xe9] sm:$0xff] }
 0x28b   : > { %v6792_v19 = vpop.f32.mrb[211].mxu1  ;;  %v5698_v58 = vld [vmem:[%s7488_s23 + $0x209] sm:$0xff] }
 0x28c   : > { %v8613_v38 = vadd.f32 %v2430_v15, %v2247_v21  ;;  %6900 = vmatmul.mubr.msk.bf16.gmra.mrb[60].mxu0 %vm278_vm2, %v2633_v61  ;;  %v2945_v57 = vpack.c.bf16 %v5699_v10, %v5698_v58 }
 0x28d   : > { %6970 = vmatmul.mubr.msk.bf16.gmra.mrb[60].mxu1 %vm278_vm2, %v2943_v55  ;;  %6903 = vmatprep.mubr.msk.bf16.mxu0 %vm7434_vm1, %v7433_v2 }
 0x28e   : > { %6973 = vmatprep.mubr.msk.bf16.mxu1 %vm7434_vm1, %v7433_v2 }
 0x28f   : > { %v2125_v36 = vpop.f32.mrb[212].mxu0 }
 0x290   : > { %v2248_v27 = vadd.f32 %v2125_v36, %v8344_v42  ;;  %v2435_v30 = vpop.f32.mrb[212].mxu1  ;;  %v6725_v24 = vpop.f32.mrb[213].mxu0  ;;  %v2614_v42 = vld [vmem:[%s7488_s23 + $0xe1] sm:$0xff] }
 0x291   : > { %v6795_v34 = vpop.f32.mrb[213].mxu1  ;;  %v2128_v37 = vpop.f32.mrb[214].mxu0  ;;  %v2635_v55 = vpack.c.bf16 %v2615_v52, %v2614_v42  ;;  %v5701_v24 = vld [vmem:[%s7488_s23 + $0x221] sm:$0xff] }
 0x292   : > { %v8626_v46 = vadd.f32 %v2435_v30, %v2248_v27  ;;  %v2249_v45 = vadd.f32 %v2128_v37, %v8347_v12  ;;  %v2438_v33 = vpop.f32.mrb[214].mxu1  ;;  %v6726_v50 = vpop.f32.mrb[215].mxu0  ;;  %v2617_v27 = vld [vmem:[%s7488_s23 + $0xf9] sm:$0xff] }
 0x293   : > { %v6796_v41 = vpop.f32.mrb[215].mxu1  ;;  %v5700_v30 = vld [vmem:[%s7488_s23 + $0x219] sm:$0xff] }
 0x294   : > { %v8629_v6 = vadd.f32 %v2438_v33, %v2249_v45  ;;  %6904 = vmatmul.mubr.msk.bf16.gmra.mrb[64].mxu0 %vm278_vm2, %v2634_v3  ;;  %v2946_v50 = vpack.c.bf16 %v5701_v24, %v5700_v30 }
 0x295   : > { %6974 = vmatmul.mubr.msk.bf16.gmra.mrb[64].mxu1 %vm278_vm2, %v2944_v17  ;;  %6907 = vmatprep.mubr.msk.bf16.mxu0 %vm7434_vm1, %v7433_v2 }
 0x296   : > { %6977 = vmatprep.mubr.msk.bf16.mxu1 %vm7434_vm1, %v7433_v2 }
 0x297   : > { %v2133_v12 = vpop.f32.mrb[216].mxu0 }
 0x298   : > { %v2250_v61 = vadd.f32 %v2133_v12, %v8360_v59  ;;  %v2443_v5 = vpop.f32.mrb[216].mxu1  ;;  %v6729_v51 = vpop.f32.mrb[217].mxu0  ;;  %v2616_v59 = vld [vmem:[%s7488_s23 + $0xf1] sm:$0xff]  ;;  %v2618_v12 = vld [vmem:[%s7488_s23 + $0x101] sm:$0xff] }
 0x299   : > { %v6799_v21 = vpop.f32.mrb[217].mxu1  ;;  %v2136_v15 = vpop.f32.mrb[218].mxu0  ;;  %v2636_v17 = vpack.c.bf16 %v2617_v27, %v2616_v59 }
 0x29a   : > { %v8642_v19 = vadd.f32 %v2443_v5, %v2250_v61  ;;  %v2251_v26 = vadd.f32 %v2136_v15, %v8363_v47  ;;  %v2446_v53 = vpop.f32.mrb[218].mxu1  ;;  %v6730_v20 = vpop.f32.mrb[219].mxu0  ;;  %v2619_v61 = vld [vmem:[%s7488_s23 + $0x109] sm:$0xff]  ;;  %v5703_v5 = vld [vmem:[%s7488_s23 + $0x231] sm:$0xff] }
 0x29b   : > { %v6800_v8 = vpop.f32.mrb[219].mxu1 }
 0x29c   : > { %v8645_v36 = vadd.f32 %v2446_v53, %v2251_v26  ;;  %6908 = vmatmul.mubr.msk.bf16.gmra.mrb[68].mxu0 %vm278_vm2, %v2635_v55 }
 0x29d   : > { %6978 = vmatmul.mubr.msk.bf16.gmra.mrb[68].mxu1 %vm278_vm2, %v2945_v57  ;;  %6911 = vmatprep.mubr.msk.bf16.mxu0 %vm7434_vm1, %v7433_v2  ;;  %v2637_v57 = vpack.c.bf16 %v2619_v61, %v2618_v12 }
 0x29e   : > { %6981 = vmatprep.mubr.msk.bf16.mxu1 %vm7434_vm1, %v7433_v2 }
 0x29f   : > { %v2141_v47 = vpop.f32.mrb[220].mxu0 }
 0x2a0   : > { %v2252_v3 = vadd.f32 %v2141_v47, %v8376_v60  ;;  %v2451_v34 = vpop.f32.mrb[220].mxu1  ;;  %v6733_v37 = vpop.f32.mrb[221].mxu0  ;;  %v2620_v47 = vld [vmem:[%s7488_s23 + $0x111] sm:$0xff] }
 0x2a1   : > { %v6803_v45 = vpop.f32.mrb[221].mxu1  ;;  %v2144_v33 = vpop.f32.mrb[222].mxu0 }
 0x2a2   : > { %v2253_v41 = vadd.f32 %v2144_v33, %v8379_v63  ;;  %v2454_v42 = vpop.f32.mrb[222].mxu1  ;;  %v6734_v52 = vpop.f32.mrb[223].mxu0  ;;  %v8659_v58 = vadd.f32 %v2451_v34, %v2252_v3  ;;  %v5702_v63 = vld [vmem:[%s7488_s23 + $0x229] sm:$0xff]  ;;  %v2621_v3 = vld [vmem:[%s7488_s23 + $0x119] sm:$0xff]  ;;  %v5705_v34 = vld [vmem:[%s7488_s23 + $0x241] sm:$0xff] }
 0x2a3   : > { %v6804_v10 = vpop.f32.mrb[223].mxu1  ;;  %v2947_v20 = vpack.c.bf16 %v5703_v5, %v5702_v63 }
 0x2a4   : > { %6912 = vmatmul.mubr.msk.bf16.gmra.mrb[72].mxu0 %vm278_vm2, %v2636_v17  ;;  %v8662_v60 = vadd.f32 %v2454_v42, %v2253_v41 }
 0x2a5   : > { %6982 = vmatmul.mubr.msk.bf16.gmra.mrb[72].mxu1 %vm278_vm2, %v2946_v50  ;;  %6915 = vmatprep.mubr.msk.bf16.mxu0 %vm7434_vm1, %v7433_v2  ;;  %v2638_v50 = vpack.c.bf16 %v2621_v3, %v2620_v47 }
 0x2a6   : > { %6985 = vmatprep.mubr.msk.bf16.mxu1 %vm7434_vm1, %v7433_v2 }
 0x2a7   : > { %v2149_v51 = vpop.f32.mrb[224].mxu0 }
 0x2a8   : > { %v2254_v55 = vadd.f32 %v2149_v51, %v8392_v31  ;;  %v2459_v21 = vpop.f32.mrb[224].mxu1  ;;  %v6737_v15 = vpop.f32.mrb[225].mxu0  ;;  %v3208_v51 = vld [vmem:[%s7488_s23 + $0x12] sm:$0xff] }
 0x2a9   : > { %v6807_v26 = vpop.f32.mrb[225].mxu1  ;;  %v2152_v53 = vpop.f32.mrb[226].mxu0 }
 0x2aa   : > { %v2255_v8 = vadd.f32 %v2152_v53, %v8395_v16  ;;  %v2462_v59 = vpop.f32.mrb[226].mxu1  ;;  %v6738_v27 = vpop.f32.mrb[227].mxu0  ;;  %v8675_v30 = vadd.f32 %v2459_v21, %v2254_v55  ;;  %v5704_v16 = vld [vmem:[%s7488_s23 + $0x239] sm:$0xff]  ;;  %v5743_v21 = vld [vmem:[%s7488_s23 + $0x142] sm:$0xff] }
 0x2ab   : > { %v6808_v24 = vpop.f32.mrb[227].mxu1  ;;  %v2948_v52 = vpack.c.bf16 %v5705_v34, %v5704_v16  ;;  %v3209_v55 = vld [vmem:[%s7488_s23 + $0x1a] sm:$0xff] }
 0x2ac   : > { %6916 = vmatmul.mubr.msk.bf16.gmra.mrb[76].mxu0 %vm278_vm2, %v2637_v57  ;;  %v8678_v31 = vadd.f32 %v2462_v59, %v2255_v8  ;;  %v5828_v57 = vld [vmem:[%s9708_s1 + $0x30] sm:$0xf]  ;;  %v3242_v8 = vpack.c.bf16 %v3209_v55, %v3208_v51  ;;  %v5880_v59 = vld [vmem:[%s9708_s1 + $0x34] sm:$0xf] }
 0x2ad   : > { %6986 = vmatmul.mubr.msk.bf16.gmra.mrb[76].mxu1 %vm278_vm2, %v2947_v20  ;;  %6919 = vmatprep.mubr.msk.bf16.mxu0 %vm7434_vm1, %v7433_v2 }
 0x2ae   : > { %6989 = vmatprep.mubr.msk.bf16.mxu1 %vm7434_vm1, %v7433_v2 }
 0x2af   : > { %v2157_v37 = vpop.f32.mrb[228].mxu0 }
 0x2b0   : > { %v2256_v17 = vadd.f32 %v2157_v37, %v8408_v7  ;;  %v2467_v45 = vpop.f32.mrb[228].mxu1  ;;  %v6741_v33 = vpop.f32.mrb[229].mxu0 }
 0x2b1   : > { %v6811_v41 = vpop.f32.mrb[229].mxu1  ;;  %v2160_v42 = vpop.f32.mrb[230].mxu0 }
 0x2b2   : > { %v2257_v10 = vadd.f32 %v2160_v42, %v8411_v32  ;;  %v2470_v12 = vpop.f32.mrb[230].mxu1  ;;  %v6742_v61 = vpop.f32.mrb[231].mxu0  ;;  %v8691_v63 = vadd.f32 %v2467_v45, %v2256_v17  ;;  %v5742_v32 = vld [vmem:[%s7488_s23 + $0x13a] sm:$0xff]  ;;  %v4243_v45 = vsel %vm330_vm0, %v5880_v59, 0  ;;  %v3211_v41 = vld [vmem:[%s7488_s23 + $0x2a] sm:$0xff]  ;;  %v5745_v42 = vld [vmem:[%s7488_s23 + $0x152] sm:$0xff] }
 0x2b3   : > { %v6812_v5 = vpop.f32.mrb[231].mxu1  ;;  %v3552_v47 = vpack.c.bf16 %v5743_v21, %v5742_v32  ;;  %v5747_v59 = vld [vmem:[%s7488_s23 + $0x162] sm:$0xff] }
 0x2b4   : > { %6920 = vmatmul.mubr.msk.bf16.gmra.mrb[80].mxu0 %vm278_vm2, %v2638_v50  ;;  %v8694_v7 = vadd.f32 %v2470_v12, %v2257_v10  ;;  %v3210_v50 = vld [vmem:[%s7488_s23 + $0x22] sm:$0xff] }
 0x2b5   : > { %6990 = vmatmul.mubr.msk.bf16.gmra.mrb[80].mxu1 %vm278_vm2, %v2948_v52  ;;  %6995 = vmatprep.mubr.msk.bf16.mxu0 %vm7434_vm1, %v7433_v2  ;;  %v3243_v5 = vpack.c.bf16 %v3211_v41, %v3210_v50 }
 0x2b6   : > { %7065 = vmatprep.mubr.msk.bf16.mxu1 %vm7434_vm1, %v7433_v2 }
 0x2b7   : > { %v2165_v15 = vpop.f32.mrb[232].mxu0 }
 0x2b8   : > { %v2258_v26 = vadd.f32 %v2165_v15, %v8430_v39  ;;  %v2475_v53 = vpop.f32.mrb[232].mxu1  ;;  %v6745_v20 = vpop.f32.mrb[233].mxu0  ;;  %v3933_v39 = vsel %vm330_vm0, %v5828_v57, 0 }
 0x2b9   : > { %v6815_v27 = vpop.f32.mrb[233].mxu1  ;;  %v2168_v24 = vpop.f32.mrb[234].mxu0  ;;  %v3212_v20 = vld [vmem:[%s7488_s23 + $0x32] sm:$0xff] }
 0x2ba   : > { %v2259_v3 = vadd.f32 %v2168_v24, %v8435_v54  ;;  %v2478_v16 = vpop.f32.mrb[234].mxu1  ;;  %v6746_v34 = vpop.f32.mrb[235].mxu0  ;;  %v8714_v37 = vadd.f32 %v2475_v53, %v2258_v26  ;;  %v5744_v54 = vld [vmem:[%s7488_s23 + $0x14a] sm:$0xff] }
 0x2bb   : > { %v6816_v17 = vpop.f32.mrb[235].mxu1  ;;  %v3553_v32 = vpack.c.bf16 %v5745_v42, %v5744_v54 }
 0x2bc   : > { %6996 = vmatmul.mubr.msk.bf16.vlgmr.msra.gmra.mrb[84].mxu0 %vm278_vm2, %v3242_v8  ;;  %v8718_v33 = vadd.f32 %v2478_v16, %v2259_v3  ;;  %v3213_v8 = vld [vmem:[%s7488_s23 + $0x3a] sm:$0xff] }
 0x2bd   : > { %7066 = vmatmul.mubr.msk.bf16.vlgmr.msra.gmra.mrb[84].mxu1 %vm278_vm2, %v3552_v47  ;;  %7134 = vmatpush3.bf16.msra.mxu0 %v3933_v39  ;;  %v3244_v16 = vpack.c.bf16 %v3213_v8, %v3212_v20 }
 0x2be   : > { %7204 = vmatpush3.bf16.msra.mxu1 %v4243_v45  ;;  %6999 = vmatprep.mubr.msk.bf16.mxu0 %vm7434_vm1, %v7433_v2 }
 0x2bf   : > { %v2173_v52 = vpop.f32.mrb[236].mxu0  ;;  %7069 = vmatprep.mubr.msk.bf16.mxu1 %vm7434_vm1, %v7433_v2  ;;  %7273 = vmatprep.subr.bf16.mxu0 %v7433_v2 }
 0x2c0   : > { %v2260_v10 = vadd.f32 %v2173_v52, %v8450_v62  ;;  %v2483_v12 = vpop.f32.mrb[236].mxu1  ;;  %v6749_v61 = vpop.f32.mrb[237].mxu0  ;;  %7343 = vmatprep.subr.bf16.mxu1 %v7433_v2  ;;  %v3214_v52 = vld [vmem:[%s7488_s23 + $0x42] sm:$0xff] }
 0x2c1   : > { %v6819_v51 = vpop.f32.mrb[237].mxu1  ;;  %v2176_v55 = vpop.f32.mrb[238].mxu0 }
 0x2c2   : > { %v2261_v21 = vadd.f32 %v2176_v55, %v8453_v44  ;;  %v2486_v15 = vpop.f32.mrb[238].mxu1  ;;  %v6750_v57 = vpop.f32.mrb[239].mxu0  ;;  %v8733_v26 = vadd.f32 %v2483_v12, %v2260_v10  ;;  %v5746_v44 = vld [vmem:[%s7488_s23 + $0x15a] sm:$0xff]  ;;  %v3215_v10 = vld [vmem:[%s7488_s23 + $0x4a] sm:$0xff]  ;;  %v5749_v12 = vld [vmem:[%s7488_s23 + $0x172] sm:$0xff] }
 0x2c3   : > { %v6820_v53 = vpop.f32.mrb[239].mxu1  ;;  %v3554_v17 = vpack.c.bf16 %v5747_v59, %v5746_v44 }
 0x2c4   : > { %7000 = vmatmul.mubr.msk.bf16.gmra.mrb[88].mxu0 %vm278_vm2, %v3243_v5  ;;  %v8736_v62 = vadd.f32 %v2486_v15, %v2261_v21 }
 0x2c5   : > { %7070 = vmatmul.mubr.msk.bf16.gmra.mrb[88].mxu1 %vm278_vm2, %v3553_v32  ;;  %7003 = vmatprep.mubr.msk.bf16.mxu0 %vm7434_vm1, %v7433_v2  ;;  %v3245_v32 = vpack.c.bf16 %v3215_v10, %v3214_v52 }
 0x2c6   : > { %7073 = vmatprep.mubr.msk.bf16.mxu1 %vm7434_vm1, %v7433_v2 }
 0x2c7   : > { %v2181_v27 = vpop.f32.mrb[240].mxu0 }
 0x2c8   : > { %v2262_v24 = vadd.f32 %v2181_v27, %v8466_v0  ;;  %v2491_v47 = vpop.f32.mrb[240].mxu1  ;;  %v6753_v3 = vpop.f32.mrb[241].mxu0  ;;  %v3216_v27 = vld [vmem:[%s7488_s23 + $0x52] sm:$0xff] }
 0x2c9   : > { %v6823_v34 = vpop.f32.mrb[241].mxu1  ;;  %v2184_v39 = vpop.f32.mrb[242].mxu0 }
 0x2ca   : > { %v2263_v45 = vadd.f32 %v2184_v39, %v8469_v40  ;;  %v2494_v50 = vpop.f32.mrb[242].mxu1  ;;  %v6754_v41 = vpop.f32.mrb[243].mxu0  ;;  %v8749_v54 = vadd.f32 %v2491_v47, %v2262_v24  ;;  %v5748_v40 = vld [vmem:[%s7488_s23 + $0x16a] sm:$0xff]  ;;  %v3217_v24 = vld [vmem:[%s7488_s23 + $0x5a] sm:$0xff]  ;;  %v5751_v47 = vld [vmem:[%s7488_s23 + $0x182] sm:$0xff] }
 0x2cb   : > { %v6824_v42 = vpop.f32.mrb[243].mxu1  ;;  %v3555_v57 = vpack.c.bf16 %v5749_v12, %v5748_v40 }
 0x2cc   : > { %7004 = vmatmul.mubr.msk.bf16.gmra.mrb[92].mxu0 %vm278_vm2, %v3244_v16  ;;  %v8752_v0 = vadd.f32 %v2494_v50, %v2263_v45 }
 0x2cd   : > { %7074 = vmatmul.mubr.msk.bf16.gmra.mrb[92].mxu1 %vm278_vm2, %v3554_v17  ;;  %7007 = vmatprep.mubr.msk.bf16.mxu0 %vm7434_vm1, %v7433_v2  ;;  %v3246_v17 = vpack.c.bf16 %v3217_v24, %v3216_v27 }
 0x2ce   : > { %7077 = vmatprep.mubr.msk.bf16.mxu1 %vm7434_vm1, %v7433_v2 }
 0x2cf   : > { %v2189_v61 = vpop.f32.mrb[244].mxu0 }
 0x2d0   : > { %v2264_v5 = vadd.f32 %v2189_v61, %v8482_v28  ;;  %v2499_v51 = vpop.f32.mrb[244].mxu1  ;;  %v6757_v55 = vpop.f32.mrb[245].mxu0  ;;  %v3218_v61 = vld [vmem:[%s7488_s23 + $0x62] sm:$0xff] }
 0x2d1   : > { %v6827_v21 = vpop.f32.mrb[245].mxu1  ;;  %v2192_v15 = vpop.f32.mrb[246].mxu0 }
 0x2d2   : > { %v2265_v53 = vadd.f32 %v2192_v15, %v8485_v13  ;;  %v2502_v20 = vpop.f32.mrb[246].mxu1  ;;  %v6758_v8 = vpop.f32.mrb[247].mxu0  ;;  %v8765_v44 = vadd.f32 %v2499_v51, %v2264_v5  ;;  %v5750_v13 = vld [vmem:[%s7488_s23 + $0x17a] sm:$0xff]  ;;  %v3219_v5 = vld [vmem:[%s7488_s23 + $0x6a] sm:$0xff]  ;;  %v5753_v51 = vld [vmem:[%s7488_s23 + $0x192] sm:$0xff] }
 0x2d3   : > { %v6828_v59 = vpop.f32.mrb[247].mxu1  ;;  %v3556_v41 = vpack.c.bf16 %v5751_v47, %v5750_v13 }
 0x2d4   : > { %7008 = vmatmul.mubr.msk.bf16.gmra.mrb[96].mxu0 %vm278_vm2, %v3245_v32  ;;  %v8768_v28 = vadd.f32 %v2502_v20, %v2265_v53 }
 0x2d5   : > { %7078 = vmatmul.mubr.msk.bf16.gmra.mrb[96].mxu1 %vm278_vm2, %v3555_v57  ;;  %7011 = vmatprep.mubr.msk.bf16.mxu0 %vm7434_vm1, %v7433_v2  ;;  %v3247_v57 = vpack.c.bf16 %v3219_v5, %v3218_v61 }
 0x2d6   : > { %7081 = vmatprep.mubr.msk.bf16.mxu1 %vm7434_vm1, %v7433_v2 }
 0x2d7   : > { %v2197_v3 = vpop.f32.mrb[248].mxu0 }
 0x2d8   : > { %v2266_v16 = vadd.f32 %v2197_v3, %v8498_v14  ;;  %v2507_v34 = vpop.f32.mrb[248].mxu1  ;;  %v6761_v39 = vpop.f32.mrb[249].mxu0  ;;  %v3220_v3 = vld [vmem:[%s7488_s23 + $0x72] sm:$0xff] }
 0x2d9   : > { %v6831_v45 = vpop.f32.mrb[249].mxu1  ;;  %v2200_v50 = vpop.f32.mrb[250].mxu0 }
 0x2da   : > { %v2267_v42 = vadd.f32 %v2200_v50, %v8501_v23  ;;  %v2510_v52 = vpop.f32.mrb[250].mxu1  ;;  %v6762_v10 = vpop.f32.mrb[251].mxu0  ;;  %v8781_v40 = vadd.f32 %v2507_v34, %v2266_v16  ;;  %v5752_v23 = vld [vmem:[%s7488_s23 + $0x18a] sm:$0xff]  ;;  %v3221_v16 = vld [vmem:[%s7488_s23 + $0x7a] sm:$0xff]  ;;  %v5755_v34 = vld [vmem:[%s7488_s23 + $0x1a2] sm:$0xff] }
 0x2db   : > { %v6832_v12 = vpop.f32.mrb[251].mxu1  ;;  %v3557_v8 = vpack.c.bf16 %v5753_v51, %v5752_v23 }
 0x2dc   : > { %7012 = vmatmul.mubr.msk.bf16.gmra.mrb[100].mxu0 %vm278_vm2, %v3246_v17  ;;  %v8784_v14 = vadd.f32 %v2510_v52, %v2267_v42 }
 0x2dd   : > { %7082 = vmatmul.mubr.msk.bf16.gmra.mrb[100].mxu1 %vm278_vm2, %v3556_v41  ;;  %7015 = vmatprep.mubr.msk.bf16.mxu0 %vm7434_vm1, %v7433_v2  ;;  %v3248_v41 = vpack.c.bf16 %v3221_v16, %v3220_v3 }
 0x2de   : > { %7085 = vmatprep.mubr.msk.bf16.mxu1 %vm7434_vm1, %v7433_v2 }
 0x2df   : > { %v2205_v55 = vpop.f32.mrb[252].mxu0 }
 0x2e0   : > { %v2268_v32 = vadd.f32 %v2205_v55, %v8514_v4  ;;  %v2515_v21 = vpop.f32.mrb[252].mxu1  ;;  %v6765_v15 = vpop.f32.mrb[253].mxu0  ;;  %v3222_v55 = vld [vmem:[%s7488_s23 + $0x82] sm:$0xff] }
 0x2e1   : > { %v6835_v53 = vpop.f32.mrb[253].mxu1  ;;  %v2208_v20 = vpop.f32.mrb[254].mxu0 }
 0x2e2   : > { %v2269_v59 = vadd.f32 %v2208_v20, %v8517_v22  ;;  %v2518_v27 = vpop.f32.mrb[254].mxu1  ;;  %v6766_v24 = vpop.f32.mrb[255].mxu0  ;;  %v8797_v13 = vadd.f32 %v2515_v21, %v2268_v32  ;;  %v5754_v22 = vld [vmem:[%s7488_s23 + $0x19a] sm:$0xff]  ;;  %v3223_v32 = vld [vmem:[%s7488_s23 + $0x8a] sm:$0xff]  ;;  %v5757_v21 = vld [vmem:[%s7488_s23 + $0x1b2] sm:$0xff] }
 0x2e3   : > { %v6836_v47 = vpop.f32.mrb[255].mxu1  ;;  %v3558_v10 = vpack.c.bf16 %v5755_v34, %v5754_v22 }
 0x2e4   : > { %7016 = vmatmul.mubr.msk.bf16.gmra.mrb[104].mxu0 %vm278_vm2, %v3247_v57  ;;  %v8800_v4 = vadd.f32 %v2518_v27, %v2269_v59 }
 0x2e5   : > { %7086 = vmatmul.mubr.msk.bf16.gmra.mrb[104].mxu1 %vm278_vm2, %v3557_v8  ;;  %7019 = vmatprep.mubr.msk.bf16.mxu0 %vm7434_vm1, %v7433_v2  ;;  %v3249_v8 = vpack.c.bf16 %v3223_v32, %v3222_v55 }
 0x2e6   : > { %7089 = vmatprep.mubr.msk.bf16.mxu1 %vm7434_vm1, %v7433_v2 }
 0x2e7   : > { %v2213_v39 = vpop.f32.mrb[0].mxu0 }
 0x2e8   : > { %v2270_v17 = vadd.f32 %v2213_v39, %v8530_v29  ;;  %v2523_v45 = vpop.f32.mrb[0].mxu1  ;;  %v6769_v50 = vpop.f32.mrb[1].mxu0  ;;  %v3224_v39 = vld [vmem:[%s7488_s23 + $0x92] sm:$0xff] }
 0x2e9   : > { %v6839_v42 = vpop.f32.mrb[1].mxu1  ;;  %v2216_v52 = vpop.f32.mrb[2].mxu0 }
 0x2ea   : > { %v2271_v12 = vadd.f32 %v2216_v52, %v8533_v43  ;;  %v2526_v61 = vpop.f32.mrb[2].mxu1  ;;  %v6770_v5 = vpop.f32.mrb[3].mxu0  ;;  %v8813_v23 = vadd.f32 %v2523_v45, %v2270_v17  ;;  %v5756_v43 = vld [vmem:[%s7488_s23 + $0x1aa] sm:$0xff]  ;;  %v3225_v17 = vld [vmem:[%s7488_s23 + $0x9a] sm:$0xff]  ;;  %v5759_v45 = vld [vmem:[%s7488_s23 + $0x1c2] sm:$0xff] }
 0x2eb   : > { %v6840_v51 = vpop.f32.mrb[3].mxu1  ;;  %v3559_v24 = vpack.c.bf16 %v5757_v21, %v5756_v43 }
 0x2ec   : > { %7020 = vmatmul.mubr.msk.bf16.gmra.mrb[108].mxu0 %vm278_vm2, %v3248_v41  ;;  %v8816_v29 = vadd.f32 %v2526_v61, %v2271_v12 }
 0x2ed   : > { %7090 = vmatmul.mubr.msk.bf16.gmra.mrb[108].mxu1 %vm278_vm2, %v3558_v10  ;;  %7023 = vmatprep.mubr.msk.bf16.mxu0 %vm7434_vm1, %v7433_v2  ;;  %v3250_v10 = vpack.c.bf16 %v3225_v17, %v3224_v39 }
 0x2ee   : > { %7093 = vmatprep.mubr.msk.bf16.mxu1 %vm7434_vm1, %v7433_v2 }
 0x2ef   : > { %v2221_v15 = vpop.f32.mrb[4].mxu0 }
 0x2f0   : > { %v2272_v57 = vadd.f32 %v2221_v15, %v8546_v56  ;;  %v2531_v53 = vpop.f32.mrb[4].mxu1  ;;  %v6773_v20 = vpop.f32.mrb[5].mxu0  ;;  %v3226_v15 = vld [vmem:[%s7488_s23 + $0xa2] sm:$0xff] }
 0x2f1   : > { %v6843_v59 = vpop.f32.mrb[5].mxu1  ;;  %v2224_v27 = vpop.f32.mrb[6].mxu0 }
 0x2f2   : > { %v2273_v47 = vadd.f32 %v2224_v27, %v8549_v1  ;;  %v2534_v3 = vpop.f32.mrb[6].mxu1  ;;  %v6774_v16 = vpop.f32.mrb[7].mxu0  ;;  %v8829_v22 = vadd.f32 %v2531_v53, %v2272_v57  ;;  %v5758_v1 = vld [vmem:[%s7488_s23 + $0x1ba] sm:$0xff]  ;;  %v3227_v57 = vld [vmem:[%s7488_s23 + $0xaa] sm:$0xff]  ;;  %v5761_v53 = vld [vmem:[%s7488_s23 + $0x1d2] sm:$0xff] }
 0x2f3   : > { %v6844_v34 = vpop.f32.mrb[7].mxu1  ;;  %v3560_v5 = vpack.c.bf16 %v5759_v45, %v5758_v1 }
 0x2f4   : > { %7024 = vmatmul.mubr.msk.bf16.gmra.mrb[112].mxu0 %vm278_vm2, %v3249_v8  ;;  %v8832_v56 = vadd.f32 %v2534_v3, %v2273_v47 }
 0x2f5   : > { %7094 = vmatmul.mubr.msk.bf16.gmra.mrb[112].mxu1 %vm278_vm2, %v3559_v24  ;;  %7027 = vmatprep.mubr.msk.bf16.mxu0 %vm7434_vm1, %v7433_v2  ;;  %v3251_v24 = vpack.c.bf16 %v3227_v57, %v3226_v15 }
 0x2f6   : > { %7097 = vmatprep.mubr.msk.bf16.mxu1 %vm7434_vm1, %v7433_v2 }
 0x2f7   : > { %v2229_v50 = vpop.f32.mrb[8].mxu0 }
 0x2f8   : > { %v2274_v41 = vadd.f32 %v2229_v50, %v8562_v18  ;;  %v2539_v42 = vpop.f32.mrb[8].mxu1  ;;  %v6777_v52 = vpop.f32.mrb[9].mxu0  ;;  %v3228_v50 = vld [vmem:[%s7488_s23 + $0xb2] sm:$0xff] }
 0x2f9   : > { %v6847_v12 = vpop.f32.mrb[9].mxu1  ;;  %v2232_v61 = vpop.f32.mrb[10].mxu0 }
 0x2fa   : > { %v2275_v51 = vadd.f32 %v2232_v61, %v8565_v25  ;;  %v2542_v55 = vpop.f32.mrb[10].mxu1  ;;  %v6778_v32 = vpop.f32.mrb[11].mxu0  ;;  %v8845_v43 = vadd.f32 %v2539_v42, %v2274_v41  ;;  %v5760_v25 = vld [vmem:[%s7488_s23 + $0x1ca] sm:$0xff]  ;;  %v3229_v41 = vld [vmem:[%s7488_s23 + $0xba] sm:$0xff]  ;;  %v5763_v42 = vld [vmem:[%s7488_s23 + $0x1e2] sm:$0xff] }
 0x2fb   : > { %v6848_v21 = vpop.f32.mrb[11].mxu1  ;;  %v3561_v16 = vpack.c.bf16 %v5761_v53, %v5760_v25 }
 0x2fc   : > { %7028 = vmatmul.mubr.msk.bf16.gmra.mrb[116].mxu0 %vm278_vm2, %v3250_v10  ;;  %v8848_v18 = vadd.f32 %v2542_v55, %v2275_v51 }
 0x2fd   : > { %7098 = vmatmul.mubr.msk.bf16.gmra.mrb[116].mxu1 %vm278_vm2, %v3560_v5  ;;  %7031 = vmatprep.mubr.msk.bf16.mxu0 %vm7434_vm1, %v7433_v2  ;;  %v3252_v5 = vpack.c.bf16 %v3229_v41, %v3228_v50 }
 0x2fe   : > { %7101 = vmatprep.mubr.msk.bf16.mxu1 %vm7434_vm1, %v7433_v2 }
 0x2ff   : > { %v2237_v20 = vpop.f32.mrb[12].mxu0 }
 0x300   : > { %v2276_v8 = vadd.f32 %v2237_v20, %v8578_v48  ;;  %v2547_v59 = vpop.f32.mrb[12].mxu1  ;;  %v6781_v27 = vpop.f32.mrb[13].mxu0  ;;  %v3230_v20 = vld [vmem:[%s7488_s23 + $0xc2] sm:$0xff] }
 0x301   : > { %v6851_v47 = vpop.f32.mrb[13].mxu1  ;;  %v2240_v3 = vpop.f32.mrb[14].mxu0 }
 0x302   : > { %v2277_v34 = vadd.f32 %v2240_v3, %v8581_v49  ;;  %v2550_v39 = vpop.f32.mrb[14].mxu1  ;;  %v6782_v17 = vpop.f32.mrb[15].mxu0  ;;  %v8861_v1 = vadd.f32 %v2547_v59, %v2276_v8  ;;  %v5762_v49 = vld [vmem:[%s7488_s23 + $0x1da] sm:$0xff]  ;;  %v3231_v8 = vld [vmem:[%s7488_s23 + $0xca] sm:$0xff]  ;;  %v5765_v59 = vld [vmem:[%s7488_s23 + $0x1f2] sm:$0xff] }
 0x303   : > { %v6852_v45 = vpop.f32.mrb[15].mxu1  ;;  %v3562_v32 = vpack.c.bf16 %v5763_v42, %v5762_v49 }
 0x304   : > { %7032 = vmatmul.mubr.msk.bf16.gmra.mrb[120].mxu0 %vm278_vm2, %v3251_v24  ;;  %v8864_v48 = vadd.f32 %v2550_v39, %v2277_v34 }
 0x305   : > { %7102 = vmatmul.mubr.msk.bf16.gmra.mrb[120].mxu1 %vm278_vm2, %v3561_v16  ;;  %7035 = vmatprep.mubr.msk.bf16.mxu0 %vm7434_vm1, %v7433_v2  ;;  %v3253_v16 = vpack.c.bf16 %v3231_v8, %v3230_v20 }
 0x306   : > { %7105 = vmatprep.mubr.msk.bf16.mxu1 %vm7434_vm1, %v7433_v2 }
 0x307   : > { %v2729_v52 = vpop.f32.mrb[16].mxu0 }
 0x308   : > { %v2864_v10 = vadd.f32 %v2729_v52, %v8594_v35  ;;  %v3039_v12 = vpop.f32.mrb[16].mxu1  ;;  %v6857_v61 = vpop.f32.mrb[17].mxu0  ;;  %v3232_v52 = vld [vmem:[%s7488_s23 + $0xd2] sm:$0xff] }
 0x309   : > { %v6927_v51 = vpop.f32.mrb[17].mxu1  ;;  %v2732_v55 = vpop.f32.mrb[18].mxu0 }
 0x30a   : > { %v2865_v21 = vadd.f32 %v2732_v55, %v8597_v11  ;;  %v3042_v15 = vpop.f32.mrb[18].mxu1  ;;  %v6858_v57 = vpop.f32.mrb[19].mxu0  ;;  %v8877_v25 = vadd.f32 %v3039_v12, %v2864_v10  ;;  %v5764_v11 = vld [vmem:[%s7488_s23 + $0x1ea] sm:$0xff]  ;;  %v3233_v10 = vld [vmem:[%s7488_s23 + $0xda] sm:$0xff]  ;;  %v5767_v12 = vld [vmem:[%s7488_s23 + $0x202] sm:$0xff] }
 0x30b   : > { %v6928_v53 = vpop.f32.mrb[19].mxu1  ;;  %v3563_v17 = vpack.c.bf16 %v5765_v59, %v5764_v11 }
 0x30c   : > { %7036 = vmatmul.mubr.msk.bf16.gmra.mrb[124].mxu0 %vm278_vm2, %v3252_v5  ;;  %v8880_v35 = vadd.f32 %v3042_v15, %v2865_v21 }
 0x30d   : > { %7106 = vmatmul.mubr.msk.bf16.gmra.mrb[124].mxu1 %vm278_vm2, %v3562_v32  ;;  %7039 = vmatprep.mubr.msk.bf16.mxu0 %vm7434_vm1, %v7433_v2  ;;  %v3254_v32 = vpack.c.bf16 %v3233_v10, %v3232_v52 }
 0x30e   : > { %7109 = vmatprep.mubr.msk.bf16.mxu1 %vm7434_vm1, %v7433_v2 }
 0x30f   : > { %v2737_v27 = vpop.f32.mrb[20].mxu0 }
 0x310   : > { %v2866_v24 = vadd.f32 %v2737_v27, %v8610_v9  ;;  %v3047_v47 = vpop.f32.mrb[20].mxu1  ;;  %v6861_v3 = vpop.f32.mrb[21].mxu0  ;;  %v3234_v27 = vld [vmem:[%s7488_s23 + $0xe2] sm:$0xff] }
 0x311   : > { %v6931_v34 = vpop.f32.mrb[21].mxu1  ;;  %v2740_v39 = vpop.f32.mrb[22].mxu0 }
 0x312   : > { %v2867_v45 = vadd.f32 %v2740_v39, %v8613_v38  ;;  %v3050_v50 = vpop.f32.mrb[22].mxu1  ;;  %v6862_v41 = vpop.f32.mrb[23].mxu0  ;;  %v8893_v49 = vadd.f32 %v3047_v47, %v2866_v24  ;;  %v5766_v38 = vld [vmem:[%s7488_s23 + $0x1fa] sm:$0xff]  ;;  %v3235_v24 = vld [vmem:[%s7488_s23 + $0xea] sm:$0xff]  ;;  %v5769_v47 = vld [vmem:[%s7488_s23 + $0x212] sm:$0xff] }
 0x313   : > { %v6932_v42 = vpop.f32.mrb[23].mxu1  ;;  %v3564_v57 = vpack.c.bf16 %v5767_v12, %v5766_v38 }
 0x314   : > { %7040 = vmatmul.mubr.msk.bf16.gmra.mrb[128].mxu0 %vm278_vm2, %v3253_v16  ;;  %v8896_v9 = vadd.f32 %v3050_v50, %v2867_v45 }
 0x315   : > { %7110 = vmatmul.mubr.msk.bf16.gmra.mrb[128].mxu1 %vm278_vm2, %v3563_v17  ;;  %7043 = vmatprep.mubr.msk.bf16.mxu0 %vm7434_vm1, %v7433_v2  ;;  %v3255_v17 = vpack.c.bf16 %v3235_v24, %v3234_v27 }
 0x316   : > { %7113 = vmatprep.mubr.msk.bf16.mxu1 %vm7434_vm1, %v7433_v2 }
 0x317   : > { %v2745_v61 = vpop.f32.mrb[24].mxu0 }
 0x318   : > { %v2868_v5 = vadd.f32 %v2745_v61, %v8626_v46  ;;  %v3055_v51 = vpop.f32.mrb[24].mxu1  ;;  %v6865_v55 = vpop.f32.mrb[25].mxu0  ;;  %v3236_v61 = vld [vmem:[%s7488_s23 + $0xf2] sm:$0xff] }
 0x319   : > { %v6935_v21 = vpop.f32.mrb[25].mxu1  ;;  %v2748_v15 = vpop.f32.mrb[26].mxu0 }
 0x31a   : > { %v2869_v53 = vadd.f32 %v2748_v15, %v8629_v6  ;;  %v3058_v20 = vpop.f32.mrb[26].mxu1  ;;  %v6866_v8 = vpop.f32.mrb[27].mxu0  ;;  %v8909_v11 = vadd.f32 %v3055_v51, %v2868_v5  ;;  %v5768_v6 = vld [vmem:[%s7488_s23 + $0x20a] sm:$0xff]  ;;  %v3237_v5 = vld [vmem:[%s7488_s23 + $0xfa] sm:$0xff]  ;;  %v5771_v51 = vld [vmem:[%s7488_s23 + $0x222] sm:$0xff] }
 0x31b   : > { %v6936_v59 = vpop.f32.mrb[27].mxu1  ;;  %v3565_v41 = vpack.c.bf16 %v5769_v47, %v5768_v6 }
 0x31c   : > { %7044 = vmatmul.mubr.msk.bf16.gmra.mrb[132].mxu0 %vm278_vm2, %v3254_v32  ;;  %v8912_v46 = vadd.f32 %v3058_v20, %v2869_v53 }
 0x31d   : > { %7114 = vmatmul.mubr.msk.bf16.gmra.mrb[132].mxu1 %vm278_vm2, %v3564_v57  ;;  %7047 = vmatprep.mubr.msk.bf16.mxu0 %vm7434_vm1, %v7433_v2  ;;  %v3256_v57 = vpack.c.bf16 %v3237_v5, %v3236_v61 }
 0x31e   : > { %7117 = vmatprep.mubr.msk.bf16.mxu1 %vm7434_vm1, %v7433_v2 }
 0x31f   : > { %v2753_v3 = vpop.f32.mrb[28].mxu0 }
 0x320   : > { %v2870_v16 = vadd.f32 %v2753_v3, %v8642_v19  ;;  %v3063_v34 = vpop.f32.mrb[28].mxu1  ;;  %v6869_v39 = vpop.f32.mrb[29].mxu0 }
 0x321   : > { %v6939_v45 = vpop.f32.mrb[29].mxu1  ;;  %v2756_v50 = vpop.f32.mrb[30].mxu0  ;;  %v5773_v39 = vld [vmem:[%s7488_s23 + $0x232] sm:$0xff] }
 0x322   : > { %v2871_v42 = vadd.f32 %v2756_v50, %v8645_v36  ;;  %v3066_v52 = vpop.f32.mrb[30].mxu1  ;;  %v6870_v10 = vpop.f32.mrb[31].mxu0  ;;  %v8925_v38 = vadd.f32 %v3063_v34, %v2870_v16  ;;  %v5770_v36 = vld [vmem:[%s7488_s23 + $0x21a] sm:$0xff]  ;;  %v3239_v16 = vld [vmem:[%s7488_s23 + $0x10a] sm:$0xff] }
 0x323   : > { %v6940_v12 = vpop.f32.mrb[31].mxu1  ;;  %v3566_v8 = vpack.c.bf16 %v5771_v51, %v5770_v36  ;;  %v5772_v34 = vld [vmem:[%s7488_s23 + $0x22a] sm:$0xff] }
 0x324   : > { %7048 = vmatmul.mubr.msk.bf16.gmra.mrb[136].mxu0 %vm278_vm2, %v3255_v17  ;;  %v8928_v19 = vadd.f32 %v3066_v52, %v2871_v42  ;;  %v3567_v10 = vpack.c.bf16 %v5773_v39, %v5772_v34 }
 0x325   : > { %7118 = vmatmul.mubr.msk.bf16.gmra.mrb[136].mxu1 %vm278_vm2, %v3565_v41  ;;  %7051 = vmatprep.mubr.msk.bf16.mxu0 %vm7434_vm1, %v7433_v2 }
 0x326   : > { %7121 = vmatprep.mubr.msk.bf16.mxu1 %vm7434_vm1, %v7433_v2 }
 0x327   : > { %v2761_v55 = vpop.f32.mrb[32].mxu0 }
 0x328   : > { %v2872_v32 = vadd.f32 %v2761_v55, %v8659_v58  ;;  %v3071_v21 = vpop.f32.mrb[32].mxu1  ;;  %v6873_v15 = vpop.f32.mrb[33].mxu0  ;;  %v3238_v58 = vld [vmem:[%s7488_s23 + $0x102] sm:$0xff] }
 0x329   : > { %v6943_v53 = vpop.f32.mrb[33].mxu1  ;;  %v2764_v20 = vpop.f32.mrb[34].mxu0  ;;  %v3257_v41 = vpack.c.bf16 %v3239_v16, %v3238_v58  ;;  %v5775_v15 = vld [vmem:[%s7488_s23 + $0x242] sm:$0xff] }
 0x32a   : > { %v8940_v59 = vadd.f32 %v3071_v21, %v2872_v32  ;;  %v2873_v27 = vadd.f32 %v2764_v20, %v8662_v60  ;;  %v3074_v24 = vpop.f32.mrb[34].mxu1  ;;  %v6874_v6 = vpop.f32.mrb[35].mxu0  ;;  %v3241_v32 = vld [vmem:[%s7488_s23 + $0x11a] sm:$0xff] }
 0x32b   : > { %v6944_v47 = vpop.f32.mrb[35].mxu1  ;;  %v5774_v21 = vld [vmem:[%s7488_s23 + $0x23a] sm:$0xff] }
 0x32c   : > { %v8943_v3 = vadd.f32 %v3074_v24, %v2873_v27  ;;  %7052 = vmatmul.mubr.msk.bf16.gmra.mrb[140].mxu0 %vm278_vm2, %v3256_v57  ;;  %v3568_v6 = vpack.c.bf16 %v5775_v15, %v5774_v21 }
 0x32d   : > { %7122 = vmatmul.mubr.msk.bf16.gmra.mrb[140].mxu1 %vm278_vm2, %v3566_v8  ;;  %7055 = vmatprep.mubr.msk.bf16.mxu0 %vm7434_vm1, %v7433_v2 }
 0x32e   : > { %7125 = vmatprep.mubr.msk.bf16.mxu1 %vm7434_vm1, %v7433_v2 }
 0x32f   : > { %v2769_v60 = vpop.f32.mrb[36].mxu0 }
 0x330   : > { %v2874_v17 = vadd.f32 %v2769_v60, %v8675_v30  ;;  %v3079_v45 = vpop.f32.mrb[36].mxu1  ;;  %v6877_v50 = vpop.f32.mrb[37].mxu0  ;;  %v3240_v30 = vld [vmem:[%s7488_s23 + $0x112] sm:$0xff] }
 0x331   : > { %v6947_v42 = vpop.f32.mrb[37].mxu1  ;;  %v2772_v52 = vpop.f32.mrb[38].mxu0  ;;  %v3258_v8 = vpack.c.bf16 %v3241_v32, %v3240_v30  ;;  %v5847_v50 = vld [vmem:[%s7488_s23 + $0x391] sm:$0xff] }
 0x332   : > { %v8956_v12 = vadd.f32 %v3079_v45, %v2874_v17  ;;  %v2875_v61 = vadd.f32 %v2772_v52, %v8678_v31  ;;  %v3082_v5 = vpop.f32.mrb[38].mxu1  ;;  %v6878_v36 = vpop.f32.mrb[39].mxu0  ;;  %v5795_v17 = vld [vmem:[%s7488_s23 + $0x269] sm:$0xff] }
 0x333   : > { %v6948_v51 = vpop.f32.mrb[39].mxu1  ;;  %v5846_v45 = vld [vmem:[%s7488_s23 + $0x389] sm:$0xff] }
 0x334   : > { %v8959_v55 = vadd.f32 %v3082_v5, %v2875_v61  ;;  %7056 = vmatmul.mubr.msk.bf16.gmra.mrb[144].mxu0 %vm278_vm2, %v3257_v41  ;;  %v5932_v41 = vld [vmem:[%s9708_s1 + $0x38] sm:$0xf]  ;;  %v5984_v5 = vld [vmem:[%s9708_s1 + $0x3c] sm:$0xf]  ;;  %v4172_v30 = vpack.c.bf16 %v5847_v50, %v5846_v45 }
 0x335   : > { %7126 = vmatmul.mubr.msk.bf16.gmra.mrb[144].mxu1 %vm278_vm2, %v3567_v10  ;;  %7059 = vmatprep.mubr.msk.bf16.mxu0 %vm7434_vm1, %v7433_v2 }
 0x336   : > { %7129 = vmatprep.mubr.msk.bf16.mxu1 %vm7434_vm1, %v7433_v2 }
 0x337   : > { %v2777_v31 = vpop.f32.mrb[40].mxu0 }
 0x338   : > { %v2876_v57 = vadd.f32 %v2777_v31, %v8691_v63  ;;  %v3087_v53 = vpop.f32.mrb[40].mxu1  ;;  %v6881_v20 = vpop.f32.mrb[41].mxu0  ;;  %v5794_v63 = vld [vmem:[%s7488_s23 + $0x261] sm:$0xff]  ;;  %v4553_v31 = vsel %vm330_vm0, %v5932_v41, 0 }
 0x339   : > { %v6951_v27 = vpop.f32.mrb[41].mxu1  ;;  %v2780_v24 = vpop.f32.mrb[42].mxu0  ;;  %v3862_v61 = vpack.c.bf16 %v5795_v17, %v5794_v63 }
 0x33a   : > { %v8972_v47 = vadd.f32 %v3087_v53, %v2876_v57  ;;  %v2877_v58 = vadd.f32 %v2780_v24, %v8694_v7  ;;  %v3090_v16 = vpop.f32.mrb[42].mxu1  ;;  %v6882_v34 = vpop.f32.mrb[43].mxu0  ;;  %v4863_v53 = vsel %vm330_vm0, %v5984_v5, 0  ;;  %v5797_v27 = vld [vmem:[%s7488_s23 + $0x279] sm:$0xff]  ;;  %v5849_v24 = vld [vmem:[%s7488_s23 + $0x3a1] sm:$0xff]  ;;  %v5850_v5 = vld [vmem:[%s7488_s23 + $0x3a9] sm:$0xff] }
 0x33b   : > { %v6952_v39 = vpop.f32.mrb[43].mxu1 }
 0x33c   : > { %v8975_v60 = vadd.f32 %v3090_v16, %v2877_v58  ;;  %7060 = vmatmul.mubr.msk.bf16.gmra.mrb[148].mxu0 %vm278_vm2, %v3258_v8  ;;  %v5796_v8 = vld [vmem:[%s7488_s23 + $0x271] sm:$0xff] }
 0x33d   : > { %7130 = vmatmul.mubr.msk.bf16.gmra.mrb[148].mxu1 %vm278_vm2, %v3568_v6  ;;  %7135 = vmatprep.mubr.msk.bf16.mxu0 %vm7434_vm1, %v7433_v2  ;;  %v3863_v39 = vpack.c.bf16 %v5797_v27, %v5796_v8 }
 0x33e   : > { %7205 = vmatprep.mubr.msk.bf16.mxu1 %vm7434_vm1, %v7433_v2 }
 0x33f   : > { %v2785_v7 = vpop.f32.mrb[44].mxu0 }
 0x340   : > { %v2878_v42 = vadd.f32 %v2785_v7, %v8714_v37  ;;  %v3095_v52 = vpop.f32.mrb[44].mxu1  ;;  %v6885_v10 = vpop.f32.mrb[45].mxu0 }
 0x341   : > { %v6955_v36 = vpop.f32.mrb[45].mxu1  ;;  %v2788_v51 = vpop.f32.mrb[46].mxu0 }
 0x342   : > { %v8994_v32 = vadd.f32 %v3095_v52, %v2878_v42  ;;  %v2879_v21 = vadd.f32 %v2788_v51, %v8718_v33  ;;  %v3098_v15 = vpop.f32.mrb[46].mxu1  ;;  %v6886_v37 = vpop.f32.mrb[47].mxu0  ;;  %v5848_v33 = vld [vmem:[%s7488_s23 + $0x399] sm:$0xff]  ;;  %v5851_v36 = vld [vmem:[%s7488_s23 + $0x3b1] sm:$0xff] }
 0x343   : > { %v6956_v57 = vpop.f32.mrb[47].mxu1  ;;  %v4173_v45 = vpack.c.bf16 %v5849_v24, %v5848_v33 }
 0x344   : > { %v8999_v20 = vadd.f32 %v3098_v15, %v2879_v21  ;;  %7136 = vmatmul.mubr.msk.bf16.vlgmr.msra.gmra.mrb[152].mxu0 %vm278_vm2, %v3862_v61  ;;  %v5799_v61 = vld [vmem:[%s7488_s23 + $0x289] sm:$0xff]  ;;  %v4174_v57 = vpack.c.bf16 %v5851_v36, %v5850_v5 }
 0x345   : > { %7206 = vmatmul.mubr.msk.bf16.vlgmr.msra.gmra.mrb[152].mxu1 %vm278_vm2, %v4172_v30  ;;  %7274 = vmatpush3.bf16.msra.mxu0 %v4553_v31 }
 0x346   : > { %7344 = vmatpush3.bf16.msra.mxu1 %v4863_v53  ;;  %7139 = vmatprep.mubr.msk.bf16.mxu0 %vm7434_vm1, %v7433_v2 }
 0x347   : > { %v2793_v6 = vpop.f32.mrb[48].mxu0  ;;  %7209 = vmatprep.mubr.msk.bf16.mxu1 %vm7434_vm1, %v7433_v2 }
 0x348   : > { %v2880_v58 = vadd.f32 %v2793_v6, %v8733_v26  ;;  %v3103_v16 = vpop.f32.mrb[48].mxu1  ;;  %v6889_v34 = vpop.f32.mrb[49].mxu0  ;;  %v5798_v26 = vld [vmem:[%s7488_s23 + $0x281] sm:$0xff] }
 0x349   : > { %v6959_v63 = vpop.f32.mrb[49].mxu1  ;;  %v2796_v17 = vpop.f32.mrb[50].mxu0  ;;  %v3864_v15 = vpack.c.bf16 %v5799_v61, %v5798_v26  ;;  %v5853_v34 = vld [vmem:[%s7488_s23 + $0x3c1] sm:$0xff] }
 0x34a   : > { %v9012_v50 = vadd.f32 %v3103_v16, %v2880_v58  ;;  %v2881_v7 = vadd.f32 %v2796_v17, %v8736_v62  ;;  %v3106_v41 = vpop.f32.mrb[50].mxu1  ;;  %v6890_v42 = vpop.f32.mrb[51].mxu0  ;;  %v5801_v58 = vld [vmem:[%s7488_s23 + $0x299] sm:$0xff] }
 0x34b   : > { %v6960_v52 = vpop.f32.mrb[51].mxu1  ;;  %v5852_v16 = vld [vmem:[%s7488_s23 + $0x3b9] sm:$0xff] }
 0x34c   : > { %v9015_v10 = vadd.f32 %v3106_v41, %v2881_v7  ;;  %7140 = vmatmul.mubr.msk.bf16.gmra.mrb[156].mxu0 %vm278_vm2, %v3863_v39  ;;  %v4175_v42 = vpack.c.bf16 %v5853_v34, %v5852_v16 }
 0x34d   : > { %7210 = vmatmul.mubr.msk.bf16.gmra.mrb[156].mxu1 %vm278_vm2, %v4173_v45  ;;  %7143 = vmatprep.mubr.msk.bf16.mxu0 %vm7434_vm1, %v7433_v2 }
 0x34e   : > { %7213 = vmatprep.mubr.msk.bf16.mxu1 %vm7434_vm1, %v7433_v2 }
 0x34f   : > { %v2801_v62 = vpop.f32.mrb[52].mxu0 }
 0x350   : > { %v2882_v51 = vadd.f32 %v2801_v62, %v8749_v54  ;;  %v3111_v30 = vpop.f32.mrb[52].mxu1  ;;  %v6893_v21 = vpop.f32.mrb[53].mxu0  ;;  %v5800_v54 = vld [vmem:[%s7488_s23 + $0x291] sm:$0xff] }
 0x351   : > { %v6963_v37 = vpop.f32.mrb[53].mxu1  ;;  %v2804_v31 = vpop.f32.mrb[54].mxu0  ;;  %v3865_v45 = vpack.c.bf16 %v5801_v58, %v5800_v54  ;;  %v5855_v21 = vld [vmem:[%s7488_s23 + $0x3d1] sm:$0xff] }
 0x352   : > { %v9028_v53 = vadd.f32 %v3111_v30, %v2882_v51  ;;  %v2883_v8 = vadd.f32 %v2804_v31, %v8752_v0  ;;  %v3114_v27 = vpop.f32.mrb[54].mxu1  ;;  %v6894_v33 = vpop.f32.mrb[55].mxu0  ;;  %v5803_v51 = vld [vmem:[%s7488_s23 + $0x2a9] sm:$0xff] }
 0x353   : > { %v6964_v24 = vpop.f32.mrb[55].mxu1  ;;  %v5854_v30 = vld [vmem:[%s7488_s23 + $0x3c9] sm:$0xff] }
 0x354   : > { %v9031_v6 = vadd.f32 %v3114_v27, %v2883_v8  ;;  %7144 = vmatmul.mubr.msk.bf16.gmra.mrb[160].mxu0 %vm278_vm2, %v3864_v15  ;;  %v4176_v33 = vpack.c.bf16 %v5855_v21, %v5854_v30 }
 0x355   : > { %7214 = vmatmul.mubr.msk.bf16.gmra.mrb[160].mxu1 %vm278_vm2, %v4174_v57  ;;  %7147 = vmatprep.mubr.msk.bf16.mxu0 %vm7434_vm1, %v7433_v2 }
 0x356   : > { %7217 = vmatprep.mubr.msk.bf16.mxu1 %vm7434_vm1, %v7433_v2 }
 0x357   : > { %v2809_v0 = vpop.f32.mrb[56].mxu0 }
 0x358   : > { %v2884_v39 = vadd.f32 %v2809_v0, %v8765_v44  ;;  %v3119_v63 = vpop.f32.mrb[56].mxu1  ;;  %v6897_v17 = vpop.f32.mrb[57].mxu0  ;;  %v5802_v44 = vld [vmem:[%s7488_s23 + $0x2a1] sm:$0xff] }
 0x359   : > { %v6967_v7 = vpop.f32.mrb[57].mxu1  ;;  %v2812_v41 = vpop.f32.mrb[58].mxu0  ;;  %v3866_v57 = vpack.c.bf16 %v5803_v51, %v5802_v44  ;;  %v5857_v17 = vld [vmem:[%s7488_s23 + $0x3e1] sm:$0xff] }
 0x35a   : > { %v9044_v52 = vadd.f32 %v3119_v63, %v2884_v39  ;;  %v2885_v26 = vadd.f32 %v2812_v41, %v8768_v28  ;;  %v3122_v61 = vpop.f32.mrb[58].mxu1  ;;  %v6898_v5 = vpop.f32.mrb[59].mxu0  ;;  %v5805_v39 = vld [vmem:[%s7488_s23 + $0x2b9] sm:$0xff] }
 0x35b   : > { %v6968_v36 = vpop.f32.mrb[59].mxu1  ;;  %v5856_v63 = vld [vmem:[%s7488_s23 + $0x3d9] sm:$0xff] }
 0x35c   : > { %v9047_v62 = vadd.f32 %v3122_v61, %v2885_v26  ;;  %7148 = vmatmul.mubr.msk.bf16.gmra.mrb[164].mxu0 %vm278_vm2, %v3865_v45  ;;  %v4177_v5 = vpack.c.bf16 %v5857_v17, %v5856_v63 }
 0x35d   : > { %7218 = vmatmul.mubr.msk.bf16.gmra.mrb[164].mxu1 %vm278_vm2, %v4175_v42  ;;  %7151 = vmatprep.mubr.msk.bf16.mxu0 %vm7434_vm1, %v7433_v2 }
 0x35e   : > { %7221 = vmatprep.mubr.msk.bf16.mxu1 %vm7434_vm1, %v7433_v2 }
 0x35f   : > { %v2817_v28 = vpop.f32.mrb[60].mxu0 }
 0x360   : > { %v2886_v15 = vadd.f32 %v2817_v28, %v8781_v40  ;;  %v3127_v37 = vpop.f32.mrb[60].mxu1  ;;  %v6901_v31 = vpop.f32.mrb[61].mxu0  ;;  %v5804_v40 = vld [vmem:[%s7488_s23 + $0x2b1] sm:$0xff] }
 0x361   : > { %v6971_v8 = vpop.f32.mrb[61].mxu1  ;;  %v2820_v27 = vpop.f32.mrb[62].mxu0  ;;  %v3867_v42 = vpack.c.bf16 %v5805_v39, %v5804_v40  ;;  %v5859_v31 = vld [vmem:[%s7488_s23 + $0x3f1] sm:$0xff] }
 0x362   : > { %v9060_v24 = vadd.f32 %v3127_v37, %v2886_v15  ;;  %v2887_v54 = vadd.f32 %v2820_v27, %v8784_v14  ;;  %v3130_v58 = vpop.f32.mrb[62].mxu1  ;;  %v6902_v16 = vpop.f32.mrb[63].mxu0  ;;  %v5807_v15 = vld [vmem:[%s7488_s23 + $0x2c9] sm:$0xff] }
 0x363   : > { %v6972_v34 = vpop.f32.mrb[63].mxu1  ;;  %v5858_v37 = vld [vmem:[%s7488_s23 + $0x3e9] sm:$0xff] }
 0x364   : > { %v9063_v0 = vadd.f32 %v3130_v58, %v2887_v54  ;;  %7152 = vmatmul.mubr.msk.bf16.gmra.mrb[168].mxu0 %vm278_vm2, %v3866_v57  ;;  %v4178_v16 = vpack.c.bf16 %v5859_v31, %v5858_v37 }
 0x365   : > { %7222 = vmatmul.mubr.msk.bf16.gmra.mrb[168].mxu1 %vm278_vm2, %v4176_v33  ;;  %7155 = vmatprep.mubr.msk.bf16.mxu0 %vm7434_vm1, %v7433_v2 }
 0x366   : > { %7225 = vmatprep.mubr.msk.bf16.mxu1 %vm7434_vm1, %v7433_v2 }
 0x367   : > { %v2825_v14 = vpop.f32.mrb[64].mxu0 }
 0x368   : > { %v2888_v45 = vadd.f32 %v2825_v14, %v8797_v13  ;;  %v3135_v7 = vpop.f32.mrb[64].mxu1  ;;  %v6905_v41 = vpop.f32.mrb[65].mxu0  ;;  %v5806_v13 = vld [vmem:[%s7488_s23 + $0x2c1] sm:$0xff] }
 0x369   : > { %v6975_v26 = vpop.f32.mrb[65].mxu1  ;;  %v2828_v61 = vpop.f32.mrb[66].mxu0  ;;  %v3868_v33 = vpack.c.bf16 %v5807_v15, %v5806_v13  ;;  %v5861_v41 = vld [vmem:[%s7488_s23 + $0x401] sm:$0xff] }
 0x36a   : > { %v9076_v36 = vadd.f32 %v3135_v7, %v2888_v45  ;;  %v2889_v44 = vadd.f32 %v2828_v61, %v8800_v4  ;;  %v3138_v51 = vpop.f32.mrb[66].mxu1  ;;  %v6906_v30 = vpop.f32.mrb[67].mxu0  ;;  %v5809_v45 = vld [vmem:[%s7488_s23 + $0x2d9] sm:$0xff] }
 0x36b   : > { %v6976_v21 = vpop.f32.mrb[67].mxu1  ;;  %v5860_v7 = vld [vmem:[%s7488_s23 + $0x3f9] sm:$0xff] }
 0x36c   : > { %v9079_v28 = vadd.f32 %v3138_v51, %v2889_v44  ;;  %7156 = vmatmul.mubr.msk.bf16.gmra.mrb[172].mxu0 %vm278_vm2, %v3867_v42  ;;  %v4179_v30 = vpack.c.bf16 %v5861_v41, %v5860_v7 }
 0x36d   : > { %7226 = vmatmul.mubr.msk.bf16.gmra.mrb[172].mxu1 %vm278_vm2, %v4177_v5  ;;  %7159 = vmatprep.mubr.msk.bf16.mxu0 %vm7434_vm1, %v7433_v2 }
 0x36e   : > { %7229 = vmatprep.mubr.msk.bf16.mxu1 %vm7434_vm1, %v7433_v2 }
 0x36f   : > { %v2833_v4 = vpop.f32.mrb[68].mxu0 }
 0x370   : > { %v2890_v57 = vadd.f32 %v2833_v4, %v8813_v23  ;;  %v3143_v8 = vpop.f32.mrb[68].mxu1  ;;  %v6909_v27 = vpop.f32.mrb[69].mxu0  ;;  %v5808_v23 = vld [vmem:[%s7488_s23 + $0x2d1] sm:$0xff] }
 0x371   : > { %v6979_v54 = vpop.f32.mrb[69].mxu1  ;;  %v2836_v58 = vpop.f32.mrb[70].mxu0  ;;  %v3869_v5 = vpack.c.bf16 %v5809_v45, %v5808_v23  ;;  %v5863_v27 = vld [vmem:[%s7488_s23 + $0x411] sm:$0xff] }
 0x372   : > { %v9092_v34 = vadd.f32 %v3143_v8, %v2890_v57  ;;  %v2891_v40 = vadd.f32 %v2836_v58, %v8816_v29  ;;  %v3146_v39 = vpop.f32.mrb[70].mxu1  ;;  %v6910_v63 = vpop.f32.mrb[71].mxu0  ;;  %v5811_v57 = vld [vmem:[%s7488_s23 + $0x2e9] sm:$0xff] }
 0x373   : > { %v6980_v17 = vpop.f32.mrb[71].mxu1  ;;  %v5862_v8 = vld [vmem:[%s7488_s23 + $0x409] sm:$0xff] }
 0x374   : > { %v9095_v14 = vadd.f32 %v3146_v39, %v2891_v40  ;;  %7160 = vmatmul.mubr.msk.bf16.gmra.mrb[176].mxu0 %vm278_vm2, %v3868_v33  ;;  %v4180_v63 = vpack.c.bf16 %v5863_v27, %v5862_v8 }
 0x375   : > { %7230 = vmatmul.mubr.msk.bf16.gmra.mrb[176].mxu1 %vm278_vm2, %v4178_v16  ;;  %7163 = vmatprep.mubr.msk.bf16.mxu0 %vm7434_vm1, %v7433_v2 }
 0x376   : > { %7233 = vmatprep.mubr.msk.bf16.mxu1 %vm7434_vm1, %v7433_v2 }
 0x377   : > { %v2841_v29 = vpop.f32.mrb[72].mxu0 }
 0x378   : > { %v2892_v42 = vadd.f32 %v2841_v29, %v8829_v22  ;;  %v3151_v26 = vpop.f32.mrb[72].mxu1  ;;  %v6913_v61 = vpop.f32.mrb[73].mxu0  ;;  %v5810_v22 = vld [vmem:[%s7488_s23 + $0x2e1] sm:$0xff] }
 0x379   : > { %v6983_v44 = vpop.f32.mrb[73].mxu1  ;;  %v2844_v51 = vpop.f32.mrb[74].mxu0  ;;  %v3870_v16 = vpack.c.bf16 %v5811_v57, %v5810_v22  ;;  %v5865_v61 = vld [vmem:[%s7488_s23 + $0x421] sm:$0xff] }
 0x37a   : > { %v9108_v21 = vadd.f32 %v3151_v26, %v2892_v42  ;;  %v2893_v13 = vadd.f32 %v2844_v51, %v8832_v56  ;;  %v3154_v15 = vpop.f32.mrb[74].mxu1  ;;  %v6914_v37 = vpop.f32.mrb[75].mxu0  ;;  %v5813_v42 = vld [vmem:[%s7488_s23 + $0x2f9] sm:$0xff] }
 0x37b   : > { %v6984_v31 = vpop.f32.mrb[75].mxu1  ;;  %v5864_v26 = vld [vmem:[%s7488_s23 + $0x419] sm:$0xff] }
 0x37c   : > { %v9111_v4 = vadd.f32 %v3154_v15, %v2893_v13  ;;  %7164 = vmatmul.mubr.msk.bf16.gmra.mrb[180].mxu0 %vm278_vm2, %v3869_v5  ;;  %v4181_v37 = vpack.c.bf16 %v5865_v61, %v5864_v26 }
 0x37d   : > { %7234 = vmatmul.mubr.msk.bf16.gmra.mrb[180].mxu1 %vm278_vm2, %v4179_v30  ;;  %7167 = vmatprep.mubr.msk.bf16.mxu0 %vm7434_vm1, %v7433_v2 }
 0x37e   : > { %7237 = vmatprep.mubr.msk.bf16.mxu1 %vm7434_vm1, %v7433_v2 }
 0x37f   : > { %v2849_v56 = vpop.f32.mrb[76].mxu0 }
 0x380   : > { %v2894_v33 = vadd.f32 %v2849_v56, %v8845_v43  ;;  %v3159_v54 = vpop.f32.mrb[76].mxu1  ;;  %v6917_v58 = vpop.f32.mrb[77].mxu0  ;;  %v5812_v43 = vld [vmem:[%s7488_s23 + $0x2f1] sm:$0xff] }
 0x381   : > { %v6987_v40 = vpop.f32.mrb[77].mxu1  ;;  %v2852_v39 = vpop.f32.mrb[78].mxu0  ;;  %v3871_v30 = vpack.c.bf16 %v5813_v42, %v5812_v43  ;;  %v5867_v58 = vld [vmem:[%s7488_s23 + $0x431] sm:$0xff] }
 0x382   : > { %v9124_v17 = vadd.f32 %v3159_v54, %v2894_v33  ;;  %v2895_v23 = vadd.f32 %v2852_v39, %v8848_v18  ;;  %v3162_v45 = vpop.f32.mrb[78].mxu1  ;;  %v6918_v7 = vpop.f32.mrb[79].mxu0  ;;  %v5815_v33 = vld [vmem:[%s7488_s23 + $0x309] sm:$0xff] }
 0x383   : > { %v6988_v41 = vpop.f32.mrb[79].mxu1  ;;  %v5866_v54 = vld [vmem:[%s7488_s23 + $0x429] sm:$0xff] }
 0x384   : > { %v9127_v29 = vadd.f32 %v3162_v45, %v2895_v23  ;;  %7168 = vmatmul.mubr.msk.bf16.gmra.mrb[184].mxu0 %vm278_vm2, %v3870_v16  ;;  %v4182_v7 = vpack.c.bf16 %v5867_v58, %v5866_v54 }
 0x385   : > { %7238 = vmatmul.mubr.msk.bf16.gmra.mrb[184].mxu1 %vm278_vm2, %v4180_v63  ;;  %7171 = vmatprep.mubr.msk.bf16.mxu0 %vm7434_vm1, %v7433_v2 }
 0x386   : > { %7241 = vmatprep.mubr.msk.bf16.mxu1 %vm7434_vm1, %v7433_v2 }
 0x387   : > { %v2857_v18 = vpop.f32.mrb[80].mxu0 }
 0x388   : > { %v2896_v5 = vadd.f32 %v2857_v18, %v8861_v1  ;;  %v3167_v44 = vpop.f32.mrb[80].mxu1  ;;  %v6921_v51 = vpop.f32.mrb[81].mxu0  ;;  %v5814_v1 = vld [vmem:[%s7488_s23 + $0x301] sm:$0xff] }
 0x389   : > { %v6991_v13 = vpop.f32.mrb[81].mxu1  ;;  %v2860_v15 = vpop.f32.mrb[82].mxu0  ;;  %v3872_v63 = vpack.c.bf16 %v5815_v33, %v5814_v1  ;;  %v5869_v51 = vld [vmem:[%s7488_s23 + $0x441] sm:$0xff] }
 0x38a   : > { %v9140_v31 = vadd.f32 %v3167_v44, %v2896_v5  ;;  %v2897_v22 = vadd.f32 %v2860_v15, %v8864_v48  ;;  %v3170_v57 = vpop.f32.mrb[82].mxu1  ;;  %v6922_v8 = vpop.f32.mrb[83].mxu0  ;;  %v5817_v5 = vld [vmem:[%s7488_s23 + $0x319] sm:$0xff] }
 0x38b   : > { %v6992_v27 = vpop.f32.mrb[83].mxu1  ;;  %v5868_v44 = vld [vmem:[%s7488_s23 + $0x439] sm:$0xff] }
 0x38c   : > { %v9143_v56 = vadd.f32 %v3170_v57, %v2897_v22  ;;  %7172 = vmatmul.mubr.msk.bf16.gmra.mrb[188].mxu0 %vm278_vm2, %v3871_v30  ;;  %v4183_v8 = vpack.c.bf16 %v5869_v51, %v5868_v44 }
 0x38d   : > { %7242 = vmatmul.mubr.msk.bf16.gmra.mrb[188].mxu1 %vm278_vm2, %v4181_v37  ;;  %7175 = vmatprep.mubr.msk.bf16.mxu0 %vm7434_vm1, %v7433_v2 }
 0x38e   : > { %7245 = vmatprep.mubr.msk.bf16.mxu1 %vm7434_vm1, %v7433_v2 }
 0x38f   : > { %v3349_v48 = vpop.f32.mrb[84].mxu0 }
 0x390   : > { %v3484_v16 = vadd.f32 %v3349_v48, %v8877_v25  ;;  %v3659_v40 = vpop.f32.mrb[84].mxu1  ;;  %v6997_v39 = vpop.f32.mrb[85].mxu0  ;;  %v5816_v25 = vld [vmem:[%s7488_s23 + $0x311] sm:$0xff] }
 0x391   : > { %v7067_v23 = vpop.f32.mrb[85].mxu1  ;;  %v3352_v45 = vpop.f32.mrb[86].mxu0  ;;  %v3873_v37 = vpack.c.bf16 %v5817_v5, %v5816_v25  ;;  %v5871_v39 = vld [vmem:[%s7488_s23 + $0x451] sm:$0xff] }
 0x392   : > { %v9156_v41 = vadd.f32 %v3659_v40, %v3484_v16  ;;  %v3485_v43 = vadd.f32 %v3352_v45, %v8880_v35  ;;  %v3662_v42 = vpop.f32.mrb[86].mxu1  ;;  %v6998_v26 = vpop.f32.mrb[87].mxu0  ;;  %v5819_v16 = vld [vmem:[%s7488_s23 + $0x329] sm:$0xff] }
 0x393   : > { %v7068_v61 = vpop.f32.mrb[87].mxu1  ;;  %v5870_v40 = vld [vmem:[%s7488_s23 + $0x449] sm:$0xff] }
 0x394   : > { %v9159_v18 = vadd.f32 %v3662_v42, %v3485_v43  ;;  %7176 = vmatmul.mubr.msk.bf16.gmra.mrb[192].mxu0 %vm278_vm2, %v3872_v63  ;;  %v4184_v26 = vpack.c.bf16 %v5871_v39, %v5870_v40 }
 0x395   : > { %7246 = vmatmul.mubr.msk.bf16.gmra.mrb[192].mxu1 %vm278_vm2, %v4182_v7  ;;  %7179 = vmatprep.mubr.msk.bf16.mxu0 %vm7434_vm1, %v7433_v2 }
 0x396   : > { %7249 = vmatprep.mubr.msk.bf16.mxu1 %vm7434_vm1, %v7433_v2 }
 0x397   : > { %v3357_v35 = vpop.f32.mrb[88].mxu0 }
 0x398   : > { %v3486_v30 = vadd.f32 %v3357_v35, %v8893_v49  ;;  %v3667_v13 = vpop.f32.mrb[88].mxu1  ;;  %v7001_v15 = vpop.f32.mrb[89].mxu0  ;;  %v5818_v49 = vld [vmem:[%s7488_s23 + $0x321] sm:$0xff] }
 0x399   : > { %v7071_v22 = vpop.f32.mrb[89].mxu1  ;;  %v3360_v57 = vpop.f32.mrb[90].mxu0  ;;  %v3874_v7 = vpack.c.bf16 %v5819_v16, %v5818_v49  ;;  %v5873_v15 = vld [vmem:[%s7488_s23 + $0x461] sm:$0xff] }
 0x39a   : > { %v9172_v27 = vadd.f32 %v3667_v13, %v3486_v30  ;;  %v3487_v1 = vadd.f32 %v3360_v57, %v8896_v9  ;;  %v3670_v33 = vpop.f32.mrb[90].mxu1  ;;  %v7002_v54 = vpop.f32.mrb[91].mxu0  ;;  %v5821_v30 = vld [vmem:[%s7488_s23 + $0x339] sm:$0xff] }
 0x39b   : > { %v7072_v58 = vpop.f32.mrb[91].mxu1  ;;  %v5872_v13 = vld [vmem:[%s7488_s23 + $0x459] sm:$0xff] }
 0x39c   : > { %v9175_v48 = vadd.f32 %v3670_v33, %v3487_v1  ;;  %7180 = vmatmul.mubr.msk.bf16.gmra.mrb[196].mxu0 %vm278_vm2, %v3873_v37  ;;  %v4185_v54 = vpack.c.bf16 %v5873_v15, %v5872_v13 }
 0x39d   : > { %7250 = vmatmul.mubr.msk.bf16.gmra.mrb[196].mxu1 %vm278_vm2, %v4183_v8  ;;  %7183 = vmatprep.mubr.msk.bf16.mxu0 %vm7434_vm1, %v7433_v2 }
 0x39e   : > { %7253 = vmatprep.mubr.msk.bf16.mxu1 %vm7434_vm1, %v7433_v2 }
 0x39f   : > { %v3365_v9 = vpop.f32.mrb[92].mxu0 }
 0x3a0   : > { %v3488_v63 = vadd.f32 %v3365_v9, %v8909_v11  ;;  %v3675_v23 = vpop.f32.mrb[92].mxu1  ;;  %v7005_v45 = vpop.f32.mrb[93].mxu0  ;;  %v5820_v11 = vld [vmem:[%s7488_s23 + $0x331] sm:$0xff] }
 0x3a1   : > { %v7075_v43 = vpop.f32.mrb[93].mxu1  ;;  %v3368_v42 = vpop.f32.mrb[94].mxu0  ;;  %v3875_v8 = vpack.c.bf16 %v5821_v30, %v5820_v11  ;;  %v5875_v45 = vld [vmem:[%s7488_s23 + $0x471] sm:$0xff] }
 0x3a2   : > { %v9188_v61 = vadd.f32 %v3675_v23, %v3488_v63  ;;  %v3489_v25 = vadd.f32 %v3368_v42, %v8912_v46  ;;  %v3678_v5 = vpop.f32.mrb[94].mxu1  ;;  %v7006_v44 = vpop.f32.mrb[95].mxu0  ;;  %v5823_v63 = vld [vmem:[%s7488_s23 + $0x349] sm:$0xff] }
 0x3a3   : > { %v7076_v51 = vpop.f32.mrb[95].mxu1  ;;  %v5874_v23 = vld [vmem:[%s7488_s23 + $0x469] sm:$0xff] }
 0x3a4   : > { %v9191_v35 = vadd.f32 %v3678_v5, %v3489_v25  ;;  %7184 = vmatmul.mubr.msk.bf16.gmra.mrb[200].mxu0 %vm278_vm2, %v3874_v7  ;;  %v4186_v44 = vpack.c.bf16 %v5875_v45, %v5874_v23 }
 0x3a5   : > { %7254 = vmatmul.mubr.msk.bf16.gmra.mrb[200].mxu1 %vm278_vm2, %v4184_v26  ;;  %7187 = vmatprep.mubr.msk.bf16.mxu0 %vm7434_vm1, %v7433_v2 }
 0x3a6   : > { %7257 = vmatprep.mubr.msk.bf16.mxu1 %vm7434_vm1, %v7433_v2 }
 0x3a7   : > { %v3373_v46 = vpop.f32.mrb[96].mxu0 }
 0x3a8   : > { %v3490_v37 = vadd.f32 %v3373_v46, %v8925_v38  ;;  %v3683_v22 = vpop.f32.mrb[96].mxu1  ;;  %v7009_v57 = vpop.f32.mrb[97].mxu0  ;;  %v5822_v38 = vld [vmem:[%s7488_s23 + $0x341] sm:$0xff] }
 0x3a9   : > { %v7079_v1 = vpop.f32.mrb[97].mxu1  ;;  %v3376_v33 = vpop.f32.mrb[98].mxu0  ;;  %v3876_v26 = vpack.c.bf16 %v5823_v63, %v5822_v38  ;;  %v5877_v57 = vld [vmem:[%s7488_s23 + $0x481] sm:$0xff] }
 0x3aa   : > { %v9204_v58 = vadd.f32 %v3683_v22, %v3490_v37  ;;  %v3491_v49 = vadd.f32 %v3376_v33, %v8928_v19  ;;  %v3686_v16 = vpop.f32.mrb[98].mxu1  ;;  %v7010_v40 = vpop.f32.mrb[99].mxu0  ;;  %v5825_v37 = vld [vmem:[%s7488_s23 + $0x359] sm:$0xff] }
 0x3ab   : > { %v7080_v39 = vpop.f32.mrb[99].mxu1  ;;  %v5876_v22 = vld [vmem:[%s7488_s23 + $0x479] sm:$0xff] }
 0x3ac   : > { %v9207_v9 = vadd.f32 %v3686_v16, %v3491_v49  ;;  %7188 = vmatmul.mubr.msk.bf16.gmra.mrb[204].mxu0 %vm278_vm2, %v3875_v8  ;;  %v4187_v40 = vpack.c.bf16 %v5877_v57, %v5876_v22 }
 0x3ad   : > { %7258 = vmatmul.mubr.msk.bf16.gmra.mrb[204].mxu1 %vm278_vm2, %v4185_v54  ;;  %7191 = vmatprep.mubr.msk.bf16.mxu0 %vm7434_vm1, %v7433_v2 }
 0x3ae   : > { %7261 = vmatprep.mubr.msk.bf16.mxu1 %vm7434_vm1, %v7433_v2 }
 0x3af   : > { %v3381_v19 = vpop.f32.mrb[100].mxu0 }
 0x3b0   : > { %v3492_v7 = vadd.f32 %v3381_v19, %v8940_v59  ;;  %v3691_v43 = vpop.f32.mrb[100].mxu1  ;;  %v7013_v42 = vpop.f32.mrb[101].mxu0  ;;  %v5824_v59 = vld [vmem:[%s7488_s23 + $0x351] sm:$0xff] }
 0x3b1   : > { %v7083_v25 = vpop.f32.mrb[101].mxu1  ;;  %v3384_v5 = vpop.f32.mrb[102].mxu0  ;;  %v3877_v54 = vpack.c.bf16 %v5825_v37, %v5824_v59  ;;  %v5879_v42 = vld [vmem:[%s7488_s23 + $0x491] sm:$0xff] }
 0x3b2   : > { %v9220_v51 = vadd.f32 %v3691_v43, %v3492_v7  ;;  %v3493_v11 = vadd.f32 %v3384_v5, %v8943_v3  ;;  %v3694_v30 = vpop.f32.mrb[102].mxu1  ;;  %v7014_v13 = vpop.f32.mrb[103].mxu0  ;;  %v5827_v7 = vld [vmem:[%s7488_s23 + $0x369] sm:$0xff] }
 0x3b3   : > { %v7084_v15 = vpop.f32.mrb[103].mxu1  ;;  %v5878_v43 = vld [vmem:[%s7488_s23 + $0x489] sm:$0xff] }
 0x3b4   : > { %v9223_v46 = vadd.f32 %v3694_v30, %v3493_v11  ;;  %7192 = vmatmul.mubr.msk.bf16.gmra.mrb[208].mxu0 %vm278_vm2, %v3876_v26  ;;  %v4188_v13 = vpack.c.bf16 %v5879_v42, %v5878_v43 }
 0x3b5   : > { %7262 = vmatmul.mubr.msk.bf16.gmra.mrb[208].mxu1 %vm278_vm2, %v4186_v44  ;;  %7195 = vmatprep.mubr.msk.bf16.mxu0 %vm7434_vm1, %v7433_v2 }
 0x3b6   : > { %7265 = vmatprep.mubr.msk.bf16.mxu1 %vm7434_vm1, %v7433_v2 }
 0x3b7   : > { %v3389_v3 = vpop.f32.mrb[104].mxu0 }
 0x3b8   : > { %v3494_v8 = vadd.f32 %v3389_v3, %v8956_v12  ;;  %v3699_v1 = vpop.f32.mrb[104].mxu1  ;;  %v7017_v33 = vpop.f32.mrb[105].mxu0  ;;  %v5826_v12 = vld [vmem:[%s7488_s23 + $0x361] sm:$0xff] }
 0x3b9   : > { %v7087_v49 = vpop.f32.mrb[105].mxu1  ;;  %v3392_v16 = vpop.f32.mrb[106].mxu0  ;;  %v3878_v44 = vpack.c.bf16 %v5827_v7, %v5826_v12  ;;  %v5951_v33 = vld [vmem:[%s7488_s23 + $0x392] sm:$0xff] }
 0x3ba   : > { %v9236_v39 = vadd.f32 %v3699_v1, %v3494_v8  ;;  %v3495_v38 = vadd.f32 %v3392_v16, %v8959_v55  ;;  %v3702_v63 = vpop.f32.mrb[106].mxu1  ;;  %v7018_v23 = vpop.f32.mrb[107].mxu0  ;;  %v5899_v8 = vld [vmem:[%s7488_s23 + $0x26a] sm:$0xff] }
 0x3bb   : > { %v7088_v45 = vpop.f32.mrb[107].mxu1  ;;  %v5950_v1 = vld [vmem:[%s7488_s23 + $0x38a] sm:$0xff] }
 0x3bc   : > { %v9239_v19 = vadd.f32 %v3702_v63, %v3495_v38  ;;  %7196 = vmatmul.mubr.msk.bf16.gmra.mrb[212].mxu0 %vm278_vm2, %v3877_v54  ;;  %v4792_v23 = vpack.c.bf16 %v5951_v33, %v5950_v1 }
 0x3bd   : > { %7266 = vmatmul.mubr.msk.bf16.gmra.mrb[212].mxu1 %vm278_vm2, %v4187_v40  ;;  %7199 = vmatprep.mubr.msk.bf16.mxu0 %vm7434_vm1, %v7433_v2 }
 0x3be   : > { %7269 = vmatprep.mubr.msk.bf16.mxu1 %vm7434_vm1, %v7433_v2 }
 0x3bf   : > { %v3397_v55 = vpop.f32.mrb[108].mxu0 }
 0x3c0   : > { %v3496_v26 = vadd.f32 %v3397_v55, %v8972_v47  ;;  %v3707_v25 = vpop.f32.mrb[108].mxu1  ;;  %v7021_v5 = vpop.f32.mrb[109].mxu0  ;;  %v5898_v47 = vld [vmem:[%s7488_s23 + $0x262] sm:$0xff] }
 0x3c1   : > { %v7091_v11 = vpop.f32.mrb[109].mxu1  ;;  %v3400_v30 = vpop.f32.mrb[110].mxu0  ;;  %v4482_v40 = vpack.c.bf16 %v5899_v8, %v5898_v47  ;;  %v5953_v5 = vld [vmem:[%s7488_s23 + $0x3a2] sm:$0xff] }
 0x3c2   : > { %v9252_v15 = vadd.f32 %v3707_v25, %v3496_v26  ;;  %v3497_v59 = vadd.f32 %v3400_v30, %v8975_v60  ;;  %v3710_v37 = vpop.f32.mrb[110].mxu1  ;;  %v7022_v22 = vpop.f32.mrb[111].mxu0  ;;  %v5901_v26 = vld [vmem:[%s7488_s23 + $0x27a] sm:$0xff] }
 0x3c3   : > { %v7092_v57 = vpop.f32.mrb[111].mxu1  ;;  %v5952_v25 = vld [vmem:[%s7488_s23 + $0x39a] sm:$0xff] }
 0x3c4   : > { %v9255_v3 = vadd.f32 %v3710_v37, %v3497_v59  ;;  %7200 = vmatmul.mubr.msk.bf16.gmra.mrb[216].mxu0 %vm278_vm2, %v3878_v44  ;;  %v4793_v22 = vpack.c.bf16 %v5953_v5, %v5952_v25 }
 0x3c5   : > { %7270 = vmatmul.mubr.msk.bf16.gmra.mrb[216].mxu1 %vm278_vm2, %v4188_v13  ;;  %7275 = vmatprep.mubr.msk.bf16.mxu0 %vm7434_vm1, %v7433_v2 }
 0x3c6   : > { %7345 = vmatprep.mubr.msk.bf16.mxu1 %vm7434_vm1, %v7433_v2 }
 0x3c7   : > { %v3405_v60 = vpop.f32.mrb[112].mxu0 }
 0x3c8   : > { %v3498_v54 = vadd.f32 %v3405_v60, %v8994_v32  ;;  %v3715_v49 = vpop.f32.mrb[112].mxu1  ;;  %v7025_v16 = vpop.f32.mrb[113].mxu0  ;;  %v5900_v32 = vld [vmem:[%s7488_s23 + $0x272] sm:$0xff] }
 0x3c9   : > { %v7095_v38 = vpop.f32.mrb[113].mxu1  ;;  %v3408_v63 = vpop.f32.mrb[114].mxu0  ;;  %v4483_v13 = vpack.c.bf16 %v5901_v26, %v5900_v32  ;;  %v5955_v16 = vld [vmem:[%s7488_s23 + $0x3b2] sm:$0xff] }
 0x3ca   : > { %v9268_v45 = vadd.f32 %v3715_v49, %v3498_v54  ;;  %v3499_v12 = vadd.f32 %v3408_v63, %v8999_v20  ;;  %v3718_v7 = vpop.f32.mrb[114].mxu1  ;;  %v7026_v43 = vpop.f32.mrb[115].mxu0  ;;  %v5903_v54 = vld [vmem:[%s7488_s23 + $0x28a] sm:$0xff] }
 0x3cb   : > { %v7096_v42 = vpop.f32.mrb[115].mxu1  ;;  %v5954_v49 = vld [vmem:[%s7488_s23 + $0x3aa] sm:$0xff] }
 0x3cc   : > { %v9271_v55 = vadd.f32 %v3718_v7, %v3499_v12  ;;  %7276 = vmatmul.mubr.msk.bf16.vlgmr.msra.gmra.mrb[220].mxu0 %vm278_vm2, %v4482_v40  ;;  %v4794_v43 = vpack.c.bf16 %v5955_v16, %v5954_v49 }
 0x3cd   : > { %7346 = vmatmul.mubr.msk.bf16.vlgmr.msra.gmra.mrb[220].mxu1 %vm278_vm2, %v4792_v23  ;;  %7279 = vmatprep.mubr.msk.bf16.mxu0 %vm7434_vm1, %v7433_v2 }
 0x3ce   : > { %7349 = vmatprep.mubr.msk.bf16.mxu1 %vm7434_vm1, %v7433_v2 }
 0x3cf   : > { %v3413_v20 = vpop.f32.mrb[116].mxu0 }
 0x3d0   : > { %v3500_v44 = vadd.f32 %v3413_v20, %v9012_v50  ;;  %v3723_v11 = vpop.f32.mrb[116].mxu1  ;;  %v7029_v30 = vpop.f32.mrb[117].mxu0  ;;  %v5902_v50 = vld [vmem:[%s7488_s23 + $0x282] sm:$0xff] }
 0x3d1   : > { %v7099_v59 = vpop.f32.mrb[117].mxu1  ;;  %v3416_v37 = vpop.f32.mrb[118].mxu0  ;;  %v4484_v23 = vpack.c.bf16 %v5903_v54, %v5902_v50  ;;  %v5957_v30 = vld [vmem:[%s7488_s23 + $0x3c2] sm:$0xff] }
 0x3d2   : > { %v9284_v57 = vadd.f32 %v3723_v11, %v3500_v44  ;;  %v3501_v47 = vadd.f32 %v3416_v37, %v9015_v10  ;;  %v3726_v8 = vpop.f32.mrb[118].mxu1  ;;  %v7030_v1 = vpop.f32.mrb[119].mxu0  ;;  %v5905_v44 = vld [vmem:[%s7488_s23 + $0x29a] sm:$0xff] }
 0x3d3   : > { %v7100_v33 = vpop.f32.mrb[119].mxu1  ;;  %v5956_v11 = vld [vmem:[%s7488_s23 + $0x3ba] sm:$0xff] }
 0x3d4   : > { %v9287_v60 = vadd.f32 %v3726_v8, %v3501_v47  ;;  %7280 = vmatmul.mubr.msk.bf16.gmra.mrb[224].mxu0 %vm278_vm2, %v4483_v13  ;;  %v4795_v1 = vpack.c.bf16 %v5957_v30, %v5956_v11 }
 0x3d5   : > { %7350 = vmatmul.mubr.msk.bf16.gmra.mrb[224].mxu1 %vm278_vm2, %v4793_v22  ;;  %7283 = vmatprep.mubr.msk.bf16.mxu0 %vm7434_vm1, %v7433_v2 }
 0x3d6   : > { %7353 = vmatprep.mubr.msk.bf16.mxu1 %vm7434_vm1, %v7433_v2 }
 0x3d7   : > { %v3421_v10 = vpop.f32.mrb[120].mxu0 }
 0x3d8   : > { %v3502_v40 = vadd.f32 %v3421_v10, %v9028_v53  ;;  %v3731_v38 = vpop.f32.mrb[120].mxu1  ;;  %v7033_v63 = vpop.f32.mrb[121].mxu0  ;;  %v5904_v53 = vld [vmem:[%s7488_s23 + $0x292] sm:$0xff] }
 0x3d9   : > { %v7103_v12 = vpop.f32.mrb[121].mxu1  ;;  %v3424_v7 = vpop.f32.mrb[122].mxu0  ;;  %v4485_v22 = vpack.c.bf16 %v5905_v44, %v5904_v53  ;;  %v5959_v63 = vld [vmem:[%s7488_s23 + $0x3d2] sm:$0xff] }
 0x3da   : > { %v9300_v42 = vadd.f32 %v3731_v38, %v3502_v40  ;;  %v3503_v32 = vadd.f32 %v3424_v7, %v9031_v6  ;;  %v3734_v26 = vpop.f32.mrb[122].mxu1  ;;  %v7034_v25 = vpop.f32.mrb[123].mxu0  ;;  %v5907_v40 = vld [vmem:[%s7488_s23 + $0x2aa] sm:$0xff] }
 0x3db   : > { %v7104_v5 = vpop.f32.mrb[123].mxu1  ;;  %v5958_v38 = vld [vmem:[%s7488_s23 + $0x3ca] sm:$0xff] }
 0x3dc   : > { %v9303_v20 = vadd.f32 %v3734_v26, %v3503_v32  ;;  %7284 = vmatmul.mubr.msk.bf16.gmra.mrb[228].mxu0 %vm278_vm2, %v4484_v23  ;;  %v4796_v25 = vpack.c.bf16 %v5959_v63, %v5958_v38 }
 0x3dd   : > { %7354 = vmatmul.mubr.msk.bf16.gmra.mrb[228].mxu1 %vm278_vm2, %v4794_v43  ;;  %7287 = vmatprep.mubr.msk.bf16.mxu0 %vm7434_vm1, %v7433_v2 }
 0x3de   : > { %7357 = vmatprep.mubr.msk.bf16.mxu1 %vm7434_vm1, %v7433_v2 }
 0x3df   : > { %v3429_v6 = vpop.f32.mrb[124].mxu0 }
 0x3e0   : > { %v3504_v13 = vadd.f32 %v3429_v6, %v9044_v52  ;;  %v3739_v59 = vpop.f32.mrb[124].mxu1  ;;  %v7037_v37 = vpop.f32.mrb[125].mxu0  ;;  %v5906_v52 = vld [vmem:[%s7488_s23 + $0x2a2] sm:$0xff] }
 0x3e1   : > { %v7107_v47 = vpop.f32.mrb[125].mxu1  ;;  %v3432_v8 = vpop.f32.mrb[126].mxu0  ;;  %v4486_v43 = vpack.c.bf16 %v5907_v40, %v5906_v52  ;;  %v5961_v37 = vld [vmem:[%s7488_s23 + $0x3e2] sm:$0xff] }
 0x3e2   : > { %v9316_v33 = vadd.f32 %v3739_v59, %v3504_v13  ;;  %v3505_v50 = vadd.f32 %v3432_v8, %v9047_v62  ;;  %v3742_v54 = vpop.f32.mrb[126].mxu1  ;;  %v7038_v49 = vpop.f32.mrb[127].mxu0  ;;  %v5909_v13 = vld [vmem:[%s7488_s23 + $0x2ba] sm:$0xff] }
 0x3e3   : > { %v7108_v16 = vpop.f32.mrb[127].mxu1  ;;  %v5960_v59 = vld [vmem:[%s7488_s23 + $0x3da] sm:$0xff] }
 0x3e4   : > { %v9319_v10 = vadd.f32 %v3742_v54, %v3505_v50  ;;  %7288 = vmatmul.mubr.msk.bf16.gmra.mrb[232].mxu0 %vm278_vm2, %v4485_v22  ;;  %v4797_v49 = vpack.c.bf16 %v5961_v37, %v5960_v59 }
 0x3e5   : > { %7358 = vmatmul.mubr.msk.bf16.gmra.mrb[232].mxu1 %vm278_vm2, %v4795_v1  ;;  %7291 = vmatprep.mubr.msk.bf16.mxu0 %vm7434_vm1, %v7433_v2 }
 0x3e6   : > { %7361 = vmatprep.mubr.msk.bf16.mxu1 %vm7434_vm1, %v7433_v2 }
 0x3e7   : > { %v3437_v62 = vpop.f32.mrb[128].mxu0 }
 0x3e8   : > { %v3506_v23 = vadd.f32 %v3437_v62, %v9060_v24  ;;  %v3747_v12 = vpop.f32.mrb[128].mxu1  ;;  %v7041_v7 = vpop.f32.mrb[129].mxu0  ;;  %v5908_v24 = vld [vmem:[%s7488_s23 + $0x2b2] sm:$0xff] }
 0x3e9   : > { %v7111_v32 = vpop.f32.mrb[129].mxu1  ;;  %v3440_v26 = vpop.f32.mrb[130].mxu0  ;;  %v4487_v1 = vpack.c.bf16 %v5909_v13, %v5908_v24  ;;  %v5963_v7 = vld [vmem:[%s7488_s23 + $0x3f2] sm:$0xff] }
 0x3ea   : > { %v9332_v5 = vadd.f32 %v3747_v12, %v3506_v23  ;;  %v3507_v53 = vadd.f32 %v3440_v26, %v9063_v0  ;;  %v3750_v44 = vpop.f32.mrb[130].mxu1  ;;  %v7042_v11 = vpop.f32.mrb[131].mxu0  ;;  %v5911_v23 = vld [vmem:[%s7488_s23 + $0x2ca] sm:$0xff] }
 0x3eb   : > { %v7112_v30 = vpop.f32.mrb[131].mxu1  ;;  %v5962_v12 = vld [vmem:[%s7488_s23 + $0x3ea] sm:$0xff] }
 0x3ec   : > { %v9335_v6 = vadd.f32 %v3750_v44, %v3507_v53  ;;  %7292 = vmatmul.mubr.msk.bf16.gmra.mrb[236].mxu0 %vm278_vm2, %v4486_v43  ;;  %v4798_v11 = vpack.c.bf16 %v5963_v7, %v5962_v12 }
 0x3ed   : > { %7362 = vmatmul.mubr.msk.bf16.gmra.mrb[236].mxu1 %vm278_vm2, %v4796_v25  ;;  %7295 = vmatprep.mubr.msk.bf16.mxu0 %vm7434_vm1, %v7433_v2 }
 0x3ee   : > { %7365 = vmatprep.mubr.msk.bf16.mxu1 %vm7434_vm1, %v7433_v2 }
 0x3ef   : > { %v3445_v0 = vpop.f32.mrb[132].mxu0 }
 0x3f0   : > { %v3508_v22 = vadd.f32 %v3445_v0, %v9076_v36  ;;  %v3755_v47 = vpop.f32.mrb[132].mxu1  ;;  %v7045_v8 = vpop.f32.mrb[133].mxu0  ;;  %v5910_v36 = vld [vmem:[%s7488_s23 + $0x2c2] sm:$0xff] }
 0x3f1   : > { %v7115_v50 = vpop.f32.mrb[133].mxu1  ;;  %v3448_v54 = vpop.f32.mrb[134].mxu0  ;;  %v4488_v25 = vpack.c.bf16 %v5911_v23, %v5910_v36  ;;  %v5965_v8 = vld [vmem:[%s7488_s23 + $0x402] sm:$0xff] }
 0x3f2   : > { %v9348_v16 = vadd.f32 %v3755_v47, %v3508_v22  ;;  %v3509_v52 = vadd.f32 %v3448_v54, %v9079_v28  ;;  %v3758_v40 = vpop.f32.mrb[134].mxu1  ;;  %v7046_v38 = vpop.f32.mrb[135].mxu0  ;;  %v5913_v22 = vld [vmem:[%s7488_s23 + $0x2da] sm:$0xff] }
 0x3f3   : > { %v7116_v63 = vpop.f32.mrb[135].mxu1  ;;  %v5964_v47 = vld [vmem:[%s7488_s23 + $0x3fa] sm:$0xff] }
 0x3f4   : > { %v9351_v62 = vadd.f32 %v3758_v40, %v3509_v52  ;;  %7296 = vmatmul.mubr.msk.bf16.gmra.mrb[240].mxu0 %vm278_vm2, %v4487_v1  ;;  %v4799_v38 = vpack.c.bf16 %v5965_v8, %v5964_v47 }
 0x3f5   : > { %7366 = vmatmul.mubr.msk.bf16.gmra.mrb[240].mxu1 %vm278_vm2, %v4797_v49  ;;  %7299 = vmatprep.mubr.msk.bf16.mxu0 %vm7434_vm1, %v7433_v2 }
 0x3f6   : > { %7369 = vmatprep.mubr.msk.bf16.mxu1 %vm7434_vm1, %v7433_v2 }
 0x3f7   : > { %v3453_v28 = vpop.f32.mrb[136].mxu0 }
 0x3f8   : > { %v3510_v43 = vadd.f32 %v3453_v28, %v9092_v34  ;;  %v3763_v32 = vpop.f32.mrb[136].mxu1  ;;  %v7049_v26 = vpop.f32.mrb[137].mxu0  ;;  %v5912_v34 = vld [vmem:[%s7488_s23 + $0x2d2] sm:$0xff] }
 0x3f9   : > { %v7119_v53 = vpop.f32.mrb[137].mxu1  ;;  %v3456_v44 = vpop.f32.mrb[138].mxu0  ;;  %v4489_v49 = vpack.c.bf16 %v5913_v22, %v5912_v34  ;;  %v5967_v26 = vld [vmem:[%s7488_s23 + $0x412] sm:$0xff] }
 0x3fa   : > { %v9364_v30 = vadd.f32 %v3763_v32, %v3510_v43  ;;  %v3511_v24 = vadd.f32 %v3456_v44, %v9095_v14  ;;  %v3766_v13 = vpop.f32.mrb[138].mxu1  ;;  %v7050_v59 = vpop.f32.mrb[139].mxu0  ;;  %v5915_v43 = vld [vmem:[%s7488_s23 + $0x2ea] sm:$0xff] }
 0x3fb   : > { %v7120_v37 = vpop.f32.mrb[139].mxu1  ;;  %v5966_v32 = vld [vmem:[%s7488_s23 + $0x40a] sm:$0xff] }
 0x3fc   : > { %v9367_v0 = vadd.f32 %v3766_v13, %v3511_v24  ;;  %7300 = vmatmul.mubr.msk.bf16.gmra.mrb[244].mxu0 %vm278_vm2, %v4488_v25  ;;  %v4800_v59 = vpack.c.bf16 %v5967_v26, %v5966_v32 }
 0x3fd   : > { %7370 = vmatmul.mubr.msk.bf16.gmra.mrb[244].mxu1 %vm278_vm2, %v4798_v11  ;;  %7303 = vmatprep.mubr.msk.bf16.mxu0 %vm7434_vm1, %v7433_v2 }
 0x3fe   : > { %7373 = vmatprep.mubr.msk.bf16.mxu1 %vm7434_vm1, %v7433_v2 }
 0x3ff   : > { %v3461_v14 = vpop.f32.mrb[140].mxu0 }
 0x400   : > { %v3512_v1 = vadd.f32 %v3461_v14, %v9108_v21  ;;  %v3771_v50 = vpop.f32.mrb[140].mxu1  ;;  %v7053_v54 = vpop.f32.mrb[141].mxu0  ;;  %v5914_v21 = vld [vmem:[%s7488_s23 + $0x2e2] sm:$0xff] }
 0x401   : > { %v7123_v52 = vpop.f32.mrb[141].mxu1  ;;  %v3464_v40 = vpop.f32.mrb[142].mxu0  ;;  %v4490_v11 = vpack.c.bf16 %v5915_v43, %v5914_v21  ;;  %v5969_v54 = vld [vmem:[%s7488_s23 + $0x422] sm:$0xff] }
 0x402   : > { %v9380_v63 = vadd.f32 %v3771_v50, %v3512_v1  ;;  %v3513_v36 = vadd.f32 %v3464_v40, %v9111_v4  ;;  %v3774_v23 = vpop.f32.mrb[142].mxu1  ;;  %v7054_v12 = vpop.f32.mrb[143].mxu0  ;;  %v5917_v1 = vld [vmem:[%s7488_s23 + $0x2fa] sm:$0xff] }
 0x403   : > { %v7124_v7 = vpop.f32.mrb[143].mxu1  ;;  %v5968_v50 = vld [vmem:[%s7488_s23 + $0x41a] sm:$0xff] }
 0x404   : > { %v9383_v28 = vadd.f32 %v3774_v23, %v3513_v36  ;;  %7304 = vmatmul.mubr.msk.bf16.gmra.mrb[248].mxu0 %vm278_vm2, %v4489_v49  ;;  %v4801_v12 = vpack.c.bf16 %v5969_v54, %v5968_v50 }
 0x405   : > { %7374 = vmatmul.mubr.msk.bf16.gmra.mrb[248].mxu1 %vm278_vm2, %v4799_v38  ;;  %7307 = vmatprep.mubr.msk.bf16.mxu0 %vm7434_vm1, %v7433_v2 }
 0x406   : > { %7377 = vmatprep.mubr.msk.bf16.mxu1 %vm7434_vm1, %v7433_v2 }
 0x407   : > { %v3469_v4 = vpop.f32.mrb[144].mxu0 }
 0x408   : > { %v3514_v25 = vadd.f32 %v3469_v4, %v9124_v17  ;;  %v3779_v53 = vpop.f32.mrb[144].mxu1  ;;  %v7057_v44 = vpop.f32.mrb[145].mxu0  ;;  %v5916_v17 = vld [vmem:[%s7488_s23 + $0x2f2] sm:$0xff] }
 0x409   : > { %v7127_v24 = vpop.f32.mrb[145].mxu1  ;;  %v3472_v13 = vpop.f32.mrb[146].mxu0  ;;  %v4491_v38 = vpack.c.bf16 %v5917_v1, %v5916_v17  ;;  %v5971_v44 = vld [vmem:[%s7488_s23 + $0x432] sm:$0xff] }
 0x40a   : > { %v9396_v37 = vadd.f32 %v3779_v53, %v3514_v25  ;;  %v3515_v34 = vadd.f32 %v3472_v13, %v9127_v29  ;;  %v3782_v22 = vpop.f32.mrb[146].mxu1  ;;  %v7058_v47 = vpop.f32.mrb[147].mxu0  ;;  %v5919_v25 = vld [vmem:[%s7488_s23 + $0x30a] sm:$0xff] }
 0x40b   : > { %v7128_v8 = vpop.f32.mrb[147].mxu1  ;;  %v5970_v53 = vld [vmem:[%s7488_s23 + $0x42a] sm:$0xff] }
 0x40c   : > { %v9399_v14 = vadd.f32 %v3782_v22, %v3515_v34  ;;  %7308 = vmatmul.mubr.msk.bf16.gmra.mrb[252].mxu0 %vm278_vm2, %v4490_v11  ;;  %v4802_v47 = vpack.c.bf16 %v5971_v44, %v5970_v53 }
 0x40d   : > { %7378 = vmatmul.mubr.msk.bf16.gmra.mrb[252].mxu1 %vm278_vm2, %v4800_v59  ;;  %7311 = vmatprep.mubr.msk.bf16.mxu0 %vm7434_vm1, %v7433_v2 }
 0x40e   : > { %7381 = vmatprep.mubr.msk.bf16.mxu1 %vm7434_vm1, %v7433_v2 }
 0x40f   : > { %v3477_v29 = vpop.f32.mrb[148].mxu0 }
 0x410   : > { %v3516_v49 = vadd.f32 %v3477_v29, %v9140_v31  ;;  %v3787_v52 = vpop.f32.mrb[148].mxu1  ;;  %v7061_v40 = vpop.f32.mrb[149].mxu0  ;;  %v5918_v31 = vld [vmem:[%s7488_s23 + $0x302] sm:$0xff] }
 0x411   : > { %v7131_v36 = vpop.f32.mrb[149].mxu1  ;;  %v3480_v23 = vpop.f32.mrb[150].mxu0  ;;  %v4492_v59 = vpack.c.bf16 %v5919_v25, %v5918_v31  ;;  %v5973_v40 = vld [vmem:[%s7488_s23 + $0x442] sm:$0xff] }
 0x412   : > { %v9412_v7 = vadd.f32 %v3787_v52, %v3516_v49  ;;  %v3517_v21 = vadd.f32 %v3480_v23, %v9143_v56  ;;  %v3790_v43 = vpop.f32.mrb[150].mxu1  ;;  %v7062_v32 = vpop.f32.mrb[151].mxu0  ;;  %v5921_v49 = vld [vmem:[%s7488_s23 + $0x31a] sm:$0xff] }
 0x413   : > { %v7132_v26 = vpop.f32.mrb[151].mxu1  ;;  %v5972_v52 = vld [vmem:[%s7488_s23 + $0x43a] sm:$0xff] }
 0x414   : > { %v9415_v4 = vadd.f32 %v3790_v43, %v3517_v21  ;;  %7312 = vmatmul.mubr.msk.bf16.gmra.mrb[0].mxu0 %vm278_vm2, %v4491_v38  ;;  %v4803_v32 = vpack.c.bf16 %v5973_v40, %v5972_v52 }
 0x415   : > { %7382 = vmatmul.mubr.msk.bf16.gmra.mrb[0].mxu1 %vm278_vm2, %v4801_v12  ;;  %7315 = vmatprep.mubr.msk.bf16.mxu0 %vm7434_vm1, %v7433_v2 }
 0x416   : > { %7385 = vmatprep.mubr.msk.bf16.mxu1 %vm7434_vm1, %v7433_v2 }
 0x417   : > { %v3969_v56 = vpop.f32.mrb[152].mxu0 }
 0x418   : > { %v4104_v11 = vadd.f32 %v3969_v56, %v9156_v41  ;;  %v4279_v24 = vpop.f32.mrb[152].mxu1  ;;  %v7137_v13 = vpop.f32.mrb[153].mxu0  ;;  %v5920_v41 = vld [vmem:[%s7488_s23 + $0x312] sm:$0xff] }
 0x419   : > { %v7207_v34 = vpop.f32.mrb[153].mxu1  ;;  %v3972_v22 = vpop.f32.mrb[154].mxu0  ;;  %v4493_v12 = vpack.c.bf16 %v5921_v49, %v5920_v41  ;;  %v5975_v13 = vld [vmem:[%s7488_s23 + $0x452] sm:$0xff] }
 0x41a   : > { %v9428_v8 = vadd.f32 %v4279_v24, %v4104_v11  ;;  %v4105_v17 = vadd.f32 %v3972_v22, %v9159_v18  ;;  %v4282_v1 = vpop.f32.mrb[154].mxu1  ;;  %v7138_v50 = vpop.f32.mrb[155].mxu0  ;;  %v5923_v11 = vld [vmem:[%s7488_s23 + $0x32a] sm:$0xff] }
 0x41b   : > { %v7208_v54 = vpop.f32.mrb[155].mxu1  ;;  %v5974_v24 = vld [vmem:[%s7488_s23 + $0x44a] sm:$0xff] }
 0x41c   : > { %v9431_v29 = vadd.f32 %v4282_v1, %v4105_v17  ;;  %7316 = vmatmul.mubr.msk.bf16.gmra.mrb[4].mxu0 %vm278_vm2, %v4492_v59  ;;  %v4804_v50 = vpack.c.bf16 %v5975_v13, %v5974_v24 }
 0x41d   : > { %7386 = vmatmul.mubr.msk.bf16.gmra.mrb[4].mxu1 %vm278_vm2, %v4802_v47  ;;  %7319 = vmatprep.mubr.msk.bf16.mxu0 %vm7434_vm1, %v7433_v2 }
 0x41e   : > { %7389 = vmatprep.mubr.msk.bf16.mxu1 %vm7434_vm1, %v7433_v2 }
 0x41f   : > { %v3977_v18 = vpop.f32.mrb[156].mxu0 }
 0x420   : > { %v4106_v38 = vadd.f32 %v3977_v18, %v9172_v27  ;;  %v4287_v36 = vpop.f32.mrb[156].mxu1  ;;  %v7141_v23 = vpop.f32.mrb[157].mxu0  ;;  %v5922_v27 = vld [vmem:[%s7488_s23 + $0x322] sm:$0xff] }
 0x421   : > { %v7211_v21 = vpop.f32.mrb[157].mxu1  ;;  %v3980_v43 = vpop.f32.mrb[158].mxu0  ;;  %v4494_v47 = vpack.c.bf16 %v5923_v11, %v5922_v27  ;;  %v5977_v23 = vld [vmem:[%s7488_s23 + $0x462] sm:$0xff] }
 0x422   : > { %v9444_v26 = vadd.f32 %v4287_v36, %v4106_v38  ;;  %v4107_v31 = vadd.f32 %v3980_v43, %v9175_v48  ;;  %v4290_v25 = vpop.f32.mrb[158].mxu1  ;;  %v7142_v53 = vpop.f32.mrb[159].mxu0  ;;  %v5925_v38 = vld [vmem:[%s7488_s23 + $0x33a] sm:$0xff] }
 0x423   : > { %v7212_v44 = vpop.f32.mrb[159].mxu1  ;;  %v5976_v36 = vld [vmem:[%s7488_s23 + $0x45a] sm:$0xff] }
 0x424   : > { %v9447_v56 = vadd.f32 %v4290_v25, %v4107_v31  ;;  %7320 = vmatmul.mubr.msk.bf16.gmra.mrb[8].mxu0 %vm278_vm2, %v4493_v12  ;;  %v4805_v53 = vpack.c.bf16 %v5977_v23, %v5976_v36 }
 0x425   : > { %7390 = vmatmul.mubr.msk.bf16.gmra.mrb[8].mxu1 %vm278_vm2, %v4803_v32  ;;  %7323 = vmatprep.mubr.msk.bf16.mxu0 %vm7434_vm1, %v7433_v2 }
 0x426   : > { %7393 = vmatprep.mubr.msk.bf16.mxu1 %vm7434_vm1, %v7433_v2 }
 0x427   : > { %v3985_v48 = vpop.f32.mrb[160].mxu0 }
 0x428   : > { %v4108_v59 = vadd.f32 %v3985_v48, %v9188_v61  ;;  %v4295_v34 = vpop.f32.mrb[160].mxu1  ;;  %v7145_v22 = vpop.f32.mrb[161].mxu0  ;;  %v5924_v61 = vld [vmem:[%s7488_s23 + $0x332] sm:$0xff] }
 0x429   : > { %v7215_v17 = vpop.f32.mrb[161].mxu1  ;;  %v3988_v1 = vpop.f32.mrb[162].mxu0  ;;  %v4495_v32 = vpack.c.bf16 %v5925_v38, %v5924_v61  ;;  %v5979_v22 = vld [vmem:[%s7488_s23 + $0x472] sm:$0xff] }
 0x42a   : > { %v9460_v54 = vadd.f32 %v4295_v34, %v4108_v59  ;;  %v4109_v41 = vadd.f32 %v3988_v1, %v9191_v35  ;;  %v4298_v49 = vpop.f32.mrb[162].mxu1  ;;  %v7146_v52 = vpop.f32.mrb[163].mxu0  ;;  %v5927_v59 = vld [vmem:[%s7488_s23 + $0x34a] sm:$0xff] }
 0x42b   : > { %v7216_v40 = vpop.f32.mrb[163].mxu1  ;;  %v5978_v34 = vld [vmem:[%s7488_s23 + $0x46a] sm:$0xff] }
 0x42c   : > { %v9463_v18 = vadd.f32 %v4298_v49, %v4109_v41  ;;  %7324 = vmatmul.mubr.msk.bf16.gmra.mrb[12].mxu0 %vm278_vm2, %v4494_v47  ;;  %v4806_v52 = vpack.c.bf16 %v5979_v22, %v5978_v34 }
 0x42d   : > { %7394 = vmatmul.mubr.msk.bf16.gmra.mrb[12].mxu1 %vm278_vm2, %v4804_v50  ;;  %7327 = vmatprep.mubr.msk.bf16.mxu0 %vm7434_vm1, %v7433_v2 }
 0x42e   : > { %7397 = vmatprep.mubr.msk.bf16.mxu1 %vm7434_vm1, %v7433_v2 }
 0x42f   : > { %v3993_v35 = vpop.f32.mrb[164].mxu0 }
 0x430   : > { %v4110_v12 = vadd.f32 %v3993_v35, %v9204_v58  ;;  %v4303_v21 = vpop.f32.mrb[164].mxu1  ;;  %v7149_v43 = vpop.f32.mrb[165].mxu0  ;;  %v5926_v58 = vld [vmem:[%s7488_s23 + $0x342] sm:$0xff] }
 0x431   : > { %v7219_v31 = vpop.f32.mrb[165].mxu1  ;;  %v3996_v25 = vpop.f32.mrb[166].mxu0  ;;  %v4496_v50 = vpack.c.bf16 %v5927_v59, %v5926_v58  ;;  %v5981_v43 = vld [vmem:[%s7488_s23 + $0x482] sm:$0xff] }
 0x432   : > { %v9476_v44 = vadd.f32 %v4303_v21, %v4110_v12  ;;  %v4111_v27 = vadd.f32 %v3996_v25, %v9207_v9  ;;  %v4306_v11 = vpop.f32.mrb[166].mxu1  ;;  %v7150_v24 = vpop.f32.mrb[167].mxu0  ;;  %v5929_v12 = vld [vmem:[%s7488_s23 + $0x35a] sm:$0xff] }
 0x433   : > { %v7220_v13 = vpop.f32.mrb[167].mxu1  ;;  %v5980_v21 = vld [vmem:[%s7488_s23 + $0x47a] sm:$0xff] }
 0x434   : > { %v9479_v48 = vadd.f32 %v4306_v11, %v4111_v27  ;;  %7328 = vmatmul.mubr.msk.bf16.gmra.mrb[16].mxu0 %vm278_vm2, %v4495_v32  ;;  %v4807_v24 = vpack.c.bf16 %v5981_v43, %v5980_v21 }
 0x435   : > { %7398 = vmatmul.mubr.msk.bf16.gmra.mrb[16].mxu1 %vm278_vm2, %v4805_v53  ;;  %7331 = vmatprep.mubr.msk.bf16.mxu0 %vm7434_vm1, %v7433_v2 }
 0x436   : > { %7401 = vmatprep.mubr.msk.bf16.mxu1 %vm7434_vm1, %v7433_v2 }
 0x437   : > { %v4001_v9 = vpop.f32.mrb[168].mxu0 }
 0x438   : > { %v4112_v47 = vadd.f32 %v4001_v9, %v9220_v51  ;;  %v4311_v17 = vpop.f32.mrb[168].mxu1  ;;  %v7153_v1 = vpop.f32.mrb[169].mxu0  ;;  %v5928_v51 = vld [vmem:[%s7488_s23 + $0x352] sm:$0xff] }
 0x439   : > { %v7223_v41 = vpop.f32.mrb[169].mxu1  ;;  %v4004_v49 = vpop.f32.mrb[170].mxu0  ;;  %v4497_v53 = vpack.c.bf16 %v5929_v12, %v5928_v51  ;;  %v5983_v1 = vld [vmem:[%s7488_s23 + $0x492] sm:$0xff] }
 0x43a   : > { %v9492_v40 = vadd.f32 %v4311_v17, %v4112_v47  ;;  %v4113_v61 = vadd.f32 %v4004_v49, %v9223_v46  ;;  %v4314_v38 = vpop.f32.mrb[170].mxu1  ;;  %v7154_v36 = vpop.f32.mrb[171].mxu0  ;;  %v5931_v47 = vld [vmem:[%s7488_s23 + $0x36a] sm:$0xff] }
 0x43b   : > { %v7224_v23 = vpop.f32.mrb[171].mxu1  ;;  %v5982_v17 = vld [vmem:[%s7488_s23 + $0x48a] sm:$0xff] }
 0x43c   : > { %v9495_v35 = vadd.f32 %v4314_v38, %v4113_v61  ;;  %7332 = vmatmul.mubr.msk.bf16.gmra.mrb[20].mxu0 %vm278_vm2, %v4496_v50  ;;  %v4808_v36 = vpack.c.bf16 %v5983_v1, %v5982_v17 }
 0x43d   : > { %7402 = vmatmul.mubr.msk.bf16.gmra.mrb[20].mxu1 %vm278_vm2, %v4806_v52  ;;  %7335 = vmatprep.mubr.msk.bf16.mxu0 %vm7434_vm1, %v7433_v2 }
 0x43e   : > { %7405 = vmatprep.mubr.msk.bf16.mxu1 %vm7434_vm1, %v7433_v2 }
 0x43f   : > { %v4009_v46 = vpop.f32.mrb[172].mxu0 }
 0x440   : > { %v4114_v32 = vadd.f32 %v4009_v46, %v9236_v39  ;;  %v4319_v31 = vpop.f32.mrb[172].mxu1  ;;  %v7157_v25 = vpop.f32.mrb[173].mxu0  ;;  %v5930_v39 = vld [vmem:[%s7488_s23 + $0x362] sm:$0xff] }
 0x441   : > { %v7227_v27 = vpop.f32.mrb[173].mxu1  ;;  %v4012_v11 = vpop.f32.mrb[174].mxu0  ;;  %v4498_v52 = vpack.c.bf16 %v5931_v47, %v5930_v39 }
 0x442   : > { %v9508_v13 = vadd.f32 %v4319_v31, %v4114_v32  ;;  %v4115_v58 = vadd.f32 %v4012_v11, %v9239_v19  ;;  %v4322_v59 = vpop.f32.mrb[174].mxu1  ;;  %v7158_v34 = vpop.f32.mrb[175].mxu0 }
 0x443   : > { %v7228_v22 = vpop.f32.mrb[175].mxu1 }
 0x444   : > { %v9511_v9 = vadd.f32 %v4322_v59, %v4115_v58  ;;  %7336 = vmatmul.mubr.msk.bf16.gmra.mrb[24].mxu0 %vm278_vm2, %v4497_v53 }
 0x445   : > { %7406 = vmatmul.mubr.msk.bf16.gmra.mrb[24].mxu1 %vm278_vm2, %v4807_v24  ;;  %7339 = vmatprep.mubr.msk.bf16.mxu0 %vm7434_vm1, %v7433_v2 }
 0x446   : > { %7409 = vmatprep.mubr.msk.bf16.mxu1 %vm7434_vm1, %v7433_v2 }
 0x447   : > { %v4017_v19 = vpop.f32.mrb[176].mxu0 }
 0x448   : > { %v4116_v50 = vadd.f32 %v4017_v19, %v9252_v15  ;;  %v4327_v41 = vpop.f32.mrb[176].mxu1  ;;  %v7161_v49 = vpop.f32.mrb[177].mxu0 }
 0x449   : > { %v7231_v61 = vpop.f32.mrb[177].mxu1  ;;  %v4020_v38 = vpop.f32.mrb[178].mxu0 }
 0x44a   : > { %v9524_v23 = vadd.f32 %v4327_v41, %v4116_v50  ;;  %v4117_v51 = vadd.f32 %v4020_v38, %v9255_v3  ;;  %v4330_v12 = vpop.f32.mrb[178].mxu1  ;;  %v7162_v21 = vpop.f32.mrb[179].mxu0 }
 0x44b   : > { %v7232_v43 = vpop.f32.mrb[179].mxu1 }
 0x44c   : > { %v9527_v46 = vadd.f32 %v4330_v12, %v4117_v51  ;;  %7340 = vmatmul.mubr.msk.bf16.gmra.mrb[28].mxu0 %vm278_vm2, %v4498_v52 }
 0x44d   : > { %7410 = vmatmul.mubr.msk.bf16.gmra.mrb[28].mxu1 %vm278_vm2, %v4808_v36 }
 0x44f   : > { %v4025_v2 = vpop.f32.mrb[180].mxu0 }
 0x450   : > { %v4118_v15 = vadd.f32 %v4025_v2, %v9268_v45  ;;  %v4335_v32 = vpop.f32.mrb[180].mxu1  ;;  %v7165_v31 = vpop.f32.mrb[181].mxu0 }
 0x451   : > { %v7235_v25 = vpop.f32.mrb[181].mxu1  ;;  %v4028_v53 = vpop.f32.mrb[182].mxu0 }
 0x452   : > { %v9532_v27 = vadd.f32 %v4335_v32, %v4118_v15  ;;  %v4119_v3 = vadd.f32 %v4028_v53, %v9271_v55  ;;  %v4338_v11 = vpop.f32.mrb[182].mxu1  ;;  %v7166_v24 = vpop.f32.mrb[183].mxu0 }
 0x453   : > { %v7236_v58 = vpop.f32.mrb[183].mxu1 }
 0x454   : > { %v9535_v59 = vadd.f32 %v4338_v11, %v4119_v3 }
 0x457   : > { %v4033_v34 = vpop.f32.mrb[184].mxu0 }
 0x458   : > { %v4120_v22 = vadd.f32 %v4033_v34, %v9284_v57  ;;  %v4343_v39 = vpop.f32.mrb[184].mxu1  ;;  %v7169_v47 = vpop.f32.mrb[185].mxu0 }
 0x459   : > { %v7239_v17 = vpop.f32.mrb[185].mxu1  ;;  %v4036_v45 = vpop.f32.mrb[186].mxu0 }
 0x45a   : > { %v9538_v1 = vadd.f32 %v4343_v39, %v4120_v22  ;;  %v4121_v19 = vadd.f32 %v4036_v45, %v9287_v60  ;;  %v4346_v50 = vpop.f32.mrb[186].mxu1  ;;  %v7170_v41 = vpop.f32.mrb[187].mxu0 }
 0x45b   : > { %v7240_v49 = vpop.f32.mrb[187].mxu1 }
 0x45c   : > { %v9541_v55 = vadd.f32 %v4346_v50, %v4121_v19 }
 0x45f   : > { %v4041_v52 = vpop.f32.mrb[188].mxu0 }
 0x460   : > { %v4122_v61 = vadd.f32 %v4041_v52, %v9300_v42  ;;  %v4351_v38 = vpop.f32.mrb[188].mxu1  ;;  %v7173_v36 = vpop.f32.mrb[189].mxu0 }
 0x461   : > { %v7243_v51 = vpop.f32.mrb[189].mxu1  ;;  %v4044_v57 = vpop.f32.mrb[190].mxu0 }
 0x462   : > { %v9544_v12 = vadd.f32 %v4351_v38, %v4122_v61  ;;  %v4123_v21 = vadd.f32 %v4044_v57, %v9303_v20  ;;  %v4354_v43 = vpop.f32.mrb[190].mxu1  ;;  %v7174_v2 = vpop.f32.mrb[191].mxu0 }
 0x463   : > { %v7244_v15 = vpop.f32.mrb[191].mxu1 }
 0x464   : > { %v9547_v60 = vadd.f32 %v4354_v43, %v4123_v21 }
 0x467   : > { %v4049_v32 = vpop.f32.mrb[192].mxu0 }
 0x468   : > { %v4124_v31 = vadd.f32 %v4049_v32, %v9316_v33  ;;  %v4359_v25 = vpop.f32.mrb[192].mxu1  ;;  %v7177_v53 = vpop.f32.mrb[193].mxu0 }
 0x469   : > { %v7247_v3 = vpop.f32.mrb[193].mxu1  ;;  %v4052_v42 = vpop.f32.mrb[194].mxu0 }
 0x46a   : > { %v9550_v11 = vadd.f32 %v4359_v25, %v4124_v31  ;;  %v4125_v24 = vadd.f32 %v4052_v42, %v9319_v10  ;;  %v4362_v58 = vpop.f32.mrb[194].mxu1  ;;  %v7178_v34 = vpop.f32.mrb[195].mxu0 }
 0x46b   : > { %v7248_v22 = vpop.f32.mrb[195].mxu1 }
 0x46c   : > { %v9553_v20 = vadd.f32 %v4362_v58, %v4125_v24 }
 0x46f   : > { %v4057_v39 = vpop.f32.mrb[196].mxu0 }
 0x470   : > { %v4126_v47 = vadd.f32 %v4057_v39, %v9332_v5  ;;  %v4367_v17 = vpop.f32.mrb[196].mxu1  ;;  %v7181_v45 = vpop.f32.mrb[197].mxu0 }
 0x471   : > { %v7251_v19 = vpop.f32.mrb[197].mxu1  ;;  %v4060_v33 = vpop.f32.mrb[198].mxu0 }
 0x472   : > { %v9556_v50 = vadd.f32 %v4367_v17, %v4126_v47  ;;  %v4127_v41 = vadd.f32 %v4060_v33, %v9335_v6  ;;  %v4370_v49 = vpop.f32.mrb[198].mxu1  ;;  %v7182_v52 = vpop.f32.mrb[199].mxu0 }
 0x473   : > { %v7252_v61 = vpop.f32.mrb[199].mxu1 }
 0x474   : > { %v9559_v10 = vadd.f32 %v4370_v49, %v4127_v41 }
 0x477   : > { %v4065_v38 = vpop.f32.mrb[200].mxu0 }
 0x478   : > { %v4128_v36 = vadd.f32 %v4065_v38, %v9348_v16  ;;  %v4375_v51 = vpop.f32.mrb[200].mxu1  ;;  %v7185_v57 = vpop.f32.mrb[201].mxu0 }
 0x479   : > { %v7255_v21 = vpop.f32.mrb[201].mxu1  ;;  %v4068_v5 = vpop.f32.mrb[202].mxu0 }
 0x47a   : > { %v9562_v43 = vadd.f32 %v4375_v51, %v4128_v36  ;;  %v4129_v2 = vadd.f32 %v4068_v5, %v9351_v62  ;;  %v4378_v15 = vpop.f32.mrb[202].mxu1  ;;  %v7186_v32 = vpop.f32.mrb[203].mxu0 }
 0x47b   : > { %v7256_v31 = vpop.f32.mrb[203].mxu1 }
 0x47c   : > { %v9565_v6 = vadd.f32 %v4378_v15, %v4129_v2 }
 0x47f   : > { %v4073_v25 = vpop.f32.mrb[204].mxu0 }
 0x480   : > { %v4130_v53 = vadd.f32 %v4073_v25, %v9364_v30  ;;  %v4383_v3 = vpop.f32.mrb[204].mxu1  ;;  %v7189_v42 = vpop.f32.mrb[205].mxu0 }
 0x481   : > { %v7259_v24 = vpop.f32.mrb[205].mxu1  ;;  %v4076_v16 = vpop.f32.mrb[206].mxu0 }
 0x482   : > { %v9568_v58 = vadd.f32 %v4383_v3, %v4130_v53  ;;  %v4131_v34 = vadd.f32 %v4076_v16, %v9367_v0  ;;  %v4386_v22 = vpop.f32.mrb[206].mxu1  ;;  %v7190_v39 = vpop.f32.mrb[207].mxu0 }
 0x483   : > { %v7260_v47 = vpop.f32.mrb[207].mxu1 }
 0x484   : > { %v9571_v62 = vadd.f32 %v4386_v22, %v4131_v34 }
 0x487   : > { %v4081_v17 = vpop.f32.mrb[208].mxu0 }
 0x488   : > { %v4132_v45 = vadd.f32 %v4081_v17, %v9380_v63  ;;  %v4391_v19 = vpop.f32.mrb[208].mxu1  ;;  %v7193_v33 = vpop.f32.mrb[209].mxu0 }
 0x489   : > { %v7263_v41 = vpop.f32.mrb[209].mxu1  ;;  %v4084_v30 = vpop.f32.mrb[210].mxu0 }
 0x48a   : > { %v9574_v49 = vadd.f32 %v4391_v19, %v4132_v45  ;;  %v4133_v52 = vadd.f32 %v4084_v30, %v9383_v28  ;;  %v4394_v61 = vpop.f32.mrb[210].mxu1  ;;  %v7194_v38 = vpop.f32.mrb[211].mxu0 }
 0x48b   : > { %v7264_v36 = vpop.f32.mrb[211].mxu1 }
 0x48c   : > { %v9577_v0 = vadd.f32 %v4394_v61, %v4133_v52 }
 0x48f   : > { %v4089_v51 = vpop.f32.mrb[212].mxu0 }
 0x490   : > { %v4134_v57 = vadd.f32 %v4089_v51, %v9396_v37  ;;  %v4399_v21 = vpop.f32.mrb[212].mxu1  ;;  %v7197_v5 = vpop.f32.mrb[213].mxu0 }
 0x491   : > { %v7267_v2 = vpop.f32.mrb[213].mxu1  ;;  %v4092_v63 = vpop.f32.mrb[214].mxu0 }
 0x492   : > { %v9580_v15 = vadd.f32 %v4399_v21, %v4134_v57  ;;  %v4135_v32 = vadd.f32 %v4092_v63, %v9399_v14  ;;  %v4402_v31 = vpop.f32.mrb[214].mxu1  ;;  %v7198_v25 = vpop.f32.mrb[215].mxu0 }
 0x493   : > { %v7268_v53 = vpop.f32.mrb[215].mxu1 }
 0x494   : > { %v9583_v28 = vadd.f32 %v4402_v31, %v4135_v32 }
 0x497   : > { %v4097_v3 = vpop.f32.mrb[216].mxu0 }
 0x498   : > { %v4136_v42 = vadd.f32 %v4097_v3, %v9412_v7  ;;  %v4407_v24 = vpop.f32.mrb[216].mxu1  ;;  %v7201_v16 = vpop.f32.mrb[217].mxu0  ;;  %v9595_v7 = vld [vmem:[%s9709_s2] ss:$0 sm:$0xff] }
 0x499   : > { %v7271_v37 = vpop.f32.mrb[217].mxu1  ;;  %v4100_v34 = vpop.f32.mrb[218].mxu0 }
 0x49a   : > { %v9586_v22 = vadd.f32 %v4407_v24, %v4136_v42  ;;  %v4137_v39 = vadd.f32 %v4100_v34, %v9415_v4  ;;  %v4410_v47 = vpop.f32.mrb[218].mxu1  ;;  %v7202_v17 = vpop.f32.mrb[219].mxu0 }
 0x49b   : > { %v7272_v14 = vpop.f32.mrb[219].mxu1 }
 0x49c   : > { %v9589_v45 = vadd.f32 %v4410_v47, %v4137_v39 }
 0x49f   : > { %v4589_v19 = vpop.f32.mrb[220].mxu0 }
 0x4a0   : > { %v4724_v33 = vadd.f32 %v4589_v19, %v9428_v8  ;;  %v4899_v41 = vpop.f32.mrb[220].mxu1  ;;  %v7277_v30 = vpop.f32.mrb[221].mxu0 }
 0x4a1   : > { %v7347_v52 = vpop.f32.mrb[221].mxu1  ;;  %v4592_v61 = vpop.f32.mrb[222].mxu0 }
 0x4a2   : > { %v5034_v38 = vadd.f32 %v4899_v41, %v4724_v33  ;;  %v4725_v4 = vadd.f32 %v4592_v61, %v9431_v29  ;;  %v4902_v36 = vpop.f32.mrb[222].mxu1  ;;  %v7278_v51 = vpop.f32.mrb[223].mxu0 }
 0x4a3   : > { %v7348_v57 = vpop.f32.mrb[223].mxu1 }
 0x4a4   : > { %v5075_v21 = vadd.f32 %v9595_v7, %v5034_v38  ;;  %v5035_v5 = vadd.f32 %v4902_v36, %v4725_v4 }
 0x4a6   : > { %vm5109_vm3 = vcmp.gt.f32.partialorder %v5075_v21, 0.0  ;;  %v5143_v8 = vmul.f32 0.2, %v5075_v21  ;;  %v5076_v2 = vadd.f32 %v9595_v7, %v5035_v5 }
 0x4a7   : > { %v4597_v63 = vpop.f32.mrb[224].mxu0 }
 0x4a8   : > { %v5177_v32 = vsel %vm5109_vm3, %v5075_v21, %v5143_v8  ;;  %vm5110_vm4 = vcmp.gt.f32.partialorder %v5076_v2, 0.0  ;;  %v5144_v29 = vmul.f32 0.2, %v5076_v2  ;;  %v4726_v31 = vadd.f32 %v4597_v63, %v9444_v26  ;;  %v4907_v25 = vpop.f32.mrb[224].mxu1  ;;  %v7281_v53 = vpop.f32.mrb[225].mxu0 }
 0x4a9   : > { %5211 = vst [vmem:[%s9603_s30] sm:$0xff] %v5177_v32  ;;  %v7351_v3 = vpop.f32.mrb[225].mxu1  ;;  %v4600_v42 = vpop.f32.mrb[226].mxu0 }
 0x4aa   : > { %v5178_v24 = vsel %vm5110_vm4, %v5076_v2, %v5144_v29  ;;  %v5036_v16 = vadd.f32 %v4907_v25, %v4726_v31  ;;  %v4727_v37 = vadd.f32 %v4600_v42, %v9447_v56  ;;  %v4910_v34 = vpop.f32.mrb[226].mxu1  ;;  %v7282_v39 = vpop.f32.mrb[227].mxu0 }
 0x4ab   : > { %5212 = vst [vmem:[%s9603_s30 + $0x8] sm:$0xff] %v5178_v24  ;;  %v7352_v47 = vpop.f32.mrb[227].mxu1 }
 0x4ac   : > { %v5077_v17 = vadd.f32 %v9595_v7, %v5036_v16  ;;  %v5037_v14 = vadd.f32 %v4910_v34, %v4727_v37 }
 0x4ae   : > { %vm5111_vm5 = vcmp.gt.f32.partialorder %v5077_v17, 0.0  ;;  %v5145_v19 = vmul.f32 0.2, %v5077_v17  ;;  %v5078_v26 = vadd.f32 %v9595_v7, %v5037_v14 }
 0x4af   : > { %v4605_v33 = vpop.f32.mrb[228].mxu0 }
 0x4b0   : > { %v5179_v41 = vsel %vm5111_vm5, %v5077_v17, %v5145_v19  ;;  %vm5112_vm6 = vcmp.gt.f32.partialorder %v5078_v26, 0.0  ;;  %v5146_v30 = vmul.f32 0.2, %v5078_v26  ;;  %v4728_v52 = vadd.f32 %v4605_v33, %v9460_v54  ;;  %v4915_v56 = vpop.f32.mrb[228].mxu1  ;;  %v7285_v61 = vpop.f32.mrb[229].mxu0 }
 0x4b1   : > { %5213 = vst [vmem:[%s9603_s30 + $0x10] sm:$0xff] %v5179_v41  ;;  %v7355_v38 = vpop.f32.mrb[229].mxu1  ;;  %v4608_v4 = vpop.f32.mrb[230].mxu0 }
 0x4b2   : > { %v5180_v36 = vsel %vm5112_vm6, %v5078_v26, %v5146_v30  ;;  %v5038_v51 = vadd.f32 %v4915_v56, %v4728_v52  ;;  %v4729_v57 = vadd.f32 %v4608_v4, %v9463_v18  ;;  %v4918_v21 = vpop.f32.mrb[230].mxu1  ;;  %v7286_v5 = vpop.f32.mrb[231].mxu0 }
 0x4b3   : > { %5214 = vst [vmem:[%s9603_s30 + $0x18] sm:$0xff] %v5180_v36  ;;  %v7356_v8 = vpop.f32.mrb[231].mxu1 }
 0x4b4   : > { %v5079_v2 = vadd.f32 %v9595_v7, %v5038_v51  ;;  %v5039_v63 = vadd.f32 %v4918_v21, %v4729_v57 }
 0x4b6   : > { %vm5113_vm7 = vcmp.gt.f32.partialorder %v5079_v2, 0.0  ;;  %v5147_v32 = vmul.f32 0.2, %v5079_v2  ;;  %v5080_v54 = vadd.f32 %v9595_v7, %v5039_v63 }
 0x4b7   : > { %v4613_v29 = vpop.f32.mrb[232].mxu0 }
 0x4b8   : > { %v5181_v31 = vsel %vm5113_vm7, %v5079_v2, %v5147_v32  ;;  %vm5114_vm8 = vcmp.gt.f32.partialorder %v5080_v54, 0.0  ;;  %v5148_v25 = vmul.f32 0.2, %v5080_v54  ;;  %v4730_v53 = vadd.f32 %v4613_v29, %v9476_v44  ;;  %v4923_v18 = vpop.f32.mrb[232].mxu1  ;;  %v7289_v3 = vpop.f32.mrb[233].mxu0 }
 0x4b9   : > { %5215 = vst [vmem:[%s9603_s30 + $0x20] sm:$0xff] %v5181_v31  ;;  %v7359_v42 = vpop.f32.mrb[233].mxu1  ;;  %v4616_v24 = vpop.f32.mrb[234].mxu0 }
 0x4ba   : > { %v5182_v16 = vsel %vm5114_vm8, %v5080_v54, %v5148_v25  ;;  %v5040_v37 = vadd.f32 %v4923_v18, %v4730_v53  ;;  %v4731_v34 = vadd.f32 %v4616_v24, %v9479_v48  ;;  %v4926_v39 = vpop.f32.mrb[234].mxu1  ;;  %v7290_v47 = vpop.f32.mrb[235].mxu0 }
 0x4bb   : > { %5216 = vst [vmem:[%s9603_s30 + $0x28] sm:$0xff] %v5182_v16  ;;  %v7360_v17 = vpop.f32.mrb[235].mxu1 }
 0x4bc   : > { %v5081_v14 = vadd.f32 %v9595_v7, %v5040_v37  ;;  %v5041_v19 = vadd.f32 %v4926_v39, %v4731_v34 }
 0x4be   : > { %vm5115_vm9 = vcmp.gt.f32.partialorder %v5081_v14, 0.0  ;;  %v5149_v26 = vmul.f32 0.2, %v5081_v14  ;;  %v5082_v44 = vadd.f32 %v9595_v7, %v5041_v19 }
 0x4bf   : > { %v4621_v33 = vpop.f32.mrb[236].mxu0 }
 0x4c0   : > { %v5183_v41 = vsel %vm5115_vm9, %v5081_v14, %v5149_v26  ;;  %vm5116_vm10 = vcmp.gt.f32.partialorder %v5082_v44, 0.0  ;;  %v5150_v30 = vmul.f32 0.2, %v5082_v44  ;;  %v4732_v52 = vadd.f32 %v4621_v33, %v9492_v40  ;;  %v4931_v48 = vpop.f32.mrb[236].mxu1  ;;  %v7293_v56 = vpop.f32.mrb[237].mxu0 }
 0x4c1   : > { %5217 = vst [vmem:[%s9603_s30 + $0x30] sm:$0xff] %v5183_v41  ;;  %v7363_v61 = vpop.f32.mrb[237].mxu1  ;;  %v4624_v38 = vpop.f32.mrb[238].mxu0 }
 0x4c2   : > { %v5184_v4 = vsel %vm5116_vm10, %v5082_v44, %v5150_v30  ;;  %v5042_v36 = vadd.f32 %v4931_v48, %v4732_v52  ;;  %v4733_v51 = vadd.f32 %v4624_v38, %v9495_v35  ;;  %v4934_v57 = vpop.f32.mrb[238].mxu1  ;;  %v7294_v21 = vpop.f32.mrb[239].mxu0 }
 0x4c3   : > { %5218 = vst [vmem:[%s9603_s30 + $0x38] sm:$0xff] %v5184_v4  ;;  %v7364_v5 = vpop.f32.mrb[239].mxu1 }
 0x4c4   : > { %v5083_v8 = vadd.f32 %v9595_v7, %v5042_v36  ;;  %v5043_v2 = vadd.f32 %v4934_v57, %v4733_v51 }
 0x4c6   : > { %vm5117_vm11 = vcmp.gt.f32.partialorder %v5083_v8, 0.0  ;;  %v5151_v63 = vmul.f32 0.2, %v5083_v8  ;;  %v5084_v40 = vadd.f32 %v9595_v7, %v5043_v2 }
 0x4c7   : > { %v4629_v32 = vpop.f32.mrb[240].mxu0 }
 0x4c8   : > { %v5185_v54 = vsel %vm5117_vm11, %v5083_v8, %v5151_v63  ;;  %vm5118_vm12 = vcmp.gt.f32.partialorder %v5084_v40, 0.0  ;;  %v5152_v29 = vmul.f32 0.2, %v5084_v40  ;;  %v4734_v31 = vadd.f32 %v4629_v32, %v9508_v13  ;;  %v4939_v35 = vpop.f32.mrb[240].mxu1  ;;  %v7297_v25 = vpop.f32.mrb[241].mxu0 }
 0x4c9   : > { %5219 = vst [vmem:[%s9603_s30 + $0x40] sm:$0xff] %v5185_v54  ;;  %v7367_v53 = vpop.f32.mrb[241].mxu1  ;;  %v4632_v18 = vpop.f32.mrb[242].mxu0 }
 0x4ca   : > { %v5186_v3 = vsel %vm5118_vm12, %v5084_v40, %v5152_v29  ;;  %v5044_v42 = vadd.f32 %v4939_v35, %v4734_v31  ;;  %v4735_v24 = vadd.f32 %v4632_v18, %v9511_v9  ;;  %v4942_v16 = vpop.f32.mrb[242].mxu1  ;;  %v7298_v37 = vpop.f32.mrb[243].mxu0 }
 0x4cb   : > { %5220 = vst [vmem:[%s9603_s30 + $0x48] sm:$0xff] %v5186_v3  ;;  %v7368_v34 = vpop.f32.mrb[243].mxu1 }
 0x4cc   : > { %v5085_v39 = vadd.f32 %v9595_v7, %v5044_v42  ;;  %v5045_v47 = vadd.f32 %v4942_v16, %v4735_v24 }
 0x4ce   : > { %vm5119_vm13 = vcmp.gt.f32.partialorder %v5085_v39, 0.0  ;;  %v5153_v17 = vmul.f32 0.2, %v5085_v39  ;;  %v5086_v13 = vadd.f32 %v9595_v7, %v5045_v47 }
 0x4cf   : > { %v4637_v14 = vpop.f32.mrb[244].mxu0 }
 0x4d0   : > { %v5187_v19 = vsel %vm5119_vm13, %v5085_v39, %v5153_v17  ;;  %vm5120_vm14 = vcmp.gt.f32.partialorder %v5086_v13, 0.0  ;;  %v5154_v26 = vmul.f32 0.2, %v5086_v13  ;;  %v4736_v44 = vadd.f32 %v4637_v14, %v9524_v23  ;;  %v4947_v9 = vpop.f32.mrb[244].mxu1  ;;  %v7301_v33 = vpop.f32.mrb[245].mxu0 }
 0x4d1   : > { %5221 = vst [vmem:[%s9603_s30 + $0x50] sm:$0xff] %v5187_v19  ;;  %v7371_v41 = vpop.f32.mrb[245].mxu1  ;;  %v4640_v30 = vpop.f32.mrb[246].mxu0 }
 0x4d2   : > { %v5188_v52 = vsel %vm5120_vm14, %v5086_v13, %v5154_v26  ;;  %v5046_v48 = vadd.f32 %v4947_v9, %v4736_v44  ;;  %v4737_v56 = vadd.f32 %v4640_v30, %v9527_v46  ;;  %v4950_v61 = vpop.f32.mrb[246].mxu1  ;;  %v7302_v38 = vpop.f32.mrb[247].mxu0 }
 0x4d3   : > { %5222 = vst [vmem:[%s9603_s30 + $0x58] sm:$0xff] %v5188_v52  ;;  %v7372_v4 = vpop.f32.mrb[247].mxu1 }
 0x4d4   : > { %v5087_v36 = vadd.f32 %v9595_v7, %v5046_v48  ;;  %v5047_v51 = vadd.f32 %v4950_v61, %v4737_v56 }
 0x4d6   : > { %vm5121_vm15 = vcmp.gt.f32.partialorder %v5087_v36, 0.0  ;;  %v5155_v57 = vmul.f32 0.2, %v5087_v36  ;;  %v5088_v23 = vadd.f32 %v9595_v7, %v5047_v51 }
 0x4d7   : > { %v4645_v21 = vpop.f32.mrb[248].mxu0 }
 0x4d8   : > { %v5189_v5 = vsel %vm5121_vm15, %v5087_v36, %v5155_v57  ;;  %vm5122_vm0 = vcmp.gt.f32.partialorder %v5088_v23, 0.0  ;;  %v5156_v8 = vmul.f32 0.2, %v5088_v23  ;;  %v4738_v2 = vadd.f32 %v4645_v21, %v9532_v27  ;;  %v4955_v46 = vpop.f32.mrb[248].mxu1  ;;  %v7305_v63 = vpop.f32.mrb[249].mxu0 }
 0x4d9   : > { %5223 = vst [vmem:[%s9603_s30 + $0x60] sm:$0xff] %v5189_v5  ;;  %v7375_v40 = vpop.f32.mrb[249].mxu1  ;;  %v4648_v32 = vpop.f32.mrb[250].mxu0 }
 0x4da   : > { %v5190_v54 = vsel %vm5122_vm0, %v5088_v23, %v5156_v8  ;;  %v5048_v29 = vadd.f32 %v4955_v46, %v4738_v2  ;;  %v4739_v31 = vadd.f32 %v4648_v32, %v9535_v59  ;;  %v4958_v35 = vpop.f32.mrb[250].mxu1  ;;  %v7306_v25 = vpop.f32.mrb[251].mxu0 }
 0x4db   : > { %5224 = vst [vmem:[%s9603_s30 + $0x68] sm:$0xff] %v5190_v54  ;;  %v7376_v53 = vpop.f32.mrb[251].mxu1 }
 0x4dc   : > { %v5089_v18 = vadd.f32 %v9595_v7, %v5048_v29  ;;  %v5049_v3 = vadd.f32 %v4958_v35, %v4739_v31 }
 0x4de   : > { %vm5123_vm1 = vcmp.gt.f32.partialorder %v5089_v18, 0.0  ;;  %v5157_v42 = vmul.f32 0.2, %v5089_v18  ;;  %v5090_v27 = vadd.f32 %v9595_v7, %v5049_v3 }
 0x4df   : > { %v4653_v24 = vpop.f32.mrb[252].mxu0 }
 0x4e0   : > { %v5191_v16 = vsel %vm5123_vm1, %v5089_v18, %v5157_v42  ;;  %vm5124_vm2 = vcmp.gt.f32.partialorder %v5090_v27, 0.0  ;;  %v5158_v37 = vmul.f32 0.2, %v5090_v27  ;;  %v4740_v34 = vadd.f32 %v4653_v24, %v9538_v1  ;;  %v4963_v59 = vpop.f32.mrb[252].mxu1  ;;  %v7309_v39 = vpop.f32.mrb[253].mxu0 }
 0x4e1   : > { %5225 = vst [vmem:[%s9603_s30 + $0x70] sm:$0xff] %v5191_v16  ;;  %v7379_v47 = vpop.f32.mrb[253].mxu1  ;;  %v4656_v17 = vpop.f32.mrb[254].mxu0 }
 0x4e2   : > { %v5192_v13 = vsel %vm5124_vm2, %v5090_v27, %v5158_v37  ;;  %v5050_v14 = vadd.f32 %v4963_v59, %v4740_v34  ;;  %v4741_v19 = vadd.f32 %v4656_v17, %v9541_v55  ;;  %v4966_v26 = vpop.f32.mrb[254].mxu1  ;;  %v7310_v44 = vpop.f32.mrb[255].mxu0 }
 0x4e3   : > { %5226 = vst [vmem:[%s9603_s30 + $0x78] sm:$0xff] %v5192_v13  ;;  %v7380_v9 = vpop.f32.mrb[255].mxu1 }
 0x4e4   : > { %v5091_v33 = vadd.f32 %v9595_v7, %v5050_v14  ;;  %v5051_v41 = vadd.f32 %v4966_v26, %v4741_v19 }
 0x4e6   : > { %vm5125_vm3 = vcmp.gt.f32.partialorder %v5091_v33, 0.0  ;;  %v5159_v30 = vmul.f32 0.2, %v5091_v33  ;;  %v5092_v1 = vadd.f32 %v9595_v7, %v5051_v41 }
 0x4e7   : > { %v4661_v52 = vpop.f32.mrb[0].mxu0 }
 0x4e8   : > { %v5193_v48 = vsel %vm5125_vm3, %v5091_v33, %v5159_v30  ;;  %vm5126_vm4 = vcmp.gt.f32.partialorder %v5092_v1, 0.0  ;;  %v5160_v56 = vmul.f32 0.2, %v5092_v1  ;;  %v4742_v61 = vadd.f32 %v4661_v52, %v9544_v12  ;;  %v4971_v55 = vpop.f32.mrb[0].mxu1  ;;  %v7313_v38 = vpop.f32.mrb[1].mxu0 }
 0x4e9   : > { %5227 = vst [vmem:[%s9603_s30 + $0x80] sm:$0xff] %v5193_v48  ;;  %v7383_v4 = vpop.f32.mrb[1].mxu1  ;;  %v4664_v36 = vpop.f32.mrb[2].mxu0 }
 0x4ea   : > { %v5194_v51 = vsel %vm5126_vm4, %v5092_v1, %v5160_v56  ;;  %v5052_v57 = vadd.f32 %v4971_v55, %v4742_v61  ;;  %v4743_v23 = vadd.f32 %v4664_v36, %v9547_v60  ;;  %v4974_v21 = vpop.f32.mrb[2].mxu1  ;;  %v7314_v5 = vpop.f32.mrb[3].mxu0 }
 0x4eb   : > { %5228 = vst [vmem:[%s9603_s30 + $0x88] sm:$0xff] %v5194_v51  ;;  %v7384_v8 = vpop.f32.mrb[3].mxu1 }
 0x4ec   : > { %v5093_v2 = vadd.f32 %v9595_v7, %v5052_v57  ;;  %v5053_v46 = vadd.f32 %v4974_v21, %v4743_v23 }
 0x4ee   : > { %vm5127_vm5 = vcmp.gt.f32.partialorder %v5093_v2, 0.0  ;;  %v5161_v63 = vmul.f32 0.2, %v5093_v2  ;;  %v5094_v12 = vadd.f32 %v9595_v7, %v5053_v46 }
 0x4ef   : > { %v4669_v40 = vpop.f32.mrb[4].mxu0 }
 0x4f0   : > { %v5195_v32 = vsel %vm5127_vm5, %v5093_v2, %v5161_v63  ;;  %vm5128_vm6 = vcmp.gt.f32.partialorder %v5094_v12, 0.0  ;;  %v5162_v54 = vmul.f32 0.2, %v5094_v12  ;;  %v4744_v29 = vadd.f32 %v4669_v40, %v9550_v11  ;;  %v4979_v60 = vpop.f32.mrb[4].mxu1  ;;  %v7317_v31 = vpop.f32.mrb[5].mxu0 }
 0x4f1   : > { %5229 = vst [vmem:[%s9603_s30 + $0x90] sm:$0xff] %v5195_v32  ;;  %v7387_v35 = vpop.f32.mrb[5].mxu1  ;;  %v4672_v25 = vpop.f32.mrb[6].mxu0 }
 0x4f2   : > { %v5196_v53 = vsel %vm5128_vm6, %v5094_v12, %v5162_v54  ;;  %v5054_v18 = vadd.f32 %v4979_v60, %v4744_v29  ;;  %v4745_v3 = vadd.f32 %v4672_v25, %v9553_v20  ;;  %v4982_v42 = vpop.f32.mrb[6].mxu1  ;;  %v7318_v27 = vpop.f32.mrb[7].mxu0 }
 0x4f3   : > { %5230 = vst [vmem:[%s9603_s30 + $0x98] sm:$0xff] %v5196_v53  ;;  %v7388_v24 = vpop.f32.mrb[7].mxu1 }
 0x4f4   : > { %v5095_v16 = vadd.f32 %v9595_v7, %v5054_v18  ;;  %v5055_v37 = vadd.f32 %v4982_v42, %v4745_v3 }
 0x4f6   : > { %vm5129_vm7 = vcmp.gt.f32.partialorder %v5095_v16, 0.0  ;;  %v5163_v34 = vmul.f32 0.2, %v5095_v16  ;;  %v5096_v11 = vadd.f32 %v9595_v7, %v5055_v37 }
 0x4f7   : > { %v4677_v59 = vpop.f32.mrb[8].mxu0 }
 0x4f8   : > { %v5197_v39 = vsel %vm5129_vm7, %v5095_v16, %v5163_v34  ;;  %vm5130_vm8 = vcmp.gt.f32.partialorder %v5096_v11, 0.0  ;;  %v5164_v47 = vmul.f32 0.2, %v5096_v11  ;;  %v4746_v17 = vadd.f32 %v4677_v59, %v9556_v50  ;;  %v4987_v20 = vpop.f32.mrb[8].mxu1  ;;  %v7321_v13 = vpop.f32.mrb[9].mxu0 }
 0x4f9   : > { %5231 = vst [vmem:[%s9603_s30 + $0xa0] sm:$0xff] %v5197_v39  ;;  %v7391_v14 = vpop.f32.mrb[9].mxu1  ;;  %v4680_v19 = vpop.f32.mrb[10].mxu0 }
 0x4fa   : > { %v5198_v26 = vsel %vm5130_vm8, %v5096_v11, %v5164_v47  ;;  %v5056_v44 = vadd.f32 %v4987_v20, %v4746_v17  ;;  %v4747_v9 = vadd.f32 %v4680_v19, %v9559_v10  ;;  %v4990_v33 = vpop.f32.mrb[10].mxu1  ;;  %v7322_v41 = vpop.f32.mrb[11].mxu0 }
 0x4fb   : > { %5232 = vst [vmem:[%s9603_s30 + $0xa8] sm:$0xff] %v5198_v26  ;;  %v7392_v30 = vpop.f32.mrb[11].mxu1 }
 0x4fc   : > { %v5097_v1 = vadd.f32 %v9595_v7, %v5056_v44  ;;  %v5057_v52 = vadd.f32 %v4990_v33, %v4747_v9 }
 0x4fe   : > { %vm5131_vm9 = vcmp.gt.f32.partialorder %v5097_v1, 0.0  ;;  %v5165_v48 = vmul.f32 0.2, %v5097_v1  ;;  %v5098_v50 = vadd.f32 %v9595_v7, %v5057_v52 }
 0x4ff   : > { %v4685_v56 = vpop.f32.mrb[12].mxu0 }
 0x500   : > { %v5199_v61 = vsel %vm5131_vm9, %v5097_v1, %v5165_v48  ;;  %vm5132_vm10 = vcmp.gt.f32.partialorder %v5098_v50, 0.0  ;;  %v5166_v55 = vmul.f32 0.2, %v5098_v50  ;;  %v4748_v38 = vadd.f32 %v4685_v56, %v9562_v43  ;;  %v4995_v10 = vpop.f32.mrb[12].mxu1  ;;  %v7325_v4 = vpop.f32.mrb[13].mxu0 }
 0x501   : > { %5233 = vst [vmem:[%s9603_s30 + $0xb0] sm:$0xff] %v5199_v61  ;;  %v7395_v36 = vpop.f32.mrb[13].mxu1  ;;  %v4688_v51 = vpop.f32.mrb[14].mxu0 }
 0x502   : > { %v5200_v57 = vsel %vm5132_vm10, %v5098_v50, %v5166_v55  ;;  %v5058_v23 = vadd.f32 %v4995_v10, %v4748_v38  ;;  %v4749_v21 = vadd.f32 %v4688_v51, %v9565_v6  ;;  %v4998_v5 = vpop.f32.mrb[14].mxu1  ;;  %v7326_v8 = vpop.f32.mrb[15].mxu0 }
 0x503   : > { %5234 = vst [vmem:[%s9603_s30 + $0xb8] sm:$0xff] %v5200_v57  ;;  %v7396_v2 = vpop.f32.mrb[15].mxu1 }
 0x504   : > { %v5099_v46 = vadd.f32 %v9595_v7, %v5058_v23  ;;  %v5059_v63 = vadd.f32 %v4998_v5, %v4749_v21 }
 0x506   : > { %vm5133_vm11 = vcmp.gt.f32.partialorder %v5099_v46, 0.0  ;;  %v5167_v12 = vmul.f32 0.2, %v5099_v46  ;;  %v5100_v43 = vadd.f32 %v9595_v7, %v5059_v63 }
 0x507   : > { %v4693_v40 = vpop.f32.mrb[16].mxu0 }
 0x508   : > { %v5201_v32 = vsel %vm5133_vm11, %v5099_v46, %v5167_v12  ;;  %vm5134_vm12 = vcmp.gt.f32.partialorder %v5100_v43, 0.0  ;;  %v5168_v54 = vmul.f32 0.2, %v5100_v43  ;;  %v4750_v29 = vadd.f32 %v4693_v40, %v9568_v58  ;;  %v5003_v6 = vpop.f32.mrb[16].mxu1  ;;  %v7329_v60 = vpop.f32.mrb[17].mxu0 }
 0x509   : > { %5235 = vst [vmem:[%s9603_s30 + $0xc0] sm:$0xff] %v5201_v32  ;;  %v7399_v31 = vpop.f32.mrb[17].mxu1  ;;  %v4696_v35 = vpop.f32.mrb[18].mxu0 }
 0x50a   : > { %v5202_v25 = vsel %vm5134_vm12, %v5100_v43, %v5168_v54  ;;  %v5060_v53 = vadd.f32 %v5003_v6, %v4750_v29  ;;  %v4751_v18 = vadd.f32 %v4696_v35, %v9571_v62  ;;  %v5006_v3 = vpop.f32.mrb[18].mxu1  ;;  %v7330_v42 = vpop.f32.mrb[19].mxu0 }
 0x50b   : > { %5236 = vst [vmem:[%s9603_s30 + $0xc8] sm:$0xff] %v5202_v25  ;;  %v7400_v27 = vpop.f32.mrb[19].mxu1 }
 0x50c   : > { %v5101_v24 = vadd.f32 %v9595_v7, %v5060_v53  ;;  %v5061_v16 = vadd.f32 %v5006_v3, %v4751_v18 }
 0x50e   : > { %vm5135_vm13 = vcmp.gt.f32.partialorder %v5101_v24, 0.0  ;;  %v5169_v37 = vmul.f32 0.2, %v5101_v24  ;;  %v5102_v58 = vadd.f32 %v9595_v7, %v5061_v16 }
 0x50f   : > { %v4701_v34 = vpop.f32.mrb[20].mxu0 }
 0x510   : > { %v5203_v11 = vsel %vm5135_vm13, %v5101_v24, %v5169_v37  ;;  %vm5136_vm14 = vcmp.gt.f32.partialorder %v5102_v58, 0.0  ;;  %v5170_v59 = vmul.f32 0.2, %v5102_v58  ;;  %v4752_v39 = vadd.f32 %v4701_v34, %v9574_v49  ;;  %v5011_v62 = vpop.f32.mrb[20].mxu1  ;;  %v7333_v47 = vpop.f32.mrb[21].mxu0 }
 0x511   : > { %5237 = vst [vmem:[%s9603_s30 + $0xd0] sm:$0xff] %v5203_v11  ;;  %v7403_v17 = vpop.f32.mrb[21].mxu1  ;;  %v4704_v20 = vpop.f32.mrb[22].mxu0 }
 0x512   : > { %v5204_v13 = vsel %vm5136_vm14, %v5102_v58, %v5170_v59  ;;  %v5062_v14 = vadd.f32 %v5011_v62, %v4752_v39  ;;  %v4753_v19 = vadd.f32 %v4704_v20, %v9577_v0  ;;  %v5014_v26 = vpop.f32.mrb[22].mxu1  ;;  %v7334_v44 = vpop.f32.mrb[23].mxu0 }
 0x513   : > { %5238 = vst [vmem:[%s9603_s30 + $0xd8] sm:$0xff] %v5204_v13  ;;  %v7404_v9 = vpop.f32.mrb[23].mxu1 }
 0x514   : > { %v5103_v33 = vadd.f32 %v9595_v7, %v5062_v14  ;;  %v5063_v41 = vadd.f32 %v5014_v26, %v4753_v19 }
 0x516   : > { %vm5137_vm15 = vcmp.gt.f32.partialorder %v5103_v33, 0.0  ;;  %v5171_v30 = vmul.f32 0.2, %v5103_v33  ;;  %v5104_v49 = vadd.f32 %v9595_v7, %v5063_v41 }
 0x517   : > { %v4709_v1 = vpop.f32.mrb[24].mxu0 }
 0x518   : > { %v5205_v52 = vsel %vm5137_vm15, %v5103_v33, %v5171_v30  ;;  %vm5138_vm0 = vcmp.gt.f32.partialorder %v5104_v49, 0.0  ;;  %v5172_v48 = vmul.f32 0.2, %v5104_v49  ;;  %v4754_v50 = vadd.f32 %v4709_v1, %v9580_v15  ;;  %v5019_v0 = vpop.f32.mrb[24].mxu1  ;;  %v7337_v56 = vpop.f32.mrb[25].mxu0 }
 0x519   : > { %5239 = vst [vmem:[%s9603_s30 + $0xe0] sm:$0xff] %v5205_v52  ;;  %v7407_v61 = vpop.f32.mrb[25].mxu1  ;;  %v4712_v55 = vpop.f32.mrb[26].mxu0 }
 0x51a   : > { %v5206_v38 = vsel %vm5138_vm0, %v5104_v49, %v5172_v48  ;;  %v5064_v10 = vadd.f32 %v5019_v0, %v4754_v50  ;;  %v4755_v4 = vadd.f32 %v4712_v55, %v9583_v28  ;;  %v5022_v36 = vpop.f32.mrb[26].mxu1  ;;  %v7338_v51 = vpop.f32.mrb[27].mxu0 }
 0x51b   : > { %5240 = vst [vmem:[%s9603_s30 + $0xe8] sm:$0xff] %v5206_v38  ;;  %v7408_v57 = vpop.f32.mrb[27].mxu1 }
 0x51c   : > { %v5105_v23 = vadd.f32 %v9595_v7, %v5064_v10  ;;  %v5065_v21 = vadd.f32 %v5022_v36, %v4755_v4 }
 0x51e   : > { %vm5139_vm1 = vcmp.gt.f32.partialorder %v5105_v23, 0.0  ;;  %v5173_v5 = vmul.f32 0.2, %v5105_v23  ;;  %v5106_v15 = vadd.f32 %v9595_v7, %v5065_v21 }
 0x51f   : > { %v4717_v8 = vpop.f32.mrb[28].mxu0 }
 0x520   : > { %v5207_v2 = vsel %vm5139_vm1, %v5105_v23, %v5173_v5  ;;  %vm5140_vm2 = vcmp.gt.f32.partialorder %v5106_v15, 0.0  ;;  %v5174_v46 = vmul.f32 0.2, %v5106_v15  ;;  %v4756_v63 = vadd.f32 %v4717_v8, %v9586_v22  ;;  %v5027_v28 = vpop.f32.mrb[28].mxu1  ;;  %v7341_v12 = vpop.f32.mrb[29].mxu0 }
 0x521   : > { %5241 = vst [vmem:[%s9603_s30 + $0xf0] sm:$0xff] %v5207_v2  ;;  %v7411_v43 = vpop.f32.mrb[29].mxu1  ;;  %v4720_v40 = vpop.f32.mrb[30].mxu0 }
 0x522   : > { %v5208_v32 = vsel %vm5140_vm2, %v5106_v15, %v5174_v46  ;;  %v5066_v54 = vadd.f32 %v5027_v28, %v4756_v63  ;;  %v4757_v29 = vadd.f32 %v4720_v40, %v9589_v45  ;;  %v5030_v6 = vpop.f32.mrb[30].mxu1  ;;  %v7342_v60 = vpop.f32.mrb[31].mxu0 }
 0x523   : > { %5242 = vst [vmem:[%s9603_s30 + $0xf8] sm:$0xff] %v5208_v32  ;;  %v7412_v31 = vpop.f32.mrb[31].mxu1 }
 0x524   : > { %v5107_v35 = vadd.f32 %v9595_v7, %v5066_v54  ;;  %v5067_v25 = vadd.f32 %v5030_v6, %v4757_v29 }
 0x526   : > { %vm5141_vm3 = vcmp.gt.f32.partialorder %v5107_v35, 0.0  ;;  %v5175_v22 = vmul.f32 0.2, %v5107_v35  ;;  %v5108_v53 = vadd.f32 %v9595_v7, %v5067_v25 }
 0x528   : > { %v5209_v18 = vsel %vm5141_vm3, %v5107_v35, %v5175_v22  ;;  %vm5142_vm4 = vcmp.gt.f32.partialorder %v5108_v53, 0.0  ;;  %v5176_v3 = vmul.f32 0.2, %v5108_v53 }
 0x529   : > { %5243 = vst [vmem:[%s9603_s30 + $0x100] sm:$0xff] %v5209_v18 }
 0x52a   : > { %v5210_v42 = vsel %vm5142_vm4, %v5108_v53, %v5176_v3 }
 0x52b   : > { %5244 = vst [vmem:[%s9603_s30 + $0x108] sm:$0xff] %v5210_v42 }
 0x52c PF: > { %s13_s12 = sadd.s32 1, %s7431_s12  }
 0x52d   : > { %p10_p4 = scmp.ge.s32.totalorder %s13_s12, 4  }
 0x52f   :  { %12 = sbr.rel (!%p10_p4) target bundleno = 1 (0x1), region = 80 }

// kernel: forward.5
= control target key start
LH: loop header
LB: loop body
LE: loop exit
PB: predicated region body
PF: predicated region fallthrough
CT: control target
= control target key end

     0   :  { %s4672_s12 = smov 0   ;;  %s5718_s0 = inlined_call_operand.vmem [shape: f32[2,2,2,82,128], index: 0, kind: input, shape index: {}]   ;;  %s5719_s1 = inlined_call_operand.vmem [shape: bf16[16,128,128], index: 1, kind: input, shape index: {}]   ;;  %s5720_s2 = inlined_call_operand.vmem [shape: f32[72,1], index: 2, kind: input, shape index: {}]   ;;  %s5721_s3 = inlined_call_operand.vmem [shape: f32[2,72,128], index: 3, kind: output, shape index: {}]  }
   0x1 LB: > { %s2938_s13 = sadd.s32 4294967295, %s4647_s12   ;;  %p2942_p0 = scmp.ge.s32.totalorder %s4647_s12, 1  ;;  %s4647_s12 = sphi %s4672_s12, %s13_s12  }
   0x2   : > { %p137_p1 = scmp.lt.s32.totalorder %s4647_s12, 3 }
   0x4   : > { %p138_p2 = pnand %p2942_p0, %p137_p1 }
   0x5   : > { %v4511_v0 = vld [vmem:[%s5719_s1 + $0x40] sm:$0xff] (!%p138_p2)   ;;  %v4649_v1 = vmov (!%p138_p2), 0.0   ;;  %v4513_v3 = vld [vmem:[%s5719_s1 + $0x48] sm:$0xff] (!%p138_p2)   ;;  %vm4650_vm0 = vmmov (!%p138_p2), 0   ;;  %v4515_v5 = vld [vmem:[%s5719_s1 + $0x50] sm:$0xff] (!%p138_p2)   ;;  %p161_p3 = scmp.lt.s32.totalorder (!%p138_p2), %s2938_s13, 1 }
   0x6   : > { %141 = sbr.rel (%p138_p2) target bundleno = 645 (0x285), region = 32  ;;  %3631 = vmatprep.subr.bf16.mxu1 (!%p138_p2), %v4649_v1  ;;  %3919 = vmatprep.subr.bf16.mxu0 (!%p138_p2), %v4649_v1  ;;  %v4512_v2 = vld [vmem:[%s5719_s1 + $0x200] sm:$0xff] (!%p138_p2)   ;;  %v4514_v4 = vld [vmem:[%s5719_s1 + $0x208] sm:$0xff] (!%p138_p2)   ;;  %v4516_v6 = vld [vmem:[%s5719_s1 + $0x210] sm:$0xff] (!%p138_p2)  }
   0x7   : > { %3632 = vmatpush3.bf16.msra.mxu1 (!%p138_p2), %v4511_v0  ;;  %3647 = vmatprep.mubr.msk.bf16.mxu1 (!%p138_p2), %vm4650_vm0, %v4649_v1  ;;  %v4517_v7 = vld [vmem:[%s5719_s1 + $0x58] sm:$0xff] (!%p138_p2)   ;;  %v4519_v9 = vld [vmem:[%s5719_s1 + $0x60] sm:$0xff] (!%p138_p2)   ;;  %v4521_v11 = vld [vmem:[%s5719_s1 + $0x68] sm:$0xff] (!%p138_p2)  }
   0x8   : > { %3920 = vmatpush3.bf16.msra.mxu0 (!%p138_p2), %v4512_v2  ;;  %3633 = vmatprep.subr.bf16.mxu1 (!%p138_p2), %v4649_v1  ;;  %v4518_v8 = vld [vmem:[%s5719_s1 + $0x218] sm:$0xff] (!%p138_p2)   ;;  %v4520_v10 = vld [vmem:[%s5719_s1 + $0x220] sm:$0xff] (!%p138_p2)   ;;  %v4522_v12 = vld [vmem:[%s5719_s1 + $0x228] sm:$0xff] (!%p138_p2)  }
   0x9   : > { %3921 = vmatprep.subr.bf16.mxu0 (!%p138_p2), %v4649_v1  ;;  %3935 = vmatprep.mubr.msk.bf16.mxu0 (!%p138_p2), %vm4650_vm0, %v4649_v1  ;;  %v4523_v13 = vld [vmem:[%s5719_s1 + $0x70] sm:$0xff] (!%p138_p2)   ;;  %v4525_v18 = vld [vmem:[%s5719_s1 + $0x78] sm:$0xff] (!%p138_p2)   ;;  %v4527_v28 = vld [vmem:[%s5719_s1] sm:$0xff] (!%p138_p2)  }
   0xa   : > { %v4524_v16 = vld [vmem:[%s5719_s1 + $0x230] sm:$0xff] (!%p138_p2)   ;;  %v4526_v19 = vld [vmem:[%s5719_s1 + $0x238] sm:$0xff] (!%p138_p2)   ;;  %v4528_v31 = vld [vmem:[%s5719_s1 + $0x240] sm:$0xff] (!%p138_p2)  }
   0xb   : > { %3634 = vmatpush3.bf16.msra.mxu1 (!%p138_p2), %v4513_v3  ;;  %v4529_v33 = vld [vmem:[%s5719_s1 + $0x8] sm:$0xff] (!%p138_p2)   ;;  %v4531_v39 = vld [vmem:[%s5719_s1 + $0x10] sm:$0xff] (!%p138_p2)   ;;  %v4533_v43 = vld [vmem:[%s5719_s1 + $0x18] sm:$0xff] (!%p138_p2)  }
   0xc   : > { %3922 = vmatpush3.bf16.msra.mxu0 (!%p138_p2), %v4514_v4  ;;  %3635 = vmatprep.subr.bf16.mxu1 (!%p138_p2), %v4649_v1  ;;  %v4530_v36 = vld [vmem:[%s5719_s1 + $0x248] sm:$0xff] (!%p138_p2)   ;;  %v4532_v40 = vld [vmem:[%s5719_s1 + $0x250] sm:$0xff] (!%p138_p2)   ;;  %v4534_v44 = vld [vmem:[%s5719_s1 + $0x258] sm:$0xff] (!%p138_p2)  }
   0xd   : > { %3923 = vmatprep.subr.bf16.mxu0 %v4649_v1  ;;  %s5723_s13 = smov (!%p161_p3, %s2938_s13), 1  ;;  %v4535_v50 = vld [vmem:[%s5719_s1 + $0x20] sm:$0xff]   ;;  %v4537_v58 = vld [vmem:[%s5719_s1 + $0x28] sm:$0xff]   ;;  %v4539_v2 = vld [vmem:[%s5719_s1 + $0x30] sm:$0xff]  }
   0xe   : > { %s4496_s7 = smul.u32 352, %s5723_s13  ;;  %v4536_v51 = vld [vmem:[%s5719_s1 + $0x260] sm:$0xff]   ;;  %v4538_v59 = vld [vmem:[%s5719_s1 + $0x268] sm:$0xff]   ;;  %v4540_v3 = vld [vmem:[%s5719_s1 + $0x270] sm:$0xff]  }
   0xf   : > { %3636 = vmatpush3.bf16.msra.mxu1 %v4515_v5 }
  0x10   : > { %3924 = vmatpush3.bf16.msra.mxu0 %v4516_v6  ;;  %3637 = vmatprep.subr.bf16.mxu1 %v4649_v1  ;;  %s4741_s16 = scalar_lea.vmem %s5718_s0, %s4496_s7  ;;  %v4541_v6 = vld [vmem:[%s5719_s1 + $0x38] sm:$0xff]  }
  0x11   : > { %3925 = vmatprep.subr.bf16.mxu0 %v4649_v1  ;;  %v4748_v14 = vld [vmem:[%s4741_s16 + $0x11] sm:$0xff]  ;;  %v4751_v15 = vld [vmem:[%s4741_s16 + $0x19] sm:$0xff]  ;;  %v4769_v22 = vld [vmem:[%s4741_s16 + $0x21] sm:$0xff] }
  0x12   : > { %v484_v17 = vpack.c.bf16 %v4751_v15, %v4748_v14  ;;  %v2945_v20 = vld [vmem:[%s4741_s16 + $0x58] sm:$0xff]  ;;  %v2946_v21 = vld [vmem:[%s4741_s16 + $0x60] sm:$0xff]  ;;  %v4772_v23 = vld [vmem:[%s4741_s16 + $0x29] sm:$0xff]  ;;  %v1446_v38 = vpack.c.bf16 %v4769_v22, %v4751_v15 }
  0x13   : > { %3638 = vmatpush3.bf16.msra.mxu1 %v4517_v7  ;;  %v4776_v24 = vld [vmem:[%s4741_s16 + $0x9] sm:$0xff]  ;;  %v485_v25 = vpack.c.bf16 %v4772_v23, %v4769_v22  ;;  %v212_v26 = vpack.c.bf16 %v2946_v21, %v2945_v20  ;;  %v4787_v29 = vld [vmem:[%s4741_s16 + $0x31] sm:$0xff]  ;;  %v4790_v30 = vld [vmem:[%s4741_s16 + $0x39] sm:$0xff] }
  0x14   : > { %3926 = vmatpush3.bf16.msra.mxu0 %v4518_v8  ;;  %3639 = vmatprep.subr.bf16.mxu1 %v4649_v1  ;;  %v1445_v27 = vpack.c.bf16 %v4748_v14, %v4776_v24  ;;  %v486_v32 = vpack.c.bf16 %v4790_v30, %v4787_v29  ;;  %v2947_v34 = vld [vmem:[%s4741_s16 + $0x68] sm:$0xff]  ;;  %v2948_v35 = vld [vmem:[%s4741_s16 + $0x70] sm:$0xff]  ;;  %v2949_v41 = vld [vmem:[%s4741_s16 + $0x78] sm:$0xff]  ;;  %v1447_v49 = vpack.c.bf16 %v4787_v29, %v4772_v23 }
  0x15   : > { %3927 = vmatprep.subr.bf16.mxu0 %v4649_v1  ;;  %v213_v37 = vpack.c.bf16 %v2948_v35, %v2947_v34  ;;  %v2950_v42 = vld [vmem:[%s4741_s16 + $0x80] sm:$0xff]  ;;  %v4837_v45 = vld [vmem:[%s4741_s16 + $0x69] sm:$0xff]  ;;  %v4840_v46 = vld [vmem:[%s4741_s16 + $0x71] sm:$0xff] }
  0x16   : > { %v214_v47 = vpack.c.bf16 %v2950_v42, %v2949_v41  ;;  %v644_v48 = vpack.c.bf16 %v4840_v46, %v4837_v45  ;;  %v2951_v52 = vld [vmem:[%s4741_s16 + $0x88] sm:$0xff]  ;;  %v2952_v53 = vld [vmem:[%s4741_s16 + $0x90] sm:$0xff]  ;;  %v4858_v54 = vld [vmem:[%s4741_s16 + $0x79] sm:$0xff] }
  0x17   : > { %3640 = vmatpush3.bf16.msra.mxu1 %v4519_v9  ;;  %v4861_v55 = vld [vmem:[%s4741_s16 + $0x81] sm:$0xff]  ;;  %v4880_v60 = vld [vmem:[%s4741_s16 + $0x89] sm:$0xff]  ;;  %v4883_v61 = vld [vmem:[%s4741_s16 + $0x91] sm:$0xff]  ;;  %v215_v62 = vpack.c.bf16 %v2952_v53, %v2951_v52 }
  0x18   : > { %3928 = vmatpush3.bf16.msra.mxu0 %v4520_v10  ;;  %3641 = vmatprep.subr.bf16.mxu1 %v4649_v1  ;;  %v4864_v56 = vld [vmem:[%s4741_s16 + $0x41] sm:$0xff]  ;;  %v645_v57 = vpack.c.bf16 %v4861_v55, %v4858_v54  ;;  %v646_v63 = vpack.c.bf16 %v4883_v61, %v4880_v60  ;;  %v2953_v4 = vld [vmem:[%s4741_s16 + $0x98] sm:$0xff]  ;;  %v1444_v5 = vld [vmem:[%s4741_s16 + $0x49] sm:$0xff] }
  0x19   : > { %3929 = vmatprep.subr.bf16.mxu0 %v4649_v1  ;;  %v1448_v0 = vpack.c.bf16 %v4864_v56, %v4790_v30  ;;  %v4542_v7 = vld [vmem:[%s5719_s1 + $0x278] sm:$0xff]   ;;  %v216_v8 = vpack.c.bf16 %v2953_v4, %v2953_v4  ;;  %v1449_v9 = vpack.c.bf16 %v1444_v5, %v1444_v5  ;;  %v172_v10 = vld [vmem:[%s4741_s16] sm:$0xff]  ;;  %v4545_v20 = vld [vmem:[%s5719_s1 + $0x88] sm:$0xff]   ;;  %v487_v30 = vpack.c.bf16 %v4864_v56, %v4864_v56 }
  0x1a   : > { %v174_v21 = vld [vmem:[%s4741_s16 + $0x10] sm:$0xff]  ;;  %v176_v35 = vld [vmem:[%s4741_s16 + $0x20] sm:$0xff]  ;;  %v4574_v29 = vld [vmem:[%s5719_s1 + $0x2f8] sm:$0xff]  }
  0x1b   : > { %3642 = vmatpush3.bf16.msra.mxu1 %v4521_v11  ;;  %v173_v11 = vld [vmem:[%s4741_s16 + $0x8] sm:$0xff]  ;;  %v4548_v34 = vld [vmem:[%s5719_s1 + $0x290] sm:$0xff]   ;;  %v4551_v41 = vld [vmem:[%s5719_s1 + $0xa0] sm:$0xff]  }
  0x1c   : > { %3930 = vmatpush3.bf16.msra.mxu0 %v4522_v12  ;;  %3643 = vmatprep.subr.bf16.mxu1 %v4649_v1  ;;  %v4921_v12 = vld [vmem:[%s4741_s16 + $0x61] sm:$0xff]  ;;  %v4555_v53 = vld [vmem:[%s5719_s1 + $0xb0] sm:$0xff]  }
  0x1d   : > { %3931 = vmatprep.subr.bf16.mxu0 %v4649_v1  ;;  %v4552_v42 = vld [vmem:[%s5719_s1 + $0x2a0] sm:$0xff]   ;;  %v4571_v23 = vld [vmem:[%s5719_s1 + $0xf0] sm:$0xff]  }
  0x1e   : > { %v474_v5 = vld [vmem:[%s4741_s16 + $0x1] sm:$0xff]  ;;  %v3257_v56 = vld [vmem:[%s4741_s16 + $0x6a] sm:$0xff] }
  0x1f   : > { %3644 = vmatpush3.bf16.msra.mxu1 %v4523_v13  ;;  %v181_v13 = vpack.c.bf16 %v173_v11, %v172_v10  ;;  %v4559_v10 = vld [vmem:[%s5719_s1 + $0xc0] sm:$0xff]  }
  0x20   : > { %3932 = vmatpush3.bf16.msra.mxu0 %v4524_v16  ;;  %3645 = vmatprep.subr.bf16.mxu1 %v4649_v1  ;;  %v1605_v16 = vpack.c.bf16 %v4837_v45, %v4921_v12  ;;  %v4560_v11 = vld [vmem:[%s5719_s1 + $0x2c0] sm:$0xff]   ;;  %v5197_v45 = vld [vmem:[%s4741_s16 + $0xe9] sm:$0xff] }
  0x21   : > { %3933 = vmatprep.subr.bf16.mxu0 %v4649_v1  ;;  %v4567_v15 = vld [vmem:[%s5719_s1 + $0xe0] sm:$0xff]  }
  0x23   : > { %3646 = vmatpush3.bf16.msra.mxu1 %v4525_v18  ;;  %v4543_v18 = vld [vmem:[%s5719_s1 + $0x80] sm:$0xff]  }
  0x24   : > { %3934 = vmatpush3.bf16.msra.mxu0 %v4526_v19  ;;  %3667 = vmatprep.subr.bf16.mxu1 %v4649_v1  ;;  %v4544_v19 = vld [vmem:[%s5719_s1 + $0x280] sm:$0xff]  }
  0x25   : > { %3955 = vmatprep.subr.bf16.mxu0 %v4649_v1 }
  0x26   : > { %3648 = vmatmul.mubr.bf16.vlgmr.msra.gmra.mrb[0].mxu1 %v212_v26  ;;  %v175_v26 = vld [vmem:[%s4741_s16 + $0x18] sm:$0xff] }
  0x27   : > { %3936 = vmatmul.mubr.bf16.vlgmr.msra.gmra.mrb[0].mxu0 %v1445_v27  ;;  %3668 = vmatpush3.bf16.msra.mxu1 %v4527_v28  ;;  %v4546_v27 = vld [vmem:[%s5719_s1 + $0x288] sm:$0xff]   ;;  %v182_v28 = vpack.c.bf16 %v175_v26, %v174_v21  ;;  %v4564_v21 = vld [vmem:[%s5719_s1 + $0x2d0] sm:$0xff]   ;;  %v4565_v26 = vld [vmem:[%s5719_s1 + $0xd8] sm:$0xff]  }
  0x28   : > { %3956 = vmatpush3.bf16.msra.mxu0 %v4528_v31  ;;  %3669 = vmatprep.subr.bf16.mxu1 %v4649_v1  ;;  %v1606_v31 = vpack.c.bf16 %v4858_v54, %v4840_v46 }
  0x29   : > { %3957 = vmatprep.subr.bf16.mxu0 %v4649_v1  ;;  %3651 = vmatprep.mubr.msk.bf16.mxu1 %vm4650_vm0, %v4649_v1 }
  0x2a   : > { %3939 = vmatprep.mubr.msk.bf16.mxu0 %vm4650_vm0, %v4649_v1 }
  0x2b   : > { %3670 = vmatpush3.bf16.msra.mxu1 %v4529_v33  ;;  %v4547_v33 = vld [vmem:[%s5719_s1 + $0x90] sm:$0xff]  }
  0x2c   : > { %3958 = vmatpush3.bf16.msra.mxu0 %v4530_v36  ;;  %3671 = vmatprep.subr.bf16.mxu1 %v4649_v1  ;;  %v177_v36 = vld [vmem:[%s4741_s16 + $0x28] sm:$0xff] }
  0x2d   : > { %3959 = vmatprep.subr.bf16.mxu0 %v4649_v1 }
  0x2e   : > { %3652 = vmatmul.mubr.bf16.gmra.mrb[4].mxu1 %v213_v37  ;;  %v4549_v37 = vld [vmem:[%s5719_s1 + $0x98] sm:$0xff]  }
  0x2f   : > { %3940 = vmatmul.mubr.bf16.gmra.mrb[4].mxu0 %v1446_v38  ;;  %3672 = vmatpush3.bf16.msra.mxu1 %v4531_v39  ;;  %v4550_v38 = vld [vmem:[%s5719_s1 + $0x298] sm:$0xff]   ;;  %v183_v39 = vpack.c.bf16 %v177_v36, %v176_v35  ;;  %v1763_v35 = vld [vmem:[%s4741_s16 + $0x42] sm:$0xff] }
  0x30   : > { %3960 = vmatpush3.bf16.msra.mxu0 %v4532_v40  ;;  %3655 = vmatprep.mubr.msk.bf16.mxu1 %vm4650_vm0, %v4649_v1  ;;  %v1607_v40 = vpack.c.bf16 %v4880_v60, %v4861_v55  ;;  %v4570_v36 = vld [vmem:[%s5719_s1 + $0x2e8] sm:$0xff]   ;;  %v4587_v55 = vld [vmem:[%s5719_s1 + $0x130] sm:$0xff]   ;;  %v4590_v60 = vld [vmem:[%s5719_s1 + $0x338] sm:$0xff]  }
  0x31   : > { %3673 = vmatprep.subr.bf16.mxu1 %v4649_v1  ;;  %3943 = vmatprep.mubr.msk.bf16.mxu0 %vm4650_vm0, %v4649_v1 }
  0x32   : > { %3961 = vmatprep.subr.bf16.mxu0 %v4649_v1 }
  0x33   : > { %3674 = vmatpush3.bf16.msra.mxu1 %v4533_v43  ;;  %v178_v43 = vld [vmem:[%s4741_s16 + $0x30] sm:$0xff] }
  0x34   : > { %3962 = vmatpush3.bf16.msra.mxu0 %v4534_v44  ;;  %3675 = vmatprep.subr.bf16.mxu1 %v4649_v1  ;;  %v179_v44 = vld [vmem:[%s4741_s16 + $0x38] sm:$0xff] }
  0x35   : > { %3963 = vmatprep.subr.bf16.mxu0 %v4649_v1 }
  0x36   : > { %3656 = vmatmul.mubr.bf16.gmra.mrb[8].mxu1 %v214_v47  ;;  %v4553_v47 = vld [vmem:[%s5719_s1 + $0xa8] sm:$0xff]  }
  0x37   : > { %3944 = vmatmul.mubr.bf16.gmra.mrb[8].mxu0 %v1447_v49  ;;  %3676 = vmatpush3.bf16.msra.mxu1 %v4535_v50  ;;  %v4987_v49 = vld [vmem:[%s4741_s16 + $0x99] sm:$0xff]  ;;  %v4554_v50 = vld [vmem:[%s5719_s1 + $0x2a8] sm:$0xff]  }
  0x38   : > { %3964 = vmatpush3.bf16.msra.mxu0 %v4536_v51  ;;  %3659 = vmatprep.mubr.msk.bf16.mxu1 %vm4650_vm0, %v4649_v1  ;;  %v184_v51 = vpack.c.bf16 %v179_v44, %v178_v43  ;;  %v1608_v52 = vpack.c.bf16 %v4987_v49, %v4883_v61  ;;  %v647_v61 = vpack.c.bf16 %v4987_v49, %v4987_v49  ;;  %v5265_v49 = vld [vmem:[%s4741_s16 + $0xb9] sm:$0xff] }
  0x39   : > { %3947 = vmatprep.mubr.msk.bf16.mxu0 %vm4650_vm0, %v4649_v1  ;;  %3677 = vmatprep.subr.bf16.mxu1 %v4649_v1 }
  0x3a   : > { %3965 = vmatprep.subr.bf16.mxu0 %v4649_v1 }
  0x3b   : > { %3678 = vmatpush3.bf16.msra.mxu1 %v4537_v58  ;;  %v4556_v58 = vld [vmem:[%s5719_s1 + $0x2b0] sm:$0xff]  }
  0x3c   : > { %3966 = vmatpush3.bf16.msra.mxu0 %v4538_v59  ;;  %3679 = vmatprep.subr.bf16.mxu1 %v4649_v1  ;;  %v180_v59 = vld [vmem:[%s4741_s16 + $0x40] sm:$0xff] }
  0x3d   : > { %3967 = vmatprep.subr.bf16.mxu0 %v4649_v1 }
  0x3e   : > { %3660 = vmatmul.mubr.bf16.gmra.mrb[12].mxu1 %v215_v62  ;;  %v3207_v62 = vld [vmem:[%s4741_s16 + $0xa1] sm:$0xff] }
  0x3f   : > { %3948 = vmatmul.mubr.bf16.gmra.mrb[12].mxu0 %v1448_v0  ;;  %3663 = vmatprep.mubr.msk.bf16.mxu1 %vm4650_vm0, %v4649_v1  ;;  %v4557_v0 = vld [vmem:[%s5719_s1 + $0xb8] sm:$0xff]   ;;  %v1609_v4 = vpack.c.bf16 %v3207_v62, %v3207_v62 }
  0x40   : > { %3680 = vmatpush3.bf16.msra.mxu1 %v4539_v2  ;;  %3951 = vmatprep.mubr.msk.bf16.mxu0 %vm4650_vm0, %v4649_v1  ;;  %v4558_v2 = vld [vmem:[%s5719_s1 + $0x2b8] sm:$0xff]  }
  0x41   : > { %3968 = vmatpush3.bf16.msra.mxu0 %v4540_v3  ;;  %3681 = vmatprep.subr.bf16.mxu1 %v4649_v1  ;;  %v185_v3 = vpack.c.bf16 %v180_v59, %v180_v59  ;;  %v5159_v59 = vld [vmem:[%s4741_s16 + $0xd1] sm:$0xff]  ;;  %v5162_v62 = vld [vmem:[%s4741_s16 + $0xd9] sm:$0xff] }
  0x42   : > { %3969 = vmatprep.subr.bf16.mxu0 %v4649_v1 }
  0x44   : > { %3682 = vmatpush3.bf16.msra.mxu1 %v4541_v6  ;;  %v1756_v6 = vld [vmem:[%s4741_s16 + $0xa] sm:$0xff] }
  0x45   : > { %3970 = vmatpush3.bf16.msra.mxu0 %v4542_v7  ;;  %3703 = vmatprep.subr.bf16.mxu1 %v4649_v1  ;;  %v1757_v7 = vld [vmem:[%s4741_s16 + $0x12] sm:$0xff] }
  0x46   : > { %3664 = vmatmul.mubr.bf16.gmra.mrb[16].mxu1 %v216_v8  ;;  %3991 = vmatprep.subr.bf16.mxu0 %v4649_v1  ;;  %v483_v8 = vpack.c.bf16 %v4776_v24, %v474_v5  ;;  %v1758_v24 = vld [vmem:[%s4741_s16 + $0x1a] sm:$0xff] }
  0x47   : > { %3952 = vmatmul.mubr.bf16.gmra.mrb[16].mxu0 %v1449_v9  ;;  %3683 = vmatprep.mubr.msk.bf16.mxu1 %vm4650_vm0, %v4649_v1  ;;  %v1765_v9 = vpack.c.bf16 %v1757_v7, %v1756_v6  ;;  %v4581_v5 = vld [vmem:[%s5719_s1 + $0x118] sm:$0xff]   ;;  %v3260_v6 = vld [vmem:[%s4741_s16 + $0x82] sm:$0xff]  ;;  %v3261_v7 = vld [vmem:[%s4741_s16 + $0x8a] sm:$0xff] }
  0x48   : > { %3971 = vmatprep.mubr.msk.bf16.mxu0 %vm4650_vm0, %v4649_v1 }
  0x4e   : > { %3684 = vmatmul.mubr.bf16.vlgmr.msra.gmra.mrb[0].mxu1 %v181_v13  ;;  %v4561_v13 = vld [vmem:[%s5719_s1 + $0xc8] sm:$0xff]  }
  0x4f   : > { %3972 = vmatmul.mubr.bf16.vlgmr.msra.gmra.mrb[0].mxu0 %v1605_v16  ;;  %3704 = vmatpush3.bf16.msra.mxu1 %v4543_v18  ;;  %v4562_v16 = vld [vmem:[%s5719_s1 + $0x2c8] sm:$0xff]  }
  0x50   : > { %3992 = vmatpush3.bf16.msra.mxu0 %v4544_v19  ;;  %3705 = vmatprep.subr.bf16.mxu1 %v4649_v1  ;;  %v1759_v18 = vld [vmem:[%s4741_s16 + $0x22] sm:$0xff] }
  0x51   : > { %3993 = vmatprep.subr.bf16.mxu0 %v4649_v1  ;;  %3687 = vmatprep.mubr.msk.bf16.mxu1 %vm4650_vm0, %v4649_v1  ;;  %v1766_v19 = vpack.c.bf16 %v1759_v18, %v1758_v24  ;;  %v3263_v24 = vld [vmem:[%s4741_s16 + $0x9a] sm:$0xff]  ;;  %v4586_v18 = vld [vmem:[%s5719_s1 + $0x328] sm:$0xff]  }
  0x52   : > { %3975 = vmatprep.mubr.msk.bf16.mxu0 %vm4650_vm0, %v4649_v1 }
  0x53   : > { %3706 = vmatpush3.bf16.msra.mxu1 %v4545_v20  ;;  %v4563_v20 = vld [vmem:[%s5719_s1 + $0xd0] sm:$0xff]  }
  0x54   : > { %3994 = vmatpush3.bf16.msra.mxu0 %v4546_v27  ;;  %3707 = vmatprep.subr.bf16.mxu1 %v4649_v1  ;;  %v1760_v27 = vld [vmem:[%s4741_s16 + $0x2a] sm:$0xff] }
  0x55   : > { %3995 = vmatprep.subr.bf16.mxu0 %v4649_v1 }
  0x56   : > { %3688 = vmatmul.mubr.bf16.gmra.mrb[4].mxu1 %v182_v28  ;;  %v1761_v28 = vld [vmem:[%s4741_s16 + $0x32] sm:$0xff] }
  0x57   : > { %3976 = vmatmul.mubr.bf16.gmra.mrb[4].mxu0 %v1606_v31  ;;  %3708 = vmatpush3.bf16.msra.mxu1 %v4547_v33  ;;  %v4566_v31 = vld [vmem:[%s5719_s1 + $0x2d8] sm:$0xff]   ;;  %v1767_v14 = vpack.c.bf16 %v1761_v28, %v1760_v27 }
  0x58   : > { %3996 = vmatpush3.bf16.msra.mxu0 %v4548_v34  ;;  %3691 = vmatprep.mubr.msk.bf16.mxu1 %vm4650_vm0, %v4649_v1  ;;  %v1762_v33 = vld [vmem:[%s4741_s16 + $0x3a] sm:$0xff]  ;;  %v4569_v34 = vld [vmem:[%s5719_s1 + $0xe8] sm:$0xff]  }
  0x59   : > { %3709 = vmatprep.subr.bf16.mxu1 %v4649_v1  ;;  %3979 = vmatprep.mubr.msk.bf16.mxu0 %vm4650_vm0, %v4649_v1  ;;  %v1768_v22 = vpack.c.bf16 %v1763_v35, %v1762_v33  ;;  %v3046_v33 = vld [vmem:[%s4741_s16 + $0xc8] sm:$0xff] }
  0x5a   : > { %3997 = vmatprep.subr.bf16.mxu0 %v4649_v1 }
  0x5b   : > { %3710 = vmatpush3.bf16.msra.mxu1 %v4549_v37  ;;  %v1764_v37 = vld [vmem:[%s4741_s16 + $0x4a] sm:$0xff] }
  0x5c   : > { %3998 = vmatpush3.bf16.msra.mxu0 %v4550_v38  ;;  %3711 = vmatprep.subr.bf16.mxu1 %v4649_v1  ;;  %v4573_v38 = vld [vmem:[%s5719_s1 + $0xf8] sm:$0xff]  }
  0x5d   : > { %3999 = vmatprep.subr.bf16.mxu0 %v4649_v1 }
  0x5e   : > { %3692 = vmatmul.mubr.bf16.gmra.mrb[8].mxu1 %v183_v39  ;;  %v3010_v39 = vld [vmem:[%s4741_s16 + $0x59] sm:$0xff] }
  0x5f   : > { %3980 = vmatmul.mubr.bf16.gmra.mrb[8].mxu0 %v1607_v40  ;;  %3712 = vmatpush3.bf16.msra.mxu1 %v4551_v41  ;;  %v3256_v40 = vld [vmem:[%s4741_s16 + $0x62] sm:$0xff]  ;;  %v643_v43 = vpack.c.bf16 %v4921_v12, %v3010_v39  ;;  %v3258_v12 = vld [vmem:[%s4741_s16 + $0x72] sm:$0xff] }
  0x60   : > { %4000 = vmatpush3.bf16.msra.mxu0 %v4552_v42  ;;  %3695 = vmatprep.mubr.msk.bf16.mxu1 %vm4650_vm0, %v4649_v1  ;;  %v4575_v41 = vld [vmem:[%s5719_s1 + $0x100] sm:$0xff]   ;;  %v1925_v44 = vpack.c.bf16 %v3257_v56, %v3256_v40 }
  0x61   : > { %3983 = vmatprep.mubr.msk.bf16.mxu0 %vm4650_vm0, %v4649_v1  ;;  %3713 = vmatprep.subr.bf16.mxu1 %v4649_v1  ;;  %v5139_v42 = vld [vmem:[%s4741_s16 + $0xc1] sm:$0xff] }
  0x62   : > { %4001 = vmatprep.subr.bf16.mxu0 %v4649_v1  ;;  %v2085_v28 = vpack.c.bf16 %v5139_v42, %v5265_v49  ;;  %v4599_v39 = vld [vmem:[%s5719_s1 + $0x160] sm:$0xff]  }
  0x63   : > { %3714 = vmatpush3.bf16.msra.mxu1 %v4553_v47  ;;  %v5143_v47 = vld [vmem:[%s4741_s16 + $0xc9] sm:$0xff]  ;;  %v4600_v40 = vld [vmem:[%s5719_s1 + $0x360] sm:$0xff]  }
  0x64   : > { %4002 = vmatpush3.bf16.msra.mxu0 %v4554_v50  ;;  %3715 = vmatprep.subr.bf16.mxu1 %v4649_v1  ;;  %v4576_v50 = vld [vmem:[%s5719_s1 + $0x300] sm:$0xff]  }
  0x65   : > { %4003 = vmatprep.subr.bf16.mxu0 %v4649_v1  ;;  %v3049_v56 = vld [vmem:[%s4741_s16 + $0xe0] sm:$0xff] }
  0x66   : > { %3696 = vmatmul.mubr.bf16.gmra.mrb[12].mxu1 %v184_v51  ;;  %v1126_v51 = vpack.c.bf16 %v5143_v47, %v5139_v42 }
  0x67   : > { %3984 = vmatmul.mubr.bf16.gmra.mrb[12].mxu0 %v1608_v52  ;;  %3699 = vmatprep.mubr.msk.bf16.mxu1 %vm4650_vm0, %v4649_v1  ;;  %v4577_v52 = vld [vmem:[%s5719_s1 + $0x108] sm:$0xff]  }
  0x68   : > { %3716 = vmatpush3.bf16.msra.mxu1 %v4555_v53  ;;  %3987 = vmatprep.mubr.msk.bf16.mxu0 %vm4650_vm0, %v4649_v1  ;;  %v4578_v53 = vld [vmem:[%s5719_s1 + $0x308] sm:$0xff]  }
  0x69   : > { %4004 = vmatpush3.bf16.msra.mxu0 %v4556_v58  ;;  %3717 = vmatprep.subr.bf16.mxu1 %v4649_v1  ;;  %v3259_v58 = vld [vmem:[%s4741_s16 + $0x7a] sm:$0xff] }
  0x6a   : > { %4005 = vmatprep.subr.bf16.mxu0 %v4649_v1 }
  0x6c   : > { %3718 = vmatpush3.bf16.msra.mxu1 %v4557_v0  ;;  %v1127_v0 = vpack.c.bf16 %v5162_v62, %v5159_v59 }
  0x6d   : > { %4006 = vmatpush3.bf16.msra.mxu0 %v4558_v2  ;;  %3739 = vmatprep.subr.bf16.mxu1 %v4649_v1  ;;  %v1926_v2 = vpack.c.bf16 %v3259_v58, %v3258_v12  ;;  %v4603_v12 = vld [vmem:[%s5719_s1 + $0x170] sm:$0xff]  }
  0x6e   : > { %3700 = vmatmul.mubr.bf16.gmra.mrb[16].mxu1 %v185_v3  ;;  %4027 = vmatprep.subr.bf16.mxu0 %v4649_v1  ;;  %v4579_v3 = vld [vmem:[%s5719_s1 + $0x110] sm:$0xff]  }
  0x6f   : > { %3988 = vmatmul.mubr.bf16.gmra.mrb[16].mxu0 %v1609_v4  ;;  %3719 = vmatprep.mubr.msk.bf16.mxu1 %vm4650_vm0, %v4649_v1  ;;  %v4580_v4 = vld [vmem:[%s5719_s1 + $0x310] sm:$0xff]  }
  0x70   : > { %4007 = vmatprep.mubr.msk.bf16.mxu0 %vm4650_vm0, %v4649_v1  ;;  %v4604_v58 = vld [vmem:[%s5719_s1 + $0x370] sm:$0xff]  }
  0x76   : > { %3720 = vmatmul.mubr.bf16.vlgmr.msra.gmra.mrb[0].mxu1 %v483_v8  ;;  %v4582_v8 = vld [vmem:[%s5719_s1 + $0x318] sm:$0xff]  }
  0x77   : > { %4008 = vmatmul.mubr.bf16.vlgmr.msra.gmra.mrb[0].mxu0 %v1765_v9  ;;  %3740 = vmatpush3.bf16.msra.mxu1 %v4559_v10  ;;  %v5194_v9 = vld [vmem:[%s4741_s16 + $0xe1] sm:$0xff] }
  0x78   : > { %4028 = vmatpush3.bf16.msra.mxu0 %v4560_v11  ;;  %3741 = vmatprep.subr.bf16.mxu1 %v4649_v1  ;;  %v1128_v46 = vpack.c.bf16 %v5197_v45, %v5194_v9  ;;  %v4583_v10 = vld [vmem:[%s5719_s1 + $0x120] sm:$0xff]  }
  0x79   : > { %4029 = vmatprep.subr.bf16.mxu0 %v4649_v1  ;;  %3723 = vmatprep.mubr.msk.bf16.mxu1 %vm4650_vm0, %v4649_v1  ;;  %v4584_v11 = vld [vmem:[%s5719_s1 + $0x320] sm:$0xff]  }
  0x7a   : > { %4011 = vmatprep.mubr.msk.bf16.mxu0 %vm4650_vm0, %v4649_v1 }
  0x7b   : > { %3742 = vmatpush3.bf16.msra.mxu1 %v4561_v13  ;;  %v4585_v13 = vld [vmem:[%s5719_s1 + $0x128] sm:$0xff]  }
  0x7c   : > { %4030 = vmatpush3.bf16.msra.mxu0 %v4562_v16  ;;  %3743 = vmatprep.subr.bf16.mxu1 %v4649_v1  ;;  %v3262_v16 = vld [vmem:[%s4741_s16 + $0x92] sm:$0xff] }
  0x7d   : > { %4031 = vmatprep.subr.bf16.mxu0 %v4649_v1  ;;  %v1928_v54 = vpack.c.bf16 %v3263_v24, %v3262_v16  ;;  %v3076_v16 = vld [vmem:[%s4741_s16 + $0x108] sm:$0xff]  ;;  %v3077_v24 = vld [vmem:[%s4741_s16 + $0x110] sm:$0xff] }
  0x7e   : > { %3724 = vmatmul.mubr.bf16.gmra.mrb[4].mxu1 %v484_v17  ;;  %v4568_v17 = vld [vmem:[%s5719_s1 + $0x2e0] sm:$0xff]  }
  0x7f   : > { %4012 = vmatmul.mubr.bf16.gmra.mrb[4].mxu0 %v1766_v19  ;;  %3744 = vmatpush3.bf16.msra.mxu1 %v4563_v20  ;;  %v3264_v19 = vld [vmem:[%s4741_s16 + $0xa2] sm:$0xff]  ;;  %v4589_v20 = vld [vmem:[%s5719_s1 + $0x138] sm:$0xff]  }
  0x80   : > { %4032 = vmatpush3.bf16.msra.mxu0 %v4564_v21  ;;  %3727 = vmatprep.mubr.msk.bf16.mxu1 %vm4650_vm0, %v4649_v1  ;;  %v3043_v21 = vld [vmem:[%s4741_s16 + $0xb0] sm:$0xff] }
  0x81   : > { %3745 = vmatprep.subr.bf16.mxu1 %v4649_v1  ;;  %4015 = vmatprep.mubr.msk.bf16.mxu0 %vm4650_vm0, %v4649_v1 }
  0x82   : > { %4033 = vmatprep.subr.bf16.mxu0 %v4649_v1 }
  0x83   : > { %3746 = vmatpush3.bf16.msra.mxu1 %v4565_v26  ;;  %v3044_v26 = vld [vmem:[%s4741_s16 + $0xb8] sm:$0xff] }
  0x84   : > { %4034 = vmatpush3.bf16.msra.mxu0 %v4566_v31  ;;  %3747 = vmatprep.subr.bf16.mxu1 %v4649_v1  ;;  %v804_v27 = vpack.c.bf16 %v3044_v26, %v3043_v21  ;;  %v4591_v31 = vld [vmem:[%s5719_s1 + $0x140] sm:$0xff]   ;;  %v4610_v21 = vld [vmem:[%s5719_s1 + $0x388] sm:$0xff]   ;;  %v3078_v26 = vld [vmem:[%s4741_s16 + $0x118] sm:$0xff] }
  0x85   : > { %4035 = vmatprep.subr.bf16.mxu0 %v4649_v1 }
  0x86   : > { %3728 = vmatmul.mubr.bf16.gmra.mrb[8].mxu1 %v485_v25  ;;  %v4572_v25 = vld [vmem:[%s5719_s1 + $0x2f0] sm:$0xff]  }
  0x87   : > { %4016 = vmatmul.mubr.bf16.gmra.mrb[8].mxu0 %v1767_v14  ;;  %3748 = vmatpush3.bf16.msra.mxu1 %v4567_v15  ;;  %v4592_v14 = vld [vmem:[%s5719_s1 + $0x340] sm:$0xff]   ;;  %v4593_v15 = vld [vmem:[%s5719_s1 + $0x148] sm:$0xff]  }
  0x88   : > { %4036 = vmatpush3.bf16.msra.mxu0 %v4568_v17  ;;  %3731 = vmatprep.mubr.msk.bf16.mxu1 %vm4650_vm0, %v4649_v1  ;;  %v3045_v17 = vld [vmem:[%s4741_s16 + $0xc0] sm:$0xff] }
  0x89   : > { %4019 = vmatprep.mubr.msk.bf16.mxu0 %vm4650_vm0, %v4649_v1  ;;  %3749 = vmatprep.subr.bf16.mxu1 %v4649_v1  ;;  %v805_v35 = vpack.c.bf16 %v3046_v33, %v3045_v17 }
  0x8a   : > { %4037 = vmatprep.subr.bf16.mxu0 %v4649_v1 }
  0x8b   : > { %3750 = vmatpush3.bf16.msra.mxu1 %v4569_v34  ;;  %v4594_v34 = vld [vmem:[%s5719_s1 + $0x348] sm:$0xff]  }
  0x8c   : > { %4038 = vmatpush3.bf16.msra.mxu0 %v4570_v36  ;;  %3751 = vmatprep.subr.bf16.mxu1 %v4649_v1  ;;  %v2086_v36 = vpack.c.bf16 %v5159_v59, %v5143_v47  ;;  %v4631_v47 = vld [vmem:[%s5719_s1 + $0x1e0] sm:$0xff]  }
  0x8d   : > { %4039 = vmatprep.subr.bf16.mxu0 %v4649_v1 }
  0x8e   : > { %3732 = vmatmul.mubr.bf16.gmra.mrb[12].mxu1 %v486_v32  ;;  %v1769_v32 = vpack.c.bf16 %v1764_v37, %v1764_v37  ;;  %v3048_v37 = vld [vmem:[%s4741_s16 + $0xd8] sm:$0xff] }
  0x8f   : > { %4020 = vmatmul.mubr.bf16.gmra.mrb[12].mxu0 %v1768_v22  ;;  %3735 = vmatprep.mubr.msk.bf16.mxu1 %vm4650_vm0, %v4649_v1  ;;  %v4595_v22 = vld [vmem:[%s5719_s1 + $0x150] sm:$0xff]  }
  0x90   : > { %3752 = vmatpush3.bf16.msra.mxu1 %v4571_v23  ;;  %4023 = vmatprep.mubr.msk.bf16.mxu0 %vm4650_vm0, %v4649_v1  ;;  %v4596_v23 = vld [vmem:[%s5719_s1 + $0x350] sm:$0xff]  }
  0x91   : > { %4040 = vmatpush3.bf16.msra.mxu0 %v4572_v25  ;;  %3753 = vmatprep.subr.bf16.mxu1 %v4649_v1  ;;  %v3047_v25 = vld [vmem:[%s4741_s16 + $0xd0] sm:$0xff] }
  0x92   : > { %4041 = vmatprep.subr.bf16.mxu0 %v4649_v1 }
  0x94   : > { %3754 = vmatpush3.bf16.msra.mxu1 %v4573_v38  ;;  %v4597_v38 = vld [vmem:[%s5719_s1 + $0x158] sm:$0xff]  }
  0x95   : > { %4042 = vmatpush3.bf16.msra.mxu0 %v4574_v29  ;;  %3775 = vmatprep.subr.bf16.mxu1 %v4649_v1  ;;  %v4598_v29 = vld [vmem:[%s5719_s1 + $0x358] sm:$0xff]  }
  0x96   : > { %3736 = vmatmul.mubr.bf16.gmra.mrb[16].mxu1 %v487_v30  ;;  %4063 = vmatprep.subr.bf16.mxu0 %v4649_v1  ;;  %v806_v30 = vpack.c.bf16 %v3048_v37, %v3047_v25  ;;  %v4613_v25 = vld [vmem:[%s5719_s1 + $0x198] sm:$0xff]  }
  0x97   : > { %4024 = vmatmul.mubr.bf16.gmra.mrb[16].mxu0 %v1769_v32  ;;  %3755 = vmatprep.mubr.msk.bf16.mxu1 %vm4650_vm0, %v4649_v1  ;;  %v2087_v32 = vpack.c.bf16 %v5194_v9, %v5162_v62  ;;  %v5451_v37 = vld [vmem:[%s4741_s16 + $0x131] sm:$0xff] }
  0x98   : > { %4043 = vmatprep.mubr.msk.bf16.mxu0 %vm4650_vm0, %v4649_v1  ;;  %v4635_v62 = vld [vmem:[%s5719_s1 + $0x1f0] sm:$0xff]   ;;  %v4638_v9 = vld [vmem:[%s5719_s1 + $0x3f8] sm:$0xff]  }
  0x9e   : > { %3756 = vmatmul.mubr.bf16.vlgmr.msra.gmra.mrb[0].mxu1 %v643_v43  ;;  %v4601_v43 = vld [vmem:[%s5719_s1 + $0x168] sm:$0xff]  }
  0x9f   : > { %4044 = vmatmul.mubr.bf16.vlgmr.msra.gmra.mrb[0].mxu0 %v1925_v44  ;;  %3776 = vmatpush3.bf16.msra.mxu1 %v4575_v41  ;;  %v3050_v41 = vld [vmem:[%s4741_s16 + $0xe8] sm:$0xff]  ;;  %v5331_v44 = vld [vmem:[%s4741_s16 + $0xf1] sm:$0xff] }
  0xa0   : > { %4064 = vmatpush3.bf16.msra.mxu0 %v4576_v50  ;;  %3777 = vmatprep.subr.bf16.mxu1 %v4649_v1  ;;  %v4602_v50 = vld [vmem:[%s5719_s1 + $0x368] sm:$0xff]  }
  0xa1   : > { %4065 = vmatprep.subr.bf16.mxu0 %v4649_v1  ;;  %3759 = vmatprep.mubr.msk.bf16.mxu1 %vm4650_vm0, %v4649_v1 }
  0xa2   : > { %4047 = vmatprep.mubr.msk.bf16.mxu0 %vm4650_vm0, %v4649_v1 }
  0xa3   : > { %3778 = vmatpush3.bf16.msra.mxu1 %v4577_v52  ;;  %v807_v52 = vpack.c.bf16 %v3050_v41, %v3049_v56  ;;  %v3082_v56 = vld [vmem:[%s4741_s16 + $0x138] sm:$0xff]  ;;  %v3083_v41 = vld [vmem:[%s4741_s16 + $0x140] sm:$0xff] }
  0xa4   : > { %4066 = vmatpush3.bf16.msra.mxu0 %v4578_v53  ;;  %3779 = vmatprep.subr.bf16.mxu1 %v4649_v1  ;;  %v2088_v53 = vpack.c.bf16 %v5331_v44, %v5197_v45  ;;  %v1129_v45 = vpack.c.bf16 %v5331_v44, %v5331_v44 }
  0xa5   : > { %4067 = vmatprep.subr.bf16.mxu0 %v4649_v1 }
  0xa6   : > { %3760 = vmatmul.mubr.bf16.gmra.mrb[4].mxu1 %v644_v48  ;;  %v1927_v48 = vpack.c.bf16 %v3261_v7, %v3260_v6  ;;  %v4606_v6 = vld [vmem:[%s5719_s1 + $0x378] sm:$0xff]   ;;  %v2718_v7 = vld [vmem:[%s5720_s2 + $0x10] sm:$0xff] }
  0xa7   : > { %4048 = vmatmul.mubr.bf16.gmra.mrb[4].mxu0 %v1926_v2  ;;  %3780 = vmatpush3.bf16.msra.mxu1 %v4579_v3  ;;  %v3051_v2 = vld [vmem:[%s4741_s16 + $0xf0] sm:$0xff]  ;;  %v3297_v3 = vld [vmem:[%s4741_s16 + $0xf9] sm:$0xff] }
  0xa8   : > { %4068 = vmatpush3.bf16.msra.mxu0 %v4580_v4  ;;  %3763 = vmatprep.mubr.msk.bf16.mxu1 %vm4650_vm0, %v4649_v1  ;;  %v4605_v4 = vld [vmem:[%s5719_s1 + $0x178] sm:$0xff]  }
  0xa9   : > { %3781 = vmatprep.subr.bf16.mxu1 %v4649_v1  ;;  %4051 = vmatprep.mubr.msk.bf16.mxu0 %vm4650_vm0, %v4649_v1 }
  0xaa   : > { %4069 = vmatprep.subr.bf16.mxu0 %v4649_v1 }
  0xab   : > { %3782 = vmatpush3.bf16.msra.mxu1 %v4581_v5  ;;  %v2716_v5 = vld [vmem:[%s5720_s2] sm:$0xff] }
  0xac   : > { %4070 = vmatpush3.bf16.msra.mxu0 %v4582_v8  ;;  %3783 = vmatprep.subr.bf16.mxu1 %v4649_v1  ;;  %v808_v8 = vpack.c.bf16 %v3051_v2, %v3051_v2  ;;  %v4619_v2 = vld [vmem:[%s5719_s1 + $0x1b0] sm:$0xff]  }
  0xad   : > { %4071 = vmatprep.subr.bf16.mxu0 %v4649_v1 }
  0xae   : > { %3764 = vmatmul.mubr.bf16.gmra.mrb[8].mxu1 %v645_v57  ;;  %v4588_v57 = vld [vmem:[%s5719_s1 + $0x330] sm:$0xff]  }
  0xaf   : > { %4052 = vmatmul.mubr.bf16.gmra.mrb[8].mxu0 %v1927_v48  ;;  %3784 = vmatpush3.bf16.msra.mxu1 %v4583_v10  ;;  %v4651_v48 = vmov 0   ;;  %v2089_v10 = vpack.c.bf16 %v3297_v3, %v3297_v3  ;;  %v4620_v3 = vld [vmem:[%s5719_s1 + $0x3b0] sm:$0xff]  }
  0xb0   : > { %4072 = vmatpush3.bf16.msra.mxu0 %v4584_v11  ;;  %3767 = vmatprep.mubr.msk.bf16.mxu1 %vm4650_vm0, %v4649_v1  ;;  %v2717_v11 = vld [vmem:[%s5720_s2 + $0x8] sm:$0xff] }
  0xb1   : > { %4055 = vmatprep.mubr.msk.bf16.mxu0 %vm4650_vm0, %v4649_v1  ;;  %3785 = vmatprep.subr.bf16.mxu1 %v4649_v1 }
  0xb2   : > { %4073 = vmatprep.subr.bf16.mxu0 %v4649_v1  ;;  %4509 = vset.pattern.permute.xlu0 %v4651_v48 }
  0xb3   : > { %3786 = vmatpush3.bf16.msra.mxu1 %v4585_v13  ;;  %2727 = vperm.xlu0 %4509, %v2716_v5   ;;  %v2719_v13 = vld [vmem:[%s5720_s2 + $0x18] sm:$0xff] }
  0xb4   : > { %4074 = vmatpush3.bf16.msra.mxu0 %v4586_v18  ;;  %3787 = vmatprep.subr.bf16.mxu1 %v4649_v1  ;;  %v5385_v18 = vld [vmem:[%s4741_s16 + $0x111] sm:$0xff] }
  0xb5   : > { %4075 = vmatprep.subr.bf16.mxu0 %v4649_v1  ;;  %4510 = vset.pattern.permute.xlu1 %v4651_v48  ;;  %v3330_v5 = vld [vmem:[%s4741_s16 + $0x151] sm:$0xff] }
  0xb6   : > { %3768 = vmatmul.mubr.bf16.gmra.mrb[12].mxu1 %v646_v63  ;;  %v1929_v63 = vpack.c.bf16 %v3264_v19, %v3264_v19  ;;  %2737 = vperm.xlu1 %4510, %v2718_v7   ;;  %v2721_v19 = vld [vmem:[%s5720_s2 + $0x28] sm:$0xff]  ;;  %v4622_v7 = vld [vmem:[%s5719_s1 + $0x3b8] sm:$0xff]   ;;  %v2249_v48 = vpack.c.bf16 %v3330_v5, %v3330_v5 }
  0xb7   : > { %4056 = vmatmul.mubr.bf16.gmra.mrb[12].mxu0 %v1928_v54  ;;  %3771 = vmatprep.mubr.msk.bf16.mxu1 %vm4650_vm0, %v4649_v1  ;;  %v5388_v54 = vld [vmem:[%s4741_s16 + $0x119] sm:$0xff] }
  0xb8   : > { %3788 = vmatpush3.bf16.msra.mxu1 %v4587_v55  ;;  %4059 = vmatprep.mubr.msk.bf16.mxu0 %vm4650_vm0, %v4649_v1  ;;  %v2720_v55 = vld [vmem:[%s5720_s2 + $0x20] sm:$0xff] }
  0xb9   : > { %4076 = vmatpush3.bf16.msra.mxu0 %v4588_v57  ;;  %3789 = vmatprep.subr.bf16.mxu1 %v4649_v1  ;;  %v965_v57 = vpack.c.bf16 %v3077_v24, %v3076_v16 }
  0xba   : > { %4077 = vmatprep.subr.bf16.mxu0 %v4649_v1  ;;  %2732 = vperm.xlu0 %4509, %v2717_v11   ;;  %v3355_v11 = vld [vmem:[%s4741_s16 + $0xba] sm:$0xff] }
  0xbb   : > { %2742 = vperm.xlu1 %4510, %v2719_v13   ;;  %v3356_v13 = vld [vmem:[%s4741_s16 + $0xc2] sm:$0xff] }
  0xbc   : > { %3790 = vmatpush3.bf16.msra.mxu1 %v4589_v20  ;;  %v2245_v20 = vpack.c.bf16 %v5388_v54, %v5385_v18  ;;  %v2405_v24 = vpack.c.bf16 %v3356_v13, %v3355_v11 }
  0xbd   : > { %4078 = vmatpush3.bf16.msra.mxu0 %v4590_v60  ;;  %3811 = vmatprep.subr.bf16.mxu1 %v4649_v1  ;;  %v4607_v60 = vld [vmem:[%s5719_s1 + $0x180] sm:$0xff]  }
  0xbe   : > { %3772 = vmatmul.mubr.bf16.gmra.mrb[16].mxu1 %v647_v61  ;;  %4099 = vmatprep.subr.bf16.mxu0 %v4649_v1  ;;  %v4608_v61 = vld [vmem:[%s5719_s1 + $0x380] sm:$0xff]  }
  0xbf   : > { %4060 = vmatmul.mubr.bf16.gmra.mrb[16].mxu0 %v1929_v63  ;;  %3791 = vmatprep.mubr.msk.bf16.mxu1 %vm4650_vm0, %v4649_v1  ;;  %v4609_v63 = vld [vmem:[%s5719_s1 + $0x188] sm:$0xff]  }
  0xc0   : > { %4079 = vmatprep.mubr.msk.bf16.mxu0 %vm4650_vm0, %v4649_v1  ;;  %2747 = vperm.xlu0 %4509, %v2720_v55   ;;  %v4623_v55 = vld [vmem:[%s5719_s1 + $0x1c0] sm:$0xff]  }
  0xc1   : > { %2752 = vperm.xlu1 %4510, %v2721_v19   ;;  %v4625_v19 = vld [vmem:[%s5719_s1 + $0x1c8] sm:$0xff]  }
  0xc6   : > { %3792 = vmatmul.mubr.bf16.vlgmr.msra.gmra.mrb[0].mxu1 %v804_v27  ;;  %v3079_v27 = vld [vmem:[%s4741_s16 + $0x120] sm:$0xff] }
  0xc7   : > { %4080 = vmatmul.mubr.bf16.vlgmr.msra.gmra.mrb[0].mxu0 %v2085_v28  ;;  %3812 = vmatpush3.bf16.msra.mxu1 %v4591_v31  ;;  %v2722_v28 = vld [vmem:[%s5720_s2 + $0x30] sm:$0xff]  ;;  %v5417_v31 = vld [vmem:[%s4741_s16 + $0x121] sm:$0xff]  ;;  %v966_v17 = vpack.c.bf16 %v3079_v27, %v3078_v26  ;;  %v4629_v26 = vld [vmem:[%s5719_s1 + $0x1d8] sm:$0xff]  }
  0xc8   : > { %4100 = vmatpush3.bf16.msra.mxu0 %v4592_v14  ;;  %3813 = vmatprep.subr.bf16.mxu1 %v4649_v1  ;;  %v5420_v14 = vld [vmem:[%s4741_s16 + $0x129] sm:$0xff]  ;;  %v3359_v27 = vld [vmem:[%s4741_s16 + $0xda] sm:$0xff] }
  0xc9   : > { %4101 = vmatprep.subr.bf16.mxu0 %v4649_v1  ;;  %3795 = vmatprep.mubr.msk.bf16.mxu1 %vm4650_vm0, %v4649_v1  ;;  %v2246_v33 = vpack.c.bf16 %v5420_v14, %v5417_v31 }
  0xca   : > { %4083 = vmatprep.mubr.msk.bf16.mxu0 %vm4650_vm0, %v4649_v1  ;;  %2757 = vperm.xlu0 %4509, %v2722_v28   ;;  %v3360_v28 = vld [vmem:[%s4741_s16 + $0xe2] sm:$0xff] }
  0xcb   : > { %3814 = vmatpush3.bf16.msra.mxu1 %v4593_v15  ;;  %v2723_v15 = vld [vmem:[%s5720_s2 + $0x38] sm:$0xff]  ;;  %v2407_v42 = vpack.c.bf16 %v3360_v28, %v3359_v27 }
  0xcc   : > { %4102 = vmatpush3.bf16.msra.mxu0 %v4594_v34  ;;  %3815 = vmatprep.subr.bf16.mxu1 %v4649_v1  ;;  %v4611_v34 = vld [vmem:[%s5719_s1 + $0x190] sm:$0xff]  }
  0xcd   : > { %4103 = vmatprep.subr.bf16.mxu0 %v4649_v1  ;;  %2762 = vperm.xlu1 %4510, %v2723_v15   ;;  %v4630_v15 = vld [vmem:[%s5719_s1 + $0x3d8] sm:$0xff]  }
  0xce   : > { %3796 = vmatmul.mubr.bf16.gmra.mrb[4].mxu1 %v805_v35  ;;  %v2724_v35 = vld [vmem:[%s5720_s2 + $0x40] sm:$0xff] }
  0xcf   : > { %4084 = vmatmul.mubr.bf16.gmra.mrb[4].mxu0 %v2086_v36  ;;  %3816 = vmatpush3.bf16.msra.mxu1 %v4595_v22  ;;  %v4612_v36 = vld [vmem:[%s5719_s1 + $0x390] sm:$0xff]   ;;  %v3080_v22 = vld [vmem:[%s4741_s16 + $0x128] sm:$0xff] }
  0xd0   : > { %4104 = vmatpush3.bf16.msra.mxu0 %v4596_v23  ;;  %3799 = vmatprep.mubr.msk.bf16.mxu1 %vm4650_vm0, %v4649_v1  ;;  %v3081_v23 = vld [vmem:[%s4741_s16 + $0x130] sm:$0xff] }
  0xd1   : > { %3817 = vmatprep.subr.bf16.mxu1 %v4649_v1  ;;  %4087 = vmatprep.mubr.msk.bf16.mxu0 %vm4650_vm0, %v4649_v1 }
  0xd2   : > { %4105 = vmatprep.subr.bf16.mxu0 %v4649_v1  ;;  %2767 = vperm.xlu0 %4509, %v2724_v35   ;;  %v4634_v35 = vld [vmem:[%s5719_s1 + $0x3e8] sm:$0xff]  }
  0xd3   : > { %3818 = vmatpush3.bf16.msra.mxu1 %v4597_v38  ;;  %v5454_v38 = vld [vmem:[%s4741_s16 + $0x139] sm:$0xff] }
  0xd4   : > { %4106 = vmatpush3.bf16.msra.mxu0 %v4598_v29  ;;  %3819 = vmatprep.subr.bf16.mxu1 %v4649_v1  ;;  %v4614_v29 = vld [vmem:[%s5719_s1 + $0x398] sm:$0xff]  }
  0xd5   : > { %4107 = vmatprep.subr.bf16.mxu0 %v4649_v1 }
  0xd6   : > { %3800 = vmatmul.mubr.bf16.gmra.mrb[8].mxu1 %v806_v30  ;;  %v967_v30 = vpack.c.bf16 %v3081_v23, %v3080_v22  ;;  %v4637_v22 = vld [vmem:[%s5719_s1 + $0x1f8] sm:$0xff]   ;;  %v3142_v23 = vld [vmem:[%s4741_s16 + $0x109] sm:$0xff] }
  0xd7   : > { %4088 = vmatmul.mubr.bf16.gmra.mrb[8].mxu0 %v2087_v32  ;;  %3820 = vmatpush3.bf16.msra.mxu1 %v4599_v39  ;;  %v2247_v32 = vpack.c.bf16 %v5454_v38, %v5451_v37  ;;  %v4615_v39 = vld [vmem:[%s5719_s1 + $0x1a0] sm:$0xff]   ;;  %v1285_v44 = vpack.c.bf16 %v5385_v18, %v3142_v23  ;;  %v3392_v18 = vld [vmem:[%s4741_s16 + $0x132] sm:$0xff] }
  0xd8   : > { %4108 = vmatpush3.bf16.msra.mxu0 %v4600_v40  ;;  %3803 = vmatprep.mubr.msk.bf16.mxu1 %vm4650_vm0, %v4649_v1  ;;  %v4616_v40 = vld [vmem:[%s5719_s1 + $0x3a0] sm:$0xff]  }
  0xd9   : > { %4091 = vmatprep.mubr.msk.bf16.mxu0 %vm4650_vm0, %v4649_v1  ;;  %3821 = vmatprep.subr.bf16.mxu1 %v4649_v1 }
  0xda   : > { %4109 = vmatprep.subr.bf16.mxu0 %v4649_v1 }
  0xdb   : > { %3822 = vmatpush3.bf16.msra.mxu1 %v4601_v43  ;;  %v4617_v43 = vld [vmem:[%s5719_s1 + $0x1a8] sm:$0xff]  }
  0xdc   : > { %4110 = vmatpush3.bf16.msra.mxu0 %v4602_v50  ;;  %3823 = vmatprep.subr.bf16.mxu1 %v4649_v1  ;;  %v5481_v50 = vld [vmem:[%s4741_s16 + $0x141] sm:$0xff] }
  0xdd   : > { %4111 = vmatprep.subr.bf16.mxu0 %v4649_v1 }
  0xde   : > { %3804 = vmatmul.mubr.bf16.gmra.mrb[12].mxu1 %v807_v52  ;;  %v5484_v52 = vld [vmem:[%s4741_s16 + $0x149] sm:$0xff] }
  0xdf   : > { %4092 = vmatmul.mubr.bf16.gmra.mrb[12].mxu0 %v2088_v53  ;;  %3807 = vmatprep.mubr.msk.bf16.mxu1 %vm4650_vm0, %v4649_v1  ;;  %v4618_v53 = vld [vmem:[%s5719_s1 + $0x3a8] sm:$0xff]  }
  0xe0   : > { %3824 = vmatpush3.bf16.msra.mxu1 %v4603_v12  ;;  %4095 = vmatprep.mubr.msk.bf16.mxu0 %vm4650_vm0, %v4649_v1  ;;  %v968_v12 = vpack.c.bf16 %v3083_v41, %v3082_v56  ;;  %v3393_v41 = vld [vmem:[%s4741_s16 + $0x13a] sm:$0xff] }
  0xe1   : > { %4112 = vmatpush3.bf16.msra.mxu0 %v4604_v58  ;;  %3825 = vmatprep.subr.bf16.mxu1 %v4649_v1  ;;  %v2248_v58 = vpack.c.bf16 %v5484_v52, %v5481_v50 }
  0xe2   : > { %4113 = vmatprep.subr.bf16.mxu0 %v4649_v1 }
  0xe4   : > { %3826 = vmatpush3.bf16.msra.mxu1 %v4605_v4  ;;  %v3084_v4 = vld [vmem:[%s4741_s16 + $0x148] sm:$0xff] }
  0xe5   : > { %4114 = vmatpush3.bf16.msra.mxu0 %v4606_v6  ;;  %3847 = vmatprep.subr.bf16.mxu1 %v4649_v1  ;;  %v4621_v6 = vld [vmem:[%s5719_s1 + $0x1b8] sm:$0xff]  }
  0xe6   : > { %3808 = vmatmul.mubr.bf16.gmra.mrb[16].mxu1 %v808_v8  ;;  %4135 = vmatprep.subr.bf16.mxu0 %v4649_v1  ;;  %v969_v8 = vpack.c.bf16 %v3084_v4, %v3084_v4 }
  0xe7   : > { %4096 = vmatmul.mubr.bf16.gmra.mrb[16].mxu0 %v2089_v10  ;;  %3827 = vmatprep.mubr.msk.bf16.mxu1 %vm4650_vm0, %v4649_v1  ;;  %v3109_v10 = vld [vmem:[%s4741_s16 + $0xb1] sm:$0xff] }
  0xe8   : > { %4115 = vmatprep.mubr.msk.bf16.mxu0 %vm4650_vm0, %v4649_v1  ;;  %v1125_v16 = vpack.c.bf16 %v5265_v49, %v3109_v10  ;;  %v4626_v49 = vld [vmem:[%s5719_s1 + $0x3c8] sm:$0xff]  }
  0xee   : > { %3828 = vmatmul.mubr.bf16.vlgmr.msra.gmra.mrb[0].mxu1 %v965_v57  ;;  %v4624_v57 = vld [vmem:[%s5719_s1 + $0x3c0] sm:$0xff]  }
  0xef   : > { %4116 = vmatmul.mubr.bf16.vlgmr.msra.gmra.mrb[0].mxu0 %v2245_v20  ;;  %3848 = vmatpush3.bf16.msra.mxu1 %v4607_v60  ;;  %v3357_v20 = vld [vmem:[%s4741_s16 + $0xca] sm:$0xff]  ;;  %v3358_v60 = vld [vmem:[%s4741_s16 + $0xd2] sm:$0xff] }
  0xf0   : > { %4136 = vmatpush3.bf16.msra.mxu0 %v4608_v61  ;;  %3849 = vmatprep.subr.bf16.mxu1 %v4649_v1  ;;  %v2406_v61 = vpack.c.bf16 %v3358_v60, %v3357_v20 }
  0xf1   : > { %4137 = vmatprep.subr.bf16.mxu0 %v4649_v1  ;;  %3831 = vmatprep.mubr.msk.bf16.mxu1 %vm4650_vm0, %v4649_v1 }
  0xf2   : > { %4119 = vmatprep.mubr.msk.bf16.mxu0 %vm4650_vm0, %v4649_v1 }
  0xf3   : > { %3850 = vmatpush3.bf16.msra.mxu1 %v4609_v63  ;;  %v4627_v63 = vld [vmem:[%s5719_s1 + $0x1d0] sm:$0xff]  }
  0xf4   : > { %4138 = vmatpush3.bf16.msra.mxu0 %v4610_v21  ;;  %3851 = vmatprep.subr.bf16.mxu1 %v4649_v1  ;;  %v4628_v21 = vld [vmem:[%s5719_s1 + $0x3d0] sm:$0xff]  }
  0xf5   : > { %4139 = vmatprep.subr.bf16.mxu0 %v4649_v1 }
  0xf6   : > { %3832 = vmatmul.mubr.bf16.gmra.mrb[4].mxu1 %v966_v17  ;;  %v4633_v17 = vld [vmem:[%s5719_s1 + $0x1e8] sm:$0xff]  }
  0xf7   : > { %4120 = vmatmul.mubr.bf16.gmra.mrb[4].mxu0 %v2246_v33  ;;  %3852 = vmatpush3.bf16.msra.mxu1 %v4611_v34  ;;  %v3361_v33 = vld [vmem:[%s4741_s16 + $0xea] sm:$0xff]  ;;  %v3362_v34 = vld [vmem:[%s4741_s16 + $0xf2] sm:$0xff] }
  0xf8   : > { %4140 = vmatpush3.bf16.msra.mxu0 %v4612_v36  ;;  %3835 = vmatprep.mubr.msk.bf16.mxu1 %vm4650_vm0, %v4649_v1  ;;  %v2408_v59 = vpack.c.bf16 %v3362_v34, %v3361_v33  ;;  %v3363_v36 = vld [vmem:[%s4741_s16 + $0xfa] sm:$0xff] }
  0xf9   : > { %3853 = vmatprep.subr.bf16.mxu1 %v4649_v1  ;;  %4123 = vmatprep.mubr.msk.bf16.mxu0 %vm4650_vm0, %v4649_v1 }
  0xfa   : > { %4141 = vmatprep.subr.bf16.mxu0 %v4649_v1 }
  0xfb   : > { %3854 = vmatpush3.bf16.msra.mxu1 %v4613_v25  ;;  %v3388_v25 = vld [vmem:[%s4741_s16 + $0x112] sm:$0xff] }
  0xfc   : > { %4142 = vmatpush3.bf16.msra.mxu0 %v4614_v29  ;;  %3855 = vmatprep.subr.bf16.mxu1 %v4649_v1  ;;  %v3389_v29 = vld [vmem:[%s4741_s16 + $0x11a] sm:$0xff] }
  0xfd   : > { %4143 = vmatprep.subr.bf16.mxu0 %v4649_v1 }
  0xfe   : > { %3836 = vmatmul.mubr.bf16.gmra.mrb[8].mxu1 %v967_v30  ;;  %v2565_v30 = vpack.c.bf16 %v3389_v29, %v3388_v25 }
  0xff   : > { %4124 = vmatmul.mubr.bf16.gmra.mrb[8].mxu0 %v2247_v32  ;;  %3856 = vmatpush3.bf16.msra.mxu1 %v4615_v39  ;;  %v3390_v32 = vld [vmem:[%s4741_s16 + $0x122] sm:$0xff]  ;;  %v3391_v39 = vld [vmem:[%s4741_s16 + $0x12a] sm:$0xff] }
 0x100   : > { %4144 = vmatpush3.bf16.msra.mxu0 %v4616_v40  ;;  %3839 = vmatprep.mubr.msk.bf16.mxu1 %vm4650_vm0, %v4649_v1  ;;  %v1286_v40 = vpack.c.bf16 %v5417_v31, %v5388_v54  ;;  %v2566_v56 = vpack.c.bf16 %v3391_v39, %v3390_v32  ;;  %v3394_v54 = vld [vmem:[%s4741_s16 + $0x142] sm:$0xff]  ;;  %v3395_v31 = vld [vmem:[%s4741_s16 + $0x14a] sm:$0xff] }
 0x101   : > { %4127 = vmatprep.mubr.msk.bf16.mxu0 %vm4650_vm0, %v4649_v1  ;;  %3857 = vmatprep.subr.bf16.mxu1 %v4649_v1 }
 0x102   : > { %4145 = vmatprep.subr.bf16.mxu0 %v4649_v1 }
 0x103   : > { %3858 = vmatpush3.bf16.msra.mxu1 %v4617_v43  ;;  %v1287_v43 = vpack.c.bf16 %v5451_v37, %v5420_v14  ;;  %v3396_v14 = vld [vmem:[%s4741_s16 + $0x152] sm:$0xff]  ;;  %v1289_v37 = vpack.c.bf16 %v5484_v52, %v5484_v52  ;;  %s4497_s16 = smul.u32 72, %s5723_s13 }
 0x104   : > { %4146 = vmatpush3.bf16.msra.mxu0 %v4618_v53  ;;  %3859 = vmatprep.subr.bf16.mxu1 %v4649_v1  ;;  %v2567_v53 = vpack.c.bf16 %v3393_v41, %v3392_v18 }
 0x105   : > { %4147 = vmatprep.subr.bf16.mxu0 %v4649_v1  ;;  %s170_s13 = scalar_lea.vmem %s5721_s3, %s4497_s16 }
 0x106   : > { %3840 = vmatmul.mubr.bf16.gmra.mrb[12].mxu1 %v968_v12  ;;  %v1288_v12 = vpack.c.bf16 %v5481_v50, %v5454_v38 }
 0x107   : > { %4128 = vmatmul.mubr.bf16.gmra.mrb[12].mxu0 %v2248_v58  ;;  %3843 = vmatprep.mubr.msk.bf16.mxu1 %vm4650_vm0, %v4649_v1  ;;  %v2568_v58 = vpack.c.bf16 %v3395_v31, %v3394_v54 }
 0x108   : > { %3860 = vmatpush3.bf16.msra.mxu1 %v4619_v2  ;;  %4131 = vmatprep.mubr.msk.bf16.mxu0 %vm4650_vm0, %v4649_v1  ;;  %v2569_v2 = vpack.c.bf16 %v3396_v14, %v3396_v14 }
 0x109   : > { %4148 = vmatpush3.bf16.msra.mxu0 %v4620_v3  ;;  %3861 = vmatprep.subr.bf16.mxu1 %v4649_v1 }
 0x10a   : > { %4149 = vmatprep.subr.bf16.mxu0 %v4649_v1 }
 0x10c   : > { %3862 = vmatpush3.bf16.msra.mxu1 %v4621_v6 }
 0x10d   : > { %4150 = vmatpush3.bf16.msra.mxu0 %v4622_v7  ;;  %3883 = vmatprep.subr.bf16.mxu1 %v4649_v1 }
 0x10e   : > { %3844 = vmatmul.mubr.bf16.gmra.mrb[16].mxu1 %v969_v8  ;;  %4171 = vmatprep.subr.bf16.mxu0 %v4649_v1 }
 0x10f   : > { %4132 = vmatmul.mubr.bf16.gmra.mrb[16].mxu0 %v2249_v48  ;;  %3863 = vmatprep.mubr.msk.bf16.mxu1 %vm4650_vm0, %v4649_v1 }
 0x110   : > { %4151 = vmatprep.mubr.msk.bf16.mxu0 %vm4650_vm0, %v4649_v1 }
 0x116   : > { %3864 = vmatmul.mubr.bf16.vlgmr.msra.gmra.mrb[0].mxu1 %v1125_v16 }
 0x117   : > { %4152 = vmatmul.mubr.bf16.vlgmr.msra.gmra.mrb[0].mxu0 %v2405_v24  ;;  %3884 = vmatpush3.bf16.msra.mxu1 %v4623_v55 }
 0x118   : > { %4172 = vmatpush3.bf16.msra.mxu0 %v4624_v57  ;;  %3885 = vmatprep.subr.bf16.mxu1 %v4649_v1 }
 0x119   : > { %4173 = vmatprep.subr.bf16.mxu0 %v4649_v1  ;;  %3867 = vmatprep.mubr.msk.bf16.mxu1 %vm4650_vm0, %v4649_v1 }
 0x11a   : > { %4155 = vmatprep.mubr.msk.bf16.mxu0 %vm4650_vm0, %v4649_v1 }
 0x11b   : > { %3886 = vmatpush3.bf16.msra.mxu1 %v4625_v19 }
 0x11c   : > { %4174 = vmatpush3.bf16.msra.mxu0 %v4626_v49  ;;  %3887 = vmatprep.subr.bf16.mxu1 %v4649_v1 }
 0x11d   : > { %4175 = vmatprep.subr.bf16.mxu0 %v4649_v1 }
 0x11e   : > { %3868 = vmatmul.mubr.bf16.gmra.mrb[4].mxu1 %v1126_v51  ;;  %v4632_v51 = vld [vmem:[%s5719_s1 + $0x3e0] sm:$0xff]  }
 0x11f   : > { %4156 = vmatmul.mubr.bf16.gmra.mrb[4].mxu0 %v2406_v61  ;;  %3888 = vmatpush3.bf16.msra.mxu1 %v4627_v63 }
 0x120   : > { %4176 = vmatpush3.bf16.msra.mxu0 %v4628_v21  ;;  %3871 = vmatprep.mubr.msk.bf16.mxu1 %vm4650_vm0, %v4649_v1 }
 0x121   : > { %3889 = vmatprep.subr.bf16.mxu1 %v4649_v1  ;;  %4159 = vmatprep.mubr.msk.bf16.mxu0 %vm4650_vm0, %v4649_v1 }
 0x122   : > { %4177 = vmatprep.subr.bf16.mxu0 %v4649_v1 }
 0x123   : > { %3890 = vmatpush3.bf16.msra.mxu1 %v4629_v26 }
 0x124   : > { %4178 = vmatpush3.bf16.msra.mxu0 %v4630_v15  ;;  %3891 = vmatprep.subr.bf16.mxu1 %v4649_v1 }
 0x125   : > { %4179 = vmatprep.subr.bf16.mxu0 %v4649_v1 }
 0x126   : > { %3872 = vmatmul.mubr.bf16.gmra.mrb[8].mxu1 %v1127_v0  ;;  %v4636_v0 = vld [vmem:[%s5719_s1 + $0x3f0] sm:$0xff]  }
 0x127   : > { %4160 = vmatmul.mubr.bf16.gmra.mrb[8].mxu0 %v2407_v42  ;;  %3892 = vmatpush3.bf16.msra.mxu1 %v4631_v47 }
 0x128   : > { %4180 = vmatpush3.bf16.msra.mxu0 %v4632_v51  ;;  %3875 = vmatprep.mubr.msk.bf16.mxu1 %vm4650_vm0, %v4649_v1 }
 0x129   : > { %4163 = vmatprep.mubr.msk.bf16.mxu0 %vm4650_vm0, %v4649_v1  ;;  %3893 = vmatprep.subr.bf16.mxu1 %v4649_v1 }
 0x12a   : > { %4181 = vmatprep.subr.bf16.mxu0 %v4649_v1 }
 0x12b   : > { %3894 = vmatpush3.bf16.msra.mxu1 %v4633_v17 }
 0x12c   : > { %4182 = vmatpush3.bf16.msra.mxu0 %v4634_v35  ;;  %3895 = vmatprep.subr.bf16.mxu1 %v4649_v1 }
 0x12d   : > { %4183 = vmatprep.subr.bf16.mxu0 %v4649_v1 }
 0x12e   : > { %3876 = vmatmul.mubr.bf16.gmra.mrb[12].mxu1 %v1128_v46  ;;  %v2409_v46 = vpack.c.bf16 %v3363_v36, %v3363_v36 }
 0x12f   : > { %4164 = vmatmul.mubr.bf16.gmra.mrb[12].mxu0 %v2408_v59  ;;  %3879 = vmatprep.mubr.msk.bf16.mxu1 %vm4650_vm0, %v4649_v1 }
 0x130   : > { %3896 = vmatpush3.bf16.msra.mxu1 %v4635_v62  ;;  %4167 = vmatprep.mubr.msk.bf16.mxu0 %vm4650_vm0, %v4649_v1 }
 0x131   : > { %4184 = vmatpush3.bf16.msra.mxu0 %v4636_v0  ;;  %3897 = vmatprep.subr.bf16.mxu1 %v4649_v1 }
 0x132   : > { %4185 = vmatprep.subr.bf16.mxu0 %v4649_v1  ;;  %v5662_v3 = vpop.permute.xlu0 %2727 }
 0x134   : > { %3898 = vmatpush3.bf16.msra.mxu1 %v4637_v22 }
 0x135   : > { %4186 = vmatpush3.bf16.msra.mxu0 %v4638_v9  ;;  %v5666_v50 = vpop.permute.xlu1 %2737 }
 0x136   : > { %3880 = vmatmul.mubr.bf16.gmra.mrb[16].mxu1 %v1129_v45 }
 0x137   : > { %4168 = vmatmul.mubr.bf16.gmra.mrb[16].mxu0 %v2409_v46  ;;  %3899 = vmatprep.mubr.msk.bf16.mxu1 %vm4650_vm0, %v4649_v1 }
 0x138   : > { %4187 = vmatprep.mubr.msk.bf16.mxu0 %vm4650_vm0, %v4649_v1 }
 0x139   : > { %v5664_v4 = vpop.permute.xlu0 %2732 }
 0x13a   : > { %v5676_v57 = vpop.permute.xlu1 %2742 }
 0x13e   : > { %3900 = vmatmul.mubr.bf16.vlgmr.msra.gmra.mrb[0].mxu1 %v1285_v44 }
 0x13f   : > { %4188 = vmatmul.mubr.bf16.vlgmr.msra.gmra.mrb[0].mxu0 %v2565_v30  ;;  %3903 = vmatprep.mubr.msk.bf16.mxu1 %vm4650_vm0, %v4649_v1  ;;  %v5683_v47 = vpop.permute.xlu0 %2747 }
 0x140   : > { %4191 = vmatprep.mubr.msk.bf16.mxu0 %vm4650_vm0, %v4649_v1  ;;  %v5686_v46 = vpop.permute.xlu1 %2752 }
 0x146   : > { %3904 = vmatmul.mubr.bf16.gmra.mrb[4].mxu1 %v1286_v40 }
 0x147   : > { %4192 = vmatmul.mubr.bf16.gmra.mrb[4].mxu0 %v2566_v56  ;;  %3907 = vmatprep.mubr.msk.bf16.mxu1 %vm4650_vm0, %v4649_v1 }
 0x148   : > { %4195 = vmatprep.mubr.msk.bf16.mxu0 %vm4650_vm0, %v4649_v1 }
 0x149   : > { %v5689_v29 = vpop.permute.xlu0 %2757 }
 0x14e   : > { %3908 = vmatmul.mubr.bf16.gmra.mrb[8].mxu1 %v1287_v43 }
 0x14f   : > { %4196 = vmatmul.mubr.bf16.gmra.mrb[8].mxu0 %v2567_v53  ;;  %3911 = vmatprep.mubr.msk.bf16.mxu1 %vm4650_vm0, %v4649_v1 }
 0x150   : > { %4199 = vmatprep.mubr.msk.bf16.mxu0 %vm4650_vm0, %v4649_v1 }
 0x156   : > { %3912 = vmatmul.mubr.bf16.gmra.mrb[12].mxu1 %v1288_v12  ;;  %v2763_v12 = vpop.permute.xlu1 %2762 }
 0x157   : > { %4200 = vmatmul.mubr.bf16.gmra.mrb[12].mxu0 %v2568_v58  ;;  %3915 = vmatprep.mubr.msk.bf16.mxu1 %vm4650_vm0, %v4649_v1 }
 0x158   : > { %4203 = vmatprep.mubr.msk.bf16.mxu0 %vm4650_vm0, %v4649_v1 }
 0x15e   : > { %3916 = vmatmul.mubr.bf16.gmra.mrb[16].mxu1 %v1289_v37  ;;  %v2768_v37 = vpop.permute.xlu0 %2767 }
 0x15f   : > { %4204 = vmatmul.mubr.bf16.gmra.mrb[16].mxu0 %v2569_v2 }
 0x211   : > { %v1389_v38 = vpop.f32.mrb[0].mxu1 }
 0x212   : > { %v2669_v5 = vpop.f32.mrb[0].mxu0  ;;  %v3901_v6 = vpop.f32.mrb[1].mxu1 }
 0x213   : > { %v5668_v7 = vadd.f32 %v2669_v5, %v1389_v38  ;;  %v4189_v8 = vpop.f32.mrb[1].mxu0  ;;  %v1392_v1 = vpop.f32.mrb[2].mxu1 }
 0x214   : > { %v2672_v48 = vpop.f32.mrb[2].mxu0  ;;  %v3902_v10 = vpop.f32.mrb[3].mxu1 }
 0x215   : > { %v5670_v11 = vadd.f32 %v2672_v48, %v1392_v1  ;;  %v4190_v52 = vpop.f32.mrb[3].mxu0  ;;  %v2770_v13 = vmul.f32 %v5668_v7, %v5662_v3 }
 0x217   : > { %v2771_v16 = vmul.f32 %v5670_v11, %v5664_v4 }
 0x219   : > { %v2779_v24 = vadd.f32 %v2771_v16, %v2770_v13  ;;  %v1397_v55 = vpop.f32.mrb[4].mxu1 }
 0x21a   : > { %v2677_v19 = vpop.f32.mrb[4].mxu0  ;;  %v3905_v49 = vpop.f32.mrb[5].mxu1 }
 0x21b   : > { %v5678_v20 = vadd.f32 %v2677_v19, %v1397_v55  ;;  %v4193_v60 = vpop.f32.mrb[5].mxu0  ;;  %v1400_v61 = vpop.f32.mrb[6].mxu1 }
 0x21c   : > { %v2680_v63 = vpop.f32.mrb[6].mxu0  ;;  %v3906_v21 = vpop.f32.mrb[7].mxu1 }
 0x21d   : > { %v2772_v26 = vmul.f32 %v5678_v20, %v5666_v50  ;;  %v4210_v27 = vadd.f32 %v2680_v63, %v1400_v61  ;;  %v4194_v28 = vpop.f32.mrb[7].mxu0 }
 0x21f   : > { %v2780_v15 = vadd.f32 %v2779_v24, %v2772_v26  ;;  %v2773_v42 = vmul.f32 %v4210_v27, %v5676_v57 }
 0x221   : > { %v2781_v51 = vadd.f32 %v2780_v15, %v2773_v42  ;;  %v1405_v17 = vpop.f32.mrb[8].mxu1 }
 0x222   : > { %v2685_v33 = vpop.f32.mrb[8].mxu0  ;;  %v3909_v34 = vpop.f32.mrb[9].mxu1 }
 0x223   : > { %v4211_v35 = vadd.f32 %v2685_v33, %v1405_v17  ;;  %v4197_v59 = vpop.f32.mrb[9].mxu0  ;;  %v1408_v62 = vpop.f32.mrb[10].mxu1 }
 0x224   : > { %v2688_v0 = vpop.f32.mrb[10].mxu0  ;;  %v3910_v36 = vpop.f32.mrb[11].mxu1 }
 0x225   : > { %v2774_v22 = vmul.f32 %v4211_v35, %v5683_v47  ;;  %v4212_v9 = vadd.f32 %v2688_v0, %v1408_v62  ;;  %v4198_v45 = vpop.f32.mrb[11].mxu0 }
 0x227   : > { %v2782_v23 = vadd.f32 %v2781_v51, %v2774_v22  ;;  %v2775_v25 = vmul.f32 %v4212_v9, %v5686_v46 }
 0x229   : > { %v2783_v44 = vadd.f32 %v2782_v23, %v2775_v25  ;;  %v1413_v30 = vpop.f32.mrb[12].mxu1 }
 0x22a   : > { %v2693_v32 = vpop.f32.mrb[12].mxu0  ;;  %v3913_v39 = vpop.f32.mrb[13].mxu1 }
 0x22b   : > { %v4213_v40 = vadd.f32 %v2693_v32, %v1413_v30  ;;  %v4201_v56 = vpop.f32.mrb[13].mxu0  ;;  %v1416_v18 = vpop.f32.mrb[14].mxu1 }
 0x22c   : > { %v2696_v41 = vpop.f32.mrb[14].mxu0  ;;  %v3914_v43 = vpop.f32.mrb[15].mxu1 }
 0x22d   : > { %v2776_v53 = vmul.f32 %v4213_v40, %v5689_v29  ;;  %v4214_v54 = vadd.f32 %v2696_v41, %v1416_v18  ;;  %v4202_v31 = vpop.f32.mrb[15].mxu0 }
 0x22f   : > { %v2784_v58 = vadd.f32 %v2783_v44, %v2776_v53  ;;  %v2777_v14 = vmul.f32 %v4214_v54, %v2763_v12 }
 0x231   : > { %v2785_v2 = vadd.f32 %v2784_v58, %v2777_v14  ;;  %v1421_v38 = vpop.f32.mrb[16].mxu1 }
 0x232   : > { %v2701_v5 = vpop.f32.mrb[16].mxu0  ;;  %v3917_v6 = vpop.f32.mrb[17].mxu1 }
 0x233   : > { %v4215_v8 = vadd.f32 %v2701_v5, %v1421_v38  ;;  %v4205_v1 = vpop.f32.mrb[17].mxu0  ;;  %v1424_v48 = vpop.f32.mrb[18].mxu1 }
 0x234   : > { %v2704_v10 = vpop.f32.mrb[18].mxu0  ;;  %v3918_v52 = vpop.f32.mrb[19].mxu1 }
 0x235   : > { %v2778_v13 = vmul.f32 %v4215_v8, %v2768_v37  ;;  %v4206_v16 = vpop.f32.mrb[19].mxu0 }
 0x237   : > { %v2786_v24 = vadd.f32 %v2785_v2, %v2778_v13 }
 0x239   : > { %v2787_v55 = vrot.slane %v2786_v24, 4 }
 0x23b   : > { %v2788_v19 = vadd.f32 %v2787_v55, %v2786_v24 }
 0x23d   : > { %v2789_v49 = vrot.slane %v2788_v19, 2 }
 0x23f   : > { %v2790_v60 = vadd.f32 %v2789_v49, %v2788_v19 }
 0x241   : > { %v2791_v61 = vrot.slane %v2790_v60, 1 }
 0x243   : > { %v2792_v63 = vadd.f32 %v2791_v61, %v2790_v60 }
 0x245   : > { %v2793_v21 = vmul.f32 0.015625, %v2792_v63 }
 0x247   : > { %v2794_v26 = vsub.f32 %v5668_v7, %v2793_v21  ;;  %v2795_v28 = vsub.f32 %v5670_v11, %v2793_v21  ;;  %v2796_v15 = vsub.f32 %v5678_v20, %v2793_v21  ;;  %v2797_v42 = vsub.f32 %v4210_v27, %v2793_v21 }
 0x248   : > { %v2798_v51 = vsub.f32 %v4211_v35, %v2793_v21  ;;  %v2799_v17 = vsub.f32 %v4212_v9, %v2793_v21  ;;  %v2800_v33 = vsub.f32 %v4213_v40, %v2793_v21  ;;  %v2801_v34 = vsub.f32 %v4214_v54, %v2793_v21 }
 0x249   : > { %v2802_v59 = vsub.f32 %v4215_v8, %v2793_v21  ;;  %v2803_v62 = vmul.f32 %v2794_v26, %v2794_v26  ;;  %v2804_v0 = vmul.f32 %v2795_v28, %v2795_v28  ;;  %v2805_v36 = vmul.f32 %v2796_v15, %v2796_v15 }
 0x24a   : > { %v2806_v22 = vmul.f32 %v2797_v42, %v2797_v42  ;;  %v2807_v25 = vmul.f32 %v2798_v51, %v2798_v51  ;;  %v2808_v44 = vmul.f32 %v2799_v17, %v2799_v17  ;;  %v2809_v35 = vmul.f32 %v2800_v33, %v2800_v33 }
 0x24b   : > { %v2812_v45 = vmul.f32 %v2803_v62, %v5662_v3  ;;  %v2813_v23 = vmul.f32 %v2804_v0, %v5664_v4  ;;  %v2814_v7 = vmul.f32 %v2805_v36, %v5666_v50  ;;  %v2810_v32 = vmul.f32 %v2801_v34, %v2801_v34 }
 0x24c   : > { %v2815_v20 = vmul.f32 %v2806_v22, %v5676_v57  ;;  %v2816_v9 = vmul.f32 %v2807_v25, %v5683_v47  ;;  %v2817_v39 = vmul.f32 %v2808_v44, %v5686_v46  ;;  %v2811_v56 = vmul.f32 %v2802_v59, %v2802_v59 }
 0x24d   : > { %v2821_v11 = vadd.f32 %v2813_v23, %v2812_v45  ;;  %v2818_v3 = vmul.f32 %v2809_v35, %v5689_v29  ;;  %v2819_v18 = vmul.f32 %v2810_v32, %v2763_v12 }
 0x24e   : > { %v2820_v41 = vmul.f32 %v2811_v56, %v2768_v37 }
 0x24f   : > { %v2822_v27 = vadd.f32 %v2821_v11, %v2814_v7 }
 0x251   : > { %v2823_v30 = vadd.f32 %v2822_v27, %v2815_v20 }
 0x253   : > { %v2824_v40 = vadd.f32 %v2823_v30, %v2816_v9 }
 0x255   : > { %v2825_v4 = vadd.f32 %v2824_v40, %v2817_v39 }
 0x257   : > { %v2826_v50 = vadd.f32 %v2825_v4, %v2818_v3 }
 0x259   : > { %v2827_v43 = vadd.f32 %v2826_v50, %v2819_v18 }
 0x25b   : > { %v2828_v53 = vadd.f32 %v2827_v43, %v2820_v41 }
 0x25d   : > { %v2829_v57 = vrot.slane %v2828_v53, 4 }
 0x25f   : > { %v2830_v54 = vadd.f32 %v2829_v57, %v2828_v53 }
 0x261   : > { %v2831_v31 = vrot.slane %v2830_v54, 2 }
 0x263   : > { %v2832_v58 = vadd.f32 %v2831_v31, %v2830_v54 }
 0x265   : > { %v2833_v47 = vrot.slane %v2832_v58, 1 }
 0x267   : > { %v2834_v14 = vadd.f32 %v2833_v47, %v2832_v58 }
 0x269   : > { %v2835_v2 = vmul.f32 0.015625, %v2834_v14 }
 0x26b   : > { %v2836_v38 = vadd.f32 1e-05, %v2835_v2 }
 0x26d   : > { %4639 = vrsqrt.f32 %v2836_v38 }
 0x277   : > { %v4640_v46 = vpop.eup %4639 }
 0x278   : > { %v2838_v5 = vmul.f32 %v4640_v46, %v2794_v26  ;;  %v2839_v29 = vmul.f32 %v4640_v46, %v2795_v28  ;;  %v2840_v6 = vmul.f32 %v4640_v46, %v2796_v15  ;;  %v2841_v8 = vmul.f32 %v4640_v46, %v2797_v42 }
 0x279   : > { %v2842_v12 = vmul.f32 %v4640_v46, %v2798_v51  ;;  %v2843_v1 = vmul.f32 %v4640_v46, %v2799_v17  ;;  %v2844_v37 = vmul.f32 %v4640_v46, %v2800_v33  ;;  %v2845_v48 = vmul.f32 %v4640_v46, %v2801_v34 }
 0x27a   : > { %v2846_v10 = vmul.f32 %v4640_v46, %v2802_v59  ;;  %vm2847_vm1 = vcmp.gt.f32.partialorder %v2838_v5, 0.0  ;;  %vm2848_vm2 = vcmp.gt.f32.partialorder %v2839_v29, 0.0  ;;  %vm2849_vm3 = vcmp.gt.f32.partialorder %v2840_v6, 0.0 }
 0x27b   : > { %vm2850_vm4 = vcmp.gt.f32.partialorder %v2841_v8, 0.0  ;;  %vm2851_vm5 = vcmp.gt.f32.partialorder %v2842_v12, 0.0  ;;  %vm2852_vm6 = vcmp.gt.f32.partialorder %v2843_v1, 0.0  ;;  %vm2853_vm7 = vcmp.gt.f32.partialorder %v2844_v37, 0.0 }
 0x27c   : > { %vm2854_vm8 = vcmp.gt.f32.partialorder %v2845_v48, 0.0  ;;  %vm2855_vm9 = vcmp.gt.f32.partialorder %v2846_v10, 0.0  ;;  %v2856_v52 = vmul.f32 0.2, %v2838_v5  ;;  %v2857_v13 = vmul.f32 0.2, %v2839_v29 }
 0x27d   : > { %v2858_v16 = vmul.f32 0.2, %v2840_v6  ;;  %v2859_v24 = vmul.f32 0.2, %v2841_v8  ;;  %v2860_v55 = vmul.f32 0.2, %v2842_v12 }
 0x27e   : > { %v2861_v19 = vmul.f32 0.2, %v2843_v1  ;;  %v2862_v49 = vmul.f32 0.2, %v2844_v37  ;;  %v2863_v60 = vmul.f32 0.2, %v2845_v48  ;;  %v2865_v61 = vsel %vm2847_vm1, %v2838_v5, %v2856_v52 }
 0x27f   : > { %v2864_v63 = vmul.f32 0.2, %v2846_v10  ;;  %v2866_v21 = vsel %vm2848_vm2, %v2839_v29, %v2857_v13  ;;  %v2867_v26 = vsel %vm2849_vm3, %v2840_v6, %v2858_v16  ;;  %v2868_v28 = vsel %vm2850_vm4, %v2841_v8, %v2859_v24  ;;  %2874 = vst [vmem:[%s170_s13] sm:$0xff] %v2865_v61 }
 0x280   : > { %v2869_v15 = vsel %vm2851_vm5, %v2842_v12, %v2860_v55  ;;  %v2870_v42 = vsel %vm2852_vm6, %v2843_v1, %v2861_v19  ;;  %v2871_v51 = vsel %vm2853_vm7, %v2844_v37, %v2862_v49  ;;  %v2872_v17 = vsel %vm2854_vm8, %v2845_v48, %v2863_v60  ;;  %2875 = vst [vmem:[%s170_s13 + $0x8] sm:$0xff] %v2866_v21 }
 0x281   : > { %2876 = vst [vmem:[%s170_s13 + $0x10] sm:$0xff] %v2867_v26  ;;  %2877 = vst [vmem:[%s170_s13 + $0x18] sm:$0xff] %v2868_v28  ;;  %v2873_v33 = vsel %vm2855_vm9, %v2846_v10, %v2864_v63 }
 0x282   : > { %2878 = vst [vmem:[%s170_s13 + $0x20] sm:$0xff] %v2869_v15  ;;  %2879 = vst [vmem:[%s170_s13 + $0x28] sm:$0xff] %v2870_v42 }
 0x283   : > { %2880 = vst [vmem:[%s170_s13 + $0x30] sm:$0xff] %v2871_v51  ;;  %2881 = vst [vmem:[%s170_s13 + $0x38] sm:$0xff] %v2872_v17 }
 0x284   : > { %2882 = vst [vmem:[%s170_s13 + $0x40] sm:$0xff] %v2873_v33 }
 0x285 PF: > { %s13_s12 = sadd.s32 1, %s4647_s12  }
 0x286   : > { %p10_p4 = scmp.ge.s32.totalorder %s13_s12, 4  }
 0x288   :  { %12 = sbr.rel (!%p10_p4) target bundleno = 1 (0x1), region = 80 }

// kernel: forward.6
= control target key start
LH: loop header
LB: loop body
LE: loop exit
PB: predicated region body
PF: predicated region fallthrough
CT: control target
= control target key end

     0   :  { %s3968_s12 = smov 0   ;;  %s4870_s0 = inlined_call_operand.vmem [shape: f32[2,2,2,26,128], index: 0, kind: input, shape index: {}]   ;;  %s4871_s1 = inlined_call_operand.vmem [shape: bf16[16,128,256], index: 1, kind: input, shape index: {}]   ;;  %s4872_s2 = inlined_call_operand.vmem [shape: f32[20,1], index: 2, kind: input, shape index: {}]   ;;  %s4873_s3 = inlined_call_operand.vmem [shape: f32[2,20,256], index: 3, kind: output, shape index: {}]  }
   0x1 LB: > { %s2878_s13 = sadd.s32 4294967295, %s3945_s12   ;;  %p2882_p0 = scmp.ge.s32.totalorder %s3945_s12, 1  ;;  %s3945_s12 = sphi %s3968_s12, %s13_s12  }
   0x2   : > { %p137_p1 = scmp.lt.s32.totalorder %s3945_s12, 3 }
   0x4   : > { %p138_p2 = pnand %p2882_p0, %p137_p1 }
   0x5   : > { %v3551_v0 = vld [vmem:[%s4871_s1 + $0x84] ss:$8 sps:$4 sm:$0xff] (!%p138_p2)   ;;  %v3947_v2 = vmov (!%p138_p2), 0   ;;  %v3555_v3 = vld [vmem:[%s4871_s1 + $0x80] ss:$8 sps:$4 sm:$0xff] (!%p138_p2)   ;;  %p161_p3 = scmp.lt.s32.totalorder (!%p138_p2), %s2878_s13, 1 }
   0x6   : > { %141 = sbr.rel (%p138_p2) target bundleno = 551 (0x227), region = 32  ;;  %v3553_v1 = vld [vmem:[%s4871_s1 + $0x404] ss:$8 sps:$4 sm:$0xff] (!%p138_p2)   ;;  %328 = vmatprep.mubr.bf16.mxu1 (!%p138_p2), %v3947_v2  ;;  %1568 = vmatprep.mubr.bf16.mxu0 (!%p138_p2), %v3947_v2  ;;  %v3556_v4 = vld [vmem:[%s4871_s1 + $0x400] ss:$8 sps:$4 sm:$0xff] (!%p138_p2)   ;;  %vm2731_vm0 = vcmask (!%p138_p2), 1043456  }
   0x7   : > { %296 = vmatprep.subr.bf16.mxu1 (!%p138_p2), %v3551_v0  ;;  %3549 = vset.pattern.permute.xlu0 (!%p138_p2), %v3947_v2  ;;  %v3557_v5 = vld [vmem:[%s4871_s1 + $0x94] ss:$8 sps:$4 sm:$0xff] (!%p138_p2)   ;;  %v3561_v7 = vld [vmem:[%s4871_s1 + $0x90] ss:$8 sps:$4 sm:$0xff] (!%p138_p2)   ;;  %v3563_v9 = vld [vmem:[%s4871_s1 + $0xa4] ss:$8 sps:$4 sm:$0xff] (!%p138_p2)  }
   0x8   : > { %1536 = vmatprep.subr.bf16.mxu0 (!%p138_p2), %v3553_v1  ;;  %3550 = vset.pattern.permute.xlu1 (!%p138_p2), %v3947_v2  ;;  %v3559_v6 = vld [vmem:[%s4871_s1 + $0x414] ss:$8 sps:$4 sm:$0xff] (!%p138_p2)   ;;  %v3562_v8 = vld [vmem:[%s4871_s1 + $0x410] ss:$8 sps:$4 sm:$0xff] (!%p138_p2)   ;;  %v3565_v10 = vld [vmem:[%s4871_s1 + $0x424] ss:$8 sps:$4 sm:$0xff] (!%p138_p2)  }
   0x9   : > { %297 = vmatpush1.bf16.msra.mxu1 (!%p138_p2), %v3555_v3  ;;  %1537 = vmatpush1.bf16.msra.mxu0 (!%p138_p2), %v3556_v4  ;;  %v3567_v11 = vld [vmem:[%s4871_s1 + $0xa0] ss:$8 sps:$4 sm:$0xff] (!%p138_p2)   ;;  %v3569_v13 = vld [vmem:[%s4871_s1 + $0xb4] ss:$8 sps:$4 sm:$0xff] (!%p138_p2)   ;;  %v3573_v15 = vld [vmem:[%s4871_s1 + $0xb0] ss:$8 sps:$4 sm:$0xff] (!%p138_p2)  }
   0xa   : > { %298 = vmatprep.subr.bf16.mxu1 (!%p138_p2), %v3557_v5  ;;  %1538 = vmatprep.subr.bf16.mxu0 (!%p138_p2), %v3559_v6  ;;  %v3568_v12 = vld [vmem:[%s4871_s1 + $0x420] ss:$8 sps:$4 sm:$0xff] (!%p138_p2)   ;;  %v3571_v14 = vld [vmem:[%s4871_s1 + $0x434] ss:$8 sps:$4 sm:$0xff] (!%p138_p2)   ;;  %v3574_v16 = vld [vmem:[%s4871_s1 + $0x430] ss:$8 sps:$4 sm:$0xff] (!%p138_p2)  }
   0xb   : > { %v3575_v17 = vld [vmem:[%s4871_s1 + $0xc4] ss:$8 sps:$4 sm:$0xff] (!%p138_p2)   ;;  %v3579_v19 = vld [vmem:[%s4871_s1 + $0xc0] ss:$8 sps:$4 sm:$0xff] (!%p138_p2)   ;;  %v3581_v21 = vld [vmem:[%s4871_s1 + $0xd4] ss:$8 sps:$4 sm:$0xff] (!%p138_p2)  }
   0xc   : > { %v3577_v18 = vld [vmem:[%s4871_s1 + $0x444] ss:$8 sps:$4 sm:$0xff] (!%p138_p2)   ;;  %v3580_v20 = vld [vmem:[%s4871_s1 + $0x440] ss:$8 sps:$4 sm:$0xff] (!%p138_p2)   ;;  %v3583_v22 = vld [vmem:[%s4871_s1 + $0x454] ss:$8 sps:$4 sm:$0xff] (!%p138_p2)  }
   0xd   : > { %299 = vmatpush1.bf16.msra.mxu1 %v3561_v7  ;;  %1539 = vmatpush1.bf16.msra.mxu0 %v3562_v8  ;;  %s4875_s13 = smov (!%p161_p3, %s2878_s13), 1  ;;  %v3585_v23 = vld [vmem:[%s4871_s1 + $0xd0] ss:$8 sps:$4 sm:$0xff]   ;;  %v3587_v25 = vld [vmem:[%s4871_s1 + $0xe4] ss:$8 sps:$4 sm:$0xff]  }
   0xe   : > { %300 = vmatprep.subr.bf16.mxu1 %v3563_v9  ;;  %1540 = vmatprep.subr.bf16.mxu0 %v3565_v10  ;;  %v3586_v24 = vld [vmem:[%s4871_s1 + $0x450] ss:$8 sps:$4 sm:$0xff]   ;;  %s3420_s14 = sshll.u32 %s4875_s13, 7  ;;  %v3589_v26 = vld [vmem:[%s4871_s1 + $0x464] ss:$8 sps:$4 sm:$0xff]  }
   0xf   : > { %s4068_s19 = scalar_lea.vmem %s4870_s0, %s3420_s14  ;;  %v3591_v27 = vld [vmem:[%s4871_s1 + $0xe0] ss:$8 sps:$4 sm:$0xff]   ;;  %v3593_v29 = vld [vmem:[%s4871_s1 + $0xf4] ss:$8 sps:$4 sm:$0xff]   ;;  %v3597_v31 = vld [vmem:[%s4871_s1 + $0xf0] ss:$8 sps:$4 sm:$0xff]  }
  0x10   : > { %v3592_v28 = vld [vmem:[%s4871_s1 + $0x460] ss:$8 sps:$4 sm:$0xff]   ;;  %v3595_v30 = vld [vmem:[%s4871_s1 + $0x474] ss:$8 sps:$4 sm:$0xff]   ;;  %v3598_v32 = vld [vmem:[%s4871_s1 + $0x470] ss:$8 sps:$4 sm:$0xff]  }
  0x11   : > { %301 = vmatpush1.bf16.msra.mxu1 %v3567_v11  ;;  %1541 = vmatpush1.bf16.msra.mxu0 %v3568_v12  ;;  %v2886_v33 = vld [vmem:[%s4068_s19 + $0x20] sm:$0xff]  ;;  %v2887_v35 = vld [vmem:[%s4068_s19 + $0x28] sm:$0xff]  ;;  %v3607_v43 = vld [vmem:[%s4871_s1 + $0x14] ss:$8 sps:$4 sm:$0xff]  }
  0x12   : > { %302 = vmatprep.subr.bf16.mxu1 %v3569_v13  ;;  %1542 = vmatprep.subr.bf16.mxu0 %v3571_v14  ;;  %v3601_v34 = vld [vmem:[%s4871_s1 + $0x4] ss:$8 sps:$4 sm:$0xff]   ;;  %v3599_v39 = vld [vmem:[%s4871_s1] ss:$8 sps:$4 sm:$0xff]   ;;  %v197_v41 = vpack.c.bf16 %v2887_v35, %v2886_v33  ;;  %v3610_v44 = vld [vmem:[%s4871_s1 + $0x494] ss:$8 sps:$4 sm:$0xff]  }
  0x13   : > { %v1434_v36 = vld [vmem:[%s4068_s19 + $0x5] sm:$0xff]  ;;  %v1435_v37 = vld [vmem:[%s4068_s19 + $0xd] sm:$0xff]  ;;  %v1436_v54 = vld [vmem:[%s4068_s19 + $0x15] sm:$0xf] }
  0x14   : > { %v3604_v38 = vld [vmem:[%s4871_s1 + $0x484] ss:$8 sps:$4 sm:$0xff]   ;;  %v3602_v40 = vld [vmem:[%s4871_s1 + $0x480] ss:$8 sps:$4 sm:$0xff]   ;;  %v1437_v42 = vpack.c.bf16 %v1435_v37, %v1434_v36  ;;  %v3605_v45 = vld [vmem:[%s4871_s1 + $0x10] ss:$8 sps:$4 sm:$0xff]   ;;  %v1438_v56 = vpack.c.bf16 %v1436_v54, %v1436_v54 }
  0x15   : > { %303 = vmatpush1.bf16.msra.mxu1 %v3573_v15  ;;  %1543 = vmatpush1.bf16.msra.mxu0 %v3574_v16  ;;  %v3608_v46 = vld [vmem:[%s4871_s1 + $0x490] ss:$8 sps:$4 sm:$0xff]   ;;  %v3613_v47 = vld [vmem:[%s4871_s1 + $0x24] ss:$8 sps:$4 sm:$0xff]   ;;  %v3611_v49 = vld [vmem:[%s4871_s1 + $0x20] ss:$8 sps:$4 sm:$0xff]  }
  0x16   : > { %304 = vmatprep.subr.bf16.mxu1 %v3575_v17  ;;  %1544 = vmatprep.subr.bf16.mxu0 %v3577_v18  ;;  %v3616_v48 = vld [vmem:[%s4871_s1 + $0x4a4] ss:$8 sps:$4 sm:$0xff]   ;;  %v3614_v50 = vld [vmem:[%s4871_s1 + $0x4a0] ss:$8 sps:$4 sm:$0xff]   ;;  %v3619_v51 = vld [vmem:[%s4871_s1 + $0x34] ss:$8 sps:$4 sm:$0xff]  }
  0x17   : > { %v3622_v52 = vld [vmem:[%s4871_s1 + $0x4b4] ss:$8 sps:$4 sm:$0xff]   ;;  %v2888_v53 = vld [vmem:[%s4068_s19 + $0x30] sm:$0xf]  ;;  %v3625_v59 = vld [vmem:[%s4871_s1 + $0x44] ss:$8 sps:$4 sm:$0xff]  }
  0x18   : > { %v198_v55 = vpack.c.bf16 %v2888_v53, %v2888_v53  ;;  %v3617_v57 = vld [vmem:[%s4871_s1 + $0x30] ss:$8 sps:$4 sm:$0xff]   ;;  %v3628_v60 = vld [vmem:[%s4871_s1 + $0x4c4] ss:$8 sps:$4 sm:$0xff]   ;;  %v3623_v61 = vld [vmem:[%s4871_s1 + $0x40] ss:$8 sps:$4 sm:$0xff]  }
  0x19   : > { %305 = vmatpush1.bf16.msra.mxu1 %v3579_v19  ;;  %1545 = vmatpush1.bf16.msra.mxu0 %v3580_v20  ;;  %v3620_v58 = vld [vmem:[%s4871_s1 + $0x4b0] ss:$8 sps:$4 sm:$0xff]   ;;  %v3626_v62 = vld [vmem:[%s4871_s1 + $0x4c0] ss:$8 sps:$4 sm:$0xff]   ;;  %v3631_v63 = vld [vmem:[%s4871_s1 + $0x54] ss:$8 sps:$4 sm:$0xff]  }
  0x1a   : > { %306 = vmatprep.subr.bf16.mxu1 %v3581_v21  ;;  %1546 = vmatprep.subr.bf16.mxu0 %v3583_v22  ;;  %v3634_v0 = vld [vmem:[%s4871_s1 + $0x4d4] ss:$8 sps:$4 sm:$0xff]   ;;  %v3629_v1 = vld [vmem:[%s4871_s1 + $0x50] ss:$8 sps:$4 sm:$0xff]   ;;  %v3637_v4 = vld [vmem:[%s4871_s1 + $0x64] ss:$8 sps:$4 sm:$0xff]  }
  0x1b   : > { %v3632_v3 = vld [vmem:[%s4871_s1 + $0x4d0] ss:$8 sps:$4 sm:$0xff]   ;;  %v3640_v5 = vld [vmem:[%s4871_s1 + $0x4e4] ss:$8 sps:$4 sm:$0xff]   ;;  %v3635_v6 = vld [vmem:[%s4871_s1 + $0x60] ss:$8 sps:$4 sm:$0xff]  }
  0x1c   : > { %v3638_v7 = vld [vmem:[%s4871_s1 + $0x4e0] ss:$8 sps:$4 sm:$0xff]   ;;  %v3643_v8 = vld [vmem:[%s4871_s1 + $0x74] ss:$8 sps:$4 sm:$0xff]   ;;  %v3641_v10 = vld [vmem:[%s4871_s1 + $0x70] ss:$8 sps:$4 sm:$0xff]  }
  0x1d   : > { %307 = vmatpush1.bf16.msra.mxu1 %v3585_v23  ;;  %1547 = vmatpush1.bf16.msra.mxu0 %v3586_v24  ;;  %v3646_v9 = vld [vmem:[%s4871_s1 + $0x4f4] ss:$8 sps:$4 sm:$0xff]   ;;  %v3644_v11 = vld [vmem:[%s4871_s1 + $0x4f0] ss:$8 sps:$4 sm:$0xff]   ;;  %v172_v12 = vld [vmem:[%s4068_s19] sm:$0xff] }
  0x1e   : > { %308 = vmatprep.subr.bf16.mxu1 %v3587_v25  ;;  %1548 = vmatprep.subr.bf16.mxu0 %v3589_v26  ;;  %v173_v13 = vld [vmem:[%s4068_s19 + $0x8] sm:$0xff]  ;;  %v3655_v22 = vld [vmem:[%s4871_s1 + $0x114] ss:$8 sps:$4 sm:$0xff]   ;;  %v3653_v24 = vld [vmem:[%s4871_s1 + $0x110] ss:$8 sps:$4 sm:$0xff]  }
  0x1f   : > { %v3176_v14 = vld [vmem:[%s4068_s19 + $0x25] sm:$0xff]  ;;  %v3177_v15 = vld [vmem:[%s4068_s19 + $0x2d] sm:$0xff]  ;;  %v175_v18 = vpack.c.bf16 %v173_v13, %v172_v12 }
  0x20   : > { %v3649_v16 = vld [vmem:[%s4871_s1 + $0x104] ss:$8 sps:$4 sm:$0xff]   ;;  %v1596_v19 = vpack.c.bf16 %v3177_v15, %v3176_v14  ;;  %v3647_v20 = vld [vmem:[%s4871_s1 + $0x100] ss:$8 sps:$4 sm:$0xff]   ;;  %v3658_v23 = vld [vmem:[%s4871_s1 + $0x514] ss:$8 sps:$4 sm:$0xff]  }
  0x21   : > { %309 = vmatpush1.bf16.msra.mxu1 %v3591_v27  ;;  %1549 = vmatpush1.bf16.msra.mxu0 %v3592_v28  ;;  %v3652_v17 = vld [vmem:[%s4871_s1 + $0x504] ss:$8 sps:$4 sm:$0xff]   ;;  %v3650_v21 = vld [vmem:[%s4871_s1 + $0x500] ss:$8 sps:$4 sm:$0xff]   ;;  %v3656_v25 = vld [vmem:[%s4871_s1 + $0x510] ss:$8 sps:$4 sm:$0xff]  }
  0x22   : > { %310 = vmatprep.subr.bf16.mxu1 %v3593_v29  ;;  %1550 = vmatprep.subr.bf16.mxu0 %v3595_v30  ;;  %v3661_v26 = vld [vmem:[%s4871_s1 + $0x124] ss:$8 sps:$4 sm:$0xff]   ;;  %v174_v27 = vld [vmem:[%s4068_s19 + $0x10] sm:$0xf]  ;;  %v3178_v28 = vld [vmem:[%s4068_s19 + $0x35] sm:$0xf] }
  0x23   : > { %v3664_v29 = vld [vmem:[%s4871_s1 + $0x524] ss:$8 sps:$4 sm:$0xff]   ;;  %v3659_v30 = vld [vmem:[%s4871_s1 + $0x120] ss:$8 sps:$4 sm:$0xff]   ;;  %v1597_v33 = vpack.c.bf16 %v3178_v28, %v3178_v28  ;;  %v3670_v35 = vld [vmem:[%s4871_s1 + $0x534] ss:$8 sps:$4 sm:$0xff]  }
  0x24   : > { %v3665_v36 = vld [vmem:[%s4871_s1 + $0x130] ss:$8 sps:$4 sm:$0xff]   ;;  %v478_v54 = vld [vmem:[%s4068_s19 + $0x1] sm:$0xff]  ;;  %v3715_v13 = vld [vmem:[%s4871_s1 + $0x1b4] ss:$8 sps:$4 sm:$0xff]  }
  0x25   : > { %311 = vmatpush1.bf16.msra.mxu1 %v3597_v31  ;;  %1551 = vmatpush1.bf16.msra.mxu0 %v3598_v32  ;;  %v3662_v31 = vld [vmem:[%s4871_s1 + $0x520] ss:$8 sps:$4 sm:$0xff]   ;;  %v176_v32 = vpack.c.bf16 %v174_v27, %v174_v27  ;;  %v3668_v37 = vld [vmem:[%s4871_s1 + $0x530] ss:$8 sps:$4 sm:$0xff]   ;;  %v3718_v14 = vld [vmem:[%s4871_s1 + $0x5b4] ss:$8 sps:$4 sm:$0xff]  }
  0x26   : > { %427 = vmatprep.subr.bf16.mxu1 %v3601_v34  ;;  %1695 = vmatprep.subr.bf16.mxu0 %v3604_v38  ;;  %v3667_v34 = vld [vmem:[%s4871_s1 + $0x134] ss:$8 sps:$4 sm:$0xff]   ;;  %v3673_v38 = vld [vmem:[%s4871_s1 + $0x144] ss:$8 sps:$4 sm:$0xff]   ;;  %v3692_v53 = vld [vmem:[%s4871_s1 + $0x570] ss:$8 sps:$4 sm:$0xff]  }
  0x27   : > { %v3710_v12 = vld [vmem:[%s4871_s1 + $0x5a0] ss:$8 sps:$4 sm:$0xff]   ;;  %v3713_v15 = vld [vmem:[%s4871_s1 + $0x1b0] ss:$8 sps:$4 sm:$0xff]  }
  0x28   : > { %329 = vmatmul.mubr.bf16.vlgmr.msra.gmra.mrb[0].mxu1 %v197_v41  ;;  %1569 = vmatmul.mubr.bf16.vlgmr.msra.gmra.mrb[0].mxu0 %v1437_v42  ;;  %v3674_v41 = vld [vmem:[%s4871_s1 + $0x540] ss:$8 sps:$4 sm:$0xff]   ;;  %v3679_v42 = vld [vmem:[%s4871_s1 + $0x154] ss:$8 sps:$4 sm:$0xff]  }
  0x29   : > { %428 = vmatpush1.bf16.msra.mxu1 %v3599_v39  ;;  %1696 = vmatpush1.bf16.msra.mxu0 %v3602_v40  ;;  %v3676_v39 = vld [vmem:[%s4871_s1 + $0x544] ss:$8 sps:$4 sm:$0xff]   ;;  %v3671_v40 = vld [vmem:[%s4871_s1 + $0x140] ss:$8 sps:$4 sm:$0xff]  }
  0x2a   : > { %429 = vmatprep.subr.bf16.mxu1 %v3607_v43  ;;  %1697 = vmatprep.subr.bf16.mxu0 %v3610_v44  ;;  %v3682_v43 = vld [vmem:[%s4871_s1 + $0x554] ss:$8 sps:$4 sm:$0xff]   ;;  %v3677_v44 = vld [vmem:[%s4871_s1 + $0x150] ss:$8 sps:$4 sm:$0xff]   ;;  %v3731_v27 = vld [vmem:[%s4871_s1 + $0x1e0] ss:$8 sps:$4 sm:$0xff]  }
  0x2b   : > { %338 = vmatprep.mubr.bf16.mxu1 %v3947_v2  ;;  %1578 = vmatprep.mubr.bf16.mxu0 %v3947_v2  ;;  %v3734_v28 = vld [vmem:[%s4871_s1 + $0x5e0] ss:$8 sps:$4 sm:$0xff]  }
  0x2d   : > { %430 = vmatpush1.bf16.msra.mxu1 %v3605_v45  ;;  %1698 = vmatpush1.bf16.msra.mxu0 %v3608_v46  ;;  %v3680_v45 = vld [vmem:[%s4871_s1 + $0x550] ss:$8 sps:$4 sm:$0xff]   ;;  %v3685_v46 = vld [vmem:[%s4871_s1 + $0x164] ss:$8 sps:$4 sm:$0xff]  }
  0x2e   : > { %431 = vmatprep.subr.bf16.mxu1 %v3613_v47  ;;  %1699 = vmatprep.subr.bf16.mxu0 %v3616_v48  ;;  %v3688_v47 = vld [vmem:[%s4871_s1 + $0x564] ss:$8 sps:$4 sm:$0xff]   ;;  %v3683_v48 = vld [vmem:[%s4871_s1 + $0x160] ss:$8 sps:$4 sm:$0xff]  }
  0x30   : > { %339 = vmatmul.mubr.bf16.gmra.mrb[4].mxu1 %v198_v55  ;;  %1579 = vmatmul.mubr.bf16.gmra.mrb[4].mxu0 %v1438_v56  ;;  %v479_v55 = vld [vmem:[%s4068_s19 + $0x9] sm:$0xff] }
  0x31   : > { %432 = vmatpush1.bf16.msra.mxu1 %v3611_v49  ;;  %1700 = vmatpush1.bf16.msra.mxu0 %v3614_v50  ;;  %v3686_v49 = vld [vmem:[%s4871_s1 + $0x560] ss:$8 sps:$4 sm:$0xff]   ;;  %v3691_v50 = vld [vmem:[%s4871_s1 + $0x174] ss:$8 sps:$4 sm:$0xff]  }
  0x32   : > { %433 = vmatprep.subr.bf16.mxu1 %v3619_v51  ;;  %1701 = vmatprep.subr.bf16.mxu0 %v3622_v52  ;;  %v3694_v51 = vld [vmem:[%s4871_s1 + $0x574] ss:$8 sps:$4 sm:$0xff]   ;;  %v3689_v52 = vld [vmem:[%s4871_s1 + $0x170] ss:$8 sps:$4 sm:$0xff]   ;;  %v1752_v56 = vld [vmem:[%s4068_s19 + $0x6] sm:$0xff] }
  0x33   : > { %459 = vmatprep.mubr.bf16.mxu1 %v3947_v2  ;;  %1727 = vmatprep.mubr.bf16.mxu0 %v3947_v2 }
  0x35   : > { %434 = vmatpush1.bf16.msra.mxu1 %v3617_v57  ;;  %1702 = vmatpush1.bf16.msra.mxu0 %v3620_v58  ;;  %v1753_v57 = vld [vmem:[%s4068_s19 + $0xe] sm:$0xff] }
  0x36   : > { %435 = vmatprep.subr.bf16.mxu1 %v3625_v59  ;;  %1703 = vmatprep.subr.bf16.mxu0 %v3628_v60  ;;  %v3697_v58 = vld [vmem:[%s4871_s1 + $0x184] ss:$8 sps:$4 sm:$0xff]   ;;  %v481_v60 = vpack.c.bf16 %v479_v55, %v478_v54  ;;  %v3758_v54 = vld [vmem:[%s4871_s1 + $0x620] ss:$8 sps:$4 sm:$0xff]   ;;  %v3763_v55 = vld [vmem:[%s4871_s1 + $0x234] ss:$8 sps:$4 sm:$0xff]  }
  0x37   : > { %v3700_v59 = vld [vmem:[%s4871_s1 + $0x584] ss:$8 sps:$4 sm:$0xff]  }
  0x39   : > { %436 = vmatpush1.bf16.msra.mxu1 %v3623_v61  ;;  %1704 = vmatpush1.bf16.msra.mxu0 %v3626_v62  ;;  %v1755_v61 = vpack.c.bf16 %v1753_v57, %v1752_v56  ;;  %v3695_v62 = vld [vmem:[%s4871_s1 + $0x180] ss:$8 sps:$4 sm:$0xff]   ;;  %v3766_v56 = vld [vmem:[%s4871_s1 + $0x634] ss:$8 sps:$4 sm:$0xff]   ;;  %v3761_v57 = vld [vmem:[%s4871_s1 + $0x230] ss:$8 sps:$4 sm:$0xff]  }
  0x3a   : > { %437 = vmatprep.subr.bf16.mxu1 %v3631_v63  ;;  %1705 = vmatprep.subr.bf16.mxu0 %v3634_v0  ;;  %v3698_v63 = vld [vmem:[%s4871_s1 + $0x580] ss:$8 sps:$4 sm:$0xff]   ;;  %v3703_v0 = vld [vmem:[%s4871_s1 + $0x194] ss:$8 sps:$4 sm:$0xff]  }
  0x3d   : > { %438 = vmatpush1.bf16.msra.mxu1 %v3629_v1  ;;  %1706 = vmatpush1.bf16.msra.mxu0 %v3632_v3  ;;  %v3706_v1 = vld [vmem:[%s4871_s1 + $0x594] ss:$8 sps:$4 sm:$0xff]   ;;  %v3701_v3 = vld [vmem:[%s4871_s1 + $0x190] ss:$8 sps:$4 sm:$0xff]  }
  0x3e   : > { %439 = vmatprep.subr.bf16.mxu1 %v3637_v4  ;;  %1707 = vmatprep.subr.bf16.mxu0 %v3640_v5  ;;  %v3704_v4 = vld [vmem:[%s4871_s1 + $0x590] ss:$8 sps:$4 sm:$0xff]  }
  0x3f   : > { %v480_v5 = vld [vmem:[%s4068_s19 + $0x11] sm:$0xf] }
  0x41   : > { %440 = vmatpush1.bf16.msra.mxu1 %v3635_v6  ;;  %1708 = vmatpush1.bf16.msra.mxu0 %v3638_v7  ;;  %v1754_v6 = vld [vmem:[%s4068_s19 + $0x16] sm:$0xf]  ;;  %v3709_v7 = vld [vmem:[%s4871_s1 + $0x1a4] ss:$8 sps:$4 sm:$0xff]  }
  0x42   : > { %441 = vmatprep.subr.bf16.mxu1 %v3643_v8  ;;  %1709 = vmatprep.subr.bf16.mxu0 %v3646_v9  ;;  %v3712_v8 = vld [vmem:[%s4871_s1 + $0x5a4] ss:$8 sps:$4 sm:$0xff]   ;;  %v482_v9 = vpack.c.bf16 %v480_v5, %v480_v5 }
  0x43   : > { %v3784_v5 = vld [vmem:[%s4871_s1 + $0x664] ss:$8 sps:$4 sm:$0xff]  }
  0x45   : > { %442 = vmatpush1.bf16.msra.mxu1 %v3641_v10  ;;  %1710 = vmatpush1.bf16.msra.mxu0 %v3644_v11  ;;  %v1756_v10 = vpack.c.bf16 %v1754_v6, %v1754_v6  ;;  %v3707_v11 = vld [vmem:[%s4871_s1 + $0x1a0] ss:$8 sps:$4 sm:$0xff]  }
  0x46   : > { %580 = vmatprep.subr.bf16.mxu1 %v3649_v16  ;;  %1854 = vmatprep.subr.bf16.mxu0 %v3652_v17  ;;  %v3716_v16 = vld [vmem:[%s4871_s1 + $0x5b0] ss:$8 sps:$4 sm:$0xff]   ;;  %v3721_v17 = vld [vmem:[%s4871_s1 + $0x1c4] ss:$8 sps:$4 sm:$0xff]   ;;  %v3779_v6 = vld [vmem:[%s4871_s1 + $0x260] ss:$8 sps:$4 sm:$0xff]  }
  0x48   : > { %460 = vmatmul.mubr.bf16.vlgmr.msra.gmra.mrb[0].mxu1 %v175_v18  ;;  %1728 = vmatmul.mubr.bf16.vlgmr.msra.gmra.mrb[0].mxu0 %v1596_v19  ;;  %v3724_v18 = vld [vmem:[%s4871_s1 + $0x5c4] ss:$8 sps:$4 sm:$0xff]   ;;  %v3719_v19 = vld [vmem:[%s4871_s1 + $0x1c0] ss:$8 sps:$4 sm:$0xff]  }
  0x49   : > { %581 = vmatpush1.bf16.msra.mxu1 %v3647_v20  ;;  %1855 = vmatpush1.bf16.msra.mxu0 %v3650_v21  ;;  %v3722_v20 = vld [vmem:[%s4871_s1 + $0x5c0] ss:$8 sps:$4 sm:$0xff]   ;;  %v3727_v21 = vld [vmem:[%s4871_s1 + $0x1d4] ss:$8 sps:$4 sm:$0xff]  }
  0x4a   : > { %582 = vmatprep.subr.bf16.mxu1 %v3655_v22  ;;  %1856 = vmatprep.subr.bf16.mxu0 %v3658_v23  ;;  %v3730_v22 = vld [vmem:[%s4871_s1 + $0x5d4] ss:$8 sps:$4 sm:$0xff]   ;;  %v3725_v23 = vld [vmem:[%s4871_s1 + $0x1d0] ss:$8 sps:$4 sm:$0xff]  }
  0x4b   : > { %469 = vmatprep.mubr.bf16.mxu1 %v3947_v2  ;;  %1737 = vmatprep.mubr.bf16.mxu0 %v3947_v2 }
  0x4d   : > { %583 = vmatpush1.bf16.msra.mxu1 %v3653_v24  ;;  %1857 = vmatpush1.bf16.msra.mxu0 %v3656_v25  ;;  %v3728_v24 = vld [vmem:[%s4871_s1 + $0x5d0] ss:$8 sps:$4 sm:$0xff]   ;;  %v3733_v25 = vld [vmem:[%s4871_s1 + $0x1e4] ss:$8 sps:$4 sm:$0xff]  }
  0x4e   : > { %584 = vmatprep.subr.bf16.mxu1 %v3661_v26  ;;  %1858 = vmatprep.subr.bf16.mxu0 %v3664_v29  ;;  %v3736_v26 = vld [vmem:[%s4871_s1 + $0x5e4] ss:$8 sps:$4 sm:$0xff]   ;;  %v3739_v29 = vld [vmem:[%s4871_s1 + $0x1f4] ss:$8 sps:$4 sm:$0xff]  }
  0x50   : > { %470 = vmatmul.mubr.bf16.gmra.mrb[4].mxu1 %v176_v32  ;;  %1738 = vmatmul.mubr.bf16.gmra.mrb[4].mxu0 %v1597_v33  ;;  %v3740_v32 = vld [vmem:[%s4871_s1 + $0x5f0] ss:$8 sps:$4 sm:$0xff]   ;;  %v2969_v33 = vld [vmem:[%s4068_s19 + $0x21] sm:$0xff] }
  0x51   : > { %585 = vmatpush1.bf16.msra.mxu1 %v3659_v30  ;;  %1859 = vmatpush1.bf16.msra.mxu0 %v3662_v31  ;;  %v3742_v30 = vld [vmem:[%s4871_s1 + $0x5f4] ss:$8 sps:$4 sm:$0xff]   ;;  %v3737_v31 = vld [vmem:[%s4871_s1 + $0x1f0] ss:$8 sps:$4 sm:$0xff]  }
  0x52   : > { %586 = vmatprep.subr.bf16.mxu1 %v3667_v34  ;;  %1860 = vmatprep.subr.bf16.mxu0 %v3670_v35  ;;  %v3745_v34 = vld [vmem:[%s4871_s1 + $0x204] ss:$8 sps:$4 sm:$0xff]  }
  0x53   : > { %612 = vmatprep.mubr.bf16.mxu1 %v3947_v2  ;;  %1886 = vmatprep.mubr.bf16.mxu0 %v3947_v2  ;;  %v2970_v35 = vld [vmem:[%s4068_s19 + $0x29] sm:$0xff] }
  0x55   : > { %587 = vmatpush1.bf16.msra.mxu1 %v3665_v36  ;;  %1861 = vmatpush1.bf16.msra.mxu0 %v3668_v37  ;;  %v3243_v36 = vld [vmem:[%s4068_s19 + $0x26] sm:$0xff]  ;;  %v3244_v37 = vld [vmem:[%s4068_s19 + $0x2e] sm:$0xff] }
  0x56   : > { %588 = vmatprep.subr.bf16.mxu1 %v3673_v38  ;;  %1862 = vmatprep.subr.bf16.mxu0 %v3676_v39  ;;  %v3748_v38 = vld [vmem:[%s4871_s1 + $0x604] ss:$8 sps:$4 sm:$0xff]   ;;  %v3743_v39 = vld [vmem:[%s4871_s1 + $0x200] ss:$8 sps:$4 sm:$0xff]  }
  0x59   : > { %589 = vmatpush1.bf16.msra.mxu1 %v3671_v40  ;;  %1863 = vmatpush1.bf16.msra.mxu0 %v3674_v41  ;;  %v3746_v40 = vld [vmem:[%s4871_s1 + $0x600] ss:$8 sps:$4 sm:$0xff]   ;;  %v640_v41 = vpack.c.bf16 %v2970_v35, %v2969_v33  ;;  %v3814_v35 = vld [vmem:[%s4871_s1 + $0x6b4] ss:$8 sps:$4 sm:$0xff]  }
  0x5a   : > { %590 = vmatprep.subr.bf16.mxu1 %v3679_v42  ;;  %1864 = vmatprep.subr.bf16.mxu0 %v3682_v43  ;;  %v1914_v42 = vpack.c.bf16 %v3244_v37, %v3243_v36  ;;  %v3751_v43 = vld [vmem:[%s4871_s1 + $0x214] ss:$8 sps:$4 sm:$0xff]   ;;  %v3809_v36 = vld [vmem:[%s4871_s1 + $0x2b0] ss:$8 sps:$4 sm:$0xff]  }
  0x5b   : > { %v3812_v37 = vld [vmem:[%s4871_s1 + $0x6b0] ss:$8 sps:$4 sm:$0xff]  }
  0x5d   : > { %591 = vmatpush1.bf16.msra.mxu1 %v3677_v44  ;;  %1865 = vmatpush1.bf16.msra.mxu0 %v3680_v45  ;;  %v3754_v44 = vld [vmem:[%s4871_s1 + $0x614] ss:$8 sps:$4 sm:$0xff]   ;;  %v3749_v45 = vld [vmem:[%s4871_s1 + $0x210] ss:$8 sps:$4 sm:$0xff]  }
  0x5e   : > { %592 = vmatprep.subr.bf16.mxu1 %v3685_v46  ;;  %1866 = vmatprep.subr.bf16.mxu0 %v3688_v47  ;;  %v3752_v46 = vld [vmem:[%s4871_s1 + $0x610] ss:$8 sps:$4 sm:$0xff]   ;;  %v3757_v47 = vld [vmem:[%s4871_s1 + $0x224] ss:$8 sps:$4 sm:$0xff]  }
  0x61   : > { %593 = vmatpush1.bf16.msra.mxu1 %v3683_v48  ;;  %1867 = vmatpush1.bf16.msra.mxu0 %v3686_v49  ;;  %v2971_v48 = vld [vmem:[%s4068_s19 + $0x31] sm:$0xf]  ;;  %v3245_v49 = vld [vmem:[%s4068_s19 + $0x36] sm:$0xf] }
  0x62   : > { %594 = vmatprep.subr.bf16.mxu1 %v3691_v50  ;;  %1868 = vmatprep.subr.bf16.mxu0 %v3694_v51  ;;  %v3760_v50 = vld [vmem:[%s4871_s1 + $0x624] ss:$8 sps:$4 sm:$0xff]   ;;  %v641_v51 = vpack.c.bf16 %v2971_v48, %v2971_v48  ;;  %v3827_v48 = vld [vmem:[%s4871_s1 + $0x2e0] ss:$8 sps:$4 sm:$0xff]  }
  0x65   : > { %595 = vmatpush1.bf16.msra.mxu1 %v3689_v52  ;;  %1869 = vmatpush1.bf16.msra.mxu0 %v3692_v53  ;;  %v1915_v52 = vpack.c.bf16 %v3245_v49, %v3245_v49  ;;  %v3755_v53 = vld [vmem:[%s4871_s1 + $0x220] ss:$8 sps:$4 sm:$0xff]  }
  0x66   : > { %739 = vmatprep.subr.bf16.mxu1 %v3697_v58  ;;  %2013 = vmatprep.subr.bf16.mxu0 %v3700_v59  ;;  %v3764_v58 = vld [vmem:[%s4871_s1 + $0x630] ss:$8 sps:$4 sm:$0xff]   ;;  %v3769_v59 = vld [vmem:[%s4871_s1 + $0x244] ss:$8 sps:$4 sm:$0xff]   ;;  %v3830_v49 = vld [vmem:[%s4871_s1 + $0x6e0] ss:$8 sps:$4 sm:$0xff]  }
  0x68   : > { %613 = vmatmul.mubr.bf16.vlgmr.msra.gmra.mrb[0].mxu1 %v481_v60  ;;  %1887 = vmatmul.mubr.bf16.vlgmr.msra.gmra.mrb[0].mxu0 %v1755_v61  ;;  %v3772_v60 = vld [vmem:[%s4871_s1 + $0x644] ss:$8 sps:$4 sm:$0xff]   ;;  %v3767_v61 = vld [vmem:[%s4871_s1 + $0x240] ss:$8 sps:$4 sm:$0xff]  }
  0x69   : > { %740 = vmatpush1.bf16.msra.mxu1 %v3695_v62  ;;  %2014 = vmatpush1.bf16.msra.mxu0 %v3698_v63  ;;  %v3770_v62 = vld [vmem:[%s4871_s1 + $0x640] ss:$8 sps:$4 sm:$0xff]   ;;  %v3775_v63 = vld [vmem:[%s4871_s1 + $0x254] ss:$8 sps:$4 sm:$0xff]  }
  0x6a   : > { %741 = vmatprep.subr.bf16.mxu1 %v3703_v0  ;;  %2015 = vmatprep.subr.bf16.mxu0 %v3706_v1  ;;  %v3778_v0 = vld [vmem:[%s4871_s1 + $0x654] ss:$8 sps:$4 sm:$0xff]   ;;  %v3773_v1 = vld [vmem:[%s4871_s1 + $0x250] ss:$8 sps:$4 sm:$0xff]  }
  0x6b   : > { %622 = vmatprep.mubr.bf16.mxu1 %v3947_v2  ;;  %1896 = vmatprep.mubr.bf16.mxu0 %v3947_v2 }
  0x6d   : > { %742 = vmatpush1.bf16.msra.mxu1 %v3701_v3  ;;  %2016 = vmatpush1.bf16.msra.mxu0 %v3704_v4  ;;  %v3776_v3 = vld [vmem:[%s4871_s1 + $0x650] ss:$8 sps:$4 sm:$0xff]   ;;  %v3781_v4 = vld [vmem:[%s4871_s1 + $0x264] ss:$8 sps:$4 sm:$0xff]  }
  0x6e   : > { %743 = vmatprep.subr.bf16.mxu1 %v3709_v7  ;;  %2017 = vmatprep.subr.bf16.mxu0 %v3712_v8  ;;  %v3782_v7 = vld [vmem:[%s4871_s1 + $0x660] ss:$8 sps:$4 sm:$0xff]   ;;  %v3787_v8 = vld [vmem:[%s4871_s1 + $0x274] ss:$8 sps:$4 sm:$0xff]  }
  0x70   : > { %623 = vmatmul.mubr.bf16.gmra.mrb[4].mxu1 %v482_v9  ;;  %1897 = vmatmul.mubr.bf16.gmra.mrb[4].mxu0 %v1756_v10  ;;  %v3790_v9 = vld [vmem:[%s4871_s1 + $0x674] ss:$8 sps:$4 sm:$0xff]   ;;  %v3785_v10 = vld [vmem:[%s4871_s1 + $0x270] ss:$8 sps:$4 sm:$0xff]  }
  0x71   : > { %744 = vmatpush1.bf16.msra.mxu1 %v3707_v11  ;;  %2018 = vmatpush1.bf16.msra.mxu0 %v3710_v12  ;;  %v3788_v11 = vld [vmem:[%s4871_s1 + $0x670] ss:$8 sps:$4 sm:$0xff]   ;;  %v3004_v12 = vld [vmem:[%s4068_s19 + $0x40] sm:$0xff] }
  0x72   : > { %745 = vmatprep.subr.bf16.mxu1 %v3715_v13  ;;  %2019 = vmatprep.subr.bf16.mxu0 %v3718_v14  ;;  %v3005_v13 = vld [vmem:[%s4068_s19 + $0x48] sm:$0xff] }
  0x73   : > { %771 = vmatprep.mubr.bf16.mxu1 %v3947_v2  ;;  %2045 = vmatprep.mubr.bf16.mxu0 %v3947_v2  ;;  %v3278_v14 = vld [vmem:[%s4068_s19 + $0x45] sm:$0xff] }
  0x75   : > { %746 = vmatpush1.bf16.msra.mxu1 %v3713_v15  ;;  %2020 = vmatpush1.bf16.msra.mxu0 %v3716_v16  ;;  %v3279_v15 = vld [vmem:[%s4068_s19 + $0x4d] sm:$0xff] }
  0x76   : > { %747 = vmatprep.subr.bf16.mxu1 %v3721_v17  ;;  %2021 = vmatprep.subr.bf16.mxu0 %v3724_v18  ;;  %v3793_v16 = vld [vmem:[%s4871_s1 + $0x284] ss:$8 sps:$4 sm:$0xff]   ;;  %v3791_v18 = vld [vmem:[%s4871_s1 + $0x280] ss:$8 sps:$4 sm:$0xff]  }
  0x77   : > { %v3796_v17 = vld [vmem:[%s4871_s1 + $0x684] ss:$8 sps:$4 sm:$0xff]  }
  0x79   : > { %748 = vmatpush1.bf16.msra.mxu1 %v3719_v19  ;;  %2022 = vmatpush1.bf16.msra.mxu0 %v3722_v20  ;;  %v3794_v19 = vld [vmem:[%s4871_s1 + $0x680] ss:$8 sps:$4 sm:$0xff]   ;;  %v800_v20 = vpack.c.bf16 %v3005_v13, %v3004_v12 }
  0x7a   : > { %749 = vmatprep.subr.bf16.mxu1 %v3727_v21  ;;  %2023 = vmatprep.subr.bf16.mxu0 %v3730_v22  ;;  %v2073_v21 = vpack.c.bf16 %v3279_v15, %v3278_v14  ;;  %v3799_v22 = vld [vmem:[%s4871_s1 + $0x294] ss:$8 sps:$4 sm:$0xff]   ;;  %v3851_v14 = vld [vmem:[%s4871_s1 + $0x320] ss:$8 sps:$4 sm:$0xff]  }
  0x7b   : > { %v3854_v15 = vld [vmem:[%s4871_s1 + $0x720] ss:$8 sps:$4 sm:$0xff]  }
  0x7d   : > { %750 = vmatpush1.bf16.msra.mxu1 %v3725_v23  ;;  %2024 = vmatpush1.bf16.msra.mxu0 %v3728_v24  ;;  %v3802_v23 = vld [vmem:[%s4871_s1 + $0x694] ss:$8 sps:$4 sm:$0xff]   ;;  %v3797_v24 = vld [vmem:[%s4871_s1 + $0x290] ss:$8 sps:$4 sm:$0xff]  }
  0x7e   : > { %751 = vmatprep.subr.bf16.mxu1 %v3733_v25  ;;  %2025 = vmatprep.subr.bf16.mxu0 %v3736_v26  ;;  %v3800_v25 = vld [vmem:[%s4871_s1 + $0x690] ss:$8 sps:$4 sm:$0xff]   ;;  %v3805_v26 = vld [vmem:[%s4871_s1 + $0x2a4] ss:$8 sps:$4 sm:$0xff]  }
  0x81   : > { %752 = vmatpush1.bf16.msra.mxu1 %v3731_v27  ;;  %2026 = vmatpush1.bf16.msra.mxu0 %v3734_v28  ;;  %v3006_v27 = vld [vmem:[%s4068_s19 + $0x50] sm:$0xf]  ;;  %v3280_v28 = vld [vmem:[%s4068_s19 + $0x55] sm:$0xf] }
  0x82   : > { %753 = vmatprep.subr.bf16.mxu1 %v3739_v29  ;;  %2027 = vmatprep.subr.bf16.mxu0 %v3742_v30  ;;  %v3808_v29 = vld [vmem:[%s4871_s1 + $0x6a4] ss:$8 sps:$4 sm:$0xff]   ;;  %v3803_v30 = vld [vmem:[%s4871_s1 + $0x2a0] ss:$8 sps:$4 sm:$0xff]   ;;  %v2074_v33 = vpack.c.bf16 %v3280_v28, %v3280_v28 }
  0x83   : > { %v3877_v28 = vld [vmem:[%s4871_s1 + $0x364] ss:$8 sps:$4 sm:$0xff]  }
  0x85   : > { %754 = vmatpush1.bf16.msra.mxu1 %v3737_v31  ;;  %2028 = vmatpush1.bf16.msra.mxu0 %v3740_v32  ;;  %v3806_v31 = vld [vmem:[%s4871_s1 + $0x6a0] ss:$8 sps:$4 sm:$0xff]   ;;  %v801_v32 = vpack.c.bf16 %v3006_v27, %v3006_v27  ;;  %v3872_v27 = vld [vmem:[%s4871_s1 + $0x750] ss:$8 sps:$4 sm:$0xff]  }
  0x86   : > { %899 = vmatprep.subr.bf16.mxu1 %v3745_v34  ;;  %2172 = vmatprep.subr.bf16.mxu0 %v3748_v38  ;;  %v3811_v34 = vld [vmem:[%s4871_s1 + $0x2b4] ss:$8 sps:$4 sm:$0xff]   ;;  %v3817_v38 = vld [vmem:[%s4871_s1 + $0x2c4] ss:$8 sps:$4 sm:$0xff]  }
  0x88   : > { %772 = vmatmul.mubr.bf16.vlgmr.msra.gmra.mrb[0].mxu1 %v640_v41  ;;  %2046 = vmatmul.mubr.bf16.vlgmr.msra.gmra.mrb[0].mxu0 %v1914_v42  ;;  %v3818_v41 = vld [vmem:[%s4871_s1 + $0x6c0] ss:$8 sps:$4 sm:$0xff]   ;;  %v3823_v42 = vld [vmem:[%s4871_s1 + $0x2d4] ss:$8 sps:$4 sm:$0xff]  }
  0x89   : > { %900 = vmatpush1.bf16.msra.mxu1 %v3743_v39  ;;  %2173 = vmatpush1.bf16.msra.mxu0 %v3746_v40  ;;  %v3820_v39 = vld [vmem:[%s4871_s1 + $0x6c4] ss:$8 sps:$4 sm:$0xff]   ;;  %v3815_v40 = vld [vmem:[%s4871_s1 + $0x2c0] ss:$8 sps:$4 sm:$0xff]  }
  0x8a   : > { %901 = vmatprep.subr.bf16.mxu1 %v3751_v43  ;;  %2174 = vmatprep.subr.bf16.mxu0 %v3754_v44  ;;  %v3826_v43 = vld [vmem:[%s4871_s1 + $0x6d4] ss:$8 sps:$4 sm:$0xff]   ;;  %v3821_v44 = vld [vmem:[%s4871_s1 + $0x2d0] ss:$8 sps:$4 sm:$0xff]  }
  0x8b   : > { %781 = vmatprep.mubr.bf16.mxu1 %v3947_v2  ;;  %2055 = vmatprep.mubr.bf16.mxu0 %v3947_v2 }
  0x8d   : > { %902 = vmatpush1.bf16.msra.mxu1 %v3749_v45  ;;  %2175 = vmatpush1.bf16.msra.mxu0 %v3752_v46  ;;  %v3824_v45 = vld [vmem:[%s4871_s1 + $0x6d0] ss:$8 sps:$4 sm:$0xff]   ;;  %v3829_v46 = vld [vmem:[%s4871_s1 + $0x2e4] ss:$8 sps:$4 sm:$0xff]  }
  0x8e   : > { %903 = vmatprep.subr.bf16.mxu1 %v3757_v47  ;;  %2176 = vmatprep.subr.bf16.mxu0 %v3760_v50  ;;  %v3832_v47 = vld [vmem:[%s4871_s1 + $0x6e4] ss:$8 sps:$4 sm:$0xff]   ;;  %v3835_v50 = vld [vmem:[%s4871_s1 + $0x2f4] ss:$8 sps:$4 sm:$0xff]  }
  0x90   : > { %782 = vmatmul.mubr.bf16.gmra.mrb[4].mxu1 %v641_v51  ;;  %2056 = vmatmul.mubr.bf16.gmra.mrb[4].mxu0 %v1915_v52  ;;  %v3838_v51 = vld [vmem:[%s4871_s1 + $0x6f4] ss:$8 sps:$4 sm:$0xff]   ;;  %v3833_v52 = vld [vmem:[%s4871_s1 + $0x2f0] ss:$8 sps:$4 sm:$0xff]  }
  0x91   : > { %904 = vmatpush1.bf16.msra.mxu1 %v3755_v53  ;;  %2177 = vmatpush1.bf16.msra.mxu0 %v3758_v54  ;;  %v3836_v53 = vld [vmem:[%s4871_s1 + $0x6f0] ss:$8 sps:$4 sm:$0xff]   ;;  %v2706_v54 = vld [vmem:[%s4872_s2] sm:$0xff] }
  0x92   : > { %905 = vmatprep.subr.bf16.mxu1 %v3763_v55  ;;  %2178 = vmatprep.subr.bf16.mxu0 %v3766_v56  ;;  %v3039_v55 = vld [vmem:[%s4068_s19 + $0x60] sm:$0xff]  ;;  %v3040_v56 = vld [vmem:[%s4068_s19 + $0x68] sm:$0xff] }
  0x93   : > { %931 = vmatprep.mubr.bf16.mxu1 %v3947_v2  ;;  %2204 = vmatprep.mubr.bf16.mxu0 %v3947_v2 }
  0x94   : > { %2711 = vperm.xlu0 %3549, %v2706_v54  }
  0x95   : > { %906 = vmatpush1.bf16.msra.mxu1 %v3761_v57  ;;  %2179 = vmatpush1.bf16.msra.mxu0 %v3764_v58  ;;  %v2708_v57 = vld [vmem:[%s4872_s2 + $0x10] sm:$0xf]  ;;  %v3313_v58 = vld [vmem:[%s4068_s19 + $0x65] sm:$0xff] }
  0x96   : > { %907 = vmatprep.subr.bf16.mxu1 %v3769_v59  ;;  %2180 = vmatprep.subr.bf16.mxu0 %v3772_v60  ;;  %v3314_v59 = vld [vmem:[%s4068_s19 + $0x6d] sm:$0xff] }
  0x97   : > { %v2707_v60 = vld [vmem:[%s4872_s2 + $0x8] sm:$0xff]  ;;  %2721 = vperm.xlu1 %3550, %v2708_v57  }
  0x98   : > { %2716 = vperm.xlu0 %3549, %v2707_v60   ;;  %v3902_v57 = vld [vmem:[%s4871_s1 + $0x7a0] ss:$8 sps:$4 sm:$0xff]   ;;  %v3905_v60 = vld [vmem:[%s4871_s1 + $0x3b0] ss:$8 sps:$4 sm:$0xff]  }
  0x99   : > { %908 = vmatpush1.bf16.msra.mxu1 %v3767_v61  ;;  %2181 = vmatpush1.bf16.msra.mxu0 %v3770_v62  ;;  %v3841_v61 = vld [vmem:[%s4871_s1 + $0x304] ss:$8 sps:$4 sm:$0xff]  }
  0x9a   : > { %909 = vmatprep.subr.bf16.mxu1 %v3775_v63  ;;  %2182 = vmatprep.subr.bf16.mxu0 %v3778_v0  ;;  %v3844_v62 = vld [vmem:[%s4871_s1 + $0x704] ss:$8 sps:$4 sm:$0xff]   ;;  %v960_v63 = vpack.c.bf16 %v3040_v56, %v3039_v55  ;;  %v2232_v0 = vpack.c.bf16 %v3314_v59, %v3313_v58  ;;  %v3899_v56 = vld [vmem:[%s4871_s1 + $0x3a0] ss:$8 sps:$4 sm:$0xff]   ;;  %v3907_v58 = vld [vmem:[%s4871_s1 + $0x3b4] ss:$8 sps:$4 sm:$0xff]  }
  0x9b   : > { %v3910_v59 = vld [vmem:[%s4871_s1 + $0x7b4] ss:$8 sps:$4 sm:$0xff]  }
  0x9d   : > { %910 = vmatpush1.bf16.msra.mxu1 %v3773_v1  ;;  %2183 = vmatpush1.bf16.msra.mxu0 %v3776_v3  ;;  %v3839_v1 = vld [vmem:[%s4871_s1 + $0x300] ss:$8 sps:$4 sm:$0xff]  }
  0x9e   : > { %911 = vmatprep.subr.bf16.mxu1 %v3781_v4  ;;  %2184 = vmatprep.subr.bf16.mxu0 %v3784_v5  ;;  %v3842_v3 = vld [vmem:[%s4871_s1 + $0x700] ss:$8 sps:$4 sm:$0xff]   ;;  %v3847_v4 = vld [vmem:[%s4871_s1 + $0x314] ss:$8 sps:$4 sm:$0xff]  }
  0x9f   : > { %v3850_v5 = vld [vmem:[%s4871_s1 + $0x714] ss:$8 sps:$4 sm:$0xff]  }
  0xa1   : > { %912 = vmatpush1.bf16.msra.mxu1 %v3779_v6  ;;  %2185 = vmatpush1.bf16.msra.mxu0 %v3782_v7  ;;  %v3845_v6 = vld [vmem:[%s4871_s1 + $0x310] ss:$8 sps:$4 sm:$0xff]  }
  0xa2   : > { %913 = vmatprep.subr.bf16.mxu1 %v3787_v8  ;;  %2186 = vmatprep.subr.bf16.mxu0 %v3790_v9  ;;  %v3848_v7 = vld [vmem:[%s4871_s1 + $0x710] ss:$8 sps:$4 sm:$0xff]  }
  0xa3   : > { %v3041_v8 = vld [vmem:[%s4068_s19 + $0x70] sm:$0xf]  ;;  %v3315_v9 = vld [vmem:[%s4068_s19 + $0x75] sm:$0xf] }
  0xa4   : > { %v961_v12 = vpack.c.bf16 %v3041_v8, %v3041_v8  ;;  %v2233_v13 = vpack.c.bf16 %v3315_v9, %v3315_v9  ;;  %v3928_v8 = vld [vmem:[%s4871_s1 + $0x7e4] ss:$8 sps:$4 sm:$0xff]   ;;  %v3923_v9 = vld [vmem:[%s4871_s1 + $0x3e0] ss:$8 sps:$4 sm:$0xff]  }
  0xa5   : > { %914 = vmatpush1.bf16.msra.mxu1 %v3785_v10  ;;  %2187 = vmatpush1.bf16.msra.mxu0 %v3788_v11  ;;  %v3853_v10 = vld [vmem:[%s4871_s1 + $0x324] ss:$8 sps:$4 sm:$0xff]  }
  0xa6   : > { %1059 = vmatprep.subr.bf16.mxu1 %v3793_v16  ;;  %2331 = vmatprep.subr.bf16.mxu0 %v3796_v17  ;;  %v3856_v11 = vld [vmem:[%s4871_s1 + $0x724] ss:$8 sps:$4 sm:$0xff]   ;;  %v3859_v16 = vld [vmem:[%s4871_s1 + $0x334] ss:$8 sps:$4 sm:$0xff]  }
  0xa7   : > { %v3862_v17 = vld [vmem:[%s4871_s1 + $0x734] ss:$8 sps:$4 sm:$0xff]  }
  0xa8   : > { %932 = vmatmul.mubr.bf16.vlgmr.msra.gmra.mrb[0].mxu1 %v800_v20  ;;  %2205 = vmatmul.mubr.bf16.vlgmr.msra.gmra.mrb[0].mxu0 %v2073_v21  ;;  %v3865_v20 = vld [vmem:[%s4871_s1 + $0x344] ss:$8 sps:$4 sm:$0xff]  }
  0xa9   : > { %1060 = vmatpush1.bf16.msra.mxu1 %v3791_v18  ;;  %2332 = vmatpush1.bf16.msra.mxu0 %v3794_v19  ;;  %v3857_v18 = vld [vmem:[%s4871_s1 + $0x330] ss:$8 sps:$4 sm:$0xff]   ;;  %v3868_v21 = vld [vmem:[%s4871_s1 + $0x744] ss:$8 sps:$4 sm:$0xff]  }
  0xaa   : > { %1061 = vmatprep.subr.bf16.mxu1 %v3799_v22  ;;  %2333 = vmatprep.subr.bf16.mxu0 %v3802_v23  ;;  %v3860_v19 = vld [vmem:[%s4871_s1 + $0x730] ss:$8 sps:$4 sm:$0xff]   ;;  %v3863_v22 = vld [vmem:[%s4871_s1 + $0x340] ss:$8 sps:$4 sm:$0xff]  }
  0xab   : > { %941 = vmatprep.mubr.bf16.mxu1 %v3947_v2  ;;  %2214 = vmatprep.mubr.bf16.mxu0 %v3947_v2  ;;  %v3866_v23 = vld [vmem:[%s4871_s1 + $0x740] ss:$8 sps:$4 sm:$0xff]  }
  0xad   : > { %1062 = vmatpush1.bf16.msra.mxu1 %v3797_v24  ;;  %2334 = vmatpush1.bf16.msra.mxu0 %v3800_v25  ;;  %v3871_v24 = vld [vmem:[%s4871_s1 + $0x354] ss:$8 sps:$4 sm:$0xff]  }
  0xae   : > { %1063 = vmatprep.subr.bf16.mxu1 %v3805_v26  ;;  %2335 = vmatprep.subr.bf16.mxu0 %v3808_v29  ;;  %v3874_v25 = vld [vmem:[%s4871_s1 + $0x754] ss:$8 sps:$4 sm:$0xff]   ;;  %v3869_v26 = vld [vmem:[%s4871_s1 + $0x350] ss:$8 sps:$4 sm:$0xff]   ;;  %v3880_v29 = vld [vmem:[%s4871_s1 + $0x764] ss:$8 sps:$4 sm:$0xff]  }
  0xb0   : > { %942 = vmatmul.mubr.bf16.gmra.mrb[4].mxu1 %v801_v32  ;;  %2215 = vmatmul.mubr.bf16.gmra.mrb[4].mxu0 %v2074_v33  ;;  %v3883_v32 = vld [vmem:[%s4871_s1 + $0x374] ss:$8 sps:$4 sm:$0xff]  }
  0xb1   : > { %1064 = vmatpush1.bf16.msra.mxu1 %v3803_v30  ;;  %2336 = vmatpush1.bf16.msra.mxu0 %v3806_v31  ;;  %v3875_v30 = vld [vmem:[%s4871_s1 + $0x360] ss:$8 sps:$4 sm:$0xff]   ;;  %v3886_v33 = vld [vmem:[%s4871_s1 + $0x774] ss:$8 sps:$4 sm:$0xff]  }
  0xb2   : > { %1065 = vmatprep.subr.bf16.mxu1 %v3811_v34  ;;  %2337 = vmatprep.subr.bf16.mxu0 %v3814_v35  ;;  %v3878_v31 = vld [vmem:[%s4871_s1 + $0x760] ss:$8 sps:$4 sm:$0xff]   ;;  %v3881_v34 = vld [vmem:[%s4871_s1 + $0x370] ss:$8 sps:$4 sm:$0xff]  }
  0xb3   : > { %1091 = vmatprep.mubr.bf16.mxu1 %v3947_v2  ;;  %2363 = vmatprep.mubr.bf16.mxu0 %v3947_v2  ;;  %v3884_v35 = vld [vmem:[%s4871_s1 + $0x770] ss:$8 sps:$4 sm:$0xff]  }
  0xb5   : > { %1066 = vmatpush1.bf16.msra.mxu1 %v3809_v36  ;;  %2338 = vmatpush1.bf16.msra.mxu0 %v3812_v37  ;;  %v3074_v36 = vld [vmem:[%s4068_s19 + $0x41] sm:$0xff]  ;;  %v3075_v37 = vld [vmem:[%s4068_s19 + $0x49] sm:$0xff] }
  0xb6   : > { %1067 = vmatprep.subr.bf16.mxu1 %v3817_v38  ;;  %2339 = vmatprep.subr.bf16.mxu0 %v3820_v39  ;;  %v3348_v38 = vld [vmem:[%s4068_s19 + $0x46] sm:$0xff]  ;;  %v3349_v39 = vld [vmem:[%s4068_s19 + $0x4e] sm:$0xff] }
  0xb9   : > { %1068 = vmatpush1.bf16.msra.mxu1 %v3815_v40  ;;  %2340 = vmatpush1.bf16.msra.mxu0 %v3818_v41  ;;  %v3889_v40 = vld [vmem:[%s4871_s1 + $0x384] ss:$8 sps:$4 sm:$0xff]  }
  0xba   : > { %1069 = vmatprep.subr.bf16.mxu1 %v3823_v42  ;;  %2341 = vmatprep.subr.bf16.mxu0 %v3826_v43  ;;  %v3892_v41 = vld [vmem:[%s4871_s1 + $0x784] ss:$8 sps:$4 sm:$0xff]   ;;  %v1119_v42 = vpack.c.bf16 %v3075_v37, %v3074_v36  ;;  %v2391_v43 = vpack.c.bf16 %v3349_v39, %v3348_v38 }
  0xbd   : > { %1070 = vmatpush1.bf16.msra.mxu1 %v3821_v44  ;;  %2342 = vmatpush1.bf16.msra.mxu0 %v3824_v45  ;;  %v3887_v44 = vld [vmem:[%s4871_s1 + $0x380] ss:$8 sps:$4 sm:$0xff]  }
  0xbe   : > { %1071 = vmatprep.subr.bf16.mxu1 %v3829_v46  ;;  %2343 = vmatprep.subr.bf16.mxu0 %v3832_v47  ;;  %v3890_v45 = vld [vmem:[%s4871_s1 + $0x780] ss:$8 sps:$4 sm:$0xff]   ;;  %v3895_v46 = vld [vmem:[%s4871_s1 + $0x394] ss:$8 sps:$4 sm:$0xff]  }
  0xbf   : > { %v3898_v47 = vld [vmem:[%s4871_s1 + $0x794] ss:$8 sps:$4 sm:$0xff]  }
  0xc1   : > { %1072 = vmatpush1.bf16.msra.mxu1 %v3827_v48  ;;  %2344 = vmatpush1.bf16.msra.mxu0 %v3830_v49  ;;  %v3893_v48 = vld [vmem:[%s4871_s1 + $0x390] ss:$8 sps:$4 sm:$0xff]  }
  0xc2   : > { %1073 = vmatprep.subr.bf16.mxu1 %v3835_v50  ;;  %2345 = vmatprep.subr.bf16.mxu0 %v3838_v51  ;;  %v3896_v49 = vld [vmem:[%s4871_s1 + $0x790] ss:$8 sps:$4 sm:$0xff]  }
  0xc3   : > { %v3076_v50 = vld [vmem:[%s4068_s19 + $0x51] sm:$0xf]  ;;  %v3350_v51 = vld [vmem:[%s4068_s19 + $0x56] sm:$0xf] }
  0xc4   : > { %v1120_v54 = vpack.c.bf16 %v3076_v50, %v3076_v50  ;;  %v2392_v55 = vpack.c.bf16 %v3350_v51, %v3350_v51 }
  0xc5   : > { %1074 = vmatpush1.bf16.msra.mxu1 %v3833_v52  ;;  %2346 = vmatpush1.bf16.msra.mxu0 %v3836_v53  ;;  %v3901_v52 = vld [vmem:[%s4871_s1 + $0x3a4] ss:$8 sps:$4 sm:$0xff]  }
  0xc6   : > { %1218 = vmatprep.subr.bf16.mxu1 %v3841_v61  ;;  %2490 = vmatprep.subr.bf16.mxu0 %v3844_v62  ;;  %v3904_v53 = vld [vmem:[%s4871_s1 + $0x7a4] ss:$8 sps:$4 sm:$0xff]   ;;  %v3908_v61 = vld [vmem:[%s4871_s1 + $0x7b0] ss:$8 sps:$4 sm:$0xff]  }
  0xc7   : > { %v3913_v62 = vld [vmem:[%s4871_s1 + $0x3c4] ss:$8 sps:$4 sm:$0xff]  }
  0xc8   : > { %1092 = vmatmul.mubr.bf16.vlgmr.msra.gmra.mrb[0].mxu1 %v960_v63  ;;  %2364 = vmatmul.mubr.bf16.vlgmr.msra.gmra.mrb[0].mxu0 %v2232_v0  ;;  %v3916_v63 = vld [vmem:[%s4871_s1 + $0x7c4] ss:$8 sps:$4 sm:$0xff]   ;;  %v3911_v0 = vld [vmem:[%s4871_s1 + $0x3c0] ss:$8 sps:$4 sm:$0xff]  }
  0xc9   : > { %1219 = vmatpush1.bf16.msra.mxu1 %v3839_v1  ;;  %2491 = vmatpush1.bf16.msra.mxu0 %v3842_v3  ;;  %v3914_v1 = vld [vmem:[%s4871_s1 + $0x7c0] ss:$8 sps:$4 sm:$0xff]   ;;  %v3919_v3 = vld [vmem:[%s4871_s1 + $0x3d4] ss:$8 sps:$4 sm:$0xff]  }
  0xca   : > { %1220 = vmatprep.subr.bf16.mxu1 %v3847_v4  ;;  %2492 = vmatprep.subr.bf16.mxu0 %v3850_v5  ;;  %v3922_v4 = vld [vmem:[%s4871_s1 + $0x7d4] ss:$8 sps:$4 sm:$0xff]   ;;  %v3917_v5 = vld [vmem:[%s4871_s1 + $0x3d0] ss:$8 sps:$4 sm:$0xff]  }
  0xcb   : > { %1101 = vmatprep.mubr.bf16.mxu1 %v3947_v2  ;;  %2373 = vmatprep.mubr.bf16.mxu0 %v3947_v2 }
  0xcd   : > { %1221 = vmatpush1.bf16.msra.mxu1 %v3845_v6  ;;  %2493 = vmatpush1.bf16.msra.mxu0 %v3848_v7  ;;  %v3920_v6 = vld [vmem:[%s4871_s1 + $0x7d0] ss:$8 sps:$4 sm:$0xff]   ;;  %v3925_v7 = vld [vmem:[%s4871_s1 + $0x3e4] ss:$8 sps:$4 sm:$0xff]  }
  0xce   : > { %1222 = vmatprep.subr.bf16.mxu1 %v3853_v10  ;;  %2494 = vmatprep.subr.bf16.mxu0 %v3856_v11  ;;  %v3926_v10 = vld [vmem:[%s4871_s1 + $0x7e0] ss:$8 sps:$4 sm:$0xff]   ;;  %v3931_v11 = vld [vmem:[%s4871_s1 + $0x3f4] ss:$8 sps:$4 sm:$0xff]  }
  0xd0   : > { %1102 = vmatmul.mubr.bf16.gmra.mrb[4].mxu1 %v961_v12  ;;  %2374 = vmatmul.mubr.bf16.gmra.mrb[4].mxu0 %v2233_v13  ;;  %v3934_v12 = vld [vmem:[%s4871_s1 + $0x7f4] ss:$8 sps:$4 sm:$0xff]   ;;  %v3929_v13 = vld [vmem:[%s4871_s1 + $0x3f0] ss:$8 sps:$4 sm:$0xff]  }
  0xd1   : > { %1223 = vmatpush1.bf16.msra.mxu1 %v3851_v14  ;;  %2495 = vmatpush1.bf16.msra.mxu0 %v3854_v15  ;;  %v3932_v14 = vld [vmem:[%s4871_s1 + $0x7f0] ss:$8 sps:$4 sm:$0xff]   ;;  %v3109_v15 = vld [vmem:[%s4068_s19 + $0x61] sm:$0xff] }
  0xd2   : > { %1224 = vmatprep.subr.bf16.mxu1 %v3859_v16  ;;  %2496 = vmatprep.subr.bf16.mxu0 %v3862_v17  ;;  %v3110_v16 = vld [vmem:[%s4068_s19 + $0x69] sm:$0xff] }
  0xd3   : > { %1250 = vmatprep.mubr.bf16.mxu1 %v3947_v2  ;;  %2522 = vmatprep.mubr.bf16.mxu0 %v3947_v2  ;;  %v3383_v17 = vld [vmem:[%s4068_s19 + $0x66] sm:$0xff] }
  0xd5   : > { %1225 = vmatpush1.bf16.msra.mxu1 %v3857_v18  ;;  %2497 = vmatpush1.bf16.msra.mxu0 %v3860_v19  ;;  %v3384_v18 = vld [vmem:[%s4068_s19 + $0x6e] sm:$0xff]  ;;  %v1278_v19 = vpack.c.bf16 %v3110_v16, %v3109_v15 }
  0xd6   : > { %1226 = vmatprep.subr.bf16.mxu1 %v3865_v20  ;;  %2498 = vmatprep.subr.bf16.mxu0 %v3868_v21  ;;  %v2550_v20 = vpack.c.bf16 %v3384_v18, %v3383_v17  ;;  %v3111_v21 = vld [vmem:[%s4068_s19 + $0x71] sm:$0xf] }
  0xd9   : > { %1227 = vmatpush1.bf16.msra.mxu1 %v3863_v22  ;;  %2499 = vmatpush1.bf16.msra.mxu0 %v3866_v23  ;;  %v3385_v22 = vld [vmem:[%s4068_s19 + $0x76] sm:$0xf]  ;;  %v1279_v23 = vpack.c.bf16 %v3111_v21, %v3111_v21  ;;  %s3539_s19 = smul.u32 48, %s4875_s13 }
  0xda   : > { %1228 = vmatprep.subr.bf16.mxu1 %v3871_v24  ;;  %2500 = vmatprep.subr.bf16.mxu0 %v3874_v25  ;;  %v2551_v24 = vpack.c.bf16 %v3385_v22, %v3385_v22 }
  0xdb   : > { %s170_s5 = scalar_lea.vmem %s4873_s3, %s3539_s19 }
  0xdd   : > { %1229 = vmatpush1.bf16.msra.mxu1 %v3869_v26  ;;  %2501 = vmatpush1.bf16.msra.mxu0 %v3872_v27 }
  0xde   : > { %1230 = vmatprep.subr.bf16.mxu1 %v3877_v28  ;;  %2502 = vmatprep.subr.bf16.mxu0 %v3880_v29 }
  0xe1   : > { %1231 = vmatpush1.bf16.msra.mxu1 %v3875_v30  ;;  %2503 = vmatpush1.bf16.msra.mxu0 %v3878_v31 }
  0xe2   : > { %1232 = vmatprep.subr.bf16.mxu1 %v3883_v32  ;;  %2504 = vmatprep.subr.bf16.mxu0 %v3886_v33 }
  0xe5   : > { %1233 = vmatpush1.bf16.msra.mxu1 %v3881_v34  ;;  %2505 = vmatpush1.bf16.msra.mxu0 %v3884_v35 }
  0xe6   : > { %1377 = vmatprep.subr.bf16.mxu1 %v3889_v40  ;;  %2649 = vmatprep.subr.bf16.mxu0 %v3892_v41 }
  0xe8   : > { %1251 = vmatmul.mubr.bf16.vlgmr.msra.gmra.mrb[0].mxu1 %v1119_v42  ;;  %2523 = vmatmul.mubr.bf16.vlgmr.msra.gmra.mrb[0].mxu0 %v2391_v43 }
  0xe9   : > { %1378 = vmatpush1.bf16.msra.mxu1 %v3887_v44  ;;  %2650 = vmatpush1.bf16.msra.mxu0 %v3890_v45 }
  0xea   : > { %1379 = vmatprep.subr.bf16.mxu1 %v3895_v46  ;;  %2651 = vmatprep.subr.bf16.mxu0 %v3898_v47 }
  0xeb   : > { %1260 = vmatprep.mubr.bf16.mxu1 %v3947_v2  ;;  %2532 = vmatprep.mubr.bf16.mxu0 %v3947_v2 }
  0xed   : > { %1380 = vmatpush1.bf16.msra.mxu1 %v3893_v48  ;;  %2652 = vmatpush1.bf16.msra.mxu0 %v3896_v49 }
  0xee   : > { %1381 = vmatprep.subr.bf16.mxu1 %v3901_v52  ;;  %2653 = vmatprep.subr.bf16.mxu0 %v3904_v53 }
  0xf0   : > { %1261 = vmatmul.mubr.bf16.gmra.mrb[4].mxu1 %v1120_v54  ;;  %2533 = vmatmul.mubr.bf16.gmra.mrb[4].mxu0 %v2392_v55 }
  0xf1   : > { %1382 = vmatpush1.bf16.msra.mxu1 %v3899_v56  ;;  %2654 = vmatpush1.bf16.msra.mxu0 %v3902_v57 }
  0xf2   : > { %1383 = vmatprep.subr.bf16.mxu1 %v3907_v58  ;;  %2655 = vmatprep.subr.bf16.mxu0 %v3910_v59 }
  0xf3   : > { %1409 = vmatprep.mubr.bf16.mxu1 %v3947_v2  ;;  %2681 = vmatprep.mubr.bf16.mxu0 %v3947_v2 }
  0xf5   : > { %1384 = vmatpush1.bf16.msra.mxu1 %v3905_v60  ;;  %2656 = vmatpush1.bf16.msra.mxu0 %v3908_v61 }
  0xf6   : > { %1385 = vmatprep.subr.bf16.mxu1 %v3913_v62  ;;  %2657 = vmatprep.subr.bf16.mxu0 %v3916_v63 }
  0xf9   : > { %1386 = vmatpush1.bf16.msra.mxu1 %v3911_v0  ;;  %2658 = vmatpush1.bf16.msra.mxu0 %v3914_v1 }
  0xfa   : > { %1387 = vmatprep.subr.bf16.mxu1 %v3919_v3  ;;  %2659 = vmatprep.subr.bf16.mxu0 %v3922_v4 }
  0xfd   : > { %1388 = vmatpush1.bf16.msra.mxu1 %v3917_v5  ;;  %2660 = vmatpush1.bf16.msra.mxu0 %v3920_v6 }
  0xfe   : > { %1389 = vmatprep.subr.bf16.mxu1 %v3925_v7  ;;  %2661 = vmatprep.subr.bf16.mxu0 %v3928_v8 }
 0x101   : > { %1390 = vmatpush1.bf16.msra.mxu1 %v3923_v9  ;;  %2662 = vmatpush1.bf16.msra.mxu0 %v3926_v10 }
 0x102   : > { %1391 = vmatprep.subr.bf16.mxu1 %v3931_v11  ;;  %2663 = vmatprep.subr.bf16.mxu0 %v3934_v12 }
 0x105   : > { %1392 = vmatpush1.bf16.msra.mxu1 %v3929_v13  ;;  %2664 = vmatpush1.bf16.msra.mxu0 %v3932_v14 }
 0x108   : > { %1410 = vmatmul.mubr.bf16.vlgmr.msra.gmra.mrb[0].mxu1 %v1278_v19  ;;  %2682 = vmatmul.mubr.bf16.vlgmr.msra.gmra.mrb[0].mxu0 %v2550_v20 }
 0x109   : > { %1419 = vmatprep.mubr.bf16.mxu1 %v3947_v2  ;;  %2691 = vmatprep.mubr.bf16.mxu0 %v3947_v2 }
 0x110   : > { %1420 = vmatmul.mubr.bf16.gmra.mrb[4].mxu1 %v1279_v23  ;;  %2692 = vmatmul.mubr.bf16.gmra.mrb[4].mxu0 %v2551_v24 }
 0x113   : > { %v4847_v25 = vpop.permute.xlu0 %2711 }
 0x116   : > { %v2722_v43 = vpop.permute.xlu1 %2721 }
 0x117   : > { %v4849_v26 = vpop.permute.xlu0 %2716 }
 0x1db   : > { %v1411_v27 = vpop.f32.mrb[0].mxu1  ;;  %v2683_v28 = vpop.f32.mrb[0].mxu0 }
 0x1dc   : > { %v3421_v29 = vadd.f32 %v2683_v28, %v1411_v27  ;;  %v1413_v30 = vpop.f32.mrb[1].mxu1  ;;  %v2685_v31 = vpop.f32.mrb[1].mxu0 }
 0x1dd   : > { %v3422_v32 = vadd.f32 %v2685_v31, %v1413_v30  ;;  %v1415_v33 = vpop.f32.mrb[2].mxu1  ;;  %v2687_v34 = vpop.f32.mrb[2].mxu0 }
 0x1de   : > { %v3423_v35 = vadd.f32 %v2687_v34, %v1415_v33  ;;  %v1417_v2 = vpop.f32.mrb[3].mxu1  ;;  %v2689_v36 = vpop.f32.mrb[3].mxu0  ;;  %v2724_v38 = vmul.f32 %v3421_v29, %v4847_v25 }
 0x1df   : > { %v3424_v37 = vadd.f32 %v2689_v36, %v1417_v2  ;;  %v2725_v40 = vmul.f32 %v3422_v32, %v4847_v25 }
 0x1e0   : > { %v2726_v39 = vmul.f32 %v3423_v35, %v4849_v26 }
 0x1e1   : > { %v2727_v41 = vmul.f32 %v3424_v37, %v4849_v26 }
 0x1e2   : > { %v2730_v42 = vadd.f32 %v2726_v39, %v2724_v38 }
 0x1e3   : > { %v2740_v44 = vadd.f32 %v2727_v41, %v2725_v40  ;;  %v1421_v45 = vpop.f32.mrb[4].mxu1  ;;  %v2693_v46 = vpop.f32.mrb[4].mxu0 }
 0x1e4   : > { %v3425_v47 = vadd.f32 %v2693_v46, %v1421_v45  ;;  %v1423_v48 = vpop.f32.mrb[5].mxu1  ;;  %v2695_v49 = vpop.f32.mrb[5].mxu0 }
 0x1e5   : > { %v3426_v50 = vadd.f32 %v2695_v49, %v1423_v48  ;;  %v1425_v51 = vpop.f32.mrb[6].mxu1  ;;  %v2697_v52 = vpop.f32.mrb[6].mxu0 }
 0x1e6   : > { %v2728_v53 = vmul.f32 %v3425_v47, %v2722_v43  ;;  %v1426_v54 = vpop.f32.mrb[7].mxu1  ;;  %v2698_v55 = vpop.f32.mrb[7].mxu0 }
 0x1e7   : > { %v2729_v56 = vmul.f32 %v3426_v50, %v2722_v43 }
 0x1e8   : > { %v2732_v57 = vsel %vm2731_vm0, %v2728_v53, 0.0 }
 0x1e9   : > { %v2733_v58 = vadd.f32 %v2732_v57, %v2730_v42  ;;  %v2741_v59 = vsel %vm2731_vm0, %v2729_v56, 0.0 }
 0x1ea   : > { %v2742_v60 = vadd.f32 %v2741_v59, %v2740_v44 }
 0x1eb   : > { %v2734_v61 = vrot.slane %v2733_v58, 4 }
 0x1ec   : > { %v2743_v62 = vrot.slane %v2742_v60, 4 }
 0x1ed   : > { %v2735_v63 = vadd.f32 %v2734_v61, %v2733_v58 }
 0x1ee   : > { %v2744_v0 = vadd.f32 %v2743_v62, %v2742_v60 }
 0x1ef   : > { %v2736_v1 = vrot.slane %v2735_v63, 2 }
 0x1f0   : > { %v2745_v3 = vrot.slane %v2744_v0, 2 }
 0x1f1   : > { %v2737_v4 = vadd.f32 %v2736_v1, %v2735_v63 }
 0x1f2   : > { %v2746_v5 = vadd.f32 %v2745_v3, %v2744_v0 }
 0x1f3   : > { %v2738_v6 = vrot.slane %v2737_v4, 1 }
 0x1f4   : > { %v2747_v7 = vrot.slane %v2746_v5, 1 }
 0x1f5   : > { %v2739_v8 = vadd.f32 %v2738_v6, %v2737_v4 }
 0x1f6   : > { %v2748_v9 = vadd.f32 %v2747_v7, %v2746_v5 }
 0x1f7   : > { %v2749_v10 = vmul.f32 0.0625, %v2739_v8 }
 0x1f8   : > { %v2750_v11 = vmul.f32 0.0625, %v2748_v9 }
 0x1f9   : > { %v2751_v12 = vsub.f32 %v3421_v29, %v2749_v10  ;;  %v2753_v13 = vsub.f32 %v3423_v35, %v2749_v10  ;;  %v2755_v14 = vsub.f32 %v3425_v47, %v2749_v10 }
 0x1fa   : > { %v2752_v15 = vsub.f32 %v3422_v32, %v2750_v11  ;;  %v2754_v16 = vsub.f32 %v3424_v37, %v2750_v11  ;;  %v2756_v17 = vsub.f32 %v3426_v50, %v2750_v11 }
 0x1fb   : > { %v2757_v18 = vmul.f32 %v2751_v12, %v2751_v12  ;;  %v2759_v19 = vmul.f32 %v2753_v13, %v2753_v13  ;;  %v2761_v20 = vmul.f32 %v2755_v14, %v2755_v14 }
 0x1fc   : > { %v2758_v21 = vmul.f32 %v2752_v15, %v2752_v15  ;;  %v2760_v22 = vmul.f32 %v2754_v16, %v2754_v16  ;;  %v2762_v23 = vmul.f32 %v2756_v17, %v2756_v17 }
 0x1fd   : > { %v2763_v24 = vmul.f32 %v2757_v18, %v4847_v25  ;;  %v2765_v27 = vmul.f32 %v2759_v19, %v4849_v26  ;;  %v2767_v28 = vmul.f32 %v2761_v20, %v2722_v43 }
 0x1fe   : > { %v2764_v30 = vmul.f32 %v2758_v21, %v4847_v25  ;;  %v2766_v29 = vmul.f32 %v2760_v22, %v4849_v26  ;;  %v2768_v31 = vmul.f32 %v2762_v23, %v2722_v43 }
 0x1ff   : > { %v2769_v33 = vadd.f32 %v2765_v27, %v2763_v24  ;;  %v2770_v32 = vsel %vm2731_vm0, %v2767_v28, 0.0 }
 0x200   : > { %v2778_v34 = vadd.f32 %v2766_v29, %v2764_v30  ;;  %v2779_v35 = vsel %vm2731_vm0, %v2768_v31, 0.0 }
 0x201   : > { %v2771_v2 = vadd.f32 %v2770_v32, %v2769_v33 }
 0x202   : > { %v2780_v36 = vadd.f32 %v2779_v35, %v2778_v34 }
 0x203   : > { %v2772_v37 = vrot.slane %v2771_v2, 4 }
 0x204   : > { %v2781_v38 = vrot.slane %v2780_v36, 4 }
 0x205   : > { %v2773_v39 = vadd.f32 %v2772_v37, %v2771_v2 }
 0x206   : > { %v2782_v40 = vadd.f32 %v2781_v38, %v2780_v36 }
 0x207   : > { %v2774_v41 = vrot.slane %v2773_v39, 2 }
 0x208   : > { %v2783_v42 = vrot.slane %v2782_v40, 2 }
 0x209   : > { %v2775_v44 = vadd.f32 %v2774_v41, %v2773_v39 }
 0x20a   : > { %v2784_v25 = vadd.f32 %v2783_v42, %v2782_v40 }
 0x20b   : > { %v2776_v45 = vrot.slane %v2775_v44, 1 }
 0x20c   : > { %v2785_v26 = vrot.slane %v2784_v25, 1 }
 0x20d   : > { %v2777_v43 = vadd.f32 %v2776_v45, %v2775_v44 }
 0x20e   : > { %v2786_v46 = vadd.f32 %v2785_v26, %v2784_v25 }
 0x20f   : > { %v2787_v47 = vmul.f32 0.0625, %v2777_v43 }
 0x210   : > { %v2788_v48 = vmul.f32 0.0625, %v2786_v46 }
 0x211   : > { %v2789_v49 = vadd.f32 1e-05, %v2787_v47 }
 0x212   : > { %v2790_v50 = vadd.f32 1e-05, %v2788_v48 }
 0x213   : > { %3935 = vrsqrt.f32 %v2789_v49 }
 0x214   : > { %3937 = vrsqrt.f32 %v2790_v50 }
 0x21d   : > { %v3936_v51 = vpop.eup %3935 }
 0x21e   : > { %v3938_v52 = vpop.eup %3937  ;;  %v2793_v53 = vmul.f32 %v3936_v51, %v2751_v12  ;;  %v2795_v54 = vmul.f32 %v3936_v51, %v2753_v13  ;;  %v2797_v55 = vmul.f32 %v3936_v51, %v2755_v14 }
 0x21f   : > { %v2794_v56 = vmul.f32 %v3938_v52, %v2752_v15  ;;  %v2796_v57 = vmul.f32 %v3938_v52, %v2754_v16  ;;  %v2798_v58 = vmul.f32 %v3938_v52, %v2756_v17 }
 0x220   : > { %vm2799_vm1 = vcmp.gt.f32.partialorder %v2793_v53, 0.0  ;;  %vm2801_vm2 = vcmp.gt.f32.partialorder %v2795_v54, 0.0  ;;  %vm2803_vm3 = vcmp.gt.f32.partialorder %v2797_v55, 0.0  ;;  %v2805_v59 = vmul.f32 0.2, %v2793_v53 }
 0x221   : > { %vm2800_vm4 = vcmp.gt.f32.partialorder %v2794_v56, 0.0  ;;  %vm2802_vm5 = vcmp.gt.f32.partialorder %v2796_v57, 0.0  ;;  %vm2804_vm6 = vcmp.gt.f32.partialorder %v2798_v58, 0.0  ;;  %v2806_v60 = vmul.f32 0.2, %v2794_v56 }
 0x222   : > { %v2807_v61 = vmul.f32 0.2, %v2795_v54  ;;  %v2808_v62 = vmul.f32 0.2, %v2796_v57  ;;  %v2809_v63 = vmul.f32 0.2, %v2797_v55  ;;  %v2811_v0 = vsel %vm2799_vm1, %v2793_v53, %v2805_v59 }
 0x223   : > { %v2810_v1 = vmul.f32 0.2, %v2798_v58  ;;  %v2812_v3 = vsel %vm2800_vm4, %v2794_v56, %v2806_v60  ;;  %2817 = vst [vmem:[%s170_s5] sm:$0xff] %v2811_v0 }
 0x224   : > { %v2813_v4 = vsel %vm2801_vm2, %v2795_v54, %v2807_v61  ;;  %v2814_v5 = vsel %vm2802_vm5, %v2796_v57, %v2808_v62  ;;  %v2815_v6 = vsel %vm2803_vm3, %v2797_v55, %v2809_v63  ;;  %2818 = vst [vmem:[%s170_s5 + $0x8] sm:$0xff] %v2812_v3 }
 0x225   : > { %v2816_v7 = vsel %vm2804_vm6, %v2798_v58, %v2810_v1  ;;  %2819 = vst [vmem:[%s170_s5 + $0x10] sm:$0xff] %v2813_v4  ;;  %2820 = vst [vmem:[%s170_s5 + $0x18] sm:$0xff] %v2814_v5 }
 0x226   : > { %2821 = vst [vmem:[%s170_s5 + $0x20] sm:$0xf] %v2815_v6  ;;  %2822 = vst [vmem:[%s170_s5 + $0x28] sm:$0xf] %v2816_v7 }
 0x227 PF: > { %s13_s12 = sadd.s32 1, %s3945_s12  }
 0x228   : > { %p10_p4 = scmp.ge.s32.totalorder %s13_s12, 4  }
 0x22a   :  { %12 = sbr.rel (!%p10_p4) target bundleno = 1 (0x1), region = 80 }

// kernel: forward.7
= control target key start
LH: loop header
LB: loop body
LE: loop exit
PB: predicated region body
PF: predicated region fallthrough
CT: control target
= control target key end

     0   :  { %s5127_s12 = smov 0   ;;  %s6090_s0 = inlined_call_operand.vmem [shape: f32[2,1,1,39,256], index: 0, kind: input, shape index: {}]   ;;  %s6091_s1 = inlined_call_operand.vmem [shape: bf16[16,256,128], index: 1, kind: input, shape index: {}]   ;;  %s6092_s2 = inlined_call_operand.vmem [shape: f32[1,128], index: 2, kind: input, shape index: {}]   ;;  %s6093_s3 = inlined_call_operand.vmem [shape: f32[2,18,128], index: 3, kind: output, shape index: {}]  }
   0x1 LB: > { %s3636_s13 = sadd.s32 4294967295, %s5105_s12   ;;  %p3640_p0 = scmp.ge.s32.totalorder %s5105_s12, 1  ;;  %s5105_s12 = sphi %s5127_s12, %s13_s12  }
   0x2   : > { %p137_p1 = scmp.lt.s32.totalorder %s5105_s12, 3 }
   0x4   : > { %p138_p2 = pnand %p3640_p0, %p137_p1 }
   0x5   : > { %v4840_v0 = vld [vmem:[%s6091_s1 + $0xc0] sm:$0xff] (!%p138_p2)   ;;  %v4844_v4 = vld [vmem:[%s6091_s1 + $0xc8] sm:$0xff] (!%p138_p2)   ;;  %v4848_v8 = vld [vmem:[%s6091_s1 + $0xd0] sm:$0xff] (!%p138_p2)   ;;  %p161_p3 = scmp.lt.s32.totalorder (!%p138_p2), %s3636_s13, 1  ;;  %vm255_vm0 = vsmask.f32 (!%p138_p2), 7424 }
   0x6   : > { %141 = sbr.rel (%p138_p2) target bundleno = 519 (0x207), region = 32  ;;  %v4841_v1 = vld [vmem:[%s6091_s1 + $0x40] sm:$0xff] (!%p138_p2)   ;;  %4382 = vmatprep.subr.bf16.mxu0 (!%p138_p2), %v4840_v0  ;;  %v4845_v5 = vld [vmem:[%s6091_s1 + $0x48] sm:$0xff] (!%p138_p2)   ;;  %v4849_v9 = vld [vmem:[%s6091_s1 + $0x50] sm:$0xff] (!%p138_p2)   ;;  %vm623_vm1 = vcmask (!%p138_p2), 1046528   ;;  %vm1053_vm3 = vcmask (!%p138_p2), 1044480  }
   0x7   : > { %v4842_v2 = vld [vmem:[%s6091_s1 + $0x80] sm:$0xff] (!%p138_p2)   ;;  %4410 = vmatprep.subr.bf16.mxu1 (!%p138_p2), %v4841_v1  ;;  %v4846_v6 = vld [vmem:[%s6091_s1 + $0x88] sm:$0xff] (!%p138_p2)   ;;  %v4850_v10 = vld [vmem:[%s6091_s1 + $0x90] sm:$0xff] (!%p138_p2)   ;;  %vm822_vm2 = vsmask.f32 (!%p138_p2), 6400  ;;  %vm1895_vm5 = vcmask (!%p138_p2), 1045504  }
   0x8   : > { %v4843_v3 = vld [vmem:[%s6091_s1] sm:$0xff] (!%p138_p2)   ;;  %4383 = vmatpush3.bf16.msra.mxu0 (!%p138_p2), %v4842_v2  ;;  %v4847_v7 = vld [vmem:[%s6091_s1 + $0x8] sm:$0xff] (!%p138_p2)   ;;  %v4851_v11 = vld [vmem:[%s6091_s1 + $0x10] sm:$0xff] (!%p138_p2)   ;;  %vm1256_vm4 = vsmask.f32 (!%p138_p2), 4352 }
   0x9   : > { %4411 = vmatpush3.bf16.msra.mxu1 (!%p138_p2), %v4843_v3  ;;  %4384 = vmatprep.subr.bf16.mxu0 (!%p138_p2), %v4844_v4  ;;  %v4852_v12 = vld [vmem:[%s6091_s1 + $0xd8] sm:$0xff] (!%p138_p2)   ;;  %v4856_v16 = vld [vmem:[%s6091_s1 + $0xe0] sm:$0xff] (!%p138_p2)   ;;  %v4860_v20 = vld [vmem:[%s6091_s1 + $0xe8] sm:$0xff] (!%p138_p2)   ;;  %vm2094_vm6 = vsmask.f32 (!%p138_p2), 5376 }
   0xa   : > { %4412 = vmatprep.subr.bf16.mxu1 (!%p138_p2), %v4845_v5  ;;  %v4853_v13 = vld [vmem:[%s6091_s1 + $0x58] sm:$0xff] (!%p138_p2)   ;;  %v4857_v17 = vld [vmem:[%s6091_s1 + $0x60] sm:$0xff] (!%p138_p2)   ;;  %v4861_v21 = vld [vmem:[%s6091_s1 + $0x68] sm:$0xff] (!%p138_p2)  }
   0xb   : > { %v4854_v14 = vld [vmem:[%s6091_s1 + $0x98] sm:$0xff] (!%p138_p2)   ;;  %v4858_v18 = vld [vmem:[%s6091_s1 + $0xa0] sm:$0xff] (!%p138_p2)   ;;  %v4862_v22 = vld [vmem:[%s6091_s1 + $0xa8] sm:$0xff] (!%p138_p2)  }
   0xc   : > { %4385 = vmatpush3.bf16.msra.mxu0 (!%p138_p2), %v4846_v6  ;;  %v4855_v15 = vld [vmem:[%s6091_s1 + $0x18] sm:$0xff] (!%p138_p2)   ;;  %v4859_v19 = vld [vmem:[%s6091_s1 + $0x20] sm:$0xff] (!%p138_p2)   ;;  %v4863_v23 = vld [vmem:[%s6091_s1 + $0x28] sm:$0xff] (!%p138_p2)  }
   0xd   : > { %4413 = vmatpush3.bf16.msra.mxu1 %v4847_v7  ;;  %4386 = vmatprep.subr.bf16.mxu0 %v4848_v8  ;;  %s6095_s13 = smov (!%p161_p3, %s3636_s13), 1  ;;  %v4864_v24 = vld [vmem:[%s6091_s1 + $0xf0] sm:$0xff]   ;;  %v4868_v28 = vld [vmem:[%s6091_s1 + $0xf8] sm:$0xff]   ;;  %v4872_v48 = vld [vmem:[%s6091_s1 + $0x140] sm:$0xff]  }
   0xe   : > { %4414 = vmatprep.subr.bf16.mxu1 %v4849_v9  ;;  %v4865_v25 = vld [vmem:[%s6091_s1 + $0x70] sm:$0xff]   ;;  %s4830_s16 = smul.u32 80, %s6095_s13  ;;  %v4869_v29 = vld [vmem:[%s6091_s1 + $0x78] sm:$0xff]   ;;  %v4873_v55 = vld [vmem:[%s6091_s1 + $0x1c0] sm:$0xff]  }
   0xf   : > { %v4866_v26 = vld [vmem:[%s6091_s1 + $0xb0] sm:$0xff]   ;;  %v4870_v30 = vld [vmem:[%s6091_s1 + $0xb8] sm:$0xff]   ;;  %v4874_v57 = vld [vmem:[%s6091_s1 + $0x100] sm:$0xff]  }
  0x10   : > { %4387 = vmatpush3.bf16.msra.mxu0 %v4850_v10  ;;  %v4867_v27 = vld [vmem:[%s6091_s1 + $0x30] sm:$0xff]   ;;  %s5235_s27 = scalar_lea.vmem %s6090_s0, %s4830_s16  ;;  %v4871_v31 = vld [vmem:[%s6091_s1 + $0x38] sm:$0xff]   ;;  %v4875_v60 = vld [vmem:[%s6091_s1 + $0x180] sm:$0xff]  }
  0x11   : > { %4415 = vmatpush3.bf16.msra.mxu1 %v4851_v11  ;;  %4388 = vmatprep.subr.bf16.mxu0 %v4852_v12  ;;  %v5244_v32 = vld [vmem:[%s5235_s27 + $0x18] sm:$0xff]  ;;  %v215_v33 = vld [vmem:[%s5235_s27 + $0x8] sm:$0xfe]  ;;  %v5251_v38 = vld [vmem:[%s5235_s27 + $0x10] sm:$0xff] }
  0x12   : > { %4416 = vmatprep.subr.bf16.mxu1 %v4853_v13  ;;  %v217_v34 = vld [vmem:[%s5235_s27 + $0x28] sm:$0x7]  ;;  %v219_v35 = vpack.c.bf16 %v5244_v32, %v215_v33  ;;  %v214_v39 = vld [vmem:[%s5235_s27] sm:$0xfe]  ;;  %v4880_v7 = vld [vmem:[%s6091_s1 + $0x150] sm:$0xff]  }
  0x13   : > { %v221_v36 = vpack.c.bf16 %v217_v34, %v217_v34  ;;  %v173_v37 = vld [vmem:[%s5235_s27 + $0x8] sm:$0xff]  ;;  %v216_v41 = vld [vmem:[%s5235_s27 + $0x20] sm:$0x7]  ;;  %v218_v42 = vpack.c.bf16 %v5251_v38, %v214_v39  ;;  %v4881_v8 = vld [vmem:[%s6091_s1 + $0x1d0] sm:$0xff]  }
  0x14   : > { %4389 = vmatpush3.bf16.msra.mxu0 %v4854_v14  ;;  %v179_v40 = vpack.c.bf16 %v5244_v32, %v173_v37  ;;  %v172_v43 = vld [vmem:[%s5235_s27] sm:$0xff]  ;;  %v269_v44 = vshrl.u32 %v219_v35, 16  ;;  %v271_v45 = vshll.u32 %v219_v35, 16  ;;  %v220_v47 = vpack.c.bf16 %v216_v41, %v216_v41  ;;  %v4876_v62 = vld [vmem:[%s6091_s1 + $0x148] sm:$0xff]   ;;  %v4882_v9 = vld [vmem:[%s6091_s1 + $0x110] sm:$0xff]  }
  0x15   : > { %4417 = vmatpush3.bf16.msra.mxu1 %v4855_v15  ;;  %4390 = vmatprep.subr.bf16.mxu0 %v4856_v16  ;;  %v276_v46 = vshll.u32 %v221_v36, 16  ;;  %v257_v49 = vshrl.u32 %v218_v42, 16  ;;  %v259_v50 = vshll.u32 %v218_v42, 16  ;;  %v178_v51 = vpack.c.bf16 %v5251_v38, %v172_v43  ;;  %v4877_v1 = vld [vmem:[%s6091_s1 + $0x1c8] sm:$0xff]   ;;  %v4883_v10 = vld [vmem:[%s6091_s1 + $0x190] sm:$0xff]   ;;  %v4884_v12 = vld [vmem:[%s6091_s1 + $0x158] sm:$0xff]  }
  0x16   : > { %4418 = vmatprep.subr.bf16.mxu1 %v4857_v17  ;;  %562 = vmatprep.mubr.bf16.mxu1 %v179_v40  ;;  %v273_v52 = vrot.slane %v271_v45, 1  ;;  %v264_v54 = vshll.u32 %v220_v47, 16  ;;  %v283_v63 = vshrl.u32 %v221_v36, 16  ;;  %v4878_v3 = vld [vmem:[%s6091_s1 + $0x108] sm:$0xff]   ;;  %v280_v6 = vshrl.u32 %v220_v47, 16  ;;  %v4885_v13 = vld [vmem:[%s6091_s1 + $0x1d8] sm:$0xff]  }
  0x17   : > { %v278_v53 = vrot.slane %v276_v46, 1  ;;  %v261_v56 = vrot.slane %v259_v50, 1  ;;  %v4879_v5 = vld [vmem:[%s6091_s1 + $0x188] sm:$0xff]   ;;  %v4886_v14 = vld [vmem:[%s6091_s1 + $0x118] sm:$0xff]   ;;  %v4888_v16 = vld [vmem:[%s6091_s1 + $0x160] sm:$0xff]  }
  0x18   : > { %4391 = vmatpush3.bf16.msra.mxu0 %v4858_v18  ;;  %v274_v58 = vor.u32 %v273_v52, %v269_v44  ;;  %v266_v59 = vrot.slane %v264_v54, 1  ;;  %v4887_v15 = vld [vmem:[%s6091_s1 + $0x198] sm:$0xff]   ;;  %v4889_v17 = vld [vmem:[%s6091_s1 + $0x1e0] sm:$0xff]   ;;  %v579_v37 = vld [vmem:[%s5235_s27 + $0x8] sm:$0xfc] }
  0x19   : > { %4419 = vmatpush3.bf16.msra.mxu1 %v4859_v19  ;;  %4392 = vmatprep.subr.bf16.mxu0 %v4860_v20  ;;  %v262_v61 = vor.u32 %v261_v56, %v257_v49  ;;  %v285_v4 = vor.u32 %v283_v63, %v278_v53  ;;  %v4890_v18 = vld [vmem:[%s6091_s1 + $0x120] sm:$0xff]   ;;  %v4892_v20 = vld [vmem:[%s6091_s1 + $0x168] sm:$0xff]   ;;  %v4900_v33 = vld [vmem:[%s6091_s1 + $0x178] sm:$0xff]   ;;  %v583_v40 = vpack.c.bf16 %v5244_v32, %v579_v37 }
  0x1a   : > { %4420 = vmatprep.subr.bf16.mxu1 %v4861_v21  ;;  %v279_v0 = vsel %vm255_vm0, %v274_v58, %v278_v53  ;;  %v282_v11 = vor.u32 %v280_v6, %v266_v59  ;;  %v4891_v19 = vld [vmem:[%s6091_s1 + $0x1a0] sm:$0xff]   ;;  %v4893_v21 = vld [vmem:[%s6091_s1 + $0x1e8] sm:$0xff]   ;;  %v4901_v34 = vld [vmem:[%s6091_s1 + $0x1f8] sm:$0xff]  }
  0x1b   : > { %418 = vmatprep.mubr.bf16.mxu0 %v279_v0  ;;  %v267_v2 = vsel %vm255_vm0, %v262_v61, %v266_v59  ;;  %v4902_v35 = vld [vmem:[%s6091_s1 + $0x138] sm:$0xff]   ;;  %v581_v39 = vld [vmem:[%s5235_s27 + $0x28] sm:$0xf]  ;;  %v578_v46 = vld [vmem:[%s5235_s27] sm:$0xfc]  ;;  %v627_v49 = vrot.slane %v583_v40, 1 }
  0x1c   : > { %4393 = vmatpush3.bf16.msra.mxu0 %v4862_v22  ;;  %v4894_v22 = vld [vmem:[%s6091_s1 + $0x128] sm:$0xff]   ;;  %v4903_v36 = vld [vmem:[%s6091_s1 + $0x1b8] sm:$0xff]   ;;  %v585_v41 = vpack.c.bf16 %v581_v39, %v581_v39  ;;  %v580_v47 = vld [vmem:[%s5235_s27 + $0x20] sm:$0xf] }
  0x1d   : > { %4421 = vmatpush3.bf16.msra.mxu1 %v4863_v23  ;;  %4394 = vmatprep.subr.bf16.mxu0 %v4864_v24  ;;  %v4895_v23 = vld [vmem:[%s6091_s1 + $0x1a8] sm:$0xff]   ;;  %v584_v52 = vpack.c.bf16 %v580_v47, %v580_v47  ;;  %v783_v53 = vld [vmem:[%s5235_s27 + $0x20] sm:$0x1f]  ;;  %v4932_v47 = vld [vmem:[%s6091_s1 + $0x278] sm:$0xff]  }
  0x1e   : > { %4422 = vmatprep.subr.bf16.mxu1 %v4865_v25  ;;  %v177_v24 = vld [vmem:[%s5235_s27 + $0x28] sm:$0x3]  ;;  %v782_v42 = vld [vmem:[%s5235_s27 + $0x8] sm:$0xf8]  ;;  %v628_v50 = vrot.slane %v585_v41, 1  ;;  %v4905_v63 = vld [vmem:[%s6091_s1 + $0x2c0] sm:$0xff]  }
  0x1f   : > { %v181_v25 = vpack.c.bf16 %v177_v24, %v177_v24  ;;  %v784_v43 = vld [vmem:[%s5235_s27 + $0x28] sm:$0x1f]  ;;  %v786_v44 = vpack.c.bf16 %v5244_v32, %v782_v42  ;;  %v4912_v24 = vld [vmem:[%s6091_s1 + $0x250] sm:$0xff]   ;;  %v4921_v37 = vld [vmem:[%s6091_s1 + $0x2e0] sm:$0xff]  }
  0x20   : > { %4395 = vmatpush3.bf16.msra.mxu0 %v4866_v26  ;;  %v176_v26 = vld [vmem:[%s5235_s27 + $0x20] sm:$0x3]  ;;  %v788_v45 = vpack.c.bf16 %v784_v43, %v784_v43  ;;  %v629_v58 = vsel %vm623_vm1, %v627_v49, %v628_v50  ;;  %v4924_v39 = vld [vmem:[%s6091_s1 + $0x268] sm:$0xff]   ;;  %v4928_v43 = vld [vmem:[%s6091_s1 + $0x270] sm:$0xff]  }
  0x21   : > { %4423 = vmatpush3.bf16.msra.mxu1 %v4867_v27  ;;  %4396 = vmatprep.subr.bf16.mxu0 %v4868_v28  ;;  %v180_v27 = vpack.c.bf16 %v176_v26, %v176_v26  ;;  %v4896_v28 = vld [vmem:[%s6091_s1 + $0x170] sm:$0xff]   ;;  %v841_v54 = vshrl.u32 %v786_v44, 16  ;;  %v4911_v26 = vld [vmem:[%s6091_s1 + $0x288] sm:$0xff]   ;;  %v4923_v40 = vld [vmem:[%s6091_s1 + $0x2a0] sm:$0xff]  }
  0x22   : > { %4424 = vmatprep.subr.bf16.mxu1 %v4869_v29  ;;  %v4897_v29 = vld [vmem:[%s6091_s1 + $0x1f0] sm:$0xff]   ;;  %v849_v56 = vshrl.u32 %v788_v45, 16  ;;  %v4926_v41 = vld [vmem:[%s6091_s1 + $0x228] sm:$0xff]   ;;  %v4934_v49 = vld [vmem:[%s6091_s1 + $0x238] sm:$0xff]  }
  0x23   : > { %v843_v0 = vrot.slane %v841_v54, 1  ;;  %v4925_v42 = vld [vmem:[%s6091_s1 + $0x2e8] sm:$0xff]  }
  0x24   : > { %4397 = vmatpush3.bf16.msra.mxu0 %v4870_v30  ;;  %v4898_v30 = vld [vmem:[%s6091_s1 + $0x130] sm:$0xff]   ;;  %v1212_v54 = vld [vmem:[%s5235_s27 + $0x8] sm:$0x80] }
  0x25   : > { %4425 = vmatpush3.bf16.msra.mxu1 %v4871_v31  ;;  %4438 = vmatprep.subr.bf16.mxu0 %v4872_v48  ;;  %v4899_v31 = vld [vmem:[%s6091_s1 + $0x1b0] sm:$0xff]   ;;  %v781_v48 = vld [vmem:[%s5235_s27] sm:$0xf8] }
  0x26   : > { %4466 = vmatprep.subr.bf16.mxu1 %v4873_v55  ;;  %v844_v55 = vshll.u32 %v786_v44, 16  ;;  %v785_v61 = vpack.c.bf16 %v5251_v38, %v781_v48  ;;  %v4927_v44 = vld [vmem:[%s6091_s1 + $0x2a8] sm:$0xff]   ;;  %v4931_v48 = vld [vmem:[%s6091_s1 + $0x2b0] sm:$0xff]  }
  0x27   : > { %419 = vmatmul.mubr.bf16.vlgmr.msra.gmra.mrb[0].mxu0 %v267_v2  ;;  %v851_v2 = vrot.slane %v849_v56, 1  ;;  %v4935_v56 = vld [vmem:[%s6091_s1 + $0x2b8] sm:$0xff]  }
  0x28   : > { %563 = vmatmul.mubr.bf16.vlgmr.msra.gmra.mrb[0].mxu1 %v178_v51  ;;  %4439 = vmatpush3.bf16.msra.mxu0 %v4874_v57  ;;  %v582_v51 = vpack.c.bf16 %v5251_v38, %v578_v46  ;;  %v852_v57 = vshll.u32 %v788_v45, 16  ;;  %v824_v6 = vshrl.u32 %v785_v61, 16  ;;  %v4930_v45 = vld [vmem:[%s6091_s1 + $0x230] sm:$0xff]  }
  0x29   : > { %4467 = vmatpush3.bf16.msra.mxu1 %v4875_v60  ;;  %426 = vmatprep.mubr.bf16.mxu0 %v285_v4  ;;  %v625_v60 = vrot.slane %v584_v52, 1  ;;  %v4929_v46 = vld [vmem:[%s6091_s1 + $0x2f0] sm:$0xff]   ;;  %v5470_v52 = vld [vmem:[%s5235_s27 + $0x28] sm:$0xff] }
  0x2a   : > { %4468 = vmatprep.subr.bf16.mxu1 %v4877_v1  ;;  %4440 = vmatprep.subr.bf16.mxu0 %v4876_v62  ;;  %v624_v59 = vrot.slane %v582_v51, 1  ;;  %v4904_v62 = vld [vmem:[%s6091_s1 + $0x240] sm:$0xff]   ;;  %v846_v1 = vrot.slane %v844_v55, 2  ;;  %v1009_v51 = vld [vmem:[%s5235_s27 + $0x8] sm:$0xc0] }
  0x2b   : > { %570 = vmatprep.mubr.bf16.mxu1 %v181_v25  ;;  %v1218_v55 = vld [vmem:[%s5235_s27 + $0x38] sm:$0x1] }
  0x2c   : > { %4441 = vmatpush3.bf16.msra.mxu0 %v4878_v3  ;;  %v854_v3 = vrot.slane %v852_v57, 2  ;;  %v626_v4 = vsel %vm623_vm1, %v624_v59, %v625_v60  ;;  %v1015_v57 = vpack.c.bf16 %v5470_v52, %v5470_v52  ;;  %v1222_v59 = vpack.c.bf16 %v1218_v55, %v5470_v52  ;;  %v4958_v55 = vld [vmem:[%s6091_s1 + $0x328] sm:$0xff]  }
  0x2d   : > { %4469 = vmatpush3.bf16.msra.mxu1 %v4879_v5  ;;  %4442 = vmatprep.subr.bf16.mxu0 %v4880_v7  ;;  %v787_v5 = vpack.c.bf16 %v783_v53, %v783_v53  ;;  %v827_v7 = vshll.u32 %v785_v61, 16  ;;  %v1013_v53 = vpack.c.bf16 %v5244_v32, %v1009_v51  ;;  %v5484_v61 = vld [vmem:[%s5235_s27 + $0x20] sm:$0xff] }
  0x2e   : > { %4470 = vmatprep.subr.bf16.mxu1 %v4881_v8  ;;  %v847_v8 = vor.u32 %v846_v1, %v843_v0  ;;  %v1014_v1 = vpack.c.bf16 %v5484_v61, %v5484_v61  ;;  %v4953_v51 = vld [vmem:[%s6091_s1 + $0x3e0] sm:$0xff]  }
  0x2f   : > { %427 = vmatmul.mubr.bf16.gmra.mrb[4].mxu0 %v282_v11  ;;  %v826_v11 = vrot.slane %v824_v6, 1 }
  0x30   : > { %4443 = vmatpush3.bf16.msra.mxu0 %v4882_v9  ;;  %571 = vmatmul.mubr.bf16.gmra.mrb[4].mxu1 %v180_v27  ;;  %v855_v9 = vor.u32 %v854_v3, %v851_v2  ;;  %v4914_v27 = vld [vmem:[%s6091_s1 + $0x210] sm:$0xff]   ;;  %v1211_v2 = vld [vmem:[%s5235_s27] sm:$0x80] }
  0x31   : > { %4471 = vmatpush3.bf16.msra.mxu1 %v4883_v10  ;;  %4444 = vmatprep.subr.bf16.mxu0 %v4884_v12  ;;  %v4906_v10 = vld [vmem:[%s6091_s1 + $0x200] sm:$0xff]   ;;  %v829_v12 = vrot.slane %v827_v7, 2  ;;  %v1217_v3 = vld [vmem:[%s5235_s27 + $0x30] sm:$0x1] }
  0x32   : > { %4472 = vmatprep.subr.bf16.mxu1 %v4885_v13  ;;  %762 = vmatprep.mubr.bf16.mxu0 %v629_v58  ;;  %v832_v13 = vshrl.u32 %v787_v5, 16  ;;  %v1220_v58 = vpack.c.bf16 %v5244_v32, %v1212_v54  ;;  %v4955_v54 = vld [vmem:[%s6091_s1 + $0x3a0] sm:$0xff]  }
  0x34   : > { %4445 = vmatpush3.bf16.msra.mxu0 %v4886_v14  ;;  %v835_v14 = vshll.u32 %v787_v5, 16  ;;  %v1058_v5 = vrot.slane %v1015_v57, 3  ;;  %v1275_v6 = vshrl.u32 %v1220_v58, 16  ;;  %v1278_v7 = vshll.u32 %v1220_v58, 16  ;;  %v4960_v57 = vld [vmem:[%s6091_s1 + $0x370] sm:$0xff]   ;;  %v4959_v58 = vld [vmem:[%s6091_s1 + $0x3a8] sm:$0xff]  }
  0x35   : > { %4473 = vmatpush3.bf16.msra.mxu1 %v4887_v15  ;;  %4446 = vmatprep.subr.bf16.mxu0 %v4888_v16  ;;  %v4908_v15 = vld [vmem:[%s6091_s1 + $0x248] sm:$0xff]   ;;  %v856_v16 = vsel %vm822_vm2, %v847_v8, %v855_v9  ;;  %v1283_v8 = vshrl.u32 %v1222_v59, 16 }
  0x36   : > { %4474 = vmatprep.subr.bf16.mxu1 %v4889_v17  ;;  %989 = vmatprep.mubr.bf16.mxu1 %v856_v16  ;;  %v830_v17 = vor.u32 %v829_v12, %v826_v11  ;;  %v1055_v11 = vrot.slane %v1014_v1, 3  ;;  %v1219_v12 = vpack.c.bf16 %v5251_v38, %v1211_v2  ;;  %v1280_v16 = vrot.slane %v1278_v7, 4  ;;  %v4965_v1 = vld [vmem:[%s6091_s1 + $0x3f8] sm:$0xff]   ;;  %v1628_v7 = vld [vmem:[%s5235_s27 + $0x10] sm:$0xfe] }
  0x37   : > { %v1629_v2 = vld [vmem:[%s5235_s27 + $0x18] sm:$0xfe] }
  0x38   : > { %4447 = vmatpush3.bf16.msra.mxu0 %v4890_v18  ;;  %v834_v18 = vrot.slane %v832_v13, 1  ;;  %v4938_v13 = vld [vmem:[%s6091_s1 + $0x300] sm:$0xff]  }
  0x39   : > { %4475 = vmatpush3.bf16.msra.mxu1 %v4891_v19  ;;  %4448 = vmatprep.subr.bf16.mxu0 %v4892_v20  ;;  %v837_v19 = vrot.slane %v835_v14, 2  ;;  %v4907_v20 = vld [vmem:[%s6091_s1 + $0x280] sm:$0xff]  }
  0x3a   : > { %4476 = vmatprep.subr.bf16.mxu1 %v4893_v21  ;;  %v4910_v21 = vld [vmem:[%s6091_s1 + $0x208] sm:$0xff]  }
  0x3c   : > { %4449 = vmatpush3.bf16.msra.mxu0 %v4894_v22  ;;  %v838_v22 = vor.u32 %v837_v19, %v834_v18 }
  0x3d   : > { %4477 = vmatpush3.bf16.msra.mxu1 %v4895_v23  ;;  %4450 = vmatprep.subr.bf16.mxu0 %v4896_v28  ;;  %v4909_v23 = vld [vmem:[%s6091_s1 + $0x2c8] sm:$0xff]   ;;  %v4913_v28 = vld [vmem:[%s6091_s1 + $0x2d0] sm:$0xff]  }
  0x3e   : > { %4478 = vmatprep.subr.bf16.mxu1 %v4897_v29  ;;  %v839_v25 = vsel %vm822_vm2, %v830_v17, %v838_v22  ;;  %v4916_v29 = vld [vmem:[%s6091_s1 + $0x258] sm:$0xff]   ;;  %v1285_v17 = vrot.slane %v1283_v8, 3  ;;  %v1630_v8 = vld [vmem:[%s5235_s27 + $0x30] sm:$0x7] }
  0x40   : > { %4451 = vmatpush3.bf16.msra.mxu0 %v4898_v30  ;;  %v4915_v30 = vld [vmem:[%s6091_s1 + $0x290] sm:$0xff]  }
  0x41   : > { %4479 = vmatpush3.bf16.msra.mxu1 %v4899_v31  ;;  %4452 = vmatprep.subr.bf16.mxu0 %v4900_v33  ;;  %v4918_v31 = vld [vmem:[%s6091_s1 + $0x218] sm:$0xff]  }
  0x42   : > { %4480 = vmatprep.subr.bf16.mxu1 %v4901_v34  ;;  %v4917_v33 = vld [vmem:[%s6091_s1 + $0x2d8] sm:$0xff]   ;;  %v4920_v34 = vld [vmem:[%s6091_s1 + $0x260] sm:$0xff]  }
  0x44   : > { %4453 = vmatpush3.bf16.msra.mxu0 %v4902_v35  ;;  %v4919_v35 = vld [vmem:[%s6091_s1 + $0x298] sm:$0xff]  }
  0x45   : > { %4481 = vmatpush3.bf16.msra.mxu1 %v4903_v36  ;;  %4494 = vmatprep.subr.bf16.mxu0 %v4904_v62  ;;  %v4922_v36 = vld [vmem:[%s6091_s1 + $0x220] sm:$0xff]  }
  0x46   : > { %4522 = vmatprep.subr.bf16.mxu1 %v4905_v63  ;;  %v4936_v62 = vld [vmem:[%s6091_s1 + $0x340] sm:$0xff]   ;;  %v1057_v63 = vrot.slane %v1013_v53, 3  ;;  %v4956_v53 = vld [vmem:[%s6091_s1 + $0x368] sm:$0xff]  }
  0x47   : > { %763 = vmatmul.mubr.bf16.vlgmr.msra.gmra.mrb[8].mxu0 %v626_v4  ;;  %v4937_v4 = vld [vmem:[%s6091_s1 + $0x3c0] sm:$0xff]  }
  0x48   : > { %770 = vmatprep.mubr.bf16.mxu0 %v628_v50  ;;  %4495 = vmatpush3.bf16.msra.mxu0 %v4906_v10  ;;  %v4933_v50 = vld [vmem:[%s6091_s1 + $0x2f8] sm:$0xff]   ;;  %v1059_v14 = vsel %vm1053_vm3, %v1057_v63, %v1058_v5  ;;  %v4963_v63 = vld [vmem:[%s6091_s1 + $0x3b0] sm:$0xff]  }
  0x49   : > { %4496 = vmatprep.subr.bf16.mxu0 %v4908_v15  ;;  %990 = vmatmul.mubr.bf16.vlgmr.msra.gmra.mrb[8].mxu1 %v839_v25  ;;  %v1277_v15 = vrot.slane %v1275_v6, 3 }
  0x4a   : > { %4523 = vmatpush3.bf16.msra.mxu1 %v4907_v20  ;;  %997 = vmatprep.mubr.bf16.mxu1 %v855_v9  ;;  %v1286_v9 = vshll.u32 %v1222_v59, 16  ;;  %v1221_v20 = vpack.c.bf16 %v1217_v3, %v5484_v61  ;;  %v4962_v59 = vld [vmem:[%s6091_s1 + $0x330] sm:$0xff]   ;;  %v1631_v3 = vld [vmem:[%s5235_s27 + $0x38] sm:$0x7] }
  0x4b   : > { %4524 = vmatprep.subr.bf16.mxu1 %v4909_v23  ;;  %v4940_v23 = vld [vmem:[%s6091_s1 + $0x348] sm:$0xff]  }
  0x4c   : > { %4497 = vmatpush3.bf16.msra.mxu0 %v4910_v21  ;;  %v1288_v18 = vrot.slane %v1286_v9, 4  ;;  %v1258_v21 = vshrl.u32 %v1219_v12, 16  ;;  %v1635_v9 = vpack.c.bf16 %v1631_v3, %v1631_v3  ;;  %v4998_v3 = vld [vmem:[%s6091_s1 + $0x438] sm:$0xff]  }
  0x4d   : > { %4498 = vmatprep.subr.bf16.mxu0 %v4912_v24 }
  0x4e   : > { %4525 = vmatpush3.bf16.msra.mxu1 %v4911_v26  ;;  %v1289_v24 = vor.u32 %v1288_v18, %v1285_v17  ;;  %v1260_v25 = vrot.slane %v1258_v21, 3  ;;  %v1266_v26 = vshrl.u32 %v1221_v20, 16 }
  0x4f   : > { %771 = vmatmul.mubr.bf16.gmra.mrb[12].mxu0 %v625_v60  ;;  %4526 = vmatprep.subr.bf16.mxu1 %v4913_v28  ;;  %v1008_v60 = vld [vmem:[%s5235_s27] sm:$0xc0] }
  0x50   : > { %4499 = vmatpush3.bf16.msra.mxu0 %v4914_v27  ;;  %v1012_v0 = vpack.c.bf16 %v5251_v38, %v1008_v60  ;;  %1192 = vmatprep.mubr.bf16.mxu0 %v1059_v14  ;;  %v1261_v38 = vshll.u32 %v1219_v12, 16  ;;  %v1269_v27 = vshll.u32 %v1221_v20, 16  ;;  %v4961_v60 = vld [vmem:[%s6091_s1 + $0x3f0] sm:$0xff]   ;;  %v4968_v12 = vld [vmem:[%s6091_s1 + $0x440] sm:$0xff]  }
  0x51   : > { %4500 = vmatprep.subr.bf16.mxu0 %v4916_v29  ;;  %998 = vmatmul.mubr.bf16.gmra.mrb[12].mxu1 %v838_v22  ;;  %v1281_v22 = vor.u32 %v1280_v16, %v1277_v15  ;;  %v4942_v29 = vld [vmem:[%s6091_s1 + $0x308] sm:$0xff]   ;;  %v4967_v15 = vld [vmem:[%s6091_s1 + $0x3b8] sm:$0xff]   ;;  %v1689_v16 = vshll.u32 %v1635_v9, 16  ;;  %v4970_v20 = vld [vmem:[%s6091_s1 + $0x400] sm:$0xff]  }
  0x52   : > { %4527 = vmatpush3.bf16.msra.mxu1 %v4915_v30  ;;  %v1054_v10 = vrot.slane %v1012_v0, 3  ;;  %v1263_v28 = vrot.slane %v1261_v38, 4  ;;  %v4966_v0 = vld [vmem:[%s6091_s1 + $0x338] sm:$0xff]  }
  0x53   : > { %4528 = vmatprep.subr.bf16.mxu1 %v4917_v33  ;;  %v1290_v30 = vsel %vm1256_vm4, %v1281_v22, %v1289_v24  ;;  %v1271_v33 = vrot.slane %v1269_v27, 4  ;;  %v4969_v22 = vld [vmem:[%s6091_s1 + $0x4c0] sm:$0xff]   ;;  %v1691_v38 = vrot.slane %v1689_v16, 1 }
  0x54   : > { %4501 = vmatpush3.bf16.msra.mxu0 %v4918_v31  ;;  %v1056_v19 = vsel %vm1053_vm3, %v1054_v10, %v1055_v11  ;;  %v1268_v31 = vrot.slane %v1266_v26, 3  ;;  %1423 = vmatprep.mubr.bf16.mxu1 %v1290_v30  ;;  %v1632_v10 = vpack.c.bf16 %v5484_v61, %v1628_v7  ;;  %v4972_v26 = vld [vmem:[%s6091_s1 + $0x448] sm:$0xff]   ;;  %v1696_v30 = vshrl.u32 %v1635_v9, 16  ;;  %v2056_v9 = vld [vmem:[%s5235_s27 + $0x38] sm:$0x7f] }
  0x55   : > { %4502 = vmatprep.subr.bf16.mxu0 %v4920_v34  ;;  %v4939_v34 = vld [vmem:[%s6091_s1 + $0x380] sm:$0xff]  }
  0x56   : > { %4529 = vmatpush3.bf16.msra.mxu1 %v4919_v35  ;;  %v1264_v35 = vor.u32 %v1263_v28, %v1260_v25  ;;  %v1670_v17 = vshrl.u32 %v1632_v10, 16  ;;  %v1672_v18 = vshll.u32 %v1632_v10, 16  ;;  %v4971_v25 = vld [vmem:[%s6091_s1 + $0x480] sm:$0xff]  }
  0x57   : > { %4530 = vmatprep.subr.bf16.mxu1 %v4921_v37  ;;  %v4941_v37 = vld [vmem:[%s6091_s1 + $0x3c8] sm:$0xff]  }
  0x58   : > { %4503 = vmatpush3.bf16.msra.mxu0 %v4922_v36  ;;  %v1272_v36 = vor.u32 %v1271_v33, %v1268_v31  ;;  %v4974_v33 = vld [vmem:[%s6091_s1 + $0x408] sm:$0xff]  }
  0x59   : > { %4504 = vmatprep.subr.bf16.mxu0 %v4924_v39  ;;  %v4944_v39 = vld [vmem:[%s6091_s1 + $0x350] sm:$0xff]  }
  0x5a   : > { %4531 = vmatpush3.bf16.msra.mxu1 %v4923_v40  ;;  %v1273_v40 = vsel %vm1256_vm4, %v1264_v35, %v1272_v36  ;;  %v4975_v35 = vld [vmem:[%s6091_s1 + $0x488] sm:$0xff]  }
  0x5b   : > { %4532 = vmatprep.subr.bf16.mxu1 %v4925_v42  ;;  %v1445_v42 = vpack.c.bf16 %v5470_v52, %v5244_v32  ;;  %v4947_v32 = vld [vmem:[%s6091_s1 + $0x390] sm:$0xff]  }
  0x5c   : > { %4505 = vmatpush3.bf16.msra.mxu0 %v4926_v41  ;;  %v4943_v41 = vld [vmem:[%s6091_s1 + $0x388] sm:$0xff]  }
  0x5d   : > { %4506 = vmatprep.subr.bf16.mxu0 %v4928_v43  ;;  %v4946_v43 = vld [vmem:[%s6091_s1 + $0x310] sm:$0xff]  }
  0x5e   : > { %4533 = vmatpush3.bf16.msra.mxu1 %v4927_v44  ;;  %v4945_v44 = vld [vmem:[%s6091_s1 + $0x3d0] sm:$0xff]  }
  0x5f   : > { %4534 = vmatprep.subr.bf16.mxu1 %v4929_v46  ;;  %v4950_v46 = vld [vmem:[%s6091_s1 + $0x318] sm:$0xff]  }
  0x60   : > { %4507 = vmatpush3.bf16.msra.mxu0 %v4930_v45  ;;  %v4948_v45 = vld [vmem:[%s6091_s1 + $0x358] sm:$0xff]  }
  0x61   : > { %4508 = vmatprep.subr.bf16.mxu0 %v4932_v47  ;;  %v4949_v47 = vld [vmem:[%s6091_s1 + $0x3d8] sm:$0xff]  }
  0x62   : > { %4535 = vmatpush3.bf16.msra.mxu1 %v4931_v48  ;;  %v4952_v48 = vld [vmem:[%s6091_s1 + $0x360] sm:$0xff]  }
  0x63   : > { %4536 = vmatprep.subr.bf16.mxu1 %v4933_v50  ;;  %v4954_v50 = vld [vmem:[%s6091_s1 + $0x320] sm:$0xff]  }
  0x64   : > { %4509 = vmatpush3.bf16.msra.mxu0 %v4934_v49  ;;  %v4951_v49 = vld [vmem:[%s6091_s1 + $0x398] sm:$0xff]  }
  0x65   : > { %4550 = vmatprep.subr.bf16.mxu0 %v4936_v62  ;;  %v4964_v62 = vld [vmem:[%s6091_s1 + $0x378] sm:$0xff]  }
  0x66   : > { %4537 = vmatpush3.bf16.msra.mxu1 %v4935_v56  ;;  %v4957_v56 = vld [vmem:[%s6091_s1 + $0x3e8] sm:$0xff]  }
  0x67   : > { %1193 = vmatmul.mubr.bf16.vlgmr.msra.gmra.mrb[16].mxu0 %v1056_v19  ;;  %4578 = vmatprep.subr.bf16.mxu1 %v4937_v4  ;;  %v1633_v4 = vpack.c.bf16 %v5470_v52, %v1629_v2  ;;  %v4997_v2 = vld [vmem:[%s6091_s1 + $0x4f8] sm:$0xff]  }
  0x68   : > { %4551 = vmatpush3.bf16.msra.mxu0 %v4938_v13  ;;  %1200 = vmatprep.mubr.bf16.mxu0 %v1058_v5  ;;  %v5096_v5 = vld [vmem:[%s5235_s27 + $0x10] sm:$0xff] }
  0x69   : > { %4552 = vmatprep.subr.bf16.mxu0 %v4940_v23  ;;  %1424 = vmatmul.mubr.bf16.vlgmr.msra.gmra.mrb[16].mxu1 %v1273_v40  ;;  %v1444_v6 = vpack.c.bf16 %v5484_v61, %v5096_v5  ;;  %v1682_v13 = vshrl.u32 %v1633_v4, 16  ;;  %v1684_v14 = vshll.u32 %v1633_v4, 16  ;;  %v1674_v23 = vrot.slane %v1672_v18, 1  ;;  %v1442_v40 = vld [vmem:[%s5235_s27 + $0x30] sm:$0x3]  ;;  %v4999_v4 = vld [vmem:[%s6091_s1 + $0x4b8] sm:$0xff]  }
  0x6a   : > { %4579 = vmatpush3.bf16.msra.mxu1 %v4939_v34  ;;  %1431 = vmatprep.mubr.bf16.mxu1 %v1289_v24  ;;  %v1851_v5 = vld [vmem:[%s5235_s27 + $0x18] sm:$0xf0]  ;;  %v2053_v18 = vld [vmem:[%s5235_s27 + $0x10] sm:$0xe0] }
  0x6b   : > { %4580 = vmatprep.subr.bf16.mxu1 %v4941_v37  ;;  %v1686_v21 = vrot.slane %v1684_v14, 1  ;;  %v1675_v28 = vor.u32 %v1674_v23, %v1670_v17  ;;  %v1855_v7 = vpack.c.bf16 %v5470_v52, %v1851_v5  ;;  %v1852_v14 = vld [vmem:[%s5235_s27 + $0x30] sm:$0x3f]  ;;  %v5019_v5 = vld [vmem:[%s6091_s1 + $0x5a0] sm:$0xff]  }
  0x6c   : > { %4553 = vmatpush3.bf16.msra.mxu0 %v4942_v29  ;;  %v4973_v29 = vld [vmem:[%s6091_s1 + $0x4c8] sm:$0xff]   ;;  %v1856_v17 = vpack.c.bf16 %v1852_v14, %v1852_v14  ;;  %v5030_v14 = vld [vmem:[%s6091_s1 + $0x538] sm:$0xff]  }
  0x6d   : > { %4554 = vmatprep.subr.bf16.mxu0 %v4944_v39  ;;  %v1687_v27 = vor.u32 %v1686_v21, %v1682_v13  ;;  %v1443_v39 = vld [vmem:[%s5235_s27 + $0x38] sm:$0x3]  ;;  %v1850_v13 = vld [vmem:[%s5235_s27 + $0x10] sm:$0xf0] }
  0x6e   : > { %4581 = vmatpush3.bf16.msra.mxu1 %v4943_v41  ;;  %v1447_v41 = vpack.c.bf16 %v1443_v39, %v1443_v39  ;;  %v1854_v16 = vpack.c.bf16 %v5484_v61, %v1850_v13  ;;  %v5027_v13 = vld [vmem:[%s6091_s1 + $0x5b0] sm:$0xff]  }
  0x6f   : > { %1201 = vmatmul.mubr.bf16.gmra.mrb[20].mxu0 %v1055_v11  ;;  %4582 = vmatprep.subr.bf16.mxu1 %v4945_v44  ;;  %v1634_v11 = vpack.c.bf16 %v1630_v8, %v1630_v8  ;;  %v1692_v31 = vsel %vm255_vm0, %v1687_v27, %v1691_v38  ;;  %v4977_v44 = vld [vmem:[%s6091_s1 + $0x4d0] sm:$0xff]   ;;  %v2054_v8 = vld [vmem:[%s5235_s27 + $0x18] sm:$0xe0]  ;;  %v5001_v27 = vld [vmem:[%s6091_s1 + $0x5c0] sm:$0xff]  }
  0x70   : > { %4555 = vmatpush3.bf16.msra.mxu0 %v4946_v43  ;;  %1609 = vmatprep.mubr.bf16.mxu0 %v1445_v42  ;;  %v1446_v42 = vpack.c.bf16 %v1442_v40, %v1442_v40  ;;  %v4976_v43 = vld [vmem:[%s6091_s1 + $0x450] sm:$0xff]  }
  0x71   : > { %4556 = vmatprep.subr.bf16.mxu0 %v4948_v45  ;;  %1432 = vmatmul.mubr.bf16.gmra.mrb[20].mxu1 %v1272_v36  ;;  %v1677_v19 = vshll.u32 %v1634_v11, 16  ;;  %v1698_v36 = vor.u32 %v1696_v30, %v1691_v38  ;;  %v1693_v37 = vshrl.u32 %v1634_v11, 16  ;;  %v4978_v45 = vld [vmem:[%s6091_s1 + $0x410] sm:$0xff]   ;;  %v2058_v11 = vpack.c.bf16 %v5470_v52, %v2054_v8 }
  0x72   : > { %4583 = vmatpush3.bf16.msra.mxu1 %v4947_v32  ;;  %1831 = vmatprep.mubr.bf16.mxu1 %v1692_v31  ;;  %v4979_v32 = vld [vmem:[%s6091_s1 + $0x490] sm:$0xff]  }
  0x73   : > { %4584 = vmatprep.subr.bf16.mxu1 %v4949_v47  ;;  %v1679_v24 = vrot.slane %v1677_v19, 1  ;;  %v4980_v47 = vld [vmem:[%s6091_s1 + $0x458] sm:$0xff]   ;;  %v2055_v19 = vld [vmem:[%s5235_s27 + $0x30] sm:$0x7f]  ;;  %v2116_v38 = vshll.u32 %v2058_v11, 16 }
  0x74   : > { %4557 = vmatpush3.bf16.msra.mxu0 %v4950_v46  ;;  %v5024_v8 = vld [vmem:[%s6091_s1 + $0x570] sm:$0xff]  }
  0x75   : > { %4558 = vmatprep.subr.bf16.mxu0 %v4952_v48  ;;  %v1680_v34 = vsel %vm255_vm0, %v1675_v28, %v1679_v24  ;;  %v1695_v46 = vor.u32 %v1693_v37, %v1679_v24  ;;  %v4981_v48 = vld [vmem:[%s6091_s1 + $0x4d8] sm:$0xff]   ;;  %v1896_v24 = vrot.slane %v1854_v16, 2  ;;  %v2118_v30 = vrot.slane %v2116_v38, 3  ;;  %v2485_v38 = vld [vmem:[%s5235_s27 + $0x28] sm:$0xff] }
  0x76   : > { %4585 = vmatpush3.bf16.msra.mxu1 %v4951_v49  ;;  %v4982_v49 = vld [vmem:[%s6091_s1 + $0x418] sm:$0xff]  }
  0x77   : > { %4586 = vmatprep.subr.bf16.mxu1 %v4953_v51  ;;  %v4984_v51 = vld [vmem:[%s6091_s1 + $0x460] sm:$0xff]   ;;  %v2281_v16 = vld [vmem:[%s5235_s27 + $0x18] sm:$0xc0] }
  0x78   : > { %4559 = vmatpush3.bf16.msra.mxu0 %v4954_v50  ;;  %v4983_v50 = vld [vmem:[%s6091_s1 + $0x498] sm:$0xff]  }
  0x79   : > { %4560 = vmatprep.subr.bf16.mxu0 %v4956_v53  ;;  %v4985_v53 = vld [vmem:[%s6091_s1 + $0x4e0] sm:$0xff]  }
  0x7a   : > { %4587 = vmatpush3.bf16.msra.mxu1 %v4955_v54  ;;  %v4986_v54 = vld [vmem:[%s6091_s1 + $0x420] sm:$0xff]  }
  0x7b   : > { %4588 = vmatprep.subr.bf16.mxu1 %v4957_v56  ;;  %v4988_v56 = vld [vmem:[%s6091_s1 + $0x468] sm:$0xff]  }
  0x7c   : > { %4561 = vmatpush3.bf16.msra.mxu0 %v4958_v55  ;;  %v4987_v55 = vld [vmem:[%s6091_s1 + $0x4a0] sm:$0xff]  }
  0x7d   : > { %4562 = vmatprep.subr.bf16.mxu0 %v4960_v57  ;;  %v4989_v57 = vld [vmem:[%s6091_s1 + $0x4e8] sm:$0xff]  }
  0x7e   : > { %4589 = vmatpush3.bf16.msra.mxu1 %v4959_v58  ;;  %v4990_v58 = vld [vmem:[%s6091_s1 + $0x428] sm:$0xff]  }
  0x7f   : > { %4590 = vmatprep.subr.bf16.mxu1 %v4961_v60  ;;  %v4992_v60 = vld [vmem:[%s6091_s1 + $0x470] sm:$0xff]  }
  0x80   : > { %4563 = vmatpush3.bf16.msra.mxu0 %v4962_v59  ;;  %v4991_v59 = vld [vmem:[%s6091_s1 + $0x4a8] sm:$0xff]  }
  0x81   : > { %4564 = vmatprep.subr.bf16.mxu0 %v4964_v62  ;;  %v4993_v62 = vld [vmem:[%s6091_s1 + $0x4f0] sm:$0xff]  }
  0x82   : > { %4591 = vmatpush3.bf16.msra.mxu1 %v4963_v63  ;;  %v4994_v63 = vld [vmem:[%s6091_s1 + $0x430] sm:$0xff]  }
  0x83   : > { %4592 = vmatprep.subr.bf16.mxu1 %v4965_v1  ;;  %v4996_v1 = vld [vmem:[%s6091_s1 + $0x478] sm:$0xff]  }
  0x84   : > { %4565 = vmatpush3.bf16.msra.mxu0 %v4966_v0  ;;  %v4995_v0 = vld [vmem:[%s6091_s1 + $0x4b0] sm:$0xff]  }
  0x85   : > { %4606 = vmatprep.subr.bf16.mxu0 %v4968_v12  ;;  %v2060_v12 = vpack.c.bf16 %v2056_v9, %v2056_v9  ;;  %v5023_v9 = vld [vmem:[%s6091_s1 + $0x5a8] sm:$0xff]  }
  0x86   : > { %4593 = vmatpush3.bf16.msra.mxu1 %v4967_v15  ;;  %v1899_v15 = vrot.slane %v1855_v7, 2  ;;  %v5021_v7 = vld [vmem:[%s6091_s1 + $0x5e8] sm:$0xff]  }
  0x87   : > { %1610 = vmatmul.mubr.bf16.vlgmr.msra.gmra.mrb[24].mxu0 %v1444_v6  ;;  %4634 = vmatprep.subr.bf16.mxu1 %v4969_v22  ;;  %v1853_v6 = vld [vmem:[%s5235_s27 + $0x38] sm:$0x3f]  ;;  %v2113_v22 = vshrl.u32 %v2058_v11, 16  ;;  %v2121_v23 = vshrl.u32 %v2060_v12, 16  ;;  %v2124_v52 = vshll.u32 %v2060_v12, 16  ;;  %v5025_v11 = vld [vmem:[%s6091_s1 + $0x5f0] sm:$0xff]  }
  0x88   : > { %4607 = vmatpush3.bf16.msra.mxu0 %v4970_v20  ;;  %1617 = vmatprep.mubr.bf16.mxu0 %v1447_v41  ;;  %v1857_v10 = vpack.c.bf16 %v1853_v6, %v1853_v6  ;;  %v5000_v20 = vld [vmem:[%s6091_s1 + $0x540] sm:$0xff]   ;;  %v5022_v6 = vld [vmem:[%s6091_s1 + $0x528] sm:$0xff]   ;;  %v5028_v12 = vld [vmem:[%s6091_s1 + $0x578] sm:$0xff]  }
  0x89   : > { %4608 = vmatprep.subr.bf16.mxu0 %v4972_v26  ;;  %1832 = vmatmul.mubr.bf16.vlgmr.msra.gmra.mrb[24].mxu1 %v1680_v34  ;;  %v2057_v26 = vpack.c.bf16 %v5484_v61, %v2053_v18  ;;  %v2123_v31 = vrot.slane %v2121_v23, 2  ;;  %v2126_v34 = vrot.slane %v2124_v52, 3  ;;  %v2483_v18 = vld [vmem:[%s5235_s27 + $0x18] sm:$0x80]  ;;  %v2489_v23 = vld [vmem:[%s5235_s27 + $0x48] sm:$0x1] }
  0x8a   : > { %4635 = vmatpush3.bf16.msra.mxu1 %v4971_v25  ;;  %1839 = vmatprep.mubr.bf16.mxu1 %v1698_v36  ;;  %v1900_v21 = vrot.slane %v1857_v10, 2  ;;  %v1897_v25 = vrot.slane %v1856_v17, 2  ;;  %v2059_v36 = vpack.c.bf16 %v2055_v19, %v2055_v19  ;;  %v5026_v10 = vld [vmem:[%s6091_s1 + $0x530] sm:$0xff]   ;;  %v5814_v17 = vld [vmem:[%s5235_s27 + $0x38] sm:$0xff] }
  0x8b   : > { %4636 = vmatprep.subr.bf16.mxu1 %v4973_v29  ;;  %v2115_v29 = vrot.slane %v2113_v22, 2  ;;  %v2096_v61 = vshrl.u32 %v2057_v26, 16  ;;  %v2099_v39 = vshll.u32 %v2057_v26, 16  ;;  %v2127_v40 = vor.u32 %v2126_v34, %v2123_v31  ;;  %v5031_v19 = vld [vmem:[%s6091_s1 + $0x5b8] sm:$0xff]   ;;  %v2280_v52 = vld [vmem:[%s5235_s27 + $0x10] sm:$0xc0] }
  0x8c   : > { %4609 = vmatpush3.bf16.msra.mxu0 %v4974_v33  ;;  %v1901_v28 = vsel %vm1895_vm5, %v1899_v15, %v1900_v21  ;;  %v5002_v33 = vld [vmem:[%s6091_s1 + $0x500] sm:$0xff]   ;;  %v5029_v15 = vld [vmem:[%s6091_s1 + $0x5f8] sm:$0xff]   ;;  %v2287_v22 = vpack.c.bf16 %v5814_v17, %v5814_v17  ;;  %v5828_v26 = vld [vmem:[%s5235_s27 + $0x30] sm:$0xff] }
  0x8d   : > { %4610 = vmatprep.subr.bf16.mxu0 %v4976_v43  ;;  %v2119_v37 = vor.u32 %v2118_v30, %v2115_v29  ;;  %v2098_v41 = vrot.slane %v2096_v61, 2  ;;  %v2107_v43 = vshll.u32 %v2059_v36, 16  ;;  %v2482_v29 = vld [vmem:[%s5235_s27 + $0x10] sm:$0x80]  ;;  %v2484_v30 = vld [vmem:[%s5235_s27 + $0x20] sm:$0xff]  ;;  %v2286_v34 = vpack.c.bf16 %v5828_v26, %v5828_v26 }
  0x8e   : > { %4637 = vmatpush3.bf16.msra.mxu1 %v4975_v35  ;;  %v1898_v35 = vsel %vm1895_vm5, %v1896_v24, %v1897_v25  ;;  %v2491_v24 = vpack.c.bf16 %v2485_v38, %v2483_v18  ;;  %v5047_v18 = vld [vmem:[%s6091_s1 + $0x698] sm:$0xff]   ;;  %v5054_v38 = vld [vmem:[%s6091_s1 + $0x628] sm:$0xff]  }
  0x8f   : > { %1618 = vmatmul.mubr.bf16.gmra.mrb[28].mxu0 %v1446_v42  ;;  %4638 = vmatprep.subr.bf16.mxu1 %v4977_v44  ;;  %v2104_v42 = vshrl.u32 %v2059_v36, 16  ;;  %v5004_v44 = vld [vmem:[%s6091_s1 + $0x548] sm:$0xff]   ;;  %v2490_v36 = vpack.c.bf16 %v2484_v30, %v2482_v29  ;;  %v5059_v30 = vld [vmem:[%s6091_s1 + $0x6b0] sm:$0xff]  }
  0x90   : > { %4611 = vmatpush3.bf16.msra.mxu0 %v4978_v45  ;;  %2034 = vmatprep.mubr.bf16.mxu0 %v1901_v28  ;;  %v2101_v45 = vrot.slane %v2099_v39, 3  ;;  %v2545_v61 = vshrl.u32 %v2491_v24, 16 }
  0x91   : > { %4612 = vmatprep.subr.bf16.mxu0 %v4980_v47  ;;  %1840 = vmatmul.mubr.bf16.gmra.mrb[28].mxu1 %v1695_v46  ;;  %v2106_v46 = vrot.slane %v2104_v42, 2  ;;  %v2109_v47 = vrot.slane %v2107_v43, 3  ;;  %v2326_v43 = vrot.slane %v2286_v34, 3 }
  0x92   : > { %4639 = vmatpush3.bf16.msra.mxu1 %v4979_v32  ;;  %v2128_v32 = vsel %vm2094_vm6, %v2119_v37, %v2127_v40  ;;  %v2548_v37 = vshll.u32 %v2491_v24, 16  ;;  %v5055_v24 = vld [vmem:[%s6091_s1 + $0x6a8] sm:$0xff]  }
  0x93   : > { %4640 = vmatprep.subr.bf16.mxu1 %v4981_v48  ;;  %v5003_v48 = vld [vmem:[%s6091_s1 + $0x580] sm:$0xff]   ;;  %2261 = vmatprep.mubr.bf16.mxu1 %v2128_v32 }
  0x94   : > { %4613 = vmatpush3.bf16.msra.mxu0 %v4982_v49  ;;  %v2102_v49 = vor.u32 %v2101_v45, %v2098_v41  ;;  %v5032_v45 = vld [vmem:[%s6091_s1 + $0x640] sm:$0xff]  }
  0x95   : > { %4614 = vmatprep.subr.bf16.mxu0 %v4984_v51  ;;  %v2110_v51 = vor.u32 %v2109_v47, %v2106_v46  ;;  %v5033_v32 = vld [vmem:[%s6091_s1 + $0x6c0] sm:$0xff]   ;;  %v2547_v46 = vrot.slane %v2545_v61, 3  ;;  %v2550_v47 = vrot.slane %v2548_v37, 4  ;;  %v2713_v61 = vld [vmem:[%s5235_s27 + $0x28] sm:$0xfc] }
  0x96   : > { %4641 = vmatpush3.bf16.msra.mxu1 %v4983_v50  ;;  %v5006_v50 = vld [vmem:[%s6091_s1 + $0x508] sm:$0xff]  }
  0x97   : > { %4642 = vmatprep.subr.bf16.mxu1 %v4985_v53  ;;  %v5005_v53 = vld [vmem:[%s6091_s1 + $0x5c8] sm:$0xff]  }
  0x98   : > { %4615 = vmatpush3.bf16.msra.mxu0 %v4986_v54  ;;  %v5008_v54 = vld [vmem:[%s6091_s1 + $0x550] sm:$0xff]  }
  0x99   : > { %4616 = vmatprep.subr.bf16.mxu0 %v4988_v56  ;;  %v5007_v56 = vld [vmem:[%s6091_s1 + $0x588] sm:$0xff]  }
  0x9a   : > { %4643 = vmatpush3.bf16.msra.mxu1 %v4987_v55  ;;  %v2111_v55 = vsel %vm2094_vm6, %v2102_v49, %v2110_v51 }
  0x9b   : > { %4644 = vmatprep.subr.bf16.mxu1 %v4989_v57  ;;  %v5010_v57 = vld [vmem:[%s6091_s1 + $0x510] sm:$0xff]  }
  0x9c   : > { %4617 = vmatpush3.bf16.msra.mxu0 %v4990_v58  ;;  %v5009_v58 = vld [vmem:[%s6091_s1 + $0x5d0] sm:$0xff]  }
  0x9d   : > { %4618 = vmatprep.subr.bf16.mxu0 %v4992_v60  ;;  %v5011_v60 = vld [vmem:[%s6091_s1 + $0x590] sm:$0xff]  }
  0x9e   : > { %4645 = vmatpush3.bf16.msra.mxu1 %v4991_v59  ;;  %v5012_v59 = vld [vmem:[%s6091_s1 + $0x558] sm:$0xff]  }
  0x9f   : > { %4646 = vmatprep.subr.bf16.mxu1 %v4993_v62  ;;  %v5014_v62 = vld [vmem:[%s6091_s1 + $0x518] sm:$0xff]  }
  0xa0   : > { %4619 = vmatpush3.bf16.msra.mxu0 %v4994_v63  ;;  %v5013_v63 = vld [vmem:[%s6091_s1 + $0x5d8] sm:$0xff]  }
  0xa1   : > { %4620 = vmatprep.subr.bf16.mxu0 %v4996_v1  ;;  %v5015_v1 = vld [vmem:[%s6091_s1 + $0x598] sm:$0xff]  }
  0xa2   : > { %4647 = vmatpush3.bf16.msra.mxu1 %v4995_v0  ;;  %v5016_v0 = vld [vmem:[%s6091_s1 + $0x560] sm:$0xff]  }
  0xa3   : > { %4648 = vmatprep.subr.bf16.mxu1 %v4997_v2  ;;  %v5018_v2 = vld [vmem:[%s6091_s1 + $0x520] sm:$0xff]  }
  0xa4   : > { %4621 = vmatpush3.bf16.msra.mxu0 %v4998_v3  ;;  %v5017_v3 = vld [vmem:[%s6091_s1 + $0x5e0] sm:$0xff]  }
  0xa5   : > { %4662 = vmatprep.subr.bf16.mxu0 %v5000_v20  ;;  %v5097_v20 = vld [vmem:[%s5235_s27 + $0x28] sm:$0xff] }
  0xa6   : > { %4649 = vmatpush3.bf16.msra.mxu1 %v4999_v4  ;;  %v5020_v4 = vld [vmem:[%s6091_s1 + $0x568] sm:$0xff]  }
  0xa7   : > { %4690 = vmatprep.subr.bf16.mxu1 %v5001_v27  ;;  %2035 = vmatmul.mubr.bf16.vlgmr.msra.gmra.mrb[32].mxu0 %v1898_v35  ;;  %v5098_v27 = vld [vmem:[%s5235_s27 + $0x20] sm:$0xff] }
  0xa8   : > { %4663 = vmatpush3.bf16.msra.mxu0 %v5002_v33  ;;  %2042 = vmatprep.mubr.bf16.mxu0 %v1900_v21  ;;  %v2285_v21 = vpack.c.bf16 %v5097_v20, %v2281_v16  ;;  %v2284_v28 = vpack.c.bf16 %v5098_v27, %v2280_v52  ;;  %v2329_v33 = vrot.slane %v2287_v22, 3  ;;  %v2488_v35 = vld [vmem:[%s5235_s27 + $0x40] sm:$0x1]  ;;  %v5056_v52 = vld [vmem:[%s6091_s1 + $0x670] sm:$0xff]  }
  0xa9   : > { %4664 = vmatprep.subr.bf16.mxu0 %v5004_v44  ;;  %2262 = vmatmul.mubr.bf16.vlgmr.msra.gmra.mrb[32].mxu1 %v2111_v55  ;;  %v2492_v44 = vpack.c.bf16 %v2488_v35, %v5828_v26  ;;  %v5034_v55 = vld [vmem:[%s6091_s1 + $0x600] sm:$0xff]   ;;  %v5057_v27 = vld [vmem:[%s6091_s1 + $0x6f0] sm:$0xff]  }
  0xaa   : > { %4691 = vmatpush3.bf16.msra.mxu1 %v5003_v48  ;;  %2269 = vmatprep.mubr.bf16.mxu1 %v2127_v40  ;;  %v2328_v31 = vrot.slane %v2285_v21, 3  ;;  %v2325_v42 = vrot.slane %v2284_v28, 3  ;;  %v5048_v16 = vld [vmem:[%s6091_s1 + $0x660] sm:$0xff]   ;;  %v5052_v21 = vld [vmem:[%s6091_s1 + $0x668] sm:$0xff]   ;;  %v5060_v28 = vld [vmem:[%s6091_s1 + $0x678] sm:$0xff]  }
  0xab   : > { %4692 = vmatprep.subr.bf16.mxu1 %v5005_v53  ;;  %v2531_v53 = vshll.u32 %v2490_v36, 16  ;;  %v5049_v20 = vld [vmem:[%s6091_s1 + $0x6e0] sm:$0xff]  }
  0xac   : > { %4665 = vmatpush3.bf16.msra.mxu0 %v5006_v50  ;;  %v2330_v41 = vsel %vm1053_vm3, %v2328_v31, %v2329_v33  ;;  %v2327_v50 = vsel %vm1053_vm3, %v2325_v42, %v2326_v43  ;;  %v5051_v22 = vld [vmem:[%s6091_s1 + $0x6a0] sm:$0xff]   ;;  %v2915_v42 = vld [vmem:[%s5235_s27 + $0x28] sm:$0xf8] }
  0xad   : > { %4666 = vmatprep.subr.bf16.mxu0 %v5008_v54  ;;  %v2536_v54 = vshrl.u32 %v2492_v44, 16 }
  0xae   : > { %4693 = vmatpush3.bf16.msra.mxu1 %v5007_v56  ;;  %v2551_v56 = vor.u32 %v2550_v47, %v2547_v46  ;;  %v2712_v47 = vld [vmem:[%s5235_s27 + $0x20] sm:$0xfc] }
  0xaf   : > { %2043 = vmatmul.mubr.bf16.gmra.mrb[36].mxu0 %v1897_v25  ;;  %4694 = vmatprep.subr.bf16.mxu1 %v5009_v58  ;;  %v2493_v25 = vpack.c.bf16 %v2489_v23, %v5814_v17  ;;  %v2539_v58 = vshll.u32 %v2492_v44, 16  ;;  %v5053_v23 = vld [vmem:[%s6091_s1 + $0x6e8] sm:$0xff]  }
  0xb0   : > { %4667 = vmatpush3.bf16.msra.mxu0 %v5010_v57  ;;  %2463 = vmatprep.mubr.bf16.mxu0 %v2330_v41  ;;  %v2717_v41 = vpack.c.bf16 %v5814_v17, %v2713_v61  ;;  %v5074_v61 = vld [vmem:[%s6091_s1 + $0x710] sm:$0xff]  }
  0xb1   : > { %4668 = vmatprep.subr.bf16.mxu0 %v5012_v59  ;;  %2270 = vmatmul.mubr.bf16.gmra.mrb[36].mxu1 %v2110_v51  ;;  %v2553_v39 = vshrl.u32 %v2493_v25, 16  ;;  %v2556_v40 = vshll.u32 %v2493_v25, 16  ;;  %v2528_v51 = vshrl.u32 %v2490_v36, 16  ;;  %v5058_v25 = vld [vmem:[%s6091_s1 + $0x630] sm:$0xff]   ;;  %v5061_v36 = vld [vmem:[%s6091_s1 + $0x6f8] sm:$0xff]  }
  0xb2   : > { %4695 = vmatpush3.bf16.msra.mxu1 %v5011_v60  ;;  %v2533_v60 = vrot.slane %v2531_v53, 4 }
  0xb3   : > { %4696 = vmatprep.subr.bf16.mxu1 %v5013_v63  ;;  %v2555_v48 = vrot.slane %v2553_v39, 3  ;;  %v2558_v49 = vrot.slane %v2556_v40, 4  ;;  %v2530_v59 = vrot.slane %v2528_v51, 3  ;;  %v5036_v63 = vld [vmem:[%s6091_s1 + $0x648] sm:$0xff]   ;;  %v5063_v39 = vld [vmem:[%s6091_s1 + $0x6b8] sm:$0xff]   ;;  %v2716_v51 = vpack.c.bf16 %v5828_v26, %v2712_v47 }
  0xb4   : > { %4669 = vmatpush3.bf16.msra.mxu0 %v5014_v62  ;;  %v2538_v62 = vrot.slane %v2536_v54, 3  ;;  %v2715_v40 = vld [vmem:[%s5235_s27 + $0x48] sm:$0xf]  ;;  %v2916_v54 = vld [vmem:[%s5235_s27 + $0x40] sm:$0x1f] }
  0xb5   : > { %4670 = vmatprep.subr.bf16.mxu0 %v5016_v0  ;;  %v2559_v57 = vor.u32 %v2558_v49, %v2555_v48  ;;  %v2714_v48 = vld [vmem:[%s5235_s27 + $0x40] sm:$0xf] }
  0xb6   : > { %4697 = vmatpush3.bf16.msra.mxu1 %v5015_v1  ;;  %v2541_v1 = vrot.slane %v2539_v58, 4  ;;  %v2914_v49 = vld [vmem:[%s5235_s27 + $0x20] sm:$0xf8]  ;;  %v2718_v53 = vpack.c.bf16 %v2714_v48, %v2714_v48  ;;  %v5078_v48 = vld [vmem:[%s6091_s1 + $0x718] sm:$0xff]  }
  0xb7   : > { %4698 = vmatprep.subr.bf16.mxu1 %v5017_v3  ;;  %v2560_v0 = vsel %vm1256_vm4, %v2551_v56, %v2559_v57  ;;  %v2534_v3 = vor.u32 %v2533_v60, %v2530_v59  ;;  %v5064_v56 = vld [vmem:[%s6091_s1 + $0x740] sm:$0xff]  }
  0xb8   : > { %4671 = vmatpush3.bf16.msra.mxu0 %v5018_v2  ;;  %v5035_v2 = vld [vmem:[%s6091_s1 + $0x680] sm:$0xff]   ;;  %2693 = vmatprep.mubr.bf16.mxu1 %v2560_v0  ;;  %v2758_v0 = vrot.slane %v2718_v53, 1 }
  0xb9   : > { %4672 = vmatprep.subr.bf16.mxu0 %v5020_v4  ;;  %v2542_v4 = vor.u32 %v2541_v1, %v2538_v62  ;;  %v2920_v1 = vpack.c.bf16 %v2916_v54, %v2916_v54  ;;  %v5082_v54 = vld [vmem:[%s6091_s1 + $0x720] sm:$0xff]  }
  0xba   : > { %4699 = vmatpush3.bf16.msra.mxu1 %v5019_v5  ;;  %v5038_v5 = vld [vmem:[%s6091_s1 + $0x608] sm:$0xff]  }
  0xbb   : > { %4700 = vmatprep.subr.bf16.mxu1 %v5021_v7  ;;  %v2543_v7 = vsel %vm1256_vm4, %v2534_v3, %v2542_v4 }
  0xbc   : > { %4673 = vmatpush3.bf16.msra.mxu0 %v5022_v6  ;;  %v5037_v6 = vld [vmem:[%s6091_s1 + $0x6c8] sm:$0xff]  }
  0xbd   : > { %4674 = vmatprep.subr.bf16.mxu0 %v5024_v8  ;;  %v5040_v8 = vld [vmem:[%s6091_s1 + $0x650] sm:$0xff]  }
  0xbe   : > { %4701 = vmatpush3.bf16.msra.mxu1 %v5023_v9  ;;  %v5039_v9 = vld [vmem:[%s6091_s1 + $0x688] sm:$0xff]  }
  0xbf   : > { %4702 = vmatprep.subr.bf16.mxu1 %v5025_v11  ;;  %v5041_v11 = vld [vmem:[%s6091_s1 + $0x6d0] sm:$0xff]  }
  0xc0   : > { %4675 = vmatpush3.bf16.msra.mxu0 %v5026_v10  ;;  %v5042_v10 = vld [vmem:[%s6091_s1 + $0x610] sm:$0xff]  }
  0xc1   : > { %4676 = vmatprep.subr.bf16.mxu0 %v5028_v12  ;;  %v5044_v12 = vld [vmem:[%s6091_s1 + $0x658] sm:$0xff]  }
  0xc2   : > { %4703 = vmatpush3.bf16.msra.mxu1 %v5027_v13  ;;  %v5043_v13 = vld [vmem:[%s6091_s1 + $0x690] sm:$0xff]  }
  0xc3   : > { %4704 = vmatprep.subr.bf16.mxu1 %v5029_v15  ;;  %v5045_v15 = vld [vmem:[%s6091_s1 + $0x6d8] sm:$0xff]  }
  0xc4   : > { %4677 = vmatpush3.bf16.msra.mxu0 %v5030_v14  ;;  %v5046_v14 = vld [vmem:[%s6091_s1 + $0x618] sm:$0xff]  }
  0xc5   : > { %4718 = vmatprep.subr.bf16.mxu0 %v5032_v45  ;;  %v2719_v45 = vpack.c.bf16 %v2715_v40, %v2715_v40 }
  0xc6   : > { %4705 = vmatpush3.bf16.msra.mxu1 %v5031_v19  ;;  %v5050_v19 = vld [vmem:[%s6091_s1 + $0x620] sm:$0xff]  }
  0xc7   : > { %2464 = vmatmul.mubr.bf16.vlgmr.msra.gmra.mrb[40].mxu0 %v2327_v50  ;;  %4746 = vmatprep.subr.bf16.mxu1 %v5033_v32  ;;  %v2919_v32 = vpack.c.bf16 %v5814_v17, %v2915_v42  ;;  %v2760_v50 = vrot.slane %v2717_v41, 1  ;;  %v5073_v41 = vld [vmem:[%s6091_s1 + $0x7d0] sm:$0xff]  }
  0xc8   : > { %4719 = vmatpush3.bf16.msra.mxu0 %v5034_v55  ;;  %2471 = vmatprep.mubr.bf16.mxu0 %v2329_v33  ;;  %v5062_v33 = vld [vmem:[%s6091_s1 + $0x638] sm:$0xff]   ;;  %v2918_v55 = vpack.c.bf16 %v5828_v26, %v2914_v49 }
  0xc9   : > { %4720 = vmatprep.subr.bf16.mxu0 %v5036_v63  ;;  %2694 = vmatmul.mubr.bf16.vlgmr.msra.gmra.mrb[40].mxu1 %v2543_v7  ;;  %v2973_v58 = vshrl.u32 %v2919_v32, 16  ;;  %v2976_v59 = vshll.u32 %v2919_v32, 16  ;;  %v2757_v63 = vrot.slane %v2716_v51, 1  ;;  %v5066_v7 = vld [vmem:[%s6091_s1 + $0x700] sm:$0xff]   ;;  %v5077_v49 = vld [vmem:[%s6091_s1 + $0x7d8] sm:$0xff]  }
  0xca   : > { %4747 = vmatpush3.bf16.msra.mxu1 %v5035_v2  ;;  %2701 = vmatprep.mubr.bf16.mxu1 %v2559_v57  ;;  %v2761_v57 = vrot.slane %v2719_v45, 1  ;;  %v5065_v2 = vld [vmem:[%s6091_s1 + $0x7c0] sm:$0xff]   ;;  %v5079_v51 = vld [vmem:[%s6091_s1 + $0x798] sm:$0xff]  }
  0xcb   : > { %4748 = vmatprep.subr.bf16.mxu1 %v5037_v6 }
  0xcc   : > { %4721 = vmatpush3.bf16.msra.mxu0 %v5038_v5  ;;  %v2762_v3 = vsel %vm623_vm1, %v2760_v50, %v2761_v57  ;;  %v2978_v5 = vrot.slane %v2976_v59, 2  ;;  %v5084_v59 = vld [vmem:[%s6091_s1 + $0x768] sm:$0xff]  }
  0xcd   : > { %4722 = vmatprep.subr.bf16.mxu0 %v5040_v8 }
  0xce   : > { %4749 = vmatpush3.bf16.msra.mxu1 %v5039_v9  ;;  %v2759_v9 = vsel %vm623_vm1, %v2757_v63, %v2758_v0  ;;  %v5086_v63 = vld [vmem:[%s6091_s1 + $0x728] sm:$0xff]  }
  0xcf   : > { %2472 = vmatmul.mubr.bf16.gmra.mrb[44].mxu0 %v2326_v43  ;;  %4750 = vmatprep.subr.bf16.mxu1 %v5041_v11  ;;  %v2917_v43 = vld [vmem:[%s5235_s27 + $0x48] sm:$0x1f]  ;;  %v2959_v11 = vshll.u32 %v2918_v55, 16 }
  0xd0   : > { %4723 = vmatpush3.bf16.msra.mxu0 %v5042_v10  ;;  %v2921_v46 = vpack.c.bf16 %v2917_v43, %v2917_v43  ;;  %2895 = vmatprep.mubr.bf16.mxu0 %v2762_v3  ;;  %v2956_v10 = vshrl.u32 %v2918_v55, 16  ;;  %v5076_v43 = vld [vmem:[%s6091_s1 + $0x758] sm:$0xff]   ;;  %v5090_v3 = vld [vmem:[%s6091_s1 + $0x730] sm:$0xff]  }
  0xd1   : > { %4724 = vmatprep.subr.bf16.mxu0 %v5044_v12  ;;  %2702 = vmatmul.mubr.bf16.gmra.mrb[44].mxu1 %v2542_v4  ;;  %v2975_v4 = vrot.slane %v2973_v58, 1 }
  0xd2   : > { %4751 = vmatpush3.bf16.msra.mxu1 %v5043_v13  ;;  %v2981_v60 = vshrl.u32 %v2921_v46, 16  ;;  %v2984_v62 = vshll.u32 %v2921_v46, 16  ;;  %v2964_v13 = vshrl.u32 %v2920_v1, 16  ;;  %v5075_v46 = vld [vmem:[%s6091_s1 + $0x790] sm:$0xff]  }
  0xd3   : > { %4752 = vmatprep.subr.bf16.mxu1 %v5045_v15  ;;  %v2979_v12 = vor.u32 %v2978_v5, %v2975_v4  ;;  %v5089_v4 = vld [vmem:[%s6091_s1 + $0x7f0] sm:$0xff]   ;;  %v5092_v5 = vld [vmem:[%s6091_s1 + $0x778] sm:$0xff]  }
  0xd4   : > { %4725 = vmatpush3.bf16.msra.mxu0 %v5046_v14  ;;  %v2983_v6 = vrot.slane %v2981_v60, 1  ;;  %v2986_v8 = vrot.slane %v2984_v62, 2  ;;  %v2967_v14 = vshll.u32 %v2920_v1, 16  ;;  %v5083_v62 = vld [vmem:[%s6091_s1 + $0x7a0] sm:$0xff]   ;;  %v5088_v1 = vld [vmem:[%s6091_s1 + $0x770] sm:$0xff]  }
  0xd5   : > { %4726 = vmatprep.subr.bf16.mxu0 %v5048_v16  ;;  %v2958_v16 = vrot.slane %v2956_v10, 1  ;;  %v5093_v10 = vld [vmem:[%s6091_s1 + $0x7f8] sm:$0xff]  }
  0xd6   : > { %4753 = vmatpush3.bf16.msra.mxu1 %v5047_v18  ;;  %v2987_v15 = vor.u32 %v2986_v8, %v2983_v6  ;;  %v2961_v18 = vrot.slane %v2959_v11, 2  ;;  %v5091_v6 = vld [vmem:[%s6091_s1 + $0x7b0] sm:$0xff]   ;;  %v5094_v8 = vld [vmem:[%s6091_s1 + $0x738] sm:$0xff]   ;;  %v3141_v11 = vld [vmem:[%s5235_s27 + $0x28] sm:$0xf0] }
  0xd7   : > { %4754 = vmatprep.subr.bf16.mxu1 %v5049_v20  ;;  %v2969_v20 = vrot.slane %v2967_v14, 2  ;;  %v3143_v14 = vld [vmem:[%s5235_s27 + $0x48] sm:$0x3f] }
  0xd8   : > { %4727 = vmatpush3.bf16.msra.mxu0 %v5050_v19  ;;  %v2966_v19 = vrot.slane %v2964_v13, 1 }
  0xd9   : > { %4728 = vmatprep.subr.bf16.mxu0 %v5052_v21  ;;  %v5067_v21 = vld [vmem:[%s6091_s1 + $0x780] sm:$0xff]  }
  0xda   : > { %4755 = vmatpush3.bf16.msra.mxu1 %v5051_v22  ;;  %v5068_v22 = vld [vmem:[%s6091_s1 + $0x748] sm:$0xff]  }
  0xdb   : > { %4756 = vmatprep.subr.bf16.mxu1 %v5053_v23  ;;  %v2962_v23 = vor.u32 %v2961_v18, %v2958_v16  ;;  %v3343_v16 = vld [vmem:[%s5235_s27 + $0x28] sm:$0xe0] }
  0xdc   : > { %4729 = vmatpush3.bf16.msra.mxu0 %v5054_v38  ;;  %v2988_v38 = vsel %vm822_vm2, %v2979_v12, %v2987_v15  ;;  %v3345_v18 = vld [vmem:[%s5235_s27 + $0x48] sm:$0x7f] }
  0xdd   : > { %4730 = vmatprep.subr.bf16.mxu0 %v5056_v52  ;;  %3121 = vmatprep.mubr.bf16.mxu1 %v2988_v38  ;;  %v2970_v52 = vor.u32 %v2969_v20, %v2966_v19  ;;  %v3147_v19 = vpack.c.bf16 %v3143_v14, %v3143_v14  ;;  %v3347_v20 = vpack.c.bf16 %v5814_v17, %v3343_v16  ;;  %v3142_v38 = vld [vmem:[%s5235_s27 + $0x40] sm:$0x3f] }
  0xde   : > { %4757 = vmatpush3.bf16.msra.mxu1 %v5055_v24  ;;  %v5070_v24 = vld [vmem:[%s6091_s1 + $0x708] sm:$0xff]  }
  0xdf   : > { %4758 = vmatprep.subr.bf16.mxu1 %v5057_v27  ;;  %v5069_v27 = vld [vmem:[%s6091_s1 + $0x7c8] sm:$0xff]  }
  0xe0   : > { %4731 = vmatpush3.bf16.msra.mxu0 %v5058_v25 }
  0xe1   : > { %4732 = vmatprep.subr.bf16.mxu0 %v5060_v28 }
  0xe2   : > { %4759 = vmatpush3.bf16.msra.mxu1 %v5059_v30  ;;  %v5072_v30 = vld [vmem:[%s6091_s1 + $0x750] sm:$0xff]  }
  0xe3   : > { %4760 = vmatprep.subr.bf16.mxu1 %v5061_v36 }
  0xe4   : > { %4733 = vmatpush3.bf16.msra.mxu0 %v5062_v33 }
  0xe5   : > { %4774 = vmatprep.subr.bf16.mxu0 %v5064_v56 }
  0xe6   : > { %4761 = vmatpush3.bf16.msra.mxu1 %v5063_v39 }
  0xe7   : > { %2896 = vmatmul.mubr.bf16.vlgmr.msra.gmra.mrb[48].mxu0 %v2759_v9  ;;  %4802 = vmatprep.subr.bf16.mxu1 %v5065_v2  ;;  %v5087_v2 = vld [vmem:[%s6091_s1 + $0x7a8] sm:$0xff]  }
  0xe8   : > { %4775 = vmatpush3.bf16.msra.mxu0 %v5066_v7  ;;  %2903 = vmatprep.mubr.bf16.mxu0 %v2761_v57  ;;  %v5081_v57 = vld [vmem:[%s6091_s1 + $0x7e0] sm:$0xff]  }
  0xe9   : > { %4776 = vmatprep.subr.bf16.mxu0 %v5068_v22  ;;  %v3140_v22 = vld [vmem:[%s5235_s27 + $0x20] sm:$0xf0] }
  0xec   : > { %4777 = vmatpush3.bf16.msra.mxu0 %v5070_v24  ;;  %v5095_v24 = vld [vmem:[%s6091_s1 + $0x7b8] sm:$0xff]  }
  0xed   : > { %4778 = vmatprep.subr.bf16.mxu0 %v5072_v30 }
  0xef   : > { %2904 = vmatmul.mubr.bf16.gmra.mrb[52].mxu0 %v2758_v0  ;;  %v5085_v0 = vld [vmem:[%s6091_s1 + $0x7e8] sm:$0xff]  }
  0xf0   : > { %4779 = vmatpush3.bf16.msra.mxu0 %v5074_v61 }
  0xf1   : > { %4780 = vmatprep.subr.bf16.mxu0 %v5076_v43 }
  0xf4   : > { %4781 = vmatpush3.bf16.msra.mxu0 %v5078_v48 }
  0xfa   : > { %v4398_v25 = vpop.f32.mrb[0].mxu0 }
  0xfb   : > { %v4426_v29 = vpop.f32.mrb[0].mxu1  ;;  %v4399_v28 = vpop.f32.mrb[1].mxu0 }
  0xfc   : > { %v4427_v31 = vpop.f32.mrb[1].mxu1  ;;  %v4401_v33 = vpop.f32.mrb[2].mxu0 }
  0xfd   : > { %v5931_v34 = vadd.f32 %v4427_v31, %v4426_v29  ;;  %v4429_v35 = vpop.f32.mrb[2].mxu1  ;;  %v2971_v29 = vsel %vm822_vm2, %v2962_v23, %v2970_v52  ;;  %v4400_v31 = vadd.f32 %v4399_v28, %v4398_v25  ;;  %v4402_v36 = vpop.f32.mrb[3].mxu0  ;;  %v3342_v23 = vld [vmem:[%s5235_s27 + $0x20] sm:$0xe0]  ;;  %v3146_v28 = vpack.c.bf16 %v3142_v38, %v3142_v38 }
  0xfe   : > { %v4430_v37 = vpop.f32.mrb[3].mxu1  ;;  %3122 = vmatmul.mubr.bf16.vlgmr.msra.gmra.mrb[48].mxu1 %v2971_v29  ;;  %v4403_v39 = vadd.f32 %v4402_v36, %v4401_v33  ;;  %v3344_v29 = vld [vmem:[%s5235_s27 + $0x40] sm:$0x7f]  ;;  %v3346_v30 = vpack.c.bf16 %v5828_v26, %v3342_v23  ;;  %v3401_v33 = vshrl.u32 %v3347_v20, 16  ;;  %s4831_s27 = smul.u32 24, %s6095_s13 }
  0xff   : > { %v5944_v44 = vadd.f32 %v4430_v37, %v4429_v35  ;;  %v5071_v35 = vld [vmem:[%s6091_s1 + $0x788] sm:$0xff]   ;;  %4803 = vmatpush3.bf16.msra.mxu1 %v5067_v21  ;;  %v5988_v37 = vadd.f32 %v5931_v34, %v4400_v31  ;;  %3129 = vmatprep.mubr.bf16.mxu1 %v2987_v15  ;;  %v3145_v15 = vpack.c.bf16 %v5814_v17, %v3141_v11  ;;  %v3189_v17 = vrot.slane %v3147_v19, 2 }
 0x100   : > { %4804 = vmatprep.subr.bf16.mxu1 %v5069_v27  ;;  %v3349_v21 = vpack.c.bf16 %v3345_v18, %v3345_v18  ;;  %v3144_v27 = vpack.c.bf16 %v5828_v26, %v3140_v22  ;;  %v3384_v48 = vshrl.u32 %v3346_v30, 16  ;;  %s170_s28 = scalar_lea.vmem %s6093_s3, %s4831_s27 }
 0x101   : > { %v5997_v45 = vadd.f32 %v5944_v44, %v4403_v39  ;;  %v5080_v44 = vld [vmem:[%s6091_s1 + $0x760] sm:$0xff]   ;;  %v3188_v25 = vrot.slane %v3145_v15, 2  ;;  %v3186_v39 = vrot.slane %v3146_v28, 2 }
 0x102   : > { %v4404_v40 = vpop.f32.mrb[4].mxu0  ;;  %4782 = vmatprep.subr.bf16.mxu0 %v5080_v44  ;;  %v3409_v36 = vshrl.u32 %v3349_v21, 16  ;;  %v3412_v61 = vshll.u32 %v3349_v21, 16 }
 0x103   : > { %v4405_v42 = vpop.f32.mrb[5].mxu0  ;;  %4805 = vmatpush3.bf16.msra.mxu1 %v5071_v35  ;;  %v4432_v50 = vpop.f32.mrb[4].mxu1  ;;  %4783 = vmatpush3.bf16.msra.mxu0 %v5082_v54  ;;  %v3404_v35 = vshll.u32 %v3347_v20, 16 }
 0x104   : > { %v4406_v34 = vadd.f32 %v4405_v42, %v4404_v40  ;;  %v4407_v32 = vpop.f32.mrb[6].mxu0  ;;  %4806 = vmatprep.subr.bf16.mxu1 %v5073_v41  ;;  %v4433_v53 = vpop.f32.mrb[5].mxu1  ;;  %4784 = vmatprep.subr.bf16.mxu0 %v5084_v59  ;;  %v3348_v40 = vpack.c.bf16 %v3344_v29, %v3344_v29  ;;  %v3190_v41 = vsel %vm1895_vm5, %v3188_v25, %v3189_v17  ;;  %v3403_v42 = vrot.slane %v3401_v33, 2 }
 0x105   : > { %v4408_v47 = vpop.f32.mrb[7].mxu0  ;;  %v4434_v55 = vadd.f32 %v4433_v53, %v4432_v50  ;;  %v4435_v56 = vpop.f32.mrb[6].mxu1  ;;  %v3406_v43 = vrot.slane %v3404_v35, 3  ;;  %3323 = vmatprep.mubr.bf16.mxu0 %v3190_v41  ;;  %v3414_v26 = vrot.slane %v3412_v61, 3  ;;  %v3386_v59 = vrot.slane %v3384_v48, 2 }
 0x106   : > { %3130 = vmatmul.mubr.bf16.gmra.mrb[52].mxu1 %v2970_v52  ;;  %v4436_v58 = vpop.f32.mrb[7].mxu1  ;;  %v3392_v53 = vshrl.u32 %v3348_v40, 16  ;;  %v3395_v54 = vshll.u32 %v3348_v40, 16 }
 0x107   : > { %4807 = vmatpush3.bf16.msra.mxu1 %v5075_v46  ;;  %v6023_v60 = vadd.f32 %v4434_v55, %v4406_v34  ;;  %4785 = vmatpush3.bf16.msra.mxu0 %v5086_v63  ;;  %v3411_v34 = vrot.slane %v3409_v36, 2 }
 0x108   : > { %4808 = vmatprep.subr.bf16.mxu1 %v5077_v49  ;;  %4786 = vmatprep.subr.bf16.mxu0 %v5088_v1  ;;  %v3387_v49 = vshll.u32 %v3346_v30, 16 }
 0x109   : > { %v3415_v58 = vor.u32 %v3414_v26, %v3411_v34 }
 0x10b   : > { %4809 = vmatpush3.bf16.msra.mxu1 %v5079_v51  ;;  %4787 = vmatpush3.bf16.msra.mxu0 %v5090_v3  ;;  %v3407_v51 = vor.u32 %v3406_v43, %v3403_v42  ;;  %v3397_v3 = vrot.slane %v3395_v54, 3 }
 0x10c   : > { %4810 = vmatprep.subr.bf16.mxu1 %v5081_v57  ;;  %4788 = vmatprep.subr.bf16.mxu0 %v5092_v5 }
 0x10f   : > { %4811 = vmatpush3.bf16.msra.mxu1 %v5083_v62  ;;  %4789 = vmatpush3.bf16.msra.mxu0 %v5094_v8  ;;  %v3389_v62 = vrot.slane %v3387_v49, 3 }
 0x110   : > { %4812 = vmatprep.subr.bf16.mxu1 %v5085_v0 }
 0x113   : > { %4813 = vmatpush3.bf16.msra.mxu1 %v5087_v2  ;;  %v3394_v2 = vrot.slane %v3392_v53, 2 }
 0x114   : > { %4814 = vmatprep.subr.bf16.mxu1 %v5089_v4 }
 0x117   : > { %4815 = vmatpush3.bf16.msra.mxu1 %v5091_v6  ;;  %v3416_v6 = vsel %vm2094_vm6, %v3407_v51, %v3415_v58 }
 0x118   : > { %4816 = vmatprep.subr.bf16.mxu1 %v5093_v10  ;;  %3549 = vmatprep.mubr.bf16.mxu1 %v3416_v6  ;;  %v3398_v10 = vor.u32 %v3397_v3, %v3394_v2 }
 0x11a   : > { %v4454_v7 = vpop.f32.mrb[8].mxu0 }
 0x11b   : > { %v4455_v9 = vpop.f32.mrb[9].mxu0  ;;  %4817 = vmatpush3.bf16.msra.mxu1 %v5095_v24 }
 0x11c   : > { %v4456_v12 = vadd.f32 %v4455_v9, %v4454_v7  ;;  %v4457_v13 = vpop.f32.mrb[10].mxu0  ;;  %v4482_v32 = vpop.f32.mrb[8].mxu1  ;;  %v3390_v7 = vor.u32 %v3389_v62, %v3386_v59 }
 0x11d   : > { %v4458_v31 = vpop.f32.mrb[11].mxu0  ;;  %v4483_v44 = vpop.f32.mrb[9].mxu1 }
 0x11e   : > { %v778_v52 = vadd.f32 %v4456_v12, %v5988_v37  ;;  %v3185_v37 = vrot.slane %v3144_v27, 2  ;;  %v4484_v55 = vadd.f32 %v4483_v44, %v4482_v32  ;;  %v4485_v56 = vpop.f32.mrb[10].mxu1  ;;  %v4459_v63 = vadd.f32 %v4458_v31, %v4457_v13 }
 0x11f   : > { %v4486_v0 = vpop.f32.mrb[11].mxu1  ;;  %v3399_v14 = vsel %vm2094_vm6, %v3390_v7, %v3398_v10 }
 0x120   : > { %v3187_v47 = vsel %vm1895_vm5, %v3185_v37, %v3186_v39  ;;  %v1005_v4 = vadd.f32 %v4484_v55, %v778_v52  ;;  %v4487_v5 = vadd.f32 %v4486_v0, %v4485_v56  ;;  %v779_v8 = vadd.f32 %v4459_v63, %v5997_v45  ;;  %3550 = vmatmul.mubr.bf16.vlgmr.msra.gmra.mrb[56].mxu1 %v3399_v14 }
 0x121   : > { %3324 = vmatmul.mubr.bf16.vlgmr.msra.gmra.mrb[56].mxu0 %v3187_v47  ;;  %3557 = vmatprep.mubr.bf16.mxu1 %v3415_v58 }
 0x122   : > { %v4460_v46 = vpop.f32.mrb[12].mxu0  ;;  %3331 = vmatprep.mubr.bf16.mxu0 %v3189_v17  ;;  %v1006_v11 = vadd.f32 %v4487_v5, %v779_v8 }
 0x123   : > { %v4461_v50 = vpop.f32.mrb[13].mxu0 }
 0x124   : > { %v4463_v57 = vpop.f32.mrb[14].mxu0  ;;  %v4462_v9 = vadd.f32 %v4461_v50, %v4460_v46  ;;  %v4488_v13 = vpop.f32.mrb[12].mxu1 }
 0x125   : > { %v4464_v1 = vpop.f32.mrb[15].mxu0  ;;  %v4489_v15 = vpop.f32.mrb[13].mxu1 }
 0x126   : > { %v780_v12 = vadd.f32 %v4462_v9, %v6023_v60  ;;  %v4490_v16 = vadd.f32 %v4489_v15, %v4488_v13  ;;  %v4491_v18 = vpop.f32.mrb[14].mxu1 }
 0x127   : > { %v4492_v19 = vpop.f32.mrb[15].mxu1 }
 0x128   : > { %v1007_v20 = vadd.f32 %v4490_v16, %v780_v12  ;;  %3558 = vmatmul.mubr.bf16.gmra.mrb[60].mxu1 %v3398_v10 }
 0x129   : > { %3332 = vmatmul.mubr.bf16.gmra.mrb[60].mxu0 %v3186_v39 }
 0x13a   : > { %v4510_v21 = vpop.f32.mrb[16].mxu0 }
 0x13b   : > { %v4511_v45 = vpop.f32.mrb[17].mxu0 }
 0x13c   : > { %v4512_v22 = vadd.f32 %v4511_v45, %v4510_v21  ;;  %v4513_v38 = vpop.f32.mrb[18].mxu0  ;;  %v4538_v25 = vpop.f32.mrb[16].mxu1 }
 0x13d   : > { %v4514_v23 = vpop.f32.mrb[19].mxu0  ;;  %v4539_v28 = vpop.f32.mrb[17].mxu1 }
 0x13e   : > { %v1208_v52 = vadd.f32 %v4512_v22, %v1005_v4  ;;  %v4515_v24 = vadd.f32 %v4514_v23, %v4513_v38  ;;  %v4540_v30 = vadd.f32 %v4539_v28, %v4538_v25  ;;  %v4541_v31 = vpop.f32.mrb[18].mxu1 }
 0x13f   : > { %v4542_v35 = vpop.f32.mrb[19].mxu1 }
 0x140   : > { %v1209_v60 = vadd.f32 %v4515_v24, %v1006_v11  ;;  %v1439_v61 = vadd.f32 %v4540_v30, %v1208_v52  ;;  %v4543_v37 = vadd.f32 %v4542_v35, %v4541_v31 }
 0x142   : > { %v4516_v27 = vpop.f32.mrb[20].mxu0  ;;  %v1440_v40 = vadd.f32 %v4543_v37, %v1209_v60 }
 0x143   : > { %v4517_v29 = vpop.f32.mrb[21].mxu0 }
 0x144   : > { %v4518_v17 = vadd.f32 %v4517_v29, %v4516_v27  ;;  %v4519_v33 = vpop.f32.mrb[22].mxu0  ;;  %v4544_v41 = vpop.f32.mrb[20].mxu1 }
 0x145   : > { %v4520_v36 = vpop.f32.mrb[23].mxu0  ;;  %v4545_v42 = vpop.f32.mrb[21].mxu1 }
 0x146   : > { %v1210_v39 = vadd.f32 %v4518_v17, %v1007_v20  ;;  %v4546_v43 = vadd.f32 %v4545_v42, %v4544_v41  ;;  %v4547_v34 = vpop.f32.mrb[22].mxu1 }
 0x147   : > { %v4548_v32 = vpop.f32.mrb[23].mxu1 }
 0x148   : > { %v1441_v46 = vadd.f32 %v4546_v43, %v1210_v39 }
 0x15a   : > { %v4566_v26 = vpop.f32.mrb[24].mxu0 }
 0x15b   : > { %v4567_v47 = vpop.f32.mrb[25].mxu0 }
 0x15c   : > { %v4568_v48 = vadd.f32 %v4567_v47, %v4566_v26  ;;  %v4569_v49 = vpop.f32.mrb[26].mxu0  ;;  %v4594_v53 = vpop.f32.mrb[24].mxu1 }
 0x15d   : > { %v4570_v44 = vpop.f32.mrb[27].mxu0  ;;  %v4595_v55 = vpop.f32.mrb[25].mxu1 }
 0x15e   : > { %v1625_v50 = vadd.f32 %v4568_v48, %v1439_v61  ;;  %v4571_v51 = vadd.f32 %v4570_v44, %v4569_v49  ;;  %v4596_v56 = vadd.f32 %v4595_v55, %v4594_v53  ;;  %v4597_v57 = vpop.f32.mrb[26].mxu1 }
 0x15f   : > { %v4598_v58 = vpop.f32.mrb[27].mxu1 }
 0x160   : > { %v1626_v54 = vadd.f32 %v4571_v51, %v1440_v40  ;;  %v1847_v59 = vadd.f32 %v4596_v56, %v1625_v50  ;;  %v4599_v62 = vadd.f32 %v4598_v58, %v4597_v57 }
 0x162   : > { %v4572_v63 = vpop.f32.mrb[28].mxu0  ;;  %v1848_v1 = vadd.f32 %v4599_v62, %v1626_v54 }
 0x163   : > { %v4573_v0 = vpop.f32.mrb[29].mxu0 }
 0x164   : > { %v4574_v2 = vadd.f32 %v4573_v0, %v4572_v63  ;;  %v4575_v3 = vpop.f32.mrb[30].mxu0  ;;  %v4600_v6 = vpop.f32.mrb[28].mxu1 }
 0x165   : > { %v4576_v4 = vpop.f32.mrb[31].mxu0  ;;  %v4601_v7 = vpop.f32.mrb[29].mxu1 }
 0x166   : > { %v1627_v5 = vadd.f32 %v4574_v2, %v1441_v46  ;;  %v4602_v8 = vadd.f32 %v4601_v7, %v4600_v6  ;;  %v4603_v9 = vpop.f32.mrb[30].mxu1 }
 0x167   : > { %v4604_v10 = vpop.f32.mrb[31].mxu1 }
 0x168   : > { %v1849_v11 = vadd.f32 %v4602_v8, %v1627_v5 }
 0x17a   : > { %v4622_v12 = vpop.f32.mrb[32].mxu0 }
 0x17b   : > { %v4623_v14 = vpop.f32.mrb[33].mxu0 }
 0x17c   : > { %v4624_v13 = vadd.f32 %v4623_v14, %v4622_v12  ;;  %v4625_v15 = vpop.f32.mrb[34].mxu0  ;;  %v4650_v21 = vpop.f32.mrb[32].mxu1 }
 0x17d   : > { %v4626_v16 = vpop.f32.mrb[35].mxu0  ;;  %v4651_v22 = vpop.f32.mrb[33].mxu1 }
 0x17e   : > { %v2050_v18 = vadd.f32 %v4624_v13, %v1847_v59  ;;  %v4627_v19 = vadd.f32 %v4626_v16, %v4625_v15  ;;  %v4652_v23 = vadd.f32 %v4651_v22, %v4650_v21  ;;  %v4653_v52 = vpop.f32.mrb[34].mxu1 }
 0x17f   : > { %v4654_v25 = vpop.f32.mrb[35].mxu1 }
 0x180   : > { %v2051_v20 = vadd.f32 %v4627_v19, %v1848_v1  ;;  %v2277_v28 = vadd.f32 %v4652_v23, %v2050_v18  ;;  %v4655_v29 = vadd.f32 %v4654_v25, %v4653_v52 }
 0x182   : > { %v4628_v45 = vpop.f32.mrb[36].mxu0  ;;  %v2278_v31 = vadd.f32 %v4655_v29, %v2051_v20 }
 0x183   : > { %v4629_v38 = vpop.f32.mrb[37].mxu0 }
 0x184   : > { %v4630_v24 = vadd.f32 %v4629_v38, %v4628_v45  ;;  %v4631_v60 = vpop.f32.mrb[38].mxu0  ;;  %v4656_v17 = vpop.f32.mrb[36].mxu1 }
 0x185   : > { %v4632_v27 = vpop.f32.mrb[39].mxu0  ;;  %v4657_v33 = vpop.f32.mrb[37].mxu1 }
 0x186   : > { %v2052_v30 = vadd.f32 %v4630_v24, %v1849_v11  ;;  %v4658_v35 = vadd.f32 %v4657_v33, %v4656_v17  ;;  %v4659_v36 = vpop.f32.mrb[38].mxu1 }
 0x187   : > { %v4660_v61 = vpop.f32.mrb[39].mxu1 }
 0x188   : > { %v2279_v37 = vadd.f32 %v4658_v35, %v2052_v30 }
 0x19a   : > { %v4678_v39 = vpop.f32.mrb[40].mxu0 }
 0x19b   : > { %v4679_v40 = vpop.f32.mrb[41].mxu0 }
 0x19c   : > { %v4680_v41 = vadd.f32 %v4679_v40, %v4678_v39  ;;  %v4681_v42 = vpop.f32.mrb[42].mxu0  ;;  %v4706_v26 = vpop.f32.mrb[40].mxu1 }
 0x19d   : > { %v4682_v43 = vpop.f32.mrb[43].mxu0  ;;  %v4707_v47 = vpop.f32.mrb[41].mxu1 }
 0x19e   : > { %v2479_v34 = vadd.f32 %v4680_v41, %v2277_v28  ;;  %v4683_v32 = vadd.f32 %v4682_v43, %v4681_v42  ;;  %v4708_v49 = vadd.f32 %v4707_v47, %v4706_v26  ;;  %v4709_v44 = vpop.f32.mrb[42].mxu1 }
 0x19f   : > { %v4710_v51 = vpop.f32.mrb[43].mxu1 }
 0x1a0   : > { %v2480_v46 = vadd.f32 %v4683_v32, %v2278_v31  ;;  %v2709_v55 = vadd.f32 %v4708_v49, %v2479_v34  ;;  %v4711_v56 = vadd.f32 %v4710_v51, %v4709_v44  ;;  %v4379_v32 = vld [vmem:[%s6092_s2] ss:$0 sm:$0xff] }
 0x1a2   : > { %v4684_v48 = vpop.f32.mrb[44].mxu0  ;;  %v2710_v59 = vadd.f32 %v4711_v56, %v2480_v46 }
 0x1a3   : > { %v4685_v50 = vpop.f32.mrb[45].mxu0 }
 0x1a4   : > { %v4686_v53 = vadd.f32 %v4685_v50, %v4684_v48  ;;  %v4687_v54 = vpop.f32.mrb[46].mxu0  ;;  %v4712_v62 = vpop.f32.mrb[44].mxu1 }
 0x1a5   : > { %v4688_v57 = vpop.f32.mrb[47].mxu0  ;;  %v4713_v63 = vpop.f32.mrb[45].mxu1 }
 0x1a6   : > { %v2481_v58 = vadd.f32 %v4686_v53, %v2279_v37  ;;  %v4714_v0 = vadd.f32 %v4713_v63, %v4712_v62  ;;  %v4715_v1 = vpop.f32.mrb[46].mxu1 }
 0x1a7   : > { %v4716_v2 = vpop.f32.mrb[47].mxu1 }
 0x1a8   : > { %v2711_v3 = vadd.f32 %v4714_v0, %v2481_v58 }
 0x1ba   : > { %v4734_v4 = vpop.f32.mrb[48].mxu0 }
 0x1bb   : > { %v4735_v5 = vpop.f32.mrb[49].mxu0 }
 0x1bc   : > { %v4736_v6 = vadd.f32 %v4735_v5, %v4734_v4  ;;  %v4737_v7 = vpop.f32.mrb[50].mxu0 }
 0x1bd   : > { %v4738_v8 = vpop.f32.mrb[51].mxu0 }
 0x1be   : > { %v2911_v9 = vadd.f32 %v4736_v6, %v2709_v55  ;;  %v4739_v10 = vadd.f32 %v4738_v8, %v4737_v7 }
 0x1c0   : > { %v2912_v11 = vadd.f32 %v4739_v10, %v2710_v59 }
 0x1c2   : > { %v4740_v13 = vpop.f32.mrb[52].mxu0 }
 0x1c3   : > { %v4741_v18 = vpop.f32.mrb[53].mxu0 }
 0x1c4   : > { %v4742_v20 = vadd.f32 %v4741_v18, %v4740_v13  ;;  %v4743_v21 = vpop.f32.mrb[54].mxu0 }
 0x1c5   : > { %v4744_v38 = vpop.f32.mrb[55].mxu0 }
 0x1c6   : > { %v2913_v23 = vadd.f32 %v4742_v20, %v2711_v3 }
 0x1d1   : > { %v4762_v12 = vpop.f32.mrb[48].mxu1 }
 0x1d2   : > { %v4763_v14 = vpop.f32.mrb[49].mxu1 }
 0x1d3   : > { %v4764_v15 = vadd.f32 %v4763_v14, %v4762_v12  ;;  %v4765_v16 = vpop.f32.mrb[50].mxu1 }
 0x1d4   : > { %v4766_v19 = vpop.f32.mrb[51].mxu1 }
 0x1d5   : > { %v3137_v45 = vadd.f32 %v4764_v15, %v2911_v9  ;;  %v4767_v22 = vadd.f32 %v4766_v19, %v4765_v16 }
 0x1d7   : > { %v3138_v52 = vadd.f32 %v4767_v22, %v2912_v11 }
 0x1d9   : > { %v4768_v24 = vpop.f32.mrb[52].mxu1 }
 0x1da   : > { %v4769_v60 = vpop.f32.mrb[53].mxu1 }
 0x1db   : > { %v4770_v25 = vadd.f32 %v4769_v60, %v4768_v24  ;;  %v4771_v27 = vpop.f32.mrb[54].mxu1 }
 0x1dc   : > { %v4772_v28 = vpop.f32.mrb[55].mxu1 }
 0x1dd   : > { %v3139_v29 = vadd.f32 %v4770_v25, %v2913_v23 }
 0x1f3   : > { %v4818_v39 = vpop.f32.mrb[56].mxu1 }
 0x1f4   : > { %v4790_v30 = vpop.f32.mrb[56].mxu0  ;;  %v4819_v40 = vpop.f32.mrb[57].mxu1 }
 0x1f5   : > { %v4791_v31 = vpop.f32.mrb[57].mxu0  ;;  %v4820_v42 = vadd.f32 %v4819_v40, %v4818_v39  ;;  %v4821_v43 = vpop.f32.mrb[58].mxu1 }
 0x1f6   : > { %v4792_v17 = vadd.f32 %v4791_v31, %v4790_v30  ;;  %v4793_v33 = vpop.f32.mrb[58].mxu0  ;;  %v4822_v46 = vpop.f32.mrb[59].mxu1 }
 0x1f7   : > { %v4794_v35 = vpop.f32.mrb[59].mxu0  ;;  %v4823_v49 = vadd.f32 %v4822_v46, %v4821_v43 }
 0x1f8   : > { %v3339_v36 = vadd.f32 %v4792_v17, %v3137_v45  ;;  %v4795_v61 = vadd.f32 %v4794_v35, %v4793_v33 }
 0x1fa   : > { %v3340_v37 = vadd.f32 %v4795_v61, %v3138_v52  ;;  %v3565_v48 = vadd.f32 %v4820_v42, %v3339_v36 }
 0x1fb   : > { %v4824_v55 = vpop.f32.mrb[60].mxu1 }
 0x1fc   : > { %v4796_v41 = vpop.f32.mrb[60].mxu0  ;;  %v3575_v51 = vadd.f32 %v4379_v32, %v3565_v48  ;;  %v3566_v53 = vadd.f32 %v4823_v49, %v3340_v37  ;;  %v4825_v56 = vpop.f32.mrb[61].mxu1 }
 0x1fd   : > { %v4797_v34 = vpop.f32.mrb[61].mxu0  ;;  %v4826_v57 = vadd.f32 %v4825_v56, %v4824_v55  ;;  %v4827_v58 = vpop.f32.mrb[62].mxu1 }
 0x1fe   : > { %v4798_v26 = vadd.f32 %v4797_v34, %v4796_v41  ;;  %v4799_v47 = vpop.f32.mrb[62].mxu0  ;;  %3578 = vst [vmem:[%s170_s28] sm:$0xff] %v3575_v51  ;;  %v3576_v54 = vadd.f32 %v4379_v32, %v3566_v53  ;;  %v4828_v59 = vpop.f32.mrb[63].mxu1 }
 0x1ff   : > { %v4800_v44 = vpop.f32.mrb[63].mxu0 }
 0x200   : > { %v3341_v50 = vadd.f32 %v4798_v26, %v3139_v29  ;;  %3579 = vst [vmem:[%s170_s28 + $0x8] sm:$0xff] %v3576_v54 }
 0x202   : > { %v3567_v62 = vadd.f32 %v4826_v57, %v3341_v50 }
 0x204   : > { %v3577_v63 = vadd.f32 %v4379_v32, %v3567_v62 }
 0x206   : > { %3580 = vst [vmem:[%s170_s28 + $0x10] sm:$0x3] %v3577_v63 }
 0x207 PF: > { %s13_s12 = sadd.s32 1, %s5105_s12  }
 0x208   : > { %p10_p4 = scmp.ge.s32.totalorder %s13_s12, 4  }
 0x20a   :  { %12 = sbr.rel (!%p10_p4) target bundleno = 1 (0x1), region = 77 }

</bundles_post_ra>
